<compile_context>
chip_gen: v7x
topology: tpu7x:2x2x1
jax: 0.10.0
libtpu: 0.0.40
codegen_flags: <defaults>
</compile_context>

<pallas_src>
import jax
import jax.numpy as jnp
from jax.experimental import pallas as pl
from jax.experimental.pallas import tpu as pltpu

# ---- hyperparameters implied by the module ----
EMB_SIZE = 32                 # emb_size (Conv1d input channels)
D_MODEL = 256                 # fixed by the module
NUM_HEADS = 4
HEAD_DIM = D_MODEL // NUM_HEADS
NUM_LAYERS = 2
FFN_DIM = 2048                # PyTorch TransformerEncoderLayer default
KERNEL_SIZE = 31
PAD = 15
KCIN = KERNEL_SIZE * EMB_SIZE     # 992
KCIN_PAD = 1024                   # padded to a multiple of 256 for the MXU
LN_EPS = 1e-5                     # PyTorch LayerNorm default


def _layernorm(x, gamma, beta):
    mu = jnp.mean(x, axis=-1, keepdims=True)
    xc = x - mu
    var = jnp.mean(xc * xc, axis=-1, keepdims=True)     # biased, like PyTorch
    return xc * jax.lax.rsqrt(var + LN_EPS) * gamma + beta


def _fused_kernel(xcol_ref, cw_ref, cb_ref,
                  wqkv_ref, bqkv_ref, wo_ref, bo_ref,
                  g1_ref, bt1_ref, w1_ref, b1_ref, w2_ref, b2_ref,
                  g2_ref, bt2_ref, o_ref):
    f32 = jnp.float32
    bf16 = jnp.bfloat16
    scale = 1.0 / (HEAD_DIM ** 0.5)

    # ---- Conv1d (same padding) as a single full-depth im2col matmul ----
    # (S, 1024) bf16 @ (1024, 256) bf16 -> f32
    x = jnp.dot(xcol_ref[0], cw_ref[...], preferred_element_type=f32) + cb_ref[...]

    for l in range(NUM_LAYERS):                                        # static unroll
        # ---- multi-head self attention: one fused lane-dense QKV projection ----
        x_bf = x.astype(bf16)
        qkv = jnp.dot(x_bf, wqkv_ref[l], preferred_element_type=f32) + bqkv_ref[l]
        heads = []
        for h in range(NUM_HEADS):                                     # static unroll
            q = qkv[:, h * HEAD_DIM:(h + 1) * HEAD_DIM]
            k = qkv[:, D_MODEL + h * HEAD_DIM:D_MODEL + (h + 1) * HEAD_DIM]
            v = qkv[:, 2 * D_MODEL + h * HEAD_DIM:2 * D_MODEL + (h + 1) * HEAD_DIM]
            s = jax.lax.dot_general(q.astype(bf16), k.astype(bf16),
                                    (((1,), (1,)), ((), ())),
                                    preferred_element_type=f32)        # (S, S)
            s = s * scale
            s = s - jnp.max(s, axis=-1, keepdims=True)                 # f32 softmax
            p = jnp.exp(s)
            p = p * pl.reciprocal(jnp.sum(p, axis=-1, keepdims=True), approx=True)
            heads.append(jnp.dot(p.astype(bf16), v.astype(bf16),
                                 preferred_element_type=f32))          # (S, dh)
        attn = jnp.concatenate(heads, axis=-1)                         # (S, 256)
        attn = jnp.dot(attn.astype(bf16), wo_ref[l],
                       preferred_element_type=f32) + bo_ref[l]
        # residual + LayerNorm1 (post-norm; dropout == identity in eval)
        x = _layernorm(x + attn, g1_ref[l], bt1_ref[l])

        # ---- feed-forward (ReLU), intermediate kept in bf16 ----
        x_bf = x.astype(bf16)
        h1 = jnp.dot(x_bf, w1_ref[l], preferred_element_type=f32) + b1_ref[l]
        h1 = jnp.maximum(h1, 0.0).astype(bf16)                         # (S, 2048) bf16
        h2 = jnp.dot(h1, w2_ref[l], preferred_element_type=f32) + b2_ref[l]

        # residual + LayerNorm2
        x = _layernorm(x + h2, g2_ref[l], bt2_ref[l])

    o_ref[0] = x.astype(o_ref.dtype)


def _resident_spec(arr):
    """Full-array VMEM block whose index never changes -> loaded once, stays resident."""
    nd = arr.ndim
    return pl.BlockSpec(arr.shape, lambda b, _nd=nd: (0,) * _nd)


def transformer_model_forward(emb, params):
    """emb: (B, S, EMB_SIZE) f32  ->  (B, S, D_MODEL) f32."""
    B, S, E = emb.shape
    assert E == EMB_SIZE

    # im2col slab with the conv "same" padding folded in (depth 992 -> 1024), bf16.
    # TODO(synk): build the im2col in-kernel from the tiny (B,S,32) emb once B*S grows
    # (the wrapper-side slab is ~32x read amplification of emb).
    xp = jnp.pad(emb, ((0, 0), (PAD, PAD), (0, 0)))
    cols = jnp.concatenate([xp[:, k:k + S, :] for k in range(KERNEL_SIZE)], axis=-1)
    cols = jnp.pad(cols, ((0, 0), (0, 0), (0, KCIN_PAD - KCIN)))
    xcol = cols.astype(jnp.bfloat16)                                   # (B, S, 1024)

    L, D, F = NUM_LAYERS, D_MODEL, FFN_DIM
    flops = 2 * B * S * (KCIN_PAD * D
                         + L * (D * 3 * D + 2 * S * D + D * D + 2 * D * F))
    transcendentals = B * L * NUM_HEADS * S * S
    weight_bytes = sum(int(v.size) * v.dtype.itemsize for v in params.values())
    bytes_accessed = (weight_bytes + int(xcol.size) * xcol.dtype.itemsize
                      + B * S * D * 4)

    weight_order = ["conv_w", "conv_b", "wqkv", "bqkv", "wo", "bo",
                    "g1", "bt1", "w1", "b1", "w2", "b2", "g2", "bt2"]
    in_specs = ([pl.BlockSpec((1, S, KCIN_PAD), lambda b: (b, 0, 0))]
                + [_resident_spec(params[name]) for name in weight_order])

    out = pl.pallas_call(
        _fused_kernel,
        out_shape=jax.ShapeDtypeStruct((B, S, D_MODEL), jnp.float32),
        grid=(B,),
        in_specs=in_specs,
        out_specs=pl.BlockSpec((1, S, D_MODEL), lambda b: (b, 0, 0)),
        compiler_params=pltpu.CompilerParams(
            dimension_semantics=("parallel",),          # v7x: both TCs get batches
            vmem_limit_bytes=48 * 1024 * 1024),         # v5e default 16 MiB is tight
        cost_estimate=pl.CostEstimate(flops=flops,
                                      transcendentals=transcendentals,
                                      bytes_accessed=bytes_accessed),
    )(xcol, *[params[name] for name in weight_order])
    return out


# ----------------------------------------------------------------------------
# Deterministic synthetic parameters in the kernel's weight layouts.
# ----------------------------------------------------------------------------
def init_params(key):
    def nrm(k, shape, scale=0.02):
        return scale * jax.random.normal(k, shape, jnp.float32)

    L, D, dh, F = NUM_LAYERS, D_MODEL, HEAD_DIM, FFN_DIM
    ks = jax.random.split(key, 8)
    conv_w = nrm(ks[0], (KERNEL_SIZE, EMB_SIZE, D)).reshape(KCIN, D)
    conv_w = jnp.pad(conv_w, ((0, KCIN_PAD - KCIN), (0, 0)))  # zero tail rows
    return {
        "conv_w": conv_w.astype(jnp.bfloat16),                 # (1024, 256)
        "conv_b": nrm(ks[1], (1, D)),
        "wqkv": nrm(ks[2], (L, D, 3 * D)).astype(jnp.bfloat16),  # fused in_proj.T
        "bqkv": nrm(ks[3], (L, 1, 3 * D)),
        "wo": nrm(ks[4], (L, D, D)).astype(jnp.bfloat16),        # out_proj.T
        "bo": nrm(ks[5], (L, 1, D)),
        "g1": jnp.ones((L, 1, D), jnp.float32),
        "bt1": jnp.zeros((L, 1, D), jnp.float32),
        "w1": nrm(ks[6], (L, D, F)).astype(jnp.bfloat16),
        "b1": jnp.zeros((L, 1, F), jnp.float32),
        "w2": nrm(ks[7], (L, F, D)).astype(jnp.bfloat16),
        "b2": jnp.zeros((L, 1, D), jnp.float32),
        "g2": jnp.ones((L, 1, D), jnp.float32),
        "bt2": jnp.zeros((L, 1, D), jnp.float32),
    }


if __name__ == "__main__":
    B, S = 2, 16
    emb = jax.random.normal(jax.random.PRNGKey(0), (B, S, EMB_SIZE), jnp.float32)
    params = init_params(jax.random.PRNGKey(42))

    fwd = jax.jit(transformer_model_forward)
    out = jax.block_until_ready(fwd(emb, params))

    assert out.shape == (B, S, D_MODEL), out.shape
    assert bool(jnp.all(jnp.isfinite(out)))
    print("KERNEL_OK")
</pallas_src>

<mosaic_0001>
module attributes {stable_mosaic.version = 11 : i64} {
  func.func @_fused_kernel(%arg0: i32, %arg1: memref<1x16x1024xbf16, #tpu.memory_space<vmem>>, %arg2: memref<1024x256xbf16, #tpu.memory_space<vmem>>, %arg3: memref<1x256xf32, #tpu.memory_space<vmem>>, %arg4: memref<2x256x768xbf16, #tpu.memory_space<vmem>>, %arg5: memref<2x1x768xf32, #tpu.memory_space<vmem>>, %arg6: memref<2x256x256xbf16, #tpu.memory_space<vmem>>, %arg7: memref<2x1x256xf32, #tpu.memory_space<vmem>>, %arg8: memref<2x1x256xf32, #tpu.memory_space<vmem>>, %arg9: memref<2x1x256xf32, #tpu.memory_space<vmem>>, %arg10: memref<2x256x2048xbf16, #tpu.memory_space<vmem>>, %arg11: memref<2x1x2048xf32, #tpu.memory_space<vmem>>, %arg12: memref<2x2048x256xbf16, #tpu.memory_space<vmem>>, %arg13: memref<2x1x256xf32, #tpu.memory_space<vmem>>, %arg14: memref<2x1x256xf32, #tpu.memory_space<vmem>>, %arg15: memref<2x1x256xf32, #tpu.memory_space<vmem>>, %arg16: memref<1x16x256xf32, #tpu.memory_space<vmem>>) attributes {dimension_semantics = [#tpu.dimension_semantics<parallel>], iteration_bounds = array<i64: 2>, scalar_prefetch = 0 : i64, scratch_operands = 0 : i64, tpu.core_type = #tpu.core_type<tc>, window_params = [{transform_indices = @transform_0, window_bounds = array<i64: 1, 16, 1024>}, {pipeline_mode = #tpu.pipeline_mode<synchronous>, transform_indices = @transform_1, window_bounds = array<i64: 1024, 256>}, {pipeline_mode = #tpu.pipeline_mode<synchronous>, transform_indices = @transform_2, window_bounds = array<i64: 1, 256>}, {pipeline_mode = #tpu.pipeline_mode<synchronous>, transform_indices = @transform_3, window_bounds = array<i64: 2, 256, 768>}, {pipeline_mode = #tpu.pipeline_mode<synchronous>, transform_indices = @transform_4, window_bounds = array<i64: 2, 1, 768>}, {pipeline_mode = #tpu.pipeline_mode<synchronous>, transform_indices = @transform_5, window_bounds = array<i64: 2, 256, 256>}, {pipeline_mode = #tpu.pipeline_mode<synchronous>, transform_indices = @transform_6, window_bounds = array<i64: 2, 1, 256>}, {pipeline_mode = #tpu.pipeline_mode<synchronous>, transform_indices = @transform_7, window_bounds = array<i64: 2, 1, 256>}, {pipeline_mode = #tpu.pipeline_mode<synchronous>, transform_indices = @transform_8, window_bounds = array<i64: 2, 1, 256>}, {pipeline_mode = #tpu.pipeline_mode<synchronous>, transform_indices = @transform_9, window_bounds = array<i64: 2, 256, 2048>}, {pipeline_mode = #tpu.pipeline_mode<synchronous>, transform_indices = @transform_10, window_bounds = array<i64: 2, 1, 2048>}, {pipeline_mode = #tpu.pipeline_mode<synchronous>, transform_indices = @transform_11, window_bounds = array<i64: 2, 2048, 256>}, {pipeline_mode = #tpu.pipeline_mode<synchronous>, transform_indices = @transform_12, window_bounds = array<i64: 2, 1, 256>}, {pipeline_mode = #tpu.pipeline_mode<synchronous>, transform_indices = @transform_13, window_bounds = array<i64: 2, 1, 256>}, {pipeline_mode = #tpu.pipeline_mode<synchronous>, transform_indices = @transform_14, window_bounds = array<i64: 2, 1, 256>}, {transform_indices = @transform_15, window_bounds = array<i64: 1, 16, 256>}]} {
    %c0 = arith.constant 0 : index
    %c0_0 = arith.constant 0 : index
    %c0_1 = arith.constant 0 : index
    %0 = vector.load %arg1[%c0, %c0_0, %c0_1] : memref<1x16x1024xbf16, #tpu.memory_space<vmem>>, vector<1x16x1024xbf16>
    %1 = vector.shape_cast %0 : vector<1x16x1024xbf16> to vector<16x1024xbf16>
    %c0_2 = arith.constant 0 : index
    %c0_3 = arith.constant 0 : index
    %2 = vector.load %arg2[%c0_2, %c0_3] : memref<1024x256xbf16, #tpu.memory_space<vmem>>, vector<1024x256xbf16>
    %cst = arith.constant dense<0.000000e+00> : vector<16x256xf32>
    %3 = tpu.matmul %1, %2, %cst {dimension_numbers = #tpu.dot_dimension_numbers<[1], [0], [0], [1], [0, 0, 1, 1], [], []>} : vector<16x1024xbf16>, vector<1024x256xbf16>, vector<16x256xf32> -> vector<16x256xf32>
    %c0_4 = arith.constant 0 : index
    %c0_5 = arith.constant 0 : index
    %4 = vector.load %arg3[%c0_4, %c0_5] : memref<1x256xf32, #tpu.memory_space<vmem>>, vector<1x256xf32>
    %5 = vector.broadcast %4 : vector<1x256xf32> to vector<16x256xf32>
    %6 = arith.addf %3, %5 : vector<16x256xf32>
    %7 = arith.truncf %6 : vector<16x256xf32> to vector<16x256xbf16>
    %c0_6 = arith.constant 0 : index
    %c0_7 = arith.constant 0 : index
    %c0_8 = arith.constant 0 : index
    %8 = vector.load %arg4[%c0_6, %c0_7, %c0_8] : memref<2x256x768xbf16, #tpu.memory_space<vmem>>, vector<1x256x768xbf16>
    %9 = vector.shape_cast %8 : vector<1x256x768xbf16> to vector<256x768xbf16>
    %cst_9 = arith.constant dense<0.000000e+00> : vector<16x768xf32>
    %10 = tpu.matmul %7, %9, %cst_9 {dimension_numbers = #tpu.dot_dimension_numbers<[1], [0], [0], [1], [0, 0, 1, 1], [], []>} : vector<16x256xbf16>, vector<256x768xbf16>, vector<16x768xf32> -> vector<16x768xf32>
    %c0_10 = arith.constant 0 : index
    %c0_11 = arith.constant 0 : index
    %c0_12 = arith.constant 0 : index
    %11 = vector.load %arg5[%c0_10, %c0_11, %c0_12] : memref<2x1x768xf32, #tpu.memory_space<vmem>>, vector<1x1x768xf32>
    %12 = vector.shape_cast %11 : vector<1x1x768xf32> to vector<1x768xf32>
    %13 = vector.broadcast %12 : vector<1x768xf32> to vector<16x768xf32>
    %14 = arith.addf %10, %13 : vector<16x768xf32>
    %15 = vector.extract_strided_slice %14 {offsets = [0, 0], sizes = [16, 64], strides = [1, 1]} : vector<16x768xf32> to vector<16x64xf32>
    %16 = vector.extract_strided_slice %14 {offsets = [0, 256], sizes = [16, 64], strides = [1, 1]} : vector<16x768xf32> to vector<16x64xf32>
    %17 = vector.extract_strided_slice %14 {offsets = [0, 512], sizes = [16, 64], strides = [1, 1]} : vector<16x768xf32> to vector<16x64xf32>
    %18 = arith.truncf %15 : vector<16x64xf32> to vector<16x64xbf16>
    %19 = arith.truncf %16 : vector<16x64xf32> to vector<16x64xbf16>
    %cst_13 = arith.constant dense<0.000000e+00> : vector<16x16xf32>
    %20 = tpu.matmul %18, %19, %cst_13 {dimension_numbers = #tpu.dot_dimension_numbers<[1], [1], [0], [0], [0, 0, 1, 0], [], []>} : vector<16x64xbf16>, vector<16x64xbf16>, vector<16x16xf32> -> vector<16x16xf32>
    %cst_14 = arith.constant 1.250000e-01 : f32
    %21 = vector.broadcast %cst_14 : f32 to vector<16x16xf32>
    %22 = arith.mulf %20, %21 : vector<16x16xf32>
    %cst_15 = arith.constant dense<0xFF800000> : vector<16xf32>
    %23 = vector.multi_reduction <maximumf>, %22, %cst_15 [1] : vector<16x16xf32> to vector<16xf32>
    %24 = vector.shape_cast %23 : vector<16xf32> to vector<16x1xf32>
    %25 = vector.broadcast %24 : vector<16x1xf32> to vector<16x16xf32>
    %26 = arith.subf %22, %25 : vector<16x16xf32>
    %27 = math.exp %26 : vector<16x16xf32>
    %cst_16 = arith.constant dense<0.000000e+00> : vector<16xf32>
    %28 = vector.multi_reduction <add>, %27, %cst_16 [1] : vector<16x16xf32> to vector<16xf32>
    %29 = vector.shape_cast %28 : vector<16xf32> to vector<16x1xf32>
    %30 = tpu.reciprocal %29 {approx = true} : vector<16x1xf32> -> vector<16x1xf32>
    %31 = vector.broadcast %30 : vector<16x1xf32> to vector<16x16xf32>
    %32 = arith.mulf %27, %31 : vector<16x16xf32>
    %33 = arith.truncf %32 : vector<16x16xf32> to vector<16x16xbf16>
    %34 = arith.truncf %17 : vector<16x64xf32> to vector<16x64xbf16>
    %cst_17 = arith.constant dense<0.000000e+00> : vector<16x64xf32>
    %35 = tpu.matmul %33, %34, %cst_17 {dimension_numbers = #tpu.dot_dimension_numbers<[1], [0], [0], [1], [0, 0, 1, 1], [], []>} : vector<16x16xbf16>, vector<16x64xbf16>, vector<16x64xf32> -> vector<16x64xf32>
    %36 = vector.extract_strided_slice %14 {offsets = [0, 64], sizes = [16, 64], strides = [1, 1]} : vector<16x768xf32> to vector<16x64xf32>
    %37 = vector.extract_strided_slice %14 {offsets = [0, 320], sizes = [16, 64], strides = [1, 1]} : vector<16x768xf32> to vector<16x64xf32>
    %38 = vector.extract_strided_slice %14 {offsets = [0, 576], sizes = [16, 64], strides = [1, 1]} : vector<16x768xf32> to vector<16x64xf32>
    %39 = arith.truncf %36 : vector<16x64xf32> to vector<16x64xbf16>
    %40 = arith.truncf %37 : vector<16x64xf32> to vector<16x64xbf16>
    %cst_18 = arith.constant dense<0.000000e+00> : vector<16x16xf32>
    %41 = tpu.matmul %39, %40, %cst_18 {dimension_numbers = #tpu.dot_dimension_numbers<[1], [1], [0], [0], [0, 0, 1, 0], [], []>} : vector<16x64xbf16>, vector<16x64xbf16>, vector<16x16xf32> -> vector<16x16xf32>
    %cst_19 = arith.constant 1.250000e-01 : f32
    %42 = vector.broadcast %cst_19 : f32 to vector<16x16xf32>
    %43 = arith.mulf %41, %42 : vector<16x16xf32>
    %cst_20 = arith.constant dense<0xFF800000> : vector<16xf32>
    %44 = vector.multi_reduction <maximumf>, %43, %cst_20 [1] : vector<16x16xf32> to vector<16xf32>
    %45 = vector.shape_cast %44 : vector<16xf32> to vector<16x1xf32>
    %46 = vector.broadcast %45 : vector<16x1xf32> to vector<16x16xf32>
    %47 = arith.subf %43, %46 : vector<16x16xf32>
    %48 = math.exp %47 : vector<16x16xf32>
    %cst_21 = arith.constant dense<0.000000e+00> : vector<16xf32>
    %49 = vector.multi_reduction <add>, %48, %cst_21 [1] : vector<16x16xf32> to vector<16xf32>
    %50 = vector.shape_cast %49 : vector<16xf32> to vector<16x1xf32>
    %51 = tpu.reciprocal %50 {approx = true} : vector<16x1xf32> -> vector<16x1xf32>
    %52 = vector.broadcast %51 : vector<16x1xf32> to vector<16x16xf32>
    %53 = arith.mulf %48, %52 : vector<16x16xf32>
    %54 = arith.truncf %53 : vector<16x16xf32> to vector<16x16xbf16>
    %55 = arith.truncf %38 : vector<16x64xf32> to vector<16x64xbf16>
    %cst_22 = arith.constant dense<0.000000e+00> : vector<16x64xf32>
    %56 = tpu.matmul %54, %55, %cst_22 {dimension_numbers = #tpu.dot_dimension_numbers<[1], [0], [0], [1], [0, 0, 1, 1], [], []>} : vector<16x16xbf16>, vector<16x64xbf16>, vector<16x64xf32> -> vector<16x64xf32>
    %57 = vector.extract_strided_slice %14 {offsets = [0, 128], sizes = [16, 64], strides = [1, 1]} : vector<16x768xf32> to vector<16x64xf32>
    %58 = vector.extract_strided_slice %14 {offsets = [0, 384], sizes = [16, 64], strides = [1, 1]} : vector<16x768xf32> to vector<16x64xf32>
    %59 = vector.extract_strided_slice %14 {offsets = [0, 640], sizes = [16, 64], strides = [1, 1]} : vector<16x768xf32> to vector<16x64xf32>
    %60 = arith.truncf %57 : vector<16x64xf32> to vector<16x64xbf16>
    %61 = arith.truncf %58 : vector<16x64xf32> to vector<16x64xbf16>
    %cst_23 = arith.constant dense<0.000000e+00> : vector<16x16xf32>
    %62 = tpu.matmul %60, %61, %cst_23 {dimension_numbers = #tpu.dot_dimension_numbers<[1], [1], [0], [0], [0, 0, 1, 0], [], []>} : vector<16x64xbf16>, vector<16x64xbf16>, vector<16x16xf32> -> vector<16x16xf32>
    %cst_24 = arith.constant 1.250000e-01 : f32
    %63 = vector.broadcast %cst_24 : f32 to vector<16x16xf32>
    %64 = arith.mulf %62, %63 : vector<16x16xf32>
    %cst_25 = arith.constant dense<0xFF800000> : vector<16xf32>
    %65 = vector.multi_reduction <maximumf>, %64, %cst_25 [1] : vector<16x16xf32> to vector<16xf32>
    %66 = vector.shape_cast %65 : vector<16xf32> to vector<16x1xf32>
    %67 = vector.broadcast %66 : vector<16x1xf32> to vector<16x16xf32>
    %68 = arith.subf %64, %67 : vector<16x16xf32>
    %69 = math.exp %68 : vector<16x16xf32>
    %cst_26 = arith.constant dense<0.000000e+00> : vector<16xf32>
    %70 = vector.multi_reduction <add>, %69, %cst_26 [1] : vector<16x16xf32> to vector<16xf32>
    %71 = vector.shape_cast %70 : vector<16xf32> to vector<16x1xf32>
    %72 = tpu.reciprocal %71 {approx = true} : vector<16x1xf32> -> vector<16x1xf32>
    %73 = vector.broadcast %72 : vector<16x1xf32> to vector<16x16xf32>
    %74 = arith.mulf %69, %73 : vector<16x16xf32>
    %75 = arith.truncf %74 : vector<16x16xf32> to vector<16x16xbf16>
    %76 = arith.truncf %59 : vector<16x64xf32> to vector<16x64xbf16>
    %cst_27 = arith.constant dense<0.000000e+00> : vector<16x64xf32>
    %77 = tpu.matmul %75, %76, %cst_27 {dimension_numbers = #tpu.dot_dimension_numbers<[1], [0], [0], [1], [0, 0, 1, 1], [], []>} : vector<16x16xbf16>, vector<16x64xbf16>, vector<16x64xf32> -> vector<16x64xf32>
    %78 = vector.extract_strided_slice %14 {offsets = [0, 192], sizes = [16, 64], strides = [1, 1]} : vector<16x768xf32> to vector<16x64xf32>
    %79 = vector.extract_strided_slice %14 {offsets = [0, 448], sizes = [16, 64], strides = [1, 1]} : vector<16x768xf32> to vector<16x64xf32>
    %80 = vector.extract_strided_slice %14 {offsets = [0, 704], sizes = [16, 64], strides = [1, 1]} : vector<16x768xf32> to vector<16x64xf32>
    %81 = arith.truncf %78 : vector<16x64xf32> to vector<16x64xbf16>
    %82 = arith.truncf %79 : vector<16x64xf32> to vector<16x64xbf16>
    %cst_28 = arith.constant dense<0.000000e+00> : vector<16x16xf32>
    %83 = tpu.matmul %81, %82, %cst_28 {dimension_numbers = #tpu.dot_dimension_numbers<[1], [1], [0], [0], [0, 0, 1, 0], [], []>} : vector<16x64xbf16>, vector<16x64xbf16>, vector<16x16xf32> -> vector<16x16xf32>
    %cst_29 = arith.constant 1.250000e-01 : f32
    %84 = vector.broadcast %cst_29 : f32 to vector<16x16xf32>
    %85 = arith.mulf %83, %84 : vector<16x16xf32>
    %cst_30 = arith.constant dense<0xFF800000> : vector<16xf32>
    %86 = vector.multi_reduction <maximumf>, %85, %cst_30 [1] : vector<16x16xf32> to vector<16xf32>
    %87 = vector.shape_cast %86 : vector<16xf32> to vector<16x1xf32>
    %88 = vector.broadcast %87 : vector<16x1xf32> to vector<16x16xf32>
    %89 = arith.subf %85, %88 : vector<16x16xf32>
    %90 = math.exp %89 : vector<16x16xf32>
    %cst_31 = arith.constant dense<0.000000e+00> : vector<16xf32>
    %91 = vector.multi_reduction <add>, %90, %cst_31 [1] : vector<16x16xf32> to vector<16xf32>
    %92 = vector.shape_cast %91 : vector<16xf32> to vector<16x1xf32>
    %93 = tpu.reciprocal %92 {approx = true} : vector<16x1xf32> -> vector<16x1xf32>
    %94 = vector.broadcast %93 : vector<16x1xf32> to vector<16x16xf32>
    %95 = arith.mulf %90, %94 : vector<16x16xf32>
    %96 = arith.truncf %95 : vector<16x16xf32> to vector<16x16xbf16>
    %97 = arith.truncf %80 : vector<16x64xf32> to vector<16x64xbf16>
    %cst_32 = arith.constant dense<0.000000e+00> : vector<16x64xf32>
    %98 = tpu.matmul %96, %97, %cst_32 {dimension_numbers = #tpu.dot_dimension_numbers<[1], [0], [0], [1], [0, 0, 1, 1], [], []>} : vector<16x16xbf16>, vector<16x64xbf16>, vector<16x64xf32> -> vector<16x64xf32>
    %99 = tpu.concatenate %35, %56, %77, %98 in 1 : vector<16x64xf32>, vector<16x64xf32>, vector<16x64xf32>, vector<16x64xf32> -> vector<16x256xf32>
    %100 = arith.truncf %99 : vector<16x256xf32> to vector<16x256xbf16>
    %c0_33 = arith.constant 0 : index
    %c0_34 = arith.constant 0 : index
    %c0_35 = arith.constant 0 : index
    %101 = vector.load %arg6[%c0_33, %c0_34, %c0_35] : memref<2x256x256xbf16, #tpu.memory_space<vmem>>, vector<1x256x256xbf16>
    %102 = vector.shape_cast %101 : vector<1x256x256xbf16> to vector<256x256xbf16>
    %cst_36 = arith.constant dense<0.000000e+00> : vector<16x256xf32>
    %103 = tpu.matmul %100, %102, %cst_36 {dimension_numbers = #tpu.dot_dimension_numbers<[1], [0], [0], [1], [0, 0, 1, 1], [], []>} : vector<16x256xbf16>, vector<256x256xbf16>, vector<16x256xf32> -> vector<16x256xf32>
    %c0_37 = arith.constant 0 : index
    %c0_38 = arith.constant 0 : index
    %c0_39 = arith.constant 0 : index
    %104 = vector.load %arg7[%c0_37, %c0_38, %c0_39] : memref<2x1x256xf32, #tpu.memory_space<vmem>>, vector<1x1x256xf32>
    %105 = vector.shape_cast %104 : vector<1x1x256xf32> to vector<1x256xf32>
    %106 = vector.broadcast %105 : vector<1x256xf32> to vector<16x256xf32>
    %107 = arith.addf %103, %106 : vector<16x256xf32>
    %108 = arith.addf %6, %107 : vector<16x256xf32>
    %c0_40 = arith.constant 0 : index
    %c0_41 = arith.constant 0 : index
    %c0_42 = arith.constant 0 : index
    %109 = vector.load %arg8[%c0_40, %c0_41, %c0_42] : memref<2x1x256xf32, #tpu.memory_space<vmem>>, vector<1x1x256xf32>
    %110 = vector.shape_cast %109 : vector<1x1x256xf32> to vector<1x256xf32>
    %c0_43 = arith.constant 0 : index
    %c0_44 = arith.constant 0 : index
    %c0_45 = arith.constant 0 : index
    %111 = vector.load %arg9[%c0_43, %c0_44, %c0_45] : memref<2x1x256xf32, #tpu.memory_space<vmem>>, vector<1x1x256xf32>
    %112 = vector.shape_cast %111 : vector<1x1x256xf32> to vector<1x256xf32>
    %cst_46 = arith.constant dense<0.000000e+00> : vector<16xf32>
    %113 = vector.multi_reduction <add>, %108, %cst_46 [1] : vector<16x256xf32> to vector<16xf32>
    %114 = vector.shape_cast %113 : vector<16xf32> to vector<16x1xf32>
    %cst_47 = arith.constant 2.560000e+02 : f32
    %115 = vector.broadcast %cst_47 : f32 to vector<16x1xf32>
    %116 = arith.divf %114, %115 : vector<16x1xf32>
    %117 = vector.broadcast %116 : vector<16x1xf32> to vector<16x256xf32>
    %118 = arith.subf %108, %117 : vector<16x256xf32>
    %119 = arith.mulf %118, %118 : vector<16x256xf32>
    %cst_48 = arith.constant dense<0.000000e+00> : vector<16xf32>
    %120 = vector.multi_reduction <add>, %119, %cst_48 [1] : vector<16x256xf32> to vector<16xf32>
    %121 = vector.shape_cast %120 : vector<16xf32> to vector<16x1xf32>
    %cst_49 = arith.constant 2.560000e+02 : f32
    %122 = vector.broadcast %cst_49 : f32 to vector<16x1xf32>
    %123 = arith.divf %121, %122 : vector<16x1xf32>
    %cst_50 = arith.constant 9.99999974E-6 : f32
    %124 = vector.broadcast %cst_50 : f32 to vector<16x1xf32>
    %125 = arith.addf %123, %124 : vector<16x1xf32>
    %126 = math.rsqrt %125 : vector<16x1xf32>
    %127 = vector.broadcast %126 : vector<16x1xf32> to vector<16x256xf32>
    %128 = arith.mulf %118, %127 : vector<16x256xf32>
    %129 = vector.broadcast %110 : vector<1x256xf32> to vector<16x256xf32>
    %130 = arith.mulf %128, %129 : vector<16x256xf32>
    %131 = vector.broadcast %112 : vector<1x256xf32> to vector<16x256xf32>
    %132 = arith.addf %130, %131 : vector<16x256xf32>
    %133 = arith.truncf %132 : vector<16x256xf32> to vector<16x256xbf16>
    %c0_51 = arith.constant 0 : index
    %c0_52 = arith.constant 0 : index
    %c0_53 = arith.constant 0 : index
    %134 = vector.load %arg10[%c0_51, %c0_52, %c0_53] : memref<2x256x2048xbf16, #tpu.memory_space<vmem>>, vector<1x256x2048xbf16>
    %135 = vector.shape_cast %134 : vector<1x256x2048xbf16> to vector<256x2048xbf16>
    %cst_54 = arith.constant dense<0.000000e+00> : vector<16x2048xf32>
    %136 = tpu.matmul %133, %135, %cst_54 {dimension_numbers = #tpu.dot_dimension_numbers<[1], [0], [0], [1], [0, 0, 1, 1], [], []>} : vector<16x256xbf16>, vector<256x2048xbf16>, vector<16x2048xf32> -> vector<16x2048xf32>
    %c0_55 = arith.constant 0 : index
    %c0_56 = arith.constant 0 : index
    %c0_57 = arith.constant 0 : index
    %137 = vector.load %arg11[%c0_55, %c0_56, %c0_57] : memref<2x1x2048xf32, #tpu.memory_space<vmem>>, vector<1x1x2048xf32>
    %138 = vector.shape_cast %137 : vector<1x1x2048xf32> to vector<1x2048xf32>
    %139 = vector.broadcast %138 : vector<1x2048xf32> to vector<16x2048xf32>
    %140 = arith.addf %136, %139 : vector<16x2048xf32>
    %cst_58 = arith.constant 0.000000e+00 : f32
    %141 = vector.broadcast %cst_58 : f32 to vector<16x2048xf32>
    %142 = arith.maximumf %140, %141 : vector<16x2048xf32>
    %143 = arith.truncf %142 : vector<16x2048xf32> to vector<16x2048xbf16>
    %c0_59 = arith.constant 0 : index
    %c0_60 = arith.constant 0 : index
    %c0_61 = arith.constant 0 : index
    %144 = vector.load %arg12[%c0_59, %c0_60, %c0_61] : memref<2x2048x256xbf16, #tpu.memory_space<vmem>>, vector<1x2048x256xbf16>
    %145 = vector.shape_cast %144 : vector<1x2048x256xbf16> to vector<2048x256xbf16>
    %cst_62 = arith.constant dense<0.000000e+00> : vector<16x256xf32>
    %146 = tpu.matmul %143, %145, %cst_62 {dimension_numbers = #tpu.dot_dimension_numbers<[1], [0], [0], [1], [0, 0, 1, 1], [], []>} : vector<16x2048xbf16>, vector<2048x256xbf16>, vector<16x256xf32> -> vector<16x256xf32>
    %c0_63 = arith.constant 0 : index
    %c0_64 = arith.constant 0 : index
    %c0_65 = arith.constant 0 : index
    %147 = vector.load %arg13[%c0_63, %c0_64, %c0_65] : memref<2x1x256xf32, #tpu.memory_space<vmem>>, vector<1x1x256xf32>
    %148 = vector.shape_cast %147 : vector<1x1x256xf32> to vector<1x256xf32>
    %149 = vector.broadcast %148 : vector<1x256xf32> to vector<16x256xf32>
    %150 = arith.addf %146, %149 : vector<16x256xf32>
    %151 = arith.addf %132, %150 : vector<16x256xf32>
    %c0_66 = arith.constant 0 : index
    %c0_67 = arith.constant 0 : index
    %c0_68 = arith.constant 0 : index
    %152 = vector.load %arg14[%c0_66, %c0_67, %c0_68] : memref<2x1x256xf32, #tpu.memory_space<vmem>>, vector<1x1x256xf32>
    %153 = vector.shape_cast %152 : vector<1x1x256xf32> to vector<1x256xf32>
    %c0_69 = arith.constant 0 : index
    %c0_70 = arith.constant 0 : index
    %c0_71 = arith.constant 0 : index
    %154 = vector.load %arg15[%c0_69, %c0_70, %c0_71] : memref<2x1x256xf32, #tpu.memory_space<vmem>>, vector<1x1x256xf32>
    %155 = vector.shape_cast %154 : vector<1x1x256xf32> to vector<1x256xf32>
    %cst_72 = arith.constant dense<0.000000e+00> : vector<16xf32>
    %156 = vector.multi_reduction <add>, %151, %cst_72 [1] : vector<16x256xf32> to vector<16xf32>
    %157 = vector.shape_cast %156 : vector<16xf32> to vector<16x1xf32>
    %cst_73 = arith.constant 2.560000e+02 : f32
    %158 = vector.broadcast %cst_73 : f32 to vector<16x1xf32>
    %159 = arith.divf %157, %158 : vector<16x1xf32>
    %160 = vector.broadcast %159 : vector<16x1xf32> to vector<16x256xf32>
    %161 = arith.subf %151, %160 : vector<16x256xf32>
    %162 = arith.mulf %161, %161 : vector<16x256xf32>
    %cst_74 = arith.constant dense<0.000000e+00> : vector<16xf32>
    %163 = vector.multi_reduction <add>, %162, %cst_74 [1] : vector<16x256xf32> to vector<16xf32>
    %164 = vector.shape_cast %163 : vector<16xf32> to vector<16x1xf32>
    %cst_75 = arith.constant 2.560000e+02 : f32
    %165 = vector.broadcast %cst_75 : f32 to vector<16x1xf32>
    %166 = arith.divf %164, %165 : vector<16x1xf32>
    %cst_76 = arith.constant 9.99999974E-6 : f32
    %167 = vector.broadcast %cst_76 : f32 to vector<16x1xf32>
    %168 = arith.addf %166, %167 : vector<16x1xf32>
    %169 = math.rsqrt %168 : vector<16x1xf32>
    %170 = vector.broadcast %169 : vector<16x1xf32> to vector<16x256xf32>
    %171 = arith.mulf %161, %170 : vector<16x256xf32>
    %172 = vector.broadcast %153 : vector<1x256xf32> to vector<16x256xf32>
    %173 = arith.mulf %171, %172 : vector<16x256xf32>
    %174 = vector.broadcast %155 : vector<1x256xf32> to vector<16x256xf32>
    %175 = arith.addf %173, %174 : vector<16x256xf32>
    %176 = arith.truncf %175 : vector<16x256xf32> to vector<16x256xbf16>
    %c1 = arith.constant 1 : index
    %c0_77 = arith.constant 0 : index
    %c0_78 = arith.constant 0 : index
    %177 = vector.load %arg4[%c1, %c0_77, %c0_78] : memref<2x256x768xbf16, #tpu.memory_space<vmem>>, vector<1x256x768xbf16>
    %178 = vector.shape_cast %177 : vector<1x256x768xbf16> to vector<256x768xbf16>
    %cst_79 = arith.constant dense<0.000000e+00> : vector<16x768xf32>
    %179 = tpu.matmul %176, %178, %cst_79 {dimension_numbers = #tpu.dot_dimension_numbers<[1], [0], [0], [1], [0, 0, 1, 1], [], []>} : vector<16x256xbf16>, vector<256x768xbf16>, vector<16x768xf32> -> vector<16x768xf32>
    %c1_80 = arith.constant 1 : index
    %c0_81 = arith.constant 0 : index
    %c0_82 = arith.constant 0 : index
    %180 = vector.load %arg5[%c1_80, %c0_81, %c0_82] : memref<2x1x768xf32, #tpu.memory_space<vmem>>, vector<1x1x768xf32>
    %181 = vector.shape_cast %180 : vector<1x1x768xf32> to vector<1x768xf32>
    %182 = vector.broadcast %181 : vector<1x768xf32> to vector<16x768xf32>
    %183 = arith.addf %179, %182 : vector<16x768xf32>
    %184 = vector.extract_strided_slice %183 {offsets = [0, 0], sizes = [16, 64], strides = [1, 1]} : vector<16x768xf32> to vector<16x64xf32>
    %185 = vector.extract_strided_slice %183 {offsets = [0, 256], sizes = [16, 64], strides = [1, 1]} : vector<16x768xf32> to vector<16x64xf32>
    %186 = vector.extract_strided_slice %183 {offsets = [0, 512], sizes = [16, 64], strides = [1, 1]} : vector<16x768xf32> to vector<16x64xf32>
    %187 = arith.truncf %184 : vector<16x64xf32> to vector<16x64xbf16>
    %188 = arith.truncf %185 : vector<16x64xf32> to vector<16x64xbf16>
    %cst_83 = arith.constant dense<0.000000e+00> : vector<16x16xf32>
    %189 = tpu.matmul %187, %188, %cst_83 {dimension_numbers = #tpu.dot_dimension_numbers<[1], [1], [0], [0], [0, 0, 1, 0], [], []>} : vector<16x64xbf16>, vector<16x64xbf16>, vector<16x16xf32> -> vector<16x16xf32>
    %cst_84 = arith.constant 1.250000e-01 : f32
    %190 = vector.broadcast %cst_84 : f32 to vector<16x16xf32>
    %191 = arith.mulf %189, %190 : vector<16x16xf32>
    %cst_85 = arith.constant dense<0xFF800000> : vector<16xf32>
    %192 = vector.multi_reduction <maximumf>, %191, %cst_85 [1] : vector<16x16xf32> to vector<16xf32>
    %193 = vector.shape_cast %192 : vector<16xf32> to vector<16x1xf32>
    %194 = vector.broadcast %193 : vector<16x1xf32> to vector<16x16xf32>
    %195 = arith.subf %191, %194 : vector<16x16xf32>
    %196 = math.exp %195 : vector<16x16xf32>
    %cst_86 = arith.constant dense<0.000000e+00> : vector<16xf32>
    %197 = vector.multi_reduction <add>, %196, %cst_86 [1] : vector<16x16xf32> to vector<16xf32>
    %198 = vector.shape_cast %197 : vector<16xf32> to vector<16x1xf32>
    %199 = tpu.reciprocal %198 {approx = true} : vector<16x1xf32> -> vector<16x1xf32>
    %200 = vector.broadcast %199 : vector<16x1xf32> to vector<16x16xf32>
    %201 = arith.mulf %196, %200 : vector<16x16xf32>
    %202 = arith.truncf %201 : vector<16x16xf32> to vector<16x16xbf16>
    %203 = arith.truncf %186 : vector<16x64xf32> to vector<16x64xbf16>
    %cst_87 = arith.constant dense<0.000000e+00> : vector<16x64xf32>
    %204 = tpu.matmul %202, %203, %cst_87 {dimension_numbers = #tpu.dot_dimension_numbers<[1], [0], [0], [1], [0, 0, 1, 1], [], []>} : vector<16x16xbf16>, vector<16x64xbf16>, vector<16x64xf32> -> vector<16x64xf32>
    %205 = vector.extract_strided_slice %183 {offsets = [0, 64], sizes = [16, 64], strides = [1, 1]} : vector<16x768xf32> to vector<16x64xf32>
    %206 = vector.extract_strided_slice %183 {offsets = [0, 320], sizes = [16, 64], strides = [1, 1]} : vector<16x768xf32> to vector<16x64xf32>
    %207 = vector.extract_strided_slice %183 {offsets = [0, 576], sizes = [16, 64], strides = [1, 1]} : vector<16x768xf32> to vector<16x64xf32>
    %208 = arith.truncf %205 : vector<16x64xf32> to vector<16x64xbf16>
    %209 = arith.truncf %206 : vector<16x64xf32> to vector<16x64xbf16>
    %cst_88 = arith.constant dense<0.000000e+00> : vector<16x16xf32>
    %210 = tpu.matmul %208, %209, %cst_88 {dimension_numbers = #tpu.dot_dimension_numbers<[1], [1], [0], [0], [0, 0, 1, 0], [], []>} : vector<16x64xbf16>, vector<16x64xbf16>, vector<16x16xf32> -> vector<16x16xf32>
    %cst_89 = arith.constant 1.250000e-01 : f32
    %211 = vector.broadcast %cst_89 : f32 to vector<16x16xf32>
    %212 = arith.mulf %210, %211 : vector<16x16xf32>
    %cst_90 = arith.constant dense<0xFF800000> : vector<16xf32>
    %213 = vector.multi_reduction <maximumf>, %212, %cst_90 [1] : vector<16x16xf32> to vector<16xf32>
    %214 = vector.shape_cast %213 : vector<16xf32> to vector<16x1xf32>
    %215 = vector.broadcast %214 : vector<16x1xf32> to vector<16x16xf32>
    %216 = arith.subf %212, %215 : vector<16x16xf32>
    %217 = math.exp %216 : vector<16x16xf32>
    %cst_91 = arith.constant dense<0.000000e+00> : vector<16xf32>
    %218 = vector.multi_reduction <add>, %217, %cst_91 [1] : vector<16x16xf32> to vector<16xf32>
    %219 = vector.shape_cast %218 : vector<16xf32> to vector<16x1xf32>
    %220 = tpu.reciprocal %219 {approx = true} : vector<16x1xf32> -> vector<16x1xf32>
    %221 = vector.broadcast %220 : vector<16x1xf32> to vector<16x16xf32>
    %222 = arith.mulf %217, %221 : vector<16x16xf32>
    %223 = arith.truncf %222 : vector<16x16xf32> to vector<16x16xbf16>
    %224 = arith.truncf %207 : vector<16x64xf32> to vector<16x64xbf16>
    %cst_92 = arith.constant dense<0.000000e+00> : vector<16x64xf32>
    %225 = tpu.matmul %223, %224, %cst_92 {dimension_numbers = #tpu.dot_dimension_numbers<[1], [0], [0], [1], [0, 0, 1, 1], [], []>} : vector<16x16xbf16>, vector<16x64xbf16>, vector<16x64xf32> -> vector<16x64xf32>
    %226 = vector.extract_strided_slice %183 {offsets = [0, 128], sizes = [16, 64], strides = [1, 1]} : vector<16x768xf32> to vector<16x64xf32>
    %227 = vector.extract_strided_slice %183 {offsets = [0, 384], sizes = [16, 64], strides = [1, 1]} : vector<16x768xf32> to vector<16x64xf32>
    %228 = vector.extract_strided_slice %183 {offsets = [0, 640], sizes = [16, 64], strides = [1, 1]} : vector<16x768xf32> to vector<16x64xf32>
    %229 = arith.truncf %226 : vector<16x64xf32> to vector<16x64xbf16>
    %230 = arith.truncf %227 : vector<16x64xf32> to vector<16x64xbf16>
    %cst_93 = arith.constant dense<0.000000e+00> : vector<16x16xf32>
    %231 = tpu.matmul %229, %230, %cst_93 {dimension_numbers = #tpu.dot_dimension_numbers<[1], [1], [0], [0], [0, 0, 1, 0], [], []>} : vector<16x64xbf16>, vector<16x64xbf16>, vector<16x16xf32> -> vector<16x16xf32>
    %cst_94 = arith.constant 1.250000e-01 : f32
    %232 = vector.broadcast %cst_94 : f32 to vector<16x16xf32>
    %233 = arith.mulf %231, %232 : vector<16x16xf32>
    %cst_95 = arith.constant dense<0xFF800000> : vector<16xf32>
    %234 = vector.multi_reduction <maximumf>, %233, %cst_95 [1] : vector<16x16xf32> to vector<16xf32>
    %235 = vector.shape_cast %234 : vector<16xf32> to vector<16x1xf32>
    %236 = vector.broadcast %235 : vector<16x1xf32> to vector<16x16xf32>
    %237 = arith.subf %233, %236 : vector<16x16xf32>
    %238 = math.exp %237 : vector<16x16xf32>
    %cst_96 = arith.constant dense<0.000000e+00> : vector<16xf32>
    %239 = vector.multi_reduction <add>, %238, %cst_96 [1] : vector<16x16xf32> to vector<16xf32>
    %240 = vector.shape_cast %239 : vector<16xf32> to vector<16x1xf32>
    %241 = tpu.reciprocal %240 {approx = true} : vector<16x1xf32> -> vector<16x1xf32>
    %242 = vector.broadcast %241 : vector<16x1xf32> to vector<16x16xf32>
    %243 = arith.mulf %238, %242 : vector<16x16xf32>
    %244 = arith.truncf %243 : vector<16x16xf32> to vector<16x16xbf16>
    %245 = arith.truncf %228 : vector<16x64xf32> to vector<16x64xbf16>
    %cst_97 = arith.constant dense<0.000000e+00> : vector<16x64xf32>
    %246 = tpu.matmul %244, %245, %cst_97 {dimension_numbers = #tpu.dot_dimension_numbers<[1], [0], [0], [1], [0, 0, 1, 1], [], []>} : vector<16x16xbf16>, vector<16x64xbf16>, vector<16x64xf32> -> vector<16x64xf32>
    %247 = vector.extract_strided_slice %183 {offsets = [0, 192], sizes = [16, 64], strides = [1, 1]} : vector<16x768xf32> to vector<16x64xf32>
    %248 = vector.extract_strided_slice %183 {offsets = [0, 448], sizes = [16, 64], strides = [1, 1]} : vector<16x768xf32> to vector<16x64xf32>
    %249 = vector.extract_strided_slice %183 {offsets = [0, 704], sizes = [16, 64], strides = [1, 1]} : vector<16x768xf32> to vector<16x64xf32>
    %250 = arith.truncf %247 : vector<16x64xf32> to vector<16x64xbf16>
    %251 = arith.truncf %248 : vector<16x64xf32> to vector<16x64xbf16>
    %cst_98 = arith.constant dense<0.000000e+00> : vector<16x16xf32>
    %252 = tpu.matmul %250, %251, %cst_98 {dimension_numbers = #tpu.dot_dimension_numbers<[1], [1], [0], [0], [0, 0, 1, 0], [], []>} : vector<16x64xbf16>, vector<16x64xbf16>, vector<16x16xf32> -> vector<16x16xf32>
    %cst_99 = arith.constant 1.250000e-01 : f32
    %253 = vector.broadcast %cst_99 : f32 to vector<16x16xf32>
    %254 = arith.mulf %252, %253 : vector<16x16xf32>
    %cst_100 = arith.constant dense<0xFF800000> : vector<16xf32>
    %255 = vector.multi_reduction <maximumf>, %254, %cst_100 [1] : vector<16x16xf32> to vector<16xf32>
    %256 = vector.shape_cast %255 : vector<16xf32> to vector<16x1xf32>
    %257 = vector.broadcast %256 : vector<16x1xf32> to vector<16x16xf32>
    %258 = arith.subf %254, %257 : vector<16x16xf32>
    %259 = math.exp %258 : vector<16x16xf32>
    %cst_101 = arith.constant dense<0.000000e+00> : vector<16xf32>
    %260 = vector.multi_reduction <add>, %259, %cst_101 [1] : vector<16x16xf32> to vector<16xf32>
    %261 = vector.shape_cast %260 : vector<16xf32> to vector<16x1xf32>
    %262 = tpu.reciprocal %261 {approx = true} : vector<16x1xf32> -> vector<16x1xf32>
    %263 = vector.broadcast %262 : vector<16x1xf32> to vector<16x16xf32>
    %264 = arith.mulf %259, %263 : vector<16x16xf32>
    %265 = arith.truncf %264 : vector<16x16xf32> to vector<16x16xbf16>
    %266 = arith.truncf %249 : vector<16x64xf32> to vector<16x64xbf16>
    %cst_102 = arith.constant dense<0.000000e+00> : vector<16x64xf32>
    %267 = tpu.matmul %265, %266, %cst_102 {dimension_numbers = #tpu.dot_dimension_numbers<[1], [0], [0], [1], [0, 0, 1, 1], [], []>} : vector<16x16xbf16>, vector<16x64xbf16>, vector<16x64xf32> -> vector<16x64xf32>
    %268 = tpu.concatenate %204, %225, %246, %267 in 1 : vector<16x64xf32>, vector<16x64xf32>, vector<16x64xf32>, vector<16x64xf32> -> vector<16x256xf32>
    %269 = arith.truncf %268 : vector<16x256xf32> to vector<16x256xbf16>
    %c1_103 = arith.constant 1 : index
    %c0_104 = arith.constant 0 : index
    %c0_105 = arith.constant 0 : index
    %270 = vector.load %arg6[%c1_103, %c0_104, %c0_105] : memref<2x256x256xbf16, #tpu.memory_space<vmem>>, vector<1x256x256xbf16>
    %271 = vector.shape_cast %270 : vector<1x256x256xbf16> to vector<256x256xbf16>
    %cst_106 = arith.constant dense<0.000000e+00> : vector<16x256xf32>
    %272 = tpu.matmul %269, %271, %cst_106 {dimension_numbers = #tpu.dot_dimension_numbers<[1], [0], [0], [1], [0, 0, 1, 1], [], []>} : vector<16x256xbf16>, vector<256x256xbf16>, vector<16x256xf32> -> vector<16x256xf32>
    %c1_107 = arith.constant 1 : index
    %c0_108 = arith.constant 0 : index
    %c0_109 = arith.constant 0 : index
    %273 = vector.load %arg7[%c1_107, %c0_108, %c0_109] : memref<2x1x256xf32, #tpu.memory_space<vmem>>, vector<1x1x256xf32>
    %274 = vector.shape_cast %273 : vector<1x1x256xf32> to vector<1x256xf32>
    %275 = vector.broadcast %274 : vector<1x256xf32> to vector<16x256xf32>
    %276 = arith.addf %272, %275 : vector<16x256xf32>
    %277 = arith.addf %175, %276 : vector<16x256xf32>
    %c1_110 = arith.constant 1 : index
    %c0_111 = arith.constant 0 : index
    %c0_112 = arith.constant 0 : index
    %278 = vector.load %arg8[%c1_110, %c0_111, %c0_112] : memref<2x1x256xf32, #tpu.memory_space<vmem>>, vector<1x1x256xf32>
    %279 = vector.shape_cast %278 : vector<1x1x256xf32> to vector<1x256xf32>
    %c1_113 = arith.constant 1 : index
    %c0_114 = arith.constant 0 : index
    %c0_115 = arith.constant 0 : index
    %280 = vector.load %arg9[%c1_113, %c0_114, %c0_115] : memref<2x1x256xf32, #tpu.memory_space<vmem>>, vector<1x1x256xf32>
    %281 = vector.shape_cast %280 : vector<1x1x256xf32> to vector<1x256xf32>
    %cst_116 = arith.constant dense<0.000000e+00> : vector<16xf32>
    %282 = vector.multi_reduction <add>, %277, %cst_116 [1] : vector<16x256xf32> to vector<16xf32>
    %283 = vector.shape_cast %282 : vector<16xf32> to vector<16x1xf32>
    %cst_117 = arith.constant 2.560000e+02 : f32
    %284 = vector.broadcast %cst_117 : f32 to vector<16x1xf32>
    %285 = arith.divf %283, %284 : vector<16x1xf32>
    %286 = vector.broadcast %285 : vector<16x1xf32> to vector<16x256xf32>
    %287 = arith.subf %277, %286 : vector<16x256xf32>
    %288 = arith.mulf %287, %287 : vector<16x256xf32>
    %cst_118 = arith.constant dense<0.000000e+00> : vector<16xf32>
    %289 = vector.multi_reduction <add>, %288, %cst_118 [1] : vector<16x256xf32> to vector<16xf32>
    %290 = vector.shape_cast %289 : vector<16xf32> to vector<16x1xf32>
    %cst_119 = arith.constant 2.560000e+02 : f32
    %291 = vector.broadcast %cst_119 : f32 to vector<16x1xf32>
    %292 = arith.divf %290, %291 : vector<16x1xf32>
    %cst_120 = arith.constant 9.99999974E-6 : f32
    %293 = vector.broadcast %cst_120 : f32 to vector<16x1xf32>
    %294 = arith.addf %292, %293 : vector<16x1xf32>
    %295 = math.rsqrt %294 : vector<16x1xf32>
    %296 = vector.broadcast %295 : vector<16x1xf32> to vector<16x256xf32>
    %297 = arith.mulf %287, %296 : vector<16x256xf32>
    %298 = vector.broadcast %279 : vector<1x256xf32> to vector<16x256xf32>
    %299 = arith.mulf %297, %298 : vector<16x256xf32>
    %300 = vector.broadcast %281 : vector<1x256xf32> to vector<16x256xf32>
    %301 = arith.addf %299, %300 : vector<16x256xf32>
    %302 = arith.truncf %301 : vector<16x256xf32> to vector<16x256xbf16>
    %c1_121 = arith.constant 1 : index
    %c0_122 = arith.constant 0 : index
    %c0_123 = arith.constant 0 : index
    %303 = vector.load %arg10[%c1_121, %c0_122, %c0_123] : memref<2x256x2048xbf16, #tpu.memory_space<vmem>>, vector<1x256x2048xbf16>
    %304 = vector.shape_cast %303 : vector<1x256x2048xbf16> to vector<256x2048xbf16>
    %cst_124 = arith.constant dense<0.000000e+00> : vector<16x2048xf32>
    %305 = tpu.matmul %302, %304, %cst_124 {dimension_numbers = #tpu.dot_dimension_numbers<[1], [0], [0], [1], [0, 0, 1, 1], [], []>} : vector<16x256xbf16>, vector<256x2048xbf16>, vector<16x2048xf32> -> vector<16x2048xf32>
    %c1_125 = arith.constant 1 : index
    %c0_126 = arith.constant 0 : index
    %c0_127 = arith.constant 0 : index
    %306 = vector.load %arg11[%c1_125, %c0_126, %c0_127] : memref<2x1x2048xf32, #tpu.memory_space<vmem>>, vector<1x1x2048xf32>
    %307 = vector.shape_cast %306 : vector<1x1x2048xf32> to vector<1x2048xf32>
    %308 = vector.broadcast %307 : vector<1x2048xf32> to vector<16x2048xf32>
    %309 = arith.addf %305, %308 : vector<16x2048xf32>
    %cst_128 = arith.constant 0.000000e+00 : f32
    %310 = vector.broadcast %cst_128 : f32 to vector<16x2048xf32>
    %311 = arith.maximumf %309, %310 : vector<16x2048xf32>
    %312 = arith.truncf %311 : vector<16x2048xf32> to vector<16x2048xbf16>
    %c1_129 = arith.constant 1 : index
    %c0_130 = arith.constant 0 : index
    %c0_131 = arith.constant 0 : index
    %313 = vector.load %arg12[%c1_129, %c0_130, %c0_131] : memref<2x2048x256xbf16, #tpu.memory_space<vmem>>, vector<1x2048x256xbf16>
    %314 = vector.shape_cast %313 : vector<1x2048x256xbf16> to vector<2048x256xbf16>
    %cst_132 = arith.constant dense<0.000000e+00> : vector<16x256xf32>
    %315 = tpu.matmul %312, %314, %cst_132 {dimension_numbers = #tpu.dot_dimension_numbers<[1], [0], [0], [1], [0, 0, 1, 1], [], []>} : vector<16x2048xbf16>, vector<2048x256xbf16>, vector<16x256xf32> -> vector<16x256xf32>
    %c1_133 = arith.constant 1 : index
    %c0_134 = arith.constant 0 : index
    %c0_135 = arith.constant 0 : index
    %316 = vector.load %arg13[%c1_133, %c0_134, %c0_135] : memref<2x1x256xf32, #tpu.memory_space<vmem>>, vector<1x1x256xf32>
    %317 = vector.shape_cast %316 : vector<1x1x256xf32> to vector<1x256xf32>
    %318 = vector.broadcast %317 : vector<1x256xf32> to vector<16x256xf32>
    %319 = arith.addf %315, %318 : vector<16x256xf32>
    %320 = arith.addf %301, %319 : vector<16x256xf32>
    %c1_136 = arith.constant 1 : index
    %c0_137 = arith.constant 0 : index
    %c0_138 = arith.constant 0 : index
    %321 = vector.load %arg14[%c1_136, %c0_137, %c0_138] : memref<2x1x256xf32, #tpu.memory_space<vmem>>, vector<1x1x256xf32>
    %322 = vector.shape_cast %321 : vector<1x1x256xf32> to vector<1x256xf32>
    %c1_139 = arith.constant 1 : index
    %c0_140 = arith.constant 0 : index
    %c0_141 = arith.constant 0 : index
    %323 = vector.load %arg15[%c1_139, %c0_140, %c0_141] : memref<2x1x256xf32, #tpu.memory_space<vmem>>, vector<1x1x256xf32>
    %324 = vector.shape_cast %323 : vector<1x1x256xf32> to vector<1x256xf32>
    %cst_142 = arith.constant dense<0.000000e+00> : vector<16xf32>
    %325 = vector.multi_reduction <add>, %320, %cst_142 [1] : vector<16x256xf32> to vector<16xf32>
    %326 = vector.shape_cast %325 : vector<16xf32> to vector<16x1xf32>
    %cst_143 = arith.constant 2.560000e+02 : f32
    %327 = vector.broadcast %cst_143 : f32 to vector<16x1xf32>
    %328 = arith.divf %326, %327 : vector<16x1xf32>
    %329 = vector.broadcast %328 : vector<16x1xf32> to vector<16x256xf32>
    %330 = arith.subf %320, %329 : vector<16x256xf32>
    %331 = arith.mulf %330, %330 : vector<16x256xf32>
    %cst_144 = arith.constant dense<0.000000e+00> : vector<16xf32>
    %332 = vector.multi_reduction <add>, %331, %cst_144 [1] : vector<16x256xf32> to vector<16xf32>
    %333 = vector.shape_cast %332 : vector<16xf32> to vector<16x1xf32>
    %cst_145 = arith.constant 2.560000e+02 : f32
    %334 = vector.broadcast %cst_145 : f32 to vector<16x1xf32>
    %335 = arith.divf %333, %334 : vector<16x1xf32>
    %cst_146 = arith.constant 9.99999974E-6 : f32
    %336 = vector.broadcast %cst_146 : f32 to vector<16x1xf32>
    %337 = arith.addf %335, %336 : vector<16x1xf32>
    %338 = math.rsqrt %337 : vector<16x1xf32>
    %339 = vector.broadcast %338 : vector<16x1xf32> to vector<16x256xf32>
    %340 = arith.mulf %330, %339 : vector<16x256xf32>
    %341 = vector.broadcast %322 : vector<1x256xf32> to vector<16x256xf32>
    %342 = arith.mulf %340, %341 : vector<16x256xf32>
    %343 = vector.broadcast %324 : vector<1x256xf32> to vector<16x256xf32>
    %344 = arith.addf %342, %343 : vector<16x256xf32>
    %c0_147 = arith.constant 0 : index
    %c0_148 = arith.constant 0 : index
    %c0_149 = arith.constant 0 : index
    %345 = vector.load %arg16[%c0_147, %c0_148, %c0_149] : memref<1x16x256xf32, #tpu.memory_space<vmem>>, vector<1x16x256xf32>
    %346 = vector.shape_cast %345 : vector<1x16x256xf32> to vector<16x256xf32>
    %347 = vector.shape_cast %344 : vector<16x256xf32> to vector<1x16x256xf32>
    tpu.vector_store %arg16[%c0_147, %c0_148, %c0_149], %347 {strides = array<i32>} : memref<1x16x256xf32, #tpu.memory_space<vmem>>, vector<1x16x256xf32>,
    return
  }
  func.func @transform_0(%arg0: i32) -> (i32, i32, i32) {
    %c0_i32 = arith.constant 0 : i32
    %c0_i32_0 = arith.constant 0 : i32
    %c0_i32_1 = arith.constant 0 : i32
    return %arg0, %c0_i32, %c0_i32_0 : i32, i32, i32
  }
  func.func @transform_1(%arg0: i32) -> (i32, i32) {
    %c0_i32 = arith.constant 0 : i32
    %c0_i32_0 = arith.constant 0 : i32
    %c0_i32_1 = arith.constant 0 : i32
    return %c0_i32, %c0_i32_0 : i32, i32
  }
  func.func @transform_2(%arg0: i32) -> (i32, i32) {
    %c0_i32 = arith.constant 0 : i32
    %c0_i32_0 = arith.constant 0 : i32
    %c0_i32_1 = arith.constant 0 : i32
    return %c0_i32, %c0_i32_0 : i32, i32
  }
  func.func @transform_3(%arg0: i32) -> (i32, i32, i32) {
    %c0_i32 = arith.constant 0 : i32
    %c0_i32_0 = arith.constant 0 : i32
    %c0_i32_1 = arith.constant 0 : i32
    %c0_i32_2 = arith.constant 0 : i32
    return %c0_i32, %c0_i32_0, %c0_i32_1 : i32, i32, i32
  }
  func.func @transform_4(%arg0: i32) -> (i32, i32, i32) {
    %c0_i32 = arith.constant 0 : i32
    %c0_i32_0 = arith.constant 0 : i32
    %c0_i32_1 = arith.constant 0 : i32
    %c0_i32_2 = arith.constant 0 : i32
    return %c0_i32, %c0_i32_0, %c0_i32_1 : i32, i32, i32
  }
  func.func @transform_5(%arg0: i32) -> (i32, i32, i32) {
    %c0_i32 = arith.constant 0 : i32
    %c0_i32_0 = arith.constant 0 : i32
    %c0_i32_1 = arith.constant 0 : i32
    %c0_i32_2 = arith.constant 0 : i32
    return %c0_i32, %c0_i32_0, %c0_i32_1 : i32, i32, i32
  }
  func.func @transform_6(%arg0: i32) -> (i32, i32, i32) {
    %c0_i32 = arith.constant 0 : i32
    %c0_i32_0 = arith.constant 0 : i32
    %c0_i32_1 = arith.constant 0 : i32
    %c0_i32_2 = arith.constant 0 : i32
    return %c0_i32, %c0_i32_0, %c0_i32_1 : i32, i32, i32
  }
  func.func @transform_7(%arg0: i32) -> (i32, i32, i32) {
    %c0_i32 = arith.constant 0 : i32
    %c0_i32_0 = arith.constant 0 : i32
    %c0_i32_1 = arith.constant 0 : i32
    %c0_i32_2 = arith.constant 0 : i32
    return %c0_i32, %c0_i32_0, %c0_i32_1 : i32, i32, i32
  }
  func.func @transform_8(%arg0: i32) -> (i32, i32, i32) {
    %c0_i32 = arith.constant 0 : i32
    %c0_i32_0 = arith.constant 0 : i32
    %c0_i32_1 = arith.constant 0 : i32
    %c0_i32_2 = arith.constant 0 : i32
    return %c0_i32, %c0_i32_0, %c0_i32_1 : i32, i32, i32
  }
  func.func @transform_9(%arg0: i32) -> (i32, i32, i32) {
    %c0_i32 = arith.constant 0 : i32
    %c0_i32_0 = arith.constant 0 : i32
    %c0_i32_1 = arith.constant 0 : i32
    %c0_i32_2 = arith.constant 0 : i32
    return %c0_i32, %c0_i32_0, %c0_i32_1 : i32, i32, i32
  }
  func.func @transform_10(%arg0: i32) -> (i32, i32, i32) {
    %c0_i32 = arith.constant 0 : i32
    %c0_i32_0 = arith.constant 0 : i32
    %c0_i32_1 = arith.constant 0 : i32
    %c0_i32_2 = arith.constant 0 : i32
    return %c0_i32, %c0_i32_0, %c0_i32_1 : i32, i32, i32
  }
  func.func @transform_11(%arg0: i32) -> (i32, i32, i32) {
    %c0_i32 = arith.constant 0 : i32
    %c0_i32_0 = arith.constant 0 : i32
    %c0_i32_1 = arith.constant 0 : i32
    %c0_i32_2 = arith.constant 0 : i32
    return %c0_i32, %c0_i32_0, %c0_i32_1 : i32, i32, i32
  }
  func.func @transform_12(%arg0: i32) -> (i32, i32, i32) {
    %c0_i32 = arith.constant 0 : i32
    %c0_i32_0 = arith.constant 0 : i32
    %c0_i32_1 = arith.constant 0 : i32
    %c0_i32_2 = arith.constant 0 : i32
    return %c0_i32, %c0_i32_0, %c0_i32_1 : i32, i32, i32
  }
  func.func @transform_13(%arg0: i32) -> (i32, i32, i32) {
    %c0_i32 = arith.constant 0 : i32
    %c0_i32_0 = arith.constant 0 : i32
    %c0_i32_1 = arith.constant 0 : i32
    %c0_i32_2 = arith.constant 0 : i32
    return %c0_i32, %c0_i32_0, %c0_i32_1 : i32, i32, i32
  }
  func.func @transform_14(%arg0: i32) -> (i32, i32, i32) {
    %c0_i32 = arith.constant 0 : i32
    %c0_i32_0 = arith.constant 0 : i32
    %c0_i32_1 = arith.constant 0 : i32
    %c0_i32_2 = arith.constant 0 : i32
    return %c0_i32, %c0_i32_0, %c0_i32_1 : i32, i32, i32
  }
  func.func @transform_15(%arg0: i32) -> (i32, i32, i32) {
    %c0_i32 = arith.constant 0 : i32
    %c0_i32_0 = arith.constant 0 : i32
    %c0_i32_1 = arith.constant 0 : i32
    return %arg0, %c0_i32, %c0_i32_0 : i32, i32, i32
  }
}

</mosaic_0001>

<bundles_post_ra>
// kernel: transformer_model_forward.1
= control target key start
LH: loop header
LB: loop body
LE: loop exit
PB: predicated region body
PF: predicated region fallthrough
CT: control target
= control target key end

     0   :  { %s18033_s0 = inlined_call_operand.vmem [shape: bf16[2,16,1024], index: 0, kind: input, shape index: {}]   ;;  %s18034_s1 = inlined_call_operand.hbm [shape: bf16[1024,256], index: 1, kind: input, shape index: {}]   ;;  %s18035_s2 = inlined_call_operand.hbm [shape: f32[1,256], index: 2, kind: input, shape index: {}]   ;;  %s18036_s3 = inlined_call_operand.hbm [shape: bf16[2,256,768], index: 3, kind: input, shape index: {}]   ;;  %s18037_s4 = inlined_call_operand.hbm [shape: f32[2,1,768], index: 4, kind: input, shape index: {}]   ;;  %s18038_s5 = inlined_call_operand.hbm [shape: bf16[2,256,256], index: 5, kind: input, shape index: {}]   ;;  %s18039_s6 = inlined_call_operand.hbm [shape: f32[2,1,256], index: 6, kind: input, shape index: {}]   ;;  %s18040_s7 = inlined_call_operand.hbm [shape: f32[2,1,256], index: 7, kind: input, shape index: {}]   ;;  %s18041_s8 = inlined_call_operand.hbm [shape: f32[2,1,256], index: 8, kind: input, shape index: {}]   ;;  %s18042_s9 = inlined_call_operand.hbm [shape: bf16[2,256,2048], index: 9, kind: input, shape index: {}]   ;;  %s18043_s10 = inlined_call_operand.hbm [shape: f32[2,1,2048], index: 10, kind: input, shape index: {}]   ;;  %s18044_s11 = inlined_call_operand.hbm [shape: bf16[2,2048,256], index: 11, kind: input, shape index: {}]   ;;  %s18045_s12 = inlined_call_operand.hbm [shape: f32[2,1,256], index: 12, kind: input, shape index: {}]   ;;  %s18046_s13 = inlined_call_operand.hbm [shape: f32[2,1,256], index: 13, kind: input, shape index: {}]   ;;  %s18047_s14 = inlined_call_operand.hbm [shape: f32[2,1,256], index: 14, kind: input, shape index: {}]   ;;  %s18048_s15 = inlined_call_operand.hbm [shape: f32[2,16,256], index: 15, kind: output, shape index: {}]  }
   0x1   :  { %18073 = sst [smem:[#allocation44_spill]] %s18033_s0 }
   0x2   :  { %18074 = sst [smem:[#allocation45_spill]] %s18034_s1 }
   0x3   :  { %18075 = sst [smem:[#allocation46_spill]] %s18035_s2 }
   0x4   :  { %18076 = sst [smem:[#allocation47_spill]] %s18036_s3 }
   0x5   :  { %18077 = sst [smem:[#allocation48_spill]] %s18037_s4 }
   0x6   :  { %18078 = sst [smem:[#allocation49_spill]] %s18038_s5 }
   0x7   :  { %18079 = sst [smem:[#allocation50_spill]] %s18039_s6 }
   0x8   :  { %18080 = sst [smem:[#allocation51_spill]] %s18048_s15 }
   0x9   :  { %20 = vsyncpa [#allocation3], 0 }
   0xa   :  { %21 = vsyncpa [#allocation6], 0 }
   0xb   :  { %22 = vsyncpa [#allocation9], 0 }
   0xc   :  { %23 = vsyncpa [#allocation12], 0 }
   0xd   :  { %24 = vsyncpa [#allocation15], 0 }
   0xe   :  { %25 = vsyncpa [#allocation18], 0 }
   0xf   :  { %26 = vsyncpa [#allocation21], 0 }
  0x10   :  { %27 = vsyncpa [#allocation24], 0 }
  0x11   :  { %28 = vsyncpa [#allocation4], 0 }
  0x12   :  { %30 = vsyncpa [#allocation4 + $0x1], 0  ;;  %s16930_s18 = smov 0   ;;  %s16932_s19 = smov 0  }
  0x13   :  { %s16934_s20 = smov 0   ;;  %s16936_s21 = smov 0  }
  0x14 LB: > { %18081 = sst [smem:[#allocation35_spill]] %s16804_s18  ;;  %s16951_s22 = sadd.s32 4294967295, %s16816_s21   ;;  %s16816_s21 = sphi %s16936_s21, %s18131_s21   ;;  %s16812_s20 = sphi %s16934_s20, %s18134_s20   ;;  %s16808_s19 = sphi %s16932_s19, %s18133_s19   ;;  %s16804_s18 = sphi %s16930_s18, %s18132_s18  }
  0x15   : > { %18082 = sst [smem:[#allocation36_spill]] %s16808_s19  ;;  %s13007_s23 = sadd.s32 4294967294, %s16816_s21  }
  0x16   : > { %18083 = sst [smem:[#allocation37_spill]] %s16812_s20  ;;  %s16955_s24 = sadd.s32 1, %s16816_s21  }
  0x17   : > { %18084 = sst [smem:[#allocation38_spill]] %s16816_s21  ;;  %s363_s25 = sadd.s32 1, %s16812_s20 }
  0x18   : > { %18085 = sst [smem:[#allocation39_spill]] %s16951_s22  ;;  %s360_s26 = ssub.s32 %s16816_s21, %s16955_s24 }
  0x19   : > { %18086 = sst [smem:[#allocation40_spill]] %s16955_s24  ;;  %p373_p0 = scmp.ne.s32.totalorder %s16812_s20, %s16808_s19 }
  0x1a   : > { %p361_p1 = scmp.eq.s32.totalorder %s360_s26, 0  ;;  %p374_p2 = scmp.eq.s32.totalorder %s16951_s22, 1 }
  0x1b   : > { %p379_p3 = scmp.ne.s32.totalorder %s16808_s19, %s16804_s18  ;;  %p380_p4 = scmp.eq.s32.totalorder %s13007_s23, 1 }
  0x1c   : > { %s16966_s27 = scalar_select %p361_p1, %s16812_s20, %s363_s25  }
  0x1d   : > { %p16968_p5 = por %p374_p2, %p373_p0  ;;  %p16972_p6 = por %p380_p4, %p379_p3 }
  0x1e   : > { %18087 = sst [smem:[#allocation41_spill]] %s16966_s27  ;;  %p13008_p7 = scmp.ge.s32.totalorder %s16816_s21, 1 }
  0x1f   : > { %s18088_s28 = scalar_select %p16968_p5, 1, 0 }
  0x20   : > { %s18090_s29 = scalar_select %p16972_p6, 1, 0 }
  0x21   : > { %18089 = sst [smem:[#allocation42_spill]] %s18088_s28  ;;  %p387_p8 = scmp.lt.s32.totalorder %s16816_s21, 3 }
  0x22   : > { %18091 = sst [smem:[#allocation43_spill]] %s18090_s29  ;;  %p18056_p9 = scmp.eq.s32.totalorder %s16951_s22, 0 }
  0x23   : > { %p16979_p10 = pnand %p13008_p7, %p387_p8  ;;  %s16818_s16 = smov [#allocation5]  }
  0x24   : > { %s413_s17 = sshll.u32 %s16818_s16, 4  ;;  %s16819_s23 = smov [#allocation8]   ;;  %s414_s17 = int_to_ptr.vmem [resolvable:$true] %s413_s17 }
  0x25   : > { %s18092_s30 = scalar_select %p16979_p10, 1, 0 }
  0x26   : > { %p14747_p11 = pneg %p16979_p10  ;;  %s436_s25 = sshll.u32 %s16819_s23, 4  ;;  %s16991_s25 = int_to_ptr.vmem [resolvable:$true] %s436_s25 }
  0x27   : > { %s16820_s27 = smov [#allocation11]   ;;  %s18094_s2 = sld [smem:[#allocation46_spill]] }
  0x28   : > { %p16987_p12 = pnand %p18056_p9, %p14747_p11  ;;  %s16993_s20 = sshll.u32 %s16820_s27, 4  ;;  %s463_s20 = int_to_ptr.vmem [resolvable:$true] %s16993_s20 }
  0x2a   : > { %p17003_p0 = pneg %p16987_p12 }
  0x2d   : > { %s16330_s16 = scalar_lea.hbm %s18094_s2, 32 }
  0x2e   : > { %p16331_p13 = scmp.ne.s32.totalorder %s18094_s2, %s16330_s16  ;;  %p16337_p3 = scmp.lt.u32.totalorder %s16330_s16, %s18094_s2 }
  0x30   : > { %p16333_p1 = pnand %p17003_p0, %p16331_p13 }
  0x32   : > { %p16334_p2 = pneg %p16333_p1 }
  0x34   : > { %p16339_p4 = pnand %p16337_p3, %p16334_p2 }
  0x36   : > { %16342 = shalt.err (!%p16339_p4)
}
  0x37   : > { %s16343_s24 = scalar_lea.vmem %s414_s17, 32  ;;  %p16351_p9 = scmp.lt.s32.totalorder %s414_s17, %s414_s17 }
  0x38   : > { %p16344_p7 = scmp.ne.s32.totalorder %s414_s17, %s16343_s24  ;;  %p16352_p6 = scmp.lt.s32.totalorder %s16343_s24, %s16343_s24 }
  0x3a   : > { %p16346_p8 = pnand %p16344_p7, %p17003_p0  ;;  %p16353_p5 = por %p16352_p6, %p16351_p9 }
  0x3c   : > { %p16347_p11 = pneg %p16346_p8 }
  0x3e   : > { %p16354_p10 = pnand %p16353_p5, %p16347_p11 }
  0x40   : > { %16357 = shalt.err (!%p16354_p10)
}
  0x41   : > { %14753 = dma.hbm_to_vmem [thread:$0]  (!%p16987_p12), %s18094_s2, 32, %s414_s17, [#allocation6]  }
  0x42   : > { %s18096_s4 = sld [smem:[#allocation48_spill]] }
  0x48   : > { %s16358_s16 = scalar_lea.hbm %s18096_s4, 192 }
  0x49   : > { %p16359_p13 = scmp.ne.s32.totalorder %s18096_s4, %s16358_s16  ;;  %p16365_p5 = scmp.lt.u32.totalorder %s16358_s16, %s18096_s4 }
  0x4b   : > { %p16361_p1 = pnand %p16359_p13, %p17003_p0 }
  0x4d   : > { %p16362_p6 = pneg %p16361_p1 }
  0x4f   : > { %p16367_p9 = pnand %p16365_p5, %p16362_p6 }
  0x51   : > { %16370 = shalt.err (!%p16367_p9)
}
  0x52   : > { %s16371_s17 = scalar_lea.vmem %s16991_s25, 192  ;;  %p16379_p4 = scmp.lt.s32.totalorder %s16991_s25, %s16991_s25 }
  0x53   : > { %p16372_p10 = scmp.ne.s32.totalorder %s16991_s25, %s16371_s17  ;;  %p16380_p7 = scmp.lt.s32.totalorder %s16371_s17, %s16371_s17 }
  0x55   : > { %p16374_p2 = pnand %p16372_p10, %p17003_p0  ;;  %p16381_p8 = por %p16380_p7, %p16379_p4 }
  0x57   : > { %p16375_p3 = pneg %p16374_p2 }
  0x59   : > { %p16382_p11 = pnand %p16381_p8, %p16375_p3 }
  0x5b   : > { %16385 = shalt.err (!%p16382_p11)
}
  0x5c   : > { %s16821_s28 = smov 96   ;;  %s16822_s19 = smov 6  }
  0x5d   : > { %14759 = dma.hbm_to_vmem [thread:$0]  (!%p16987_p12), %s18096_s4, 192, %s16991_s25, [#allocation9], %s16821_s28, %s16821_s28, %s16822_s19  }
  0x5e   : > { %s18097_s6 = sld [smem:[#allocation50_spill]] }
  0x64   : > { %s16386_s16 = scalar_lea.hbm %s18097_s6, 64 }
  0x65   : > { %p16387_p13 = scmp.ne.s32.totalorder %s18097_s6, %s16386_s16  ;;  %p16393_p5 = scmp.lt.u32.totalorder %s16386_s16, %s18097_s6 }
  0x67   : > { %p16389_p1 = pnand %p16387_p13, %p17003_p0 }
  0x69   : > { %p16390_p6 = pneg %p16389_p1 }
  0x6b   : > { %p16395_p9 = pnand %p16393_p5, %p16390_p6 }
  0x6d   : > { %16398 = shalt.err (!%p16395_p9)
}
  0x6e   : > { %s16399_s18 = scalar_lea.vmem %s463_s20, 64  ;;  %p16407_p4 = scmp.lt.s32.totalorder %s463_s20, %s463_s20 }
  0x6f   : > { %p16400_p10 = scmp.ne.s32.totalorder %s463_s20, %s16399_s18  ;;  %p16408_p7 = scmp.lt.s32.totalorder %s16399_s18, %s16399_s18 }
  0x71   : > { %p16402_p2 = pnand %p16400_p10, %p17003_p0  ;;  %p16409_p8 = por %p16408_p7, %p16407_p4 }
  0x73   : > { %p16403_p3 = pneg %p16402_p2 }
  0x75   : > { %p16410_p11 = pnand %p16409_p8, %p16403_p3 }
  0x77   : > { %16413 = shalt.err (!%p16410_p11)
}
  0x78   : > { %s18065_s25 = smov 32   ;;  %s18067_s28 = smov 2  }
  0x79   : > { %14765 = dma.hbm_to_vmem [thread:$0]  (!%p16987_p12), %s18097_s6, 64, %s463_s20, [#allocation12], %s18065_s25, %s18065_s25, %s18067_s28  }
  0x7a   : > { %s16825_s21 = smov [#allocation14]   ;;  %s16826_s29 = smov [#allocation17]  }
  0x7b   : > { %s488_s15 = sshll.u32 %s16825_s21, 4  ;;  %s514_s16 = sshll.u32 %s16826_s29, 4  ;;  %s489_s15 = int_to_ptr.vmem [resolvable:$true] %s488_s15  ;;  %s515_s16 = int_to_ptr.vmem [resolvable:$true] %s514_s16 }
  0x7c   : > { %s16414_s17 = scalar_lea.hbm %s18041_s8, 64 }
  0x7d   : > { %p16415_p13 = scmp.ne.s32.totalorder %s18041_s8, %s16414_s17  ;;  %p16421_p5 = scmp.lt.u32.totalorder %s16414_s17, %s18041_s8 }
  0x7f   : > { %p16417_p1 = pnand %p16415_p13, %p17003_p0 }
  0x81   : > { %p16418_p6 = pneg %p16417_p1 }
  0x83   : > { %p16423_p9 = pnand %p16421_p5, %p16418_p6 }
  0x85   : > { %16426 = shalt.err (!%p16423_p9)
}
  0x86   : > { %s16427_s20 = scalar_lea.vmem %s489_s15, 64  ;;  %p16435_p4 = scmp.lt.s32.totalorder %s489_s15, %s489_s15 }
  0x87   : > { %p16428_p10 = scmp.ne.s32.totalorder %s489_s15, %s16427_s20  ;;  %p16436_p7 = scmp.lt.s32.totalorder %s16427_s20, %s16427_s20 }
  0x89   : > { %p16430_p2 = pnand %p16428_p10, %p17003_p0  ;;  %p16437_p8 = por %p16436_p7, %p16435_p4 }
  0x8b   : > { %p16431_p3 = pneg %p16430_p2 }
  0x8d   : > { %p16438_p11 = pnand %p16437_p8, %p16431_p3 }
  0x8f   : > { %16441 = shalt.err (!%p16438_p11)
}
  0x90   : > { %14771 = dma.hbm_to_vmem [thread:$0]  (!%p16987_p12), %s18041_s8, 64, %s489_s15, [#allocation15], %s18065_s25, %s18065_s25, %s18067_s28  }
  0x91   : > { %s16442_s19 = scalar_lea.hbm %s18043_s10, 512 }
  0x92   : > { %p16443_p13 = scmp.ne.s32.totalorder %s18043_s10, %s16442_s19  ;;  %p16449_p5 = scmp.lt.u32.totalorder %s16442_s19, %s18043_s10 }
  0x94   : > { %p16445_p1 = pnand %p16443_p13, %p17003_p0 }
  0x96   : > { %p16446_p6 = pneg %p16445_p1 }
  0x98   : > { %p16451_p9 = pnand %p16449_p5, %p16446_p6 }
  0x9a   : > { %16454 = shalt.err (!%p16451_p9)
}
  0x9b   : > { %s16455_s17 = scalar_lea.vmem %s515_s16, 512  ;;  %p16463_p4 = scmp.lt.s32.totalorder %s515_s16, %s515_s16 }
  0x9c   : > { %p16456_p10 = scmp.ne.s32.totalorder %s515_s16, %s16455_s17  ;;  %p16464_p7 = scmp.lt.s32.totalorder %s16455_s17, %s16455_s17 }
  0x9e   : > { %p16458_p2 = pnand %p16456_p10, %p17003_p0  ;;  %p16465_p8 = por %p16464_p7, %p16463_p4 }
  0xa0   : > { %p16459_p3 = pneg %p16458_p2 }
  0xa2   : > { %p16466_p11 = pnand %p16465_p8, %p16459_p3 }
  0xa4   : > { %16469 = shalt.err (!%p16466_p11)
}
  0xa5   : > { %s16827_s15 = smov 256   ;;  %s16828_s18 = smov 16  }
  0xa6   : > { %14777 = dma.hbm_to_vmem [thread:$0]  (!%p16987_p12), %s18043_s10, 512, %s515_s16, [#allocation18], %s16827_s15, %s16827_s15, %s16828_s18  }
  0xa7   : > { %s16829_s4 = smov [#allocation20]   ;;  %s16830_s2 = smov [#allocation2]  }
  0xa8   : > { %s540_s22 = sshll.u32 %s16829_s4, 4  ;;  %s399_s19 = sshll.u32 %s16830_s2, 4  ;;  %s541_s22 = int_to_ptr.vmem [resolvable:$true] %s540_s22  ;;  %s400_s19 = int_to_ptr.vmem [resolvable:$true] %s399_s19 }
  0xa9   : > { %s16470_s27 = scalar_lea.hbm %s18045_s12, 64 }
  0xaa   : > { %p16471_p13 = scmp.ne.s32.totalorder %s18045_s12, %s16470_s27  ;;  %p16477_p5 = scmp.lt.u32.totalorder %s16470_s27, %s18045_s12 }
  0xac   : > { %p16473_p1 = pnand %p16471_p13, %p17003_p0 }
  0xae   : > { %p16474_p6 = pneg %p16473_p1 }
  0xb0   : > { %p16479_p9 = pnand %p16477_p5, %p16474_p6 }
  0xb2   : > { %16482 = shalt.err (!%p16479_p9)
}
  0xb3   : > { %s16483_s16 = scalar_lea.vmem %s541_s22, 64  ;;  %p16491_p4 = scmp.lt.s32.totalorder %s541_s22, %s541_s22 }
  0xb4   : > { %p16484_p10 = scmp.ne.s32.totalorder %s541_s22, %s16483_s16  ;;  %p16492_p7 = scmp.lt.s32.totalorder %s16483_s16, %s16483_s16 }
  0xb6   : > { %p16486_p2 = pnand %p16484_p10, %p17003_p0  ;;  %p16493_p8 = por %p16492_p7, %p16491_p4 }
  0xb8   : > { %p16487_p3 = pneg %p16486_p2 }
  0xba   : > { %p16494_p11 = pnand %p16493_p8, %p16487_p3 }
  0xbc   : > { %16497 = shalt.err (!%p16494_p11)
}
  0xbd   : > { %s18098_s15 = smov 2   ;;  %s18099_s18 = smov 32  }
  0xbe   : > { %14783 = dma.hbm_to_vmem [thread:$0]  (!%p16987_p12), %s18045_s12, 64, %s541_s22, [#allocation21], %s18099_s18, %s18099_s18, %s18098_s15  }
  0xbf   : > { %s18100_s1 = sld [smem:[#allocation45_spill]] }
  0xc5   : > { %s16498_s4 = scalar_lea.hbm %s18100_s1, 16384 }
  0xc6   : > { %p16499_p13 = scmp.ne.s32.totalorder %s18100_s1, %s16498_s4  ;;  %p16505_p5 = scmp.lt.u32.totalorder %s16498_s4, %s18100_s1 }
  0xc8   : > { %p16501_p1 = pnand %p16499_p13, %p17003_p0 }
  0xca   : > { %p16502_p6 = pneg %p16501_p1 }
  0xcc   : > { %p16507_p9 = pnand %p16505_p5, %p16502_p6 }
  0xce   : > { %16510 = shalt.err (!%p16507_p9)
}
  0xcf   : > { %s16511_s24 = scalar_lea.vmem %s400_s19, 16384  ;;  %p16519_p4 = scmp.lt.s32.totalorder %s400_s19, %s400_s19 }
  0xd0   : > { %p16512_p10 = scmp.ne.s32.totalorder %s400_s19, %s16511_s24  ;;  %p16520_p7 = scmp.lt.s32.totalorder %s16511_s24, %s16511_s24 }
  0xd2   : > { %p16514_p2 = pnand %p16512_p10, %p17003_p0  ;;  %p16521_p8 = por %p16520_p7, %p16519_p4 }
  0xd4   : > { %p16515_p3 = pneg %p16514_p2 }
  0xd6   : > { %p16522_p11 = pnand %p16521_p8, %p16515_p3 }
  0xd8   : > { %16525 = shalt.err (!%p16522_p11)
}
  0xd9   : > { %s18069_s22 = smov 128   ;;  %s18071_s17 = smov 8  }
  0xda   : > { %14750 = dma.hbm_to_vmem [thread:$0]  (!%p16987_p12), %s18100_s1, 16384, %s400_s19, [#allocation3], %s18069_s22, %s18069_s22, %s18071_s17  }
  0xdb   : > { %s16833_s28 = smov [#allocation7]   ;;  %s18101_s3 = sld [smem:[#allocation47_spill]] }
  0xdc   : > { %s423_s20 = sshll.u32 %s16833_s28, 4  ;;  %s424_s20 = int_to_ptr.vmem [resolvable:$true] %s423_s20 }
  0xe1   : > { %s16526_s2 = scalar_lea.hbm %s18101_s3, 24576 }
  0xe2   : > { %p16527_p13 = scmp.ne.s32.totalorder %s18101_s3, %s16526_s2  ;;  %p16533_p5 = scmp.lt.u32.totalorder %s16526_s2, %s18101_s3 }
  0xe4   : > { %p16529_p1 = pnand %p16527_p13, %p17003_p0 }
  0xe6   : > { %p16530_p6 = pneg %p16529_p1 }
  0xe8   : > { %p16535_p9 = pnand %p16533_p5, %p16530_p6 }
  0xea   : > { %16538 = shalt.err (!%p16535_p9)
}
  0xeb   : > { %s16539_s19 = scalar_lea.vmem %s424_s20, 24576  ;;  %p16547_p4 = scmp.lt.s32.totalorder %s424_s20, %s424_s20 }
  0xec   : > { %p16540_p10 = scmp.ne.s32.totalorder %s424_s20, %s16539_s19  ;;  %p16548_p7 = scmp.lt.s32.totalorder %s16539_s19, %s16539_s19 }
  0xee   : > { %p16542_p2 = pnand %p16540_p10, %p17003_p0  ;;  %p16549_p8 = por %p16548_p7, %p16547_p4 }
  0xf0   : > { %p16543_p3 = pneg %p16542_p2 }
  0xf2   : > { %p16550_p11 = pnand %p16549_p8, %p16543_p3 }
  0xf4   : > { %16553 = shalt.err (!%p16550_p11)
}
  0xf5   : > { %s16834_s16 = smov 384   ;;  %s16835_s25 = smov 24  }
  0xf6   : > { %14756 = dma.hbm_to_vmem [thread:$0]  (!%p16987_p12), %s18101_s3, 24576, %s424_s20, [#allocation6], %s16834_s16, %s16834_s16, %s16835_s25  }
  0xf7   : > { %s16836_s4 = smov [#allocation10]   ;;  %s16837_s21 = smov [#allocation13]  }
  0xf8   : > { %s449_s2 = sshll.u32 %s16836_s4, 4  ;;  %s475_s29 = sshll.u32 %s16837_s21, 4  ;;  %s450_s2 = int_to_ptr.vmem [resolvable:$true] %s449_s2  ;;  %s17163_s29 = int_to_ptr.vmem [resolvable:$true] %s475_s29 }
  0xf9   : > { %s18102_s5 = sld [smem:[#allocation49_spill]] }
  0xff   : > { %s16554_s19 = scalar_lea.hbm %s18102_s5, 8192 }
 0x100   : > { %p16555_p13 = scmp.ne.s32.totalorder %s18102_s5, %s16554_s19  ;;  %p16561_p5 = scmp.lt.u32.totalorder %s16554_s19, %s18102_s5 }
 0x102   : > { %p16557_p1 = pnand %p16555_p13, %p17003_p0 }
 0x104   : > { %p16558_p6 = pneg %p16557_p1 }
 0x106   : > { %p16563_p9 = pnand %p16561_p5, %p16558_p6 }
 0x108   : > { %16566 = shalt.err (!%p16563_p9)
}
 0x109   : > { %s16567_s16 = scalar_lea.vmem %s450_s2, 8192  ;;  %p16575_p4 = scmp.lt.s32.totalorder %s450_s2, %s450_s2 }
 0x10a   : > { %p16568_p10 = scmp.ne.s32.totalorder %s450_s2, %s16567_s16  ;;  %p16576_p7 = scmp.lt.s32.totalorder %s16567_s16, %s16567_s16 }
 0x10c   : > { %p16570_p2 = pnand %p16568_p10, %p17003_p0  ;;  %p16577_p8 = por %p16576_p7, %p16575_p4 }
 0x10e   : > { %p16571_p3 = pneg %p16570_p2 }
 0x110   : > { %p16578_p11 = pnand %p16577_p8, %p16571_p3 }
 0x112   : > { %16581 = shalt.err (!%p16578_p11)
}
 0x113   : > { %s18103_s22 = smov 8   ;;  %s18104_s17 = smov 128  }
 0x114   : > { %14762 = dma.hbm_to_vmem [thread:$0]  (!%p16987_p12), %s18102_s5, 8192, %s450_s2, [#allocation9], %s18104_s17, %s18104_s17, %s18103_s22  }
 0x115   : > { %s16582_s27 = scalar_lea.hbm %s18040_s7, 64 }
 0x116   : > { %p16583_p13 = scmp.ne.s32.totalorder %s18040_s7, %s16582_s27  ;;  %p16589_p5 = scmp.lt.u32.totalorder %s16582_s27, %s18040_s7 }
 0x118   : > { %p16585_p1 = pnand %p16583_p13, %p17003_p0 }
 0x11a   : > { %p16586_p6 = pneg %p16585_p1 }
 0x11c   : > { %p16591_p9 = pnand %p16589_p5, %p16586_p6 }
 0x11e   : > { %16594 = shalt.err (!%p16591_p9)
}
 0x11f   : > { %s16595_s2 = scalar_lea.vmem %s17163_s29, 64  ;;  %p16603_p4 = scmp.lt.s32.totalorder %s17163_s29, %s17163_s29 }
 0x120   : > { %p16596_p10 = scmp.ne.s32.totalorder %s17163_s29, %s16595_s2  ;;  %p16604_p7 = scmp.lt.s32.totalorder %s16595_s2, %s16595_s2 }
 0x122   : > { %p16598_p2 = pnand %p16596_p10, %p17003_p0  ;;  %p16605_p8 = por %p16604_p7, %p16603_p4 }
 0x124   : > { %p16599_p3 = pneg %p16598_p2 }
 0x126   : > { %p16606_p11 = pnand %p16605_p8, %p16599_p3 }
 0x128   : > { %16609 = shalt.err (!%p16606_p11)
}
 0x129   : > { %14768 = dma.hbm_to_vmem [thread:$0]  (!%p16987_p12), %s18040_s7, 64, %s17163_s29, [#allocation12], %s18099_s18, %s18099_s18, %s18098_s15  }
 0x12a   : > { %s16838_s0 = smov [#allocation16]   ;;  %s16610_s24 = scalar_lea.hbm %s18042_s9, 65536 }
 0x12b   : > { %s501_s4 = sshll.u32 %s16838_s0, 4  ;;  %p16611_p13 = scmp.ne.s32.totalorder %s18042_s9, %s16610_s24  ;;  %s502_s4 = int_to_ptr.vmem [resolvable:$true] %s501_s4 }
 0x12c   : > { %p16617_p5 = scmp.lt.u32.totalorder %s16610_s24, %s18042_s9 }
 0x12d   : > { %p16613_p1 = pnand %p16611_p13, %p17003_p0 }
 0x12f   : > { %p16614_p6 = pneg %p16613_p1 }
 0x131   : > { %p16619_p9 = pnand %p16617_p5, %p16614_p6 }
 0x133   : > { %16622 = shalt.err (!%p16619_p9)
}
 0x134   : > { %s16623_s29 = scalar_lea.vmem %s502_s4, 65536  ;;  %p16631_p4 = scmp.lt.s32.totalorder %s502_s4, %s502_s4 }
 0x135   : > { %p16624_p10 = scmp.ne.s32.totalorder %s502_s4, %s16623_s29  ;;  %p16632_p7 = scmp.lt.s32.totalorder %s16623_s29, %s16623_s29 }
 0x137   : > { %p16626_p2 = pnand %p16624_p10, %p17003_p0  ;;  %p16633_p8 = por %p16632_p7, %p16631_p4 }
 0x139   : > { %p16627_p3 = pneg %p16626_p2 }
 0x13b   : > { %p16634_p11 = pnand %p16633_p8, %p16627_p3 }
 0x13d   : > { %16637 = shalt.err (!%p16634_p11)
}
 0x13e   : > { %s16839_s16 = smov 1024   ;;  %s16840_s25 = smov 64  }
 0x13f   : > { %14774 = dma.hbm_to_vmem [thread:$0]  (!%p16987_p12), %s18042_s9, 65536, %s502_s4, [#allocation15], %s16839_s16, %s16839_s16, %s16840_s25  }
 0x140   : > { %s16841_s27 = smov [#allocation19]   ;;  %s16842_s19 = smov [#allocation22]  }
 0x141   : > { %s527_s24 = sshll.u32 %s16841_s27, 4  ;;  %s553_s28 = sshll.u32 %s16842_s19, 4  ;;  %s528_s24 = int_to_ptr.vmem [resolvable:$true] %s527_s24  ;;  %s554_s28 = int_to_ptr.vmem [resolvable:$true] %s553_s28 }
 0x142   : > { %s16638_s29 = scalar_lea.hbm %s18044_s11, 65536 }
 0x143   : > { %p16639_p13 = scmp.ne.s32.totalorder %s18044_s11, %s16638_s29  ;;  %p16645_p5 = scmp.lt.u32.totalorder %s16638_s29, %s18044_s11 }
 0x145   : > { %p16641_p1 = pnand %p16639_p13, %p17003_p0 }
 0x147   : > { %p16642_p6 = pneg %p16641_p1 }
 0x149   : > { %p16647_p9 = pnand %p16645_p5, %p16642_p6 }
 0x14b   : > { %16650 = shalt.err (!%p16647_p9)
}
 0x14c   : > { %s16651_s4 = scalar_lea.vmem %s528_s24, 65536  ;;  %p16659_p4 = scmp.lt.s32.totalorder %s528_s24, %s528_s24 }
 0x14d   : > { %p16652_p10 = scmp.ne.s32.totalorder %s528_s24, %s16651_s4  ;;  %p16660_p7 = scmp.lt.s32.totalorder %s16651_s4, %s16651_s4 }
 0x14f   : > { %p16654_p2 = pnand %p16652_p10, %p17003_p0  ;;  %p16661_p8 = por %p16660_p7, %p16659_p4 }
 0x151   : > { %p16655_p3 = pneg %p16654_p2 }
 0x153   : > { %p16662_p11 = pnand %p16661_p8, %p16655_p3 }
 0x155   : > { %16665 = shalt.err (!%p16662_p11)
}
 0x156   : > { %14780 = dma.hbm_to_vmem [thread:$0]  (!%p16987_p12), %s18044_s11, 65536, %s528_s24, [#allocation18], %s18104_s17, %s18104_s17, %s18103_s22  }
 0x157   : > { %s16666_s16 = scalar_lea.hbm %s18046_s13, 64 }
 0x158   : > { %p16667_p13 = scmp.ne.s32.totalorder %s18046_s13, %s16666_s16  ;;  %p16673_p5 = scmp.lt.u32.totalorder %s16666_s16, %s18046_s13 }
 0x15a   : > { %p16669_p1 = pnand %p16667_p13, %p17003_p0 }
 0x15c   : > { %p16670_p6 = pneg %p16669_p1 }
 0x15e   : > { %p16675_p9 = pnand %p16673_p5, %p16670_p6 }
 0x160   : > { %16678 = shalt.err (!%p16675_p9)
}
 0x161   : > { %s16679_s19 = scalar_lea.vmem %s554_s28, 64  ;;  %p16687_p4 = scmp.lt.s32.totalorder %s554_s28, %s554_s28 }
 0x162   : > { %p16680_p10 = scmp.ne.s32.totalorder %s554_s28, %s16679_s19  ;;  %p16688_p7 = scmp.lt.s32.totalorder %s16679_s19, %s16679_s19 }
 0x164   : > { %p16682_p2 = pnand %p16680_p10, %p17003_p0  ;;  %p16689_p8 = por %p16688_p7, %p16687_p4 }
 0x166   : > { %p16683_p3 = pneg %p16682_p2 }
 0x168   : > { %p16690_p11 = pnand %p16689_p8, %p16683_p3 }
 0x16a   : > { %16693 = shalt.err (!%p16690_p11)
}
 0x16b   : > { %14786 = dma.hbm_to_vmem [thread:$0]  (!%p16987_p12), %s18046_s13, 64, %s554_s28, [#allocation21], %s18099_s18, %s18099_s18, %s18098_s15  }
 0x16c   : > { %s16843_s24 = smov [#allocation23]   ;;  %s16694_s4 = scalar_lea.hbm %s18047_s14, 64 }
 0x16d   : > { %s566_s20 = sshll.u32 %s16843_s24, 4  ;;  %p16695_p13 = scmp.ne.s32.totalorder %s18047_s14, %s16694_s4  ;;  %s567_s20 = int_to_ptr.vmem [resolvable:$true] %s566_s20 }
 0x16e   : > { %p16701_p5 = scmp.lt.u32.totalorder %s16694_s4, %s18047_s14 }
 0x16f   : > { %p16697_p1 = pnand %p16695_p13, %p17003_p0 }
 0x171   : > { %p16698_p6 = pneg %p16697_p1 }
 0x173   : > { %p16703_p9 = pnand %p16701_p5, %p16698_p6 }
 0x175   : > { %16706 = shalt.err (!%p16703_p9)
}
 0x176   : > { %s16707_s28 = scalar_lea.vmem %s567_s20, 64  ;;  %p16715_p4 = scmp.lt.s32.totalorder %s567_s20, %s567_s20 }
 0x177   : > { %p16708_p10 = scmp.ne.s32.totalorder %s567_s20, %s16707_s28  ;;  %p16716_p7 = scmp.lt.s32.totalorder %s16707_s28, %s16707_s28 }
 0x179   : > { %p16710_p2 = pnand %p16708_p10, %p17003_p0  ;;  %p16717_p8 = por %p16716_p7, %p16715_p4 }
 0x17b   : > { %p16711_p3 = pneg %p16710_p2 }
 0x17d   : > { %p16718_p11 = pnand %p16717_p8, %p16711_p3 }
 0x17f   : > { %16721 = shalt.err (!%p16718_p11)
}
 0x180   : > { %14789 = dma.hbm_to_vmem [thread:$0]  (!%p16987_p12), %s18047_s14, 64, %s567_s20, [#allocation24], %s18099_s18, %s18099_s18, %s18098_s15  }
 0x181   : > { %p18105_p13 = scmp.ne.s32.totalorder %s18092_s30, 0 }
 0x182   : > { %s18106_s23 = sld [smem:[#allocation39_spill]] (!%p18105_p13) }
 0x183   : > { %590 = sbr.rel (%p18105_p13) target bundleno = 10103 (0x2777), region = 80 }
 0x188   : > { %p18107_p0 = scmp.eq.s32.totalorder (!%p18105_p13), %s18106_s23, 0 }
 0x18a   : > { %16767 = dma.done.wait (%p18107_p0), [#allocation3], 16384   ;;  %p18108_p1 = pmov %p18107_p0 }
 0x18b   : > { %p18109_p6 = pmov %p18107_p0 }
 0x18c   : > { %16769 = vsyncadd (%p18108_p1), [#allocation3], 4294950912 }
 0x18d   : > { %16771 = dma.done.wait (%p18109_p6), [#allocation6], 24608   ;;  %p18110_p5 = pmov %p18107_p0 }
 0x18e   : > { %p18111_p9 = pmov %p18107_p0 }
 0x18f   : > { %16773 = vsyncadd (%p18110_p5), [#allocation6], 4294942688 }
 0x190   : > { %16775 = dma.done.wait (%p18111_p9), [#allocation9], 8384   ;;  %p18112_p12 = pmov %p18107_p0 }
 0x191   : > { %p18113_p10 = pmov %p18107_p0 }
 0x192   : > { %16777 = vsyncadd (%p18112_p12), [#allocation9], 4294958912 }
 0x193   : > { %16779 = dma.done.wait (%p18113_p10), [#allocation12], 128   ;;  %p18114_p2 = pmov %p18107_p0 }
 0x194   : > { %p18115_p3 = pmov %p18107_p0 }
 0x195   : > { %16781 = vsyncadd (%p18114_p2), [#allocation12], 4294967168 }
 0x196   : > { %16783 = dma.done.wait (%p18115_p3), [#allocation15], 65600   ;;  %p18116_p4 = pmov %p18107_p0 }
 0x197   : > { %p18117_p7 = pmov %p18107_p0 }
 0x198   : > { %16785 = vsyncadd (%p18116_p4), [#allocation15], 4294901696 }
 0x199   : > { %16787 = dma.done.wait (%p18117_p7), [#allocation18], 66048   ;;  %p18118_p8 = pmov %p18107_p0 }
 0x19a   : > { %p18119_p11 = pmov %p18107_p0 }
 0x19b   : > { %16789 = vsyncadd (%p18118_p8), [#allocation18], 4294901248 }
 0x19c   : > { %16791 = dma.done.wait (%p18119_p11), [#allocation21], 128   ;;  %p18120_p13 = pmov %p18107_p0 }
 0x19e   : > { %16793 = vsyncadd (%p18120_p13), [#allocation21], 4294967168 }
 0x19f   : > { %16795 = dma.done.wait (%p18107_p0), [#allocation24], 64   ;;  %p18121_p1 = pmov %p18107_p0 }
 0x1a0   : > { %v14906_v0 = vld [vmem:[#allocation2 + $0x4] ss:$8 sps:$4 sm:$0xff]   ;;  %v14908_v1 = vld [vmem:[#allocation2] ss:$8 sps:$4 sm:$0xff]   ;;  %v14909_v2 = vld [vmem:[#allocation2 + $0x14] ss:$8 sps:$4 sm:$0xff]  }
 0x1a1   : > { %16797 = vsyncadd (%p18121_p1), [#allocation24], 4294967232  ;;  %1524 = vmatprep.subr.bf16.mxu1 %v14906_v0  ;;  %v14911_v3 = vld [vmem:[#allocation2 + $0x10] ss:$8 sps:$4 sm:$0xff]   ;;  %v14912_v4 = vld [vmem:[#allocation2 + $0x24] ss:$8 sps:$4 sm:$0xff]  }
 0x1a2   : > { %1525 = vmatpush1.bf16.msra.mxu1 %v14908_v1  ;;  %v14914_v5 = vld [vmem:[#allocation2 + $0x20] ss:$8 sps:$4 sm:$0xff]   ;;  %p690_p6 = scmp.lt.s32.totalorder %s18106_s23, 1  ;;  %v14915_v6 = vld [vmem:[#allocation2 + $0x34] ss:$8 sps:$4 sm:$0xff]   ;;  %s18122_s0 = sld [smem:[#allocation44_spill]] }
 0x1a3   : > { %1526 = vmatprep.subr.bf16.mxu1 %v14909_v2  ;;  %v14917_v7 = vld [vmem:[#allocation2 + $0x30] ss:$8 sps:$4 sm:$0xff]   ;;  %v14918_v8 = vld [vmem:[#allocation2 + $0x44] ss:$8 sps:$4 sm:$0xff]   ;;  %v14920_v9 = vld [vmem:[#allocation2 + $0x40] ss:$8 sps:$4 sm:$0xff]  }
 0x1a4   : > { %s691_s30 = scalar_select %p690_p6, %s18106_s23, 1  ;;  %v14921_v10 = vld [vmem:[#allocation2 + $0x54] ss:$8 sps:$4 sm:$0xff]   ;;  %v14923_v11 = vld [vmem:[#allocation2 + $0x50] ss:$8 sps:$4 sm:$0xff]   ;;  %vm16845_vm0 = vmmov 0  }
 0x1a5   : > { %v14924_v12 = vld [vmem:[#allocation2 + $0x64] ss:$8 sps:$4 sm:$0xff]   ;;  %v14926_v16 = vld [vmem:[#allocation2 + $0x60] ss:$8 sps:$4 sm:$0xff]   ;;  %v14927_v17 = vld [vmem:[#allocation2 + $0x74] ss:$8 sps:$4 sm:$0xff]  }
 0x1a6   : > { %1527 = vmatpush1.bf16.msra.mxu1 %v14911_v3  ;;  %s14479_s26 = sshll.u32 %s691_s30, 6  ;;  %v14929_v18 = vld [vmem:[#allocation2 + $0x70] ss:$8 sps:$4 sm:$0xff]   ;;  %v14930_v19 = vld [vmem:[#allocation2 + $0x84] ss:$8 sps:$4 sm:$0xff]   ;;  %vm2437_vm1 = vcmask 523264  }
 0x1a7   : > { %1528 = vmatprep.subr.bf16.mxu1 %v14912_v4  ;;  %v14932_v20 = vld [vmem:[#allocation2 + $0x80] ss:$8 sps:$4 sm:$0xff]   ;;  %v14933_v21 = vld [vmem:[#allocation2 + $0x94] ss:$8 sps:$4 sm:$0xff]   ;;  %v14935_v22 = vld [vmem:[#allocation2 + $0x90] ss:$8 sps:$4 sm:$0xff]  }
 0x1a8   : > { %s17332_s21 = scalar_lea.vmem %s18122_s0, %s14479_s26  ;;  %v14936_v23 = vld [vmem:[#allocation2 + $0xa4] ss:$8 sps:$4 sm:$0xff]   ;;  %v14938_v24 = vld [vmem:[#allocation2 + $0xa0] ss:$8 sps:$4 sm:$0xff]   ;;  %v14939_v25 = vld [vmem:[#allocation2 + $0xb4] ss:$8 sps:$4 sm:$0xff]  }
 0x1a9   : > { %v696_v13 = vld [vmem:[%s17332_s21] sm:$0xff]  ;;  %v14941_v26 = vld [vmem:[#allocation2 + $0xb0] ss:$8 sps:$4 sm:$0xff]   ;;  %v14945_v29 = vld [vmem:[#allocation2 + $0xd4] ss:$8 sps:$4 sm:$0xff]   ;;  %vm2487_vm2 = vcmask 130048  }
 0x1aa   : > { %1529 = vmatpush1.bf16.msra.mxu1 %v14914_v5  ;;  %v700_v14 = vld [vmem:[%s17332_s21 + $0x20] sm:$0xff]  ;;  %v14947_v30 = vld [vmem:[#allocation2 + $0xd0] ss:$8 sps:$4 sm:$0xff]   ;;  %v14951_v33 = vld [vmem:[#allocation2 + $0xf4] ss:$8 sps:$4 sm:$0xff]   ;;  %s16846_s27 = smov 64  }
 0x1ab   : > { %1530 = vmatprep.subr.bf16.mxu1 %v14915_v6  ;;  %v13043_v15 = vcombine.high %v696_v13, %v700_v14  ;;  %v14942_v27 = vld [vmem:[#allocation2 + $0xc4] ss:$8 sps:$4 sm:$0xff]   ;;  %v14944_v28 = vld [vmem:[#allocation2 + $0xc0] ss:$8 sps:$4 sm:$0xff]   ;;  %v14953_v34 = vld [vmem:[#allocation2 + $0xf0] ss:$8 sps:$4 sm:$0xff]   ;;  %v13042_v38 = vcombine.low %v696_v13, %v700_v14 }
 0x1ac   : > { %v14948_v31 = vld [vmem:[#allocation2 + $0xe4] ss:$8 sps:$4 sm:$0xff]   ;;  %v14950_v32 = vld [vmem:[#allocation2 + $0xe0] ss:$8 sps:$4 sm:$0xff]   ;;  %v14959_v41 = vld [vmem:[#allocation2 + $0x114] ss:$8 sps:$4 sm:$0xff]  }
 0x1ad   : > { %1556 = vmatprep.mubr.bf16.mxu1 %v13043_v15  ;;  %v14956_v35 = vld [vmem:[#allocation2 + $0x104] ss:$8 sps:$4 sm:$0xff]   ;;  %v14954_v39 = vld [vmem:[#allocation2 + $0x100] ss:$8 sps:$4 sm:$0xff]   ;;  %v14957_v42 = vld [vmem:[#allocation2 + $0x110] ss:$8 sps:$4 sm:$0xff]  }
 0x1ae   : > { %1531 = vmatpush1.bf16.msra.mxu1 %v14917_v7  ;;  %v17337_v36 = vld [vmem:[%s17332_s21 + $0x8] sm:$0xff]  ;;  %v14965_v45 = vld [vmem:[#allocation2 + $0x134] ss:$8 sps:$4 sm:$0xff]   ;;  %v14963_v46 = vld [vmem:[#allocation2 + $0x130] ss:$8 sps:$4 sm:$0xff]   ;;  %s18123_s19 = sld [smem:[#allocation36_spill]] }
 0x1af   : > { %1532 = vmatprep.subr.bf16.mxu1 %v14918_v8  ;;  %v17340_v37 = vld [vmem:[%s17332_s21 + $0x28] sm:$0xff]  ;;  %v14971_v49 = vld [vmem:[#allocation2 + $0x154] ss:$8 sps:$4 sm:$0xff]   ;;  %v14969_v50 = vld [vmem:[#allocation2 + $0x150] ss:$8 sps:$4 sm:$0xff]   ;;  %s14480_s24 = sshll.u32 %s18106_s23, 9 }
 0x1b0   : > { %v13045_v40 = vcombine.high %v17337_v36, %v17340_v37  ;;  %v14962_v43 = vld [vmem:[#allocation2 + $0x124] ss:$8 sps:$4 sm:$0xff]   ;;  %v14960_v44 = vld [vmem:[#allocation2 + $0x120] ss:$8 sps:$4 sm:$0xff]   ;;  %v14977_v53 = vld [vmem:[#allocation2 + $0x174] ss:$8 sps:$4 sm:$0xff]  }
 0x1b1   : > { %v14968_v47 = vld [vmem:[#allocation2 + $0x144] ss:$8 sps:$4 sm:$0xff]   ;;  %v14966_v48 = vld [vmem:[#allocation2 + $0x140] ss:$8 sps:$4 sm:$0xff]   ;;  %v14975_v54 = vld [vmem:[#allocation2 + $0x170] ss:$8 sps:$4 sm:$0xff]  }
 0x1b2   : > { %1533 = vmatpush1.bf16.msra.mxu1 %v14920_v9  ;;  %v14974_v51 = vld [vmem:[#allocation2 + $0x164] ss:$8 sps:$4 sm:$0xff]   ;;  %v14972_v52 = vld [vmem:[#allocation2 + $0x160] ss:$8 sps:$4 sm:$0xff]   ;;  %v14983_v57 = vld [vmem:[#allocation2 + $0x194] ss:$8 sps:$4 sm:$0xff]  }
 0x1b3   : > { %1534 = vmatprep.subr.bf16.mxu1 %v14921_v10  ;;  %v14980_v55 = vld [vmem:[#allocation2 + $0x184] ss:$8 sps:$4 sm:$0xff]   ;;  %v14978_v56 = vld [vmem:[#allocation2 + $0x180] ss:$8 sps:$4 sm:$0xff]   ;;  %v14981_v58 = vld [vmem:[#allocation2 + $0x190] ss:$8 sps:$4 sm:$0xff]   ;;  %v13044_v10 = vcombine.low %v17337_v36, %v17340_v37 }
 0x1b4   : > { %v14986_v59 = vld [vmem:[#allocation2 + $0x1a4] ss:$8 sps:$4 sm:$0xff]   ;;  %v14984_v60 = vld [vmem:[#allocation2 + $0x1a0] ss:$8 sps:$4 sm:$0xff]   ;;  %v14989_v61 = vld [vmem:[#allocation2 + $0x1b4] ss:$8 sps:$4 sm:$0xff]  }
 0x1b5   : > { %v14987_v62 = vld [vmem:[#allocation2 + $0x1b0] ss:$8 sps:$4 sm:$0xff]   ;;  %v14992_v63 = vld [vmem:[#allocation2 + $0x1c4] ss:$8 sps:$4 sm:$0xff]   ;;  %v14990_v0 = vld [vmem:[#allocation2 + $0x1c0] ss:$8 sps:$4 sm:$0xff]  }
 0x1b6   : > { %1535 = vmatpush1.bf16.msra.mxu1 %v14923_v11  ;;  %v14995_v1 = vld [vmem:[#allocation2 + $0x1d4] ss:$8 sps:$4 sm:$0xff]   ;;  %v14993_v2 = vld [vmem:[#allocation2 + $0x1d0] ss:$8 sps:$4 sm:$0xff]   ;;  %v14998_v3 = vld [vmem:[#allocation2 + $0x1e4] ss:$8 sps:$4 sm:$0xff]  }
 0x1b7   : > { %1536 = vmatprep.subr.bf16.mxu1 %v14924_v12  ;;  %v14996_v4 = vld [vmem:[#allocation2 + $0x1e0] ss:$8 sps:$4 sm:$0xff]   ;;  %v15001_v5 = vld [vmem:[#allocation2 + $0x1f4] ss:$8 sps:$4 sm:$0xff]   ;;  %v14999_v6 = vld [vmem:[#allocation2 + $0x1f0] ss:$8 sps:$4 sm:$0xff]  }
 0x1b8   : > { %v15004_v7 = vld [vmem:[#allocation2 + $0x204] ss:$8 sps:$4 sm:$0xff]   ;;  %v17345_v8 = vld [vmem:[%s17332_s21 + $0x10] sm:$0xff]  ;;  %v15002_v11 = vld [vmem:[#allocation2 + $0x200] ss:$8 sps:$4 sm:$0xff]   ;;  %s687_s22 = sand.u32 1, %s18123_s19  }
 0x1b9   : > { %v17348_v9 = vld [vmem:[%s17332_s21 + $0x30] sm:$0xff]  ;;  %v15010_v15 = vld [vmem:[#allocation2 + $0x224] ss:$8 sps:$4 sm:$0xff]   ;;  %v15038_v36 = vld [vmem:[#allocation2 + $0x2c0] ss:$8 sps:$4 sm:$0xff]   ;;  %s13039_s17 = sshll.u32 %s687_s22, 5 }
 0x1ba   : > { %1537 = vmatpush1.bf16.msra.mxu1 %v14926_v16  ;;  %v15007_v12 = vld [vmem:[#allocation2 + $0x214] ss:$8 sps:$4 sm:$0xff]   ;;  %v13047_v13 = vcombine.high %v17345_v8, %v17348_v9  ;;  %v15005_v14 = vld [vmem:[#allocation2 + $0x210] ss:$8 sps:$4 sm:$0xff]   ;;  %v15008_v16 = vld [vmem:[#allocation2 + $0x220] ss:$8 sps:$4 sm:$0xff]  }
 0x1bb   : > { %1538 = vmatprep.subr.bf16.mxu1 %v14927_v17  ;;  %v15013_v17 = vld [vmem:[#allocation2 + $0x234] ss:$8 sps:$4 sm:$0xff]   ;;  %s689_s20 = scalar_lea.vmem [#allocation25], %s13039_s17  ;;  %s18124_s29 = sld [smem:[#allocation42_spill]] }
 0x1bc   : > { %v15043_v37 = vld [vmem:[#allocation2 + $0x2d4] ss:$8 sps:$4 sm:$0xff]   ;;  %s12809_s2 = sshll.u32 %s689_s20, 4  ;;  %s18125_s3 = sld [smem:[#allocation51_spill]]  ;;  %s17988_s2 = int_to_ptr.vmem [resolvable:$true] %s12809_s2 }
 0x1bd   : > { %s17992_s6 = scalar_lea.sflag [#allocation4], %s687_s22  ;;  %s16722_s28 = scalar_lea.vmem %s17988_s2, 512 }
 0x1be   : > { %1539 = vmatpush1.bf16.msra.mxu1 %v14929_v18  ;;  %v15011_v18 = vld [vmem:[#allocation2 + $0x230] ss:$8 sps:$4 sm:$0xff]   ;;  %p16723_p5 = scmp.ne.s32.totalorder %s17988_s2, %s16722_s28  ;;  %s16847_s16 = smov [#allocation25]  }
 0x1bf   : > { %1540 = vmatprep.subr.bf16.mxu1 %v14930_v19  ;;  %v15016_v19 = vld [vmem:[#allocation2 + $0x244] ss:$8 sps:$4 sm:$0xff]   ;;  %s16726_s25 = sshll.u32 %s16847_s16, 4  ;;  %s16727_s25 = int_to_ptr.vmem [resolvable:$false] %s16726_s25 }
 0x1c0   : > { %s16728_s23 = scalar_lea.vmem %s16727_s25, 1024  ;;  %p16729_p2 = scmp.lt.s32.totalorder %s17988_s2, %s16727_s25 }
 0x1c1   : > { %p18126_p9 = scmp.ne.s32.totalorder %s18124_s29, 0  ;;  %p16730_p3 = scmp.lt.s32.totalorder %s16728_s23, %s16722_s28 }
 0x1c2   : > { %1541 = vmatpush1.bf16.msra.mxu1 %v14932_v20  ;;  %v15014_v20 = vld [vmem:[#allocation2 + $0x240] ss:$8 sps:$4 sm:$0xff]   ;;  %s17986_s5 = scalar_lea.hbm %s18125_s3, %s14480_s24 }
 0x1c3   : > { %1542 = vmatprep.subr.bf16.mxu1 %v14933_v21  ;;  %v15019_v21 = vld [vmem:[#allocation2 + $0x254] ss:$8 sps:$4 sm:$0xff]   ;;  %p16724_p12 = pnand %p16723_p5, %p18126_p9  ;;  %p16731_p4 = por %p16730_p3, %p16729_p2 }
 0x1c5   : > { %p16725_p10 = pneg %p16724_p12 }
 0x1c6   : > { %1543 = vmatpush1.bf16.msra.mxu1 %v14935_v22  ;;  %v15017_v22 = vld [vmem:[#allocation2 + $0x250] ss:$8 sps:$4 sm:$0xff]  }
 0x1c7   : > { %1544 = vmatprep.subr.bf16.mxu1 %v14936_v23  ;;  %v15022_v23 = vld [vmem:[#allocation2 + $0x264] ss:$8 sps:$4 sm:$0xff]   ;;  %p16732_p7 = pnand %p16731_p4, %p16725_p10 }
 0x1ca   : > { %1545 = vmatpush1.bf16.msra.mxu1 %v14938_v24  ;;  %v15020_v24 = vld [vmem:[#allocation2 + $0x260] ss:$8 sps:$4 sm:$0xff]  }
 0x1cb   : > { %1546 = vmatprep.subr.bf16.mxu1 %v14939_v25  ;;  %v15025_v25 = vld [vmem:[#allocation2 + $0x274] ss:$8 sps:$4 sm:$0xff]  }
 0x1ce   : > { %1547 = vmatpush1.bf16.msra.mxu1 %v14941_v26  ;;  %v15023_v26 = vld [vmem:[#allocation2 + $0x270] ss:$8 sps:$4 sm:$0xff]  }
 0x1cf   : > { %1548 = vmatprep.subr.bf16.mxu1 %v14942_v27  ;;  %v15028_v27 = vld [vmem:[#allocation2 + $0x284] ss:$8 sps:$4 sm:$0xff]  }
 0x1d2   : > { %1549 = vmatpush1.bf16.msra.mxu1 %v14944_v28  ;;  %v15026_v28 = vld [vmem:[#allocation2 + $0x280] ss:$8 sps:$4 sm:$0xff]  }
 0x1d3   : > { %1550 = vmatprep.subr.bf16.mxu1 %v14945_v29  ;;  %v15031_v29 = vld [vmem:[#allocation2 + $0x294] ss:$8 sps:$4 sm:$0xff]  }
 0x1d6   : > { %1551 = vmatpush1.bf16.msra.mxu1 %v14947_v30  ;;  %v15029_v30 = vld [vmem:[#allocation2 + $0x290] ss:$8 sps:$4 sm:$0xff]  }
 0x1d7   : > { %1552 = vmatprep.subr.bf16.mxu1 %v14948_v31  ;;  %v15034_v31 = vld [vmem:[#allocation2 + $0x2a4] ss:$8 sps:$4 sm:$0xff]  }
 0x1da   : > { %1553 = vmatpush1.bf16.msra.mxu1 %v14950_v32  ;;  %v15032_v32 = vld [vmem:[#allocation2 + $0x2a0] ss:$8 sps:$4 sm:$0xff]  }
 0x1db   : > { %1554 = vmatprep.subr.bf16.mxu1 %v14951_v33  ;;  %v15037_v33 = vld [vmem:[#allocation2 + $0x2b4] ss:$8 sps:$4 sm:$0xff]  }
 0x1de   : > { %1555 = vmatpush1.bf16.msra.mxu1 %v14953_v34  ;;  %v15035_v34 = vld [vmem:[#allocation2 + $0x2b0] ss:$8 sps:$4 sm:$0xff]  }
 0x1df   : > { %1567 = vmatprep.subr.bf16.mxu1 %v14956_v35  ;;  %v15040_v35 = vld [vmem:[#allocation2 + $0x2c4] ss:$8 sps:$4 sm:$0xff]  }
 0x1e1   : > { %1557 = vmatmul.mubr.bf16.vlgmr.msra.gmra.mrb[0].mxu1 %v13042_v38  ;;  %v15041_v38 = vld [vmem:[#allocation2 + $0x2d0] ss:$8 sps:$4 sm:$0xff]  }
 0x1e2   : > { %1568 = vmatpush1.bf16.msra.mxu1 %v14954_v39  ;;  %1599 = vmatprep.mubr.bf16.mxu1 %v13045_v40  ;;  %v15046_v39 = vld [vmem:[#allocation2 + $0x2e4] ss:$8 sps:$4 sm:$0xff]   ;;  %v15044_v40 = vld [vmem:[#allocation2 + $0x2e0] ss:$8 sps:$4 sm:$0xff]  }
 0x1e3   : > { %1569 = vmatprep.subr.bf16.mxu1 %v14959_v41  ;;  %v15049_v41 = vld [vmem:[#allocation2 + $0x2f4] ss:$8 sps:$4 sm:$0xff]  }
 0x1e6   : > { %1570 = vmatpush1.bf16.msra.mxu1 %v14957_v42  ;;  %v15047_v42 = vld [vmem:[#allocation2 + $0x2f0] ss:$8 sps:$4 sm:$0xff]  }
 0x1e7   : > { %1571 = vmatprep.subr.bf16.mxu1 %v14962_v43  ;;  %v15052_v43 = vld [vmem:[#allocation2 + $0x304] ss:$8 sps:$4 sm:$0xff]  }
 0x1ea   : > { %1572 = vmatpush1.bf16.msra.mxu1 %v14960_v44  ;;  %v17355_v44 = vld [vmem:[%s17332_s21 + $0x18] sm:$0xff] }
 0x1eb   : > { %1573 = vmatprep.subr.bf16.mxu1 %v14965_v45  ;;  %v17358_v45 = vld [vmem:[%s17332_s21 + $0x38] sm:$0xff] }
 0x1ee   : > { %1574 = vmatpush1.bf16.msra.mxu1 %v14963_v46  ;;  %v15050_v46 = vld [vmem:[#allocation2 + $0x300] ss:$8 sps:$4 sm:$0xff]  }
 0x1ef   : > { %1575 = vmatprep.subr.bf16.mxu1 %v14968_v47  ;;  %v13046_v47 = vcombine.low %v17345_v8, %v17348_v9  ;;  %v15086_v8 = vld [vmem:[#allocation2 + $0x3c0] ss:$8 sps:$4 sm:$0xff]   ;;  %v15091_v9 = vld [vmem:[#allocation2 + $0x3d4] ss:$8 sps:$4 sm:$0xff]  }
 0x1f2   : > { %1576 = vmatpush1.bf16.msra.mxu1 %v14966_v48  ;;  %v15055_v48 = vld [vmem:[#allocation2 + $0x314] ss:$8 sps:$4 sm:$0xff]  }
 0x1f3   : > { %1577 = vmatprep.subr.bf16.mxu1 %v14971_v49  ;;  %v13049_v49 = vcombine.high %v17355_v44, %v17358_v45 }
 0x1f6   : > { %1578 = vmatpush1.bf16.msra.mxu1 %v14969_v50  ;;  %v15053_v50 = vld [vmem:[#allocation2 + $0x310] ss:$8 sps:$4 sm:$0xff]  }
 0x1f7   : > { %1579 = vmatprep.subr.bf16.mxu1 %v14974_v51  ;;  %v15058_v51 = vld [vmem:[#allocation2 + $0x324] ss:$8 sps:$4 sm:$0xff]  }
 0x1fa   : > { %1580 = vmatpush1.bf16.msra.mxu1 %v14972_v52  ;;  %v15056_v52 = vld [vmem:[#allocation2 + $0x320] ss:$8 sps:$4 sm:$0xff]  }
 0x1fb   : > { %1581 = vmatprep.subr.bf16.mxu1 %v14977_v53  ;;  %v15061_v53 = vld [vmem:[#allocation2 + $0x334] ss:$8 sps:$4 sm:$0xff]  }
 0x1fe   : > { %1582 = vmatpush1.bf16.msra.mxu1 %v14975_v54  ;;  %v15059_v54 = vld [vmem:[#allocation2 + $0x330] ss:$8 sps:$4 sm:$0xff]  }
 0x1ff   : > { %1583 = vmatprep.subr.bf16.mxu1 %v14980_v55  ;;  %v15064_v55 = vld [vmem:[#allocation2 + $0x344] ss:$8 sps:$4 sm:$0xff]  }
 0x202   : > { %1584 = vmatpush1.bf16.msra.mxu1 %v14978_v56  ;;  %v15062_v56 = vld [vmem:[#allocation2 + $0x340] ss:$8 sps:$4 sm:$0xff]  }
 0x203   : > { %1585 = vmatprep.subr.bf16.mxu1 %v14983_v57  ;;  %v15067_v57 = vld [vmem:[#allocation2 + $0x354] ss:$8 sps:$4 sm:$0xff]  }
 0x206   : > { %1586 = vmatpush1.bf16.msra.mxu1 %v14981_v58  ;;  %v15065_v58 = vld [vmem:[#allocation2 + $0x350] ss:$8 sps:$4 sm:$0xff]  }
 0x207   : > { %1587 = vmatprep.subr.bf16.mxu1 %v14986_v59  ;;  %v15070_v59 = vld [vmem:[#allocation2 + $0x364] ss:$8 sps:$4 sm:$0xff]  }
 0x20a   : > { %1588 = vmatpush1.bf16.msra.mxu1 %v14984_v60  ;;  %v15068_v60 = vld [vmem:[#allocation2 + $0x360] ss:$8 sps:$4 sm:$0xff]  }
 0x20b   : > { %1589 = vmatprep.subr.bf16.mxu1 %v14989_v61  ;;  %v15073_v61 = vld [vmem:[#allocation2 + $0x374] ss:$8 sps:$4 sm:$0xff]  }
 0x20e   : > { %1590 = vmatpush1.bf16.msra.mxu1 %v14987_v62  ;;  %v15071_v62 = vld [vmem:[#allocation2 + $0x370] ss:$8 sps:$4 sm:$0xff]  }
 0x20f   : > { %1591 = vmatprep.subr.bf16.mxu1 %v14992_v63  ;;  %v15076_v63 = vld [vmem:[#allocation2 + $0x384] ss:$8 sps:$4 sm:$0xff]  }
 0x212   : > { %1592 = vmatpush1.bf16.msra.mxu1 %v14990_v0  ;;  %v15074_v0 = vld [vmem:[#allocation2 + $0x380] ss:$8 sps:$4 sm:$0xff]  }
 0x213   : > { %1593 = vmatprep.subr.bf16.mxu1 %v14995_v1  ;;  %v15079_v1 = vld [vmem:[#allocation2 + $0x394] ss:$8 sps:$4 sm:$0xff]  }
 0x216   : > { %1594 = vmatpush1.bf16.msra.mxu1 %v14993_v2  ;;  %v15077_v2 = vld [vmem:[#allocation2 + $0x390] ss:$8 sps:$4 sm:$0xff]  }
 0x217   : > { %1595 = vmatprep.subr.bf16.mxu1 %v14998_v3  ;;  %v15082_v3 = vld [vmem:[#allocation2 + $0x3a4] ss:$8 sps:$4 sm:$0xff]  }
 0x21a   : > { %1596 = vmatpush1.bf16.msra.mxu1 %v14996_v4  ;;  %v15080_v4 = vld [vmem:[#allocation2 + $0x3a0] ss:$8 sps:$4 sm:$0xff]  }
 0x21b   : > { %1597 = vmatprep.subr.bf16.mxu1 %v15001_v5  ;;  %v15085_v5 = vld [vmem:[#allocation2 + $0x3b4] ss:$8 sps:$4 sm:$0xff]  }
 0x21e   : > { %1598 = vmatpush1.bf16.msra.mxu1 %v14999_v6  ;;  %v15083_v6 = vld [vmem:[#allocation2 + $0x3b0] ss:$8 sps:$4 sm:$0xff]  }
 0x21f   : > { %1610 = vmatprep.subr.bf16.mxu1 %v15004_v7  ;;  %v15088_v7 = vld [vmem:[#allocation2 + $0x3c4] ss:$8 sps:$4 sm:$0xff]  }
 0x221   : > { %1600 = vmatmul.mubr.bf16.vlgmr.msra.gmra.mrb[0].mxu1 %v13044_v10  ;;  %v15089_v10 = vld [vmem:[#allocation2 + $0x3d0] ss:$8 sps:$4 sm:$0xff]  }
 0x222   : > { %1611 = vmatpush1.bf16.msra.mxu1 %v15002_v11  ;;  %1642 = vmatprep.mubr.bf16.mxu1 %v13047_v13  ;;  %v15094_v11 = vld [vmem:[#allocation2 + $0x3e4] ss:$8 sps:$4 sm:$0xff]   ;;  %v15097_v13 = vld [vmem:[#allocation2 + $0x3f4] ss:$8 sps:$4 sm:$0xff]  }
 0x223   : > { %1612 = vmatprep.subr.bf16.mxu1 %v15007_v12  ;;  %v15092_v12 = vld [vmem:[#allocation2 + $0x3e0] ss:$8 sps:$4 sm:$0xff]  }
 0x226   : > { %1613 = vmatpush1.bf16.msra.mxu1 %v15005_v14  ;;  %v15095_v14 = vld [vmem:[#allocation2 + $0x3f0] ss:$8 sps:$4 sm:$0xff]  }
 0x227   : > { %1614 = vmatprep.subr.bf16.mxu1 %v15010_v15  ;;  %v15100_v15 = vld [vmem:[#allocation7 + $0x4] ss:$24 sps:$4 sm:$0xff]  }
 0x22a   : > { %1615 = vmatpush1.bf16.msra.mxu1 %v15008_v16  ;;  %v15098_v16 = vld [vmem:[#allocation7] ss:$24 sps:$4 sm:$0xff]  }
 0x22b   : > { %1616 = vmatprep.subr.bf16.mxu1 %v15013_v17  ;;  %v13048_v17 = vcombine.low %v17355_v44, %v17358_v45  ;;  %v15142_v44 = vld [vmem:[#allocation7 + $0x2a4] ss:$24 sps:$4 sm:$0xff]   ;;  %v15140_v45 = vld [vmem:[#allocation7 + $0x2a0] ss:$24 sps:$4 sm:$0xff]  }
 0x22e   : > { %1617 = vmatpush1.bf16.msra.mxu1 %v15011_v18  ;;  %v15103_v18 = vld [vmem:[#allocation7 + $0x34] ss:$24 sps:$4 sm:$0xff]  }
 0x22f   : > { %1618 = vmatprep.subr.bf16.mxu1 %v15016_v19  ;;  %v15101_v19 = vld [vmem:[#allocation7 + $0x30] ss:$24 sps:$4 sm:$0xff]  }
 0x232   : > { %1619 = vmatpush1.bf16.msra.mxu1 %v15014_v20  ;;  %v15106_v20 = vld [vmem:[#allocation7 + $0x64] ss:$24 sps:$4 sm:$0xff]  }
 0x233   : > { %1620 = vmatprep.subr.bf16.mxu1 %v15019_v21  ;;  %v15104_v21 = vld [vmem:[#allocation7 + $0x60] ss:$24 sps:$4 sm:$0xff]  }
 0x236   : > { %1621 = vmatpush1.bf16.msra.mxu1 %v15017_v22  ;;  %v15109_v22 = vld [vmem:[#allocation7 + $0x94] ss:$24 sps:$4 sm:$0xff]  }
 0x237   : > { %1622 = vmatprep.subr.bf16.mxu1 %v15022_v23  ;;  %v15107_v23 = vld [vmem:[#allocation7 + $0x90] ss:$24 sps:$4 sm:$0xff]  }
 0x23a   : > { %1623 = vmatpush1.bf16.msra.mxu1 %v15020_v24  ;;  %v15112_v24 = vld [vmem:[#allocation7 + $0xc4] ss:$24 sps:$4 sm:$0xff]  }
 0x23b   : > { %1624 = vmatprep.subr.bf16.mxu1 %v15025_v25  ;;  %v15110_v25 = vld [vmem:[#allocation7 + $0xc0] ss:$24 sps:$4 sm:$0xff]  }
 0x23e   : > { %1625 = vmatpush1.bf16.msra.mxu1 %v15023_v26  ;;  %v15115_v26 = vld [vmem:[#allocation7 + $0xf4] ss:$24 sps:$4 sm:$0xff]  }
 0x23f   : > { %1626 = vmatprep.subr.bf16.mxu1 %v15028_v27  ;;  %v15113_v27 = vld [vmem:[#allocation7 + $0xf0] ss:$24 sps:$4 sm:$0xff]  }
 0x242   : > { %1627 = vmatpush1.bf16.msra.mxu1 %v15026_v28  ;;  %v15118_v28 = vld [vmem:[#allocation7 + $0x124] ss:$24 sps:$4 sm:$0xff]  }
 0x243   : > { %1628 = vmatprep.subr.bf16.mxu1 %v15031_v29  ;;  %v15116_v29 = vld [vmem:[#allocation7 + $0x120] ss:$24 sps:$4 sm:$0xff]  }
 0x246   : > { %1629 = vmatpush1.bf16.msra.mxu1 %v15029_v30  ;;  %v15121_v30 = vld [vmem:[#allocation7 + $0x154] ss:$24 sps:$4 sm:$0xff]  }
 0x247   : > { %1630 = vmatprep.subr.bf16.mxu1 %v15034_v31  ;;  %v15119_v31 = vld [vmem:[#allocation7 + $0x150] ss:$24 sps:$4 sm:$0xff]  }
 0x24a   : > { %1631 = vmatpush1.bf16.msra.mxu1 %v15032_v32  ;;  %v15124_v32 = vld [vmem:[#allocation7 + $0x184] ss:$24 sps:$4 sm:$0xff]  }
 0x24b   : > { %1632 = vmatprep.subr.bf16.mxu1 %v15037_v33  ;;  %v15122_v33 = vld [vmem:[#allocation7 + $0x180] ss:$24 sps:$4 sm:$0xff]  }
 0x24e   : > { %1633 = vmatpush1.bf16.msra.mxu1 %v15035_v34  ;;  %v15127_v34 = vld [vmem:[#allocation7 + $0x1b4] ss:$24 sps:$4 sm:$0xff]  }
 0x24f   : > { %1634 = vmatprep.subr.bf16.mxu1 %v15040_v35  ;;  %v15125_v35 = vld [vmem:[#allocation7 + $0x1b0] ss:$24 sps:$4 sm:$0xff]  }
 0x252   : > { %1635 = vmatpush1.bf16.msra.mxu1 %v15038_v36  ;;  %v15130_v36 = vld [vmem:[#allocation7 + $0x1e4] ss:$24 sps:$4 sm:$0xff]  }
 0x253   : > { %1636 = vmatprep.subr.bf16.mxu1 %v15043_v37  ;;  %v15128_v37 = vld [vmem:[#allocation7 + $0x1e0] ss:$24 sps:$4 sm:$0xff]  }
 0x256   : > { %1637 = vmatpush1.bf16.msra.mxu1 %v15041_v38  ;;  %v15133_v38 = vld [vmem:[#allocation7 + $0x214] ss:$24 sps:$4 sm:$0xff]  }
 0x257   : > { %1638 = vmatprep.subr.bf16.mxu1 %v15046_v39  ;;  %v15131_v39 = vld [vmem:[#allocation7 + $0x210] ss:$24 sps:$4 sm:$0xff]  }
 0x25a   : > { %1639 = vmatpush1.bf16.msra.mxu1 %v15044_v40  ;;  %v15136_v40 = vld [vmem:[#allocation7 + $0x244] ss:$24 sps:$4 sm:$0xff]  }
 0x25b   : > { %1640 = vmatprep.subr.bf16.mxu1 %v15049_v41  ;;  %v15134_v41 = vld [vmem:[#allocation7 + $0x240] ss:$24 sps:$4 sm:$0xff]  }
 0x25e   : > { %1641 = vmatpush1.bf16.msra.mxu1 %v15047_v42  ;;  %v15139_v42 = vld [vmem:[#allocation7 + $0x274] ss:$24 sps:$4 sm:$0xff]  }
 0x25f   : > { %1653 = vmatprep.subr.bf16.mxu1 %v15052_v43  ;;  %v15137_v43 = vld [vmem:[#allocation7 + $0x270] ss:$24 sps:$4 sm:$0xff]  }
 0x261   : > { %1643 = vmatmul.mubr.bf16.vlgmr.msra.gmra.mrb[0].mxu1 %v13046_v47  ;;  %v15143_v47 = vld [vmem:[#allocation7 + $0x2d0] ss:$24 sps:$4 sm:$0xff]  }
 0x262   : > { %1654 = vmatpush1.bf16.msra.mxu1 %v15050_v46  ;;  %1685 = vmatprep.mubr.bf16.mxu1 %v13049_v49  ;;  %v15145_v46 = vld [vmem:[#allocation7 + $0x2d4] ss:$24 sps:$4 sm:$0xff]   ;;  %v834_v49 = vlaneseq }
 0x263   : > { %1655 = vmatprep.subr.bf16.mxu1 %v15055_v48  ;;  %v15148_v48 = vld [vmem:[#allocation7 + $0xc] ss:$24 sps:$4 sm:$0xff]  }
 0x266   : > { %1656 = vmatpush1.bf16.msra.mxu1 %v15053_v50  ;;  %v17366_v50 = vshrl.u32 %v834_v49, 7  ;;  %v15220_v49 = vld [vmem:[#allocation7 + $0x194] ss:$24 sps:$4 sm:$0xff]  }
 0x267   : > { %1657 = vmatprep.subr.bf16.mxu1 %v15058_v51 }
 0x268   : > { %v17369_v51 = vsub.s32 1, %v17366_v50 }
 0x26a   : > { %1658 = vmatpush1.bf16.msra.mxu1 %v15056_v52  ;;  %v832_v52 = vld [vmem:[#allocation5] sm:$0x3] }
 0x26b   : > { %1659 = vmatprep.subr.bf16.mxu1 %v15061_v53  ;;  %v17372_v53 = vsub.s32 0, %v17366_v50 }
 0x26e   : > { %1660 = vmatpush1.bf16.msra.mxu1 %v15059_v54 }
 0x26f   : > { %1661 = vmatprep.subr.bf16.mxu1 %v15064_v55  ;;  %v841_v55 = vrot.slane %v832_v52, %v17369_v51 }
 0x272   : > { %1662 = vmatpush1.bf16.msra.mxu1 %v15062_v56  ;;  %v837_v56 = vrot.slane %v832_v52, %v17372_v53  ;;  %v15218_v52 = vld [vmem:[#allocation7 + $0x190] ss:$24 sps:$4 sm:$0xff]  }
 0x273   : > { %1663 = vmatprep.subr.bf16.mxu1 %v15067_v57 }
 0x276   : > { %1664 = vmatpush1.bf16.msra.mxu1 %v15065_v58 }
 0x277   : > { %1665 = vmatprep.subr.bf16.mxu1 %v15070_v59 }
 0x27a   : > { %1666 = vmatpush1.bf16.msra.mxu1 %v15068_v60 }
 0x27b   : > { %1667 = vmatprep.subr.bf16.mxu1 %v15073_v61 }
 0x27e   : > { %1668 = vmatpush1.bf16.msra.mxu1 %v15071_v62 }
 0x27f   : > { %1669 = vmatprep.subr.bf16.mxu1 %v15076_v63 }
 0x282   : > { %1670 = vmatpush1.bf16.msra.mxu1 %v15074_v0 }
 0x283   : > { %1671 = vmatprep.subr.bf16.mxu1 %v15079_v1  ;;  %v15146_v1 = vld [vmem:[#allocation7 + $0x8] ss:$24 sps:$4 sm:$0xff]  }
 0x286   : > { %1672 = vmatpush1.bf16.msra.mxu1 %v15077_v2 }
 0x287   : > { %1673 = vmatprep.subr.bf16.mxu1 %v15082_v3  ;;  %v15151_v3 = vld [vmem:[#allocation7 + $0x3c] ss:$24 sps:$4 sm:$0xff]  }
 0x28a   : > { %1674 = vmatpush1.bf16.msra.mxu1 %v15080_v4  ;;  %v15149_v4 = vld [vmem:[#allocation7 + $0x38] ss:$24 sps:$4 sm:$0xff]  }
 0x28b   : > { %1675 = vmatprep.subr.bf16.mxu1 %v15085_v5  ;;  %v15154_v5 = vld [vmem:[#allocation7 + $0x6c] ss:$24 sps:$4 sm:$0xff]  }
 0x28e   : > { %1676 = vmatpush1.bf16.msra.mxu1 %v15083_v6  ;;  %v15152_v6 = vld [vmem:[#allocation7 + $0x68] ss:$24 sps:$4 sm:$0xff]  }
 0x28f   : > { %1677 = vmatprep.subr.bf16.mxu1 %v15088_v7  ;;  %v15157_v7 = vld [vmem:[#allocation7 + $0x9c] ss:$24 sps:$4 sm:$0xff]  }
 0x292   : > { %1678 = vmatpush1.bf16.msra.mxu1 %v15086_v8  ;;  %v15155_v8 = vld [vmem:[#allocation7 + $0x98] ss:$24 sps:$4 sm:$0xff]  }
 0x293   : > { %1679 = vmatprep.subr.bf16.mxu1 %v15091_v9  ;;  %v15160_v9 = vld [vmem:[#allocation7 + $0xcc] ss:$24 sps:$4 sm:$0xff]  }
 0x296   : > { %1680 = vmatpush1.bf16.msra.mxu1 %v15089_v10  ;;  %v15158_v10 = vld [vmem:[#allocation7 + $0xc8] ss:$24 sps:$4 sm:$0xff]  }
 0x297   : > { %1681 = vmatprep.subr.bf16.mxu1 %v15094_v11  ;;  %v15163_v11 = vld [vmem:[#allocation7 + $0xfc] ss:$24 sps:$4 sm:$0xff]  }
 0x29a   : > { %1682 = vmatpush1.bf16.msra.mxu1 %v15092_v12  ;;  %v15161_v12 = vld [vmem:[#allocation7 + $0xf8] ss:$24 sps:$4 sm:$0xff]  }
 0x29b   : > { %1683 = vmatprep.subr.bf16.mxu1 %v15097_v13  ;;  %v15166_v13 = vld [vmem:[#allocation7 + $0x12c] ss:$24 sps:$4 sm:$0xff]  }
 0x29e   : > { %1684 = vmatpush1.bf16.msra.mxu1 %v15095_v14  ;;  %v15164_v14 = vld [vmem:[#allocation7 + $0x128] ss:$24 sps:$4 sm:$0xff]  }
 0x29f   : > { %2306 = vmatprep.subr.bf16.mxu1 %v15100_v15  ;;  %v15169_v15 = vld [vmem:[#allocation7 + $0x15c] ss:$24 sps:$4 sm:$0xff]  }
 0x2a1   : > { %1686 = vmatmul.mubr.bf16.vlgmr.msra.gmra.mrb[0].mxu1 %v13048_v17  ;;  %v15172_v17 = vld [vmem:[#allocation7 + $0x18c] ss:$24 sps:$4 sm:$0xff]  }
 0x2a2   : > { %2307 = vmatpush1.bf16.msra.mxu1 %v15098_v16  ;;  %v15167_v16 = vld [vmem:[#allocation7 + $0x158] ss:$24 sps:$4 sm:$0xff]  }
 0x2a3   : > { %2308 = vmatprep.subr.bf16.mxu1 %v15103_v18  ;;  %v15170_v18 = vld [vmem:[#allocation7 + $0x188] ss:$24 sps:$4 sm:$0xff]  }
 0x2a6   : > { %2309 = vmatpush1.bf16.msra.mxu1 %v15101_v19  ;;  %v15175_v19 = vld [vmem:[#allocation7 + $0x1bc] ss:$24 sps:$4 sm:$0xff]  }
 0x2a7   : > { %2310 = vmatprep.subr.bf16.mxu1 %v15106_v20  ;;  %v15173_v20 = vld [vmem:[#allocation7 + $0x1b8] ss:$24 sps:$4 sm:$0xff]  }
 0x2aa   : > { %2311 = vmatpush1.bf16.msra.mxu1 %v15104_v21  ;;  %v15178_v21 = vld [vmem:[#allocation7 + $0x1ec] ss:$24 sps:$4 sm:$0xff]  }
 0x2ab   : > { %2312 = vmatprep.subr.bf16.mxu1 %v15109_v22  ;;  %v15176_v22 = vld [vmem:[#allocation7 + $0x1e8] ss:$24 sps:$4 sm:$0xff]  }
 0x2ae   : > { %2313 = vmatpush1.bf16.msra.mxu1 %v15107_v23  ;;  %v15181_v23 = vld [vmem:[#allocation7 + $0x21c] ss:$24 sps:$4 sm:$0xff]  }
 0x2af   : > { %2314 = vmatprep.subr.bf16.mxu1 %v15112_v24  ;;  %v15179_v24 = vld [vmem:[#allocation7 + $0x218] ss:$24 sps:$4 sm:$0xff]  }
 0x2b2   : > { %2315 = vmatpush1.bf16.msra.mxu1 %v15110_v25  ;;  %v15184_v25 = vld [vmem:[#allocation7 + $0x24c] ss:$24 sps:$4 sm:$0xff]  }
 0x2b3   : > { %2316 = vmatprep.subr.bf16.mxu1 %v15115_v26  ;;  %v15182_v26 = vld [vmem:[#allocation7 + $0x248] ss:$24 sps:$4 sm:$0xff]  }
 0x2b6   : > { %2317 = vmatpush1.bf16.msra.mxu1 %v15113_v27  ;;  %v15187_v27 = vld [vmem:[#allocation7 + $0x27c] ss:$24 sps:$4 sm:$0xff]  }
 0x2b7   : > { %2318 = vmatprep.subr.bf16.mxu1 %v15118_v28  ;;  %v15185_v28 = vld [vmem:[#allocation7 + $0x278] ss:$24 sps:$4 sm:$0xff]  }
 0x2ba   : > { %2319 = vmatpush1.bf16.msra.mxu1 %v15116_v29  ;;  %v15190_v29 = vld [vmem:[#allocation7 + $0x2ac] ss:$24 sps:$4 sm:$0xff]  }
 0x2bb   : > { %2320 = vmatprep.subr.bf16.mxu1 %v15121_v30  ;;  %v15188_v30 = vld [vmem:[#allocation7 + $0x2a8] ss:$24 sps:$4 sm:$0xff]  }
 0x2be   : > { %2321 = vmatpush1.bf16.msra.mxu1 %v15119_v31  ;;  %v15193_v31 = vld [vmem:[#allocation7 + $0x2dc] ss:$24 sps:$4 sm:$0xff]  }
 0x2bf   : > { %2322 = vmatprep.subr.bf16.mxu1 %v15124_v32  ;;  %v15191_v32 = vld [vmem:[#allocation7 + $0x2d8] ss:$24 sps:$4 sm:$0xff]  }
 0x2c2   : > { %2323 = vmatpush1.bf16.msra.mxu1 %v15122_v33  ;;  %v15196_v33 = vld [vmem:[#allocation7 + $0x14] ss:$24 sps:$4 sm:$0xff]  }
 0x2c3   : > { %2324 = vmatprep.subr.bf16.mxu1 %v15127_v34  ;;  %v15194_v34 = vld [vmem:[#allocation7 + $0x10] ss:$24 sps:$4 sm:$0xff]  }
 0x2c6   : > { %2325 = vmatpush1.bf16.msra.mxu1 %v15125_v35  ;;  %v15199_v35 = vld [vmem:[#allocation7 + $0x44] ss:$24 sps:$4 sm:$0xff]  }
 0x2c7   : > { %2326 = vmatprep.subr.bf16.mxu1 %v15130_v36  ;;  %v15197_v36 = vld [vmem:[#allocation7 + $0x40] ss:$24 sps:$4 sm:$0xff]  }
 0x2ca   : > { %2327 = vmatpush1.bf16.msra.mxu1 %v15128_v37  ;;  %v15202_v37 = vld [vmem:[#allocation7 + $0x74] ss:$24 sps:$4 sm:$0xff]  }
 0x2cb   : > { %2328 = vmatprep.subr.bf16.mxu1 %v15133_v38  ;;  %v15200_v38 = vld [vmem:[#allocation7 + $0x70] ss:$24 sps:$4 sm:$0xff]  }
 0x2ce   : > { %2329 = vmatpush1.bf16.msra.mxu1 %v15131_v39  ;;  %v15205_v39 = vld [vmem:[#allocation7 + $0xa4] ss:$24 sps:$4 sm:$0xff]  }
 0x2cf   : > { %2330 = vmatprep.subr.bf16.mxu1 %v15136_v40  ;;  %v15203_v40 = vld [vmem:[#allocation7 + $0xa0] ss:$24 sps:$4 sm:$0xff]  }
 0x2d2   : > { %2331 = vmatpush1.bf16.msra.mxu1 %v15134_v41  ;;  %v15208_v41 = vld [vmem:[#allocation7 + $0xd4] ss:$24 sps:$4 sm:$0xff]  }
 0x2d3   : > { %2332 = vmatprep.subr.bf16.mxu1 %v15139_v42  ;;  %v15206_v42 = vld [vmem:[#allocation7 + $0xd0] ss:$24 sps:$4 sm:$0xff]  }
 0x2d6   : > { %2333 = vmatpush1.bf16.msra.mxu1 %v15137_v43  ;;  %v15211_v43 = vld [vmem:[#allocation7 + $0x104] ss:$24 sps:$4 sm:$0xff]  }
 0x2d7   : > { %2334 = vmatprep.subr.bf16.mxu1 %v15142_v44  ;;  %v15209_v44 = vld [vmem:[#allocation7 + $0x100] ss:$24 sps:$4 sm:$0xff]  }
 0x2da   : > { %2335 = vmatpush1.bf16.msra.mxu1 %v15140_v45  ;;  %v15214_v45 = vld [vmem:[#allocation7 + $0x134] ss:$24 sps:$4 sm:$0xff]  }
 0x2db   : > { %2336 = vmatprep.subr.bf16.mxu1 %v15145_v46  ;;  %v15212_v46 = vld [vmem:[#allocation7 + $0x130] ss:$24 sps:$4 sm:$0xff]  }
 0x2de   : > { %2337 = vmatpush1.bf16.msra.mxu1 %v15143_v47  ;;  %v15217_v47 = vld [vmem:[#allocation7 + $0x164] ss:$24 sps:$4 sm:$0xff]  }
 0x2df   : > { %2349 = vmatprep.subr.bf16.mxu1 %v15148_v48  ;;  %v15215_v48 = vld [vmem:[#allocation7 + $0x160] ss:$24 sps:$4 sm:$0xff]  }
 0x374   : > { %v1687_v54 = vpop.f32.mrb[0].mxu1 }
 0x375   : > { %v1689_v57 = vpop.f32.mrb[1].mxu1  ;;  %v17382_v63 = vadd.f32 %v1687_v54, %v837_v56  ;;  %v15223_v54 = vld [vmem:[#allocation7 + $0x1c4] ss:$24 sps:$4 sm:$0xff]  }
 0x376   : > { %v1691_v58 = vpop.f32.mrb[2].mxu1  ;;  %v17378_v61 = vadd.f32 %v1689_v57, %v841_v55  ;;  %v15224_v57 = vld [vmem:[#allocation7 + $0x1f0] ss:$24 sps:$4 sm:$0xff]  }
 0x377   : > { %v17376_v59 = vadd.f32 %v1691_v58, %v837_v56  ;;  %v1693_v60 = vpop.f32.mrb[3].mxu1  ;;  %v15226_v56 = vld [vmem:[#allocation7 + $0x1f4] ss:$24 sps:$4 sm:$0xff]   ;;  %v15229_v58 = vld [vmem:[#allocation7 + $0x224] ss:$24 sps:$4 sm:$0xff]  }
 0x378   : > { %v17380_v62 = vadd.f32 %v1693_v60, %v841_v55  ;;  %v15221_v55 = vld [vmem:[#allocation7 + $0x1c0] ss:$24 sps:$4 sm:$0xff]  }
 0x379   : > { %v17390_v2 = vpack.c.bf16 %v17376_v59, %v17382_v63  ;;  %v15227_v60 = vld [vmem:[#allocation7 + $0x220] ss:$24 sps:$4 sm:$0xff]  }
 0x37a   : > { %v17386_v0 = vpack.c.bf16 %v17380_v62, %v17378_v61 }
 0x37c   : > { %2338 = vmatprep.mubr.bf16.mxu1 %v17386_v0 }
 0x37d   : > { %2339 = vmatmul.mubr.bf16.vlgmr.msra.gmra.mrb[4].mxu1 %v17390_v2 }
 0x37e   : > { %2350 = vmatpush1.bf16.msra.mxu1 %v15146_v1  ;;  %2381 = vmatprep.mubr.bf16.mxu1 %v17386_v0  ;;  %v15230_v1 = vld [vmem:[#allocation7 + $0x250] ss:$24 sps:$4 sm:$0xff]  }
 0x37f   : > { %2351 = vmatprep.subr.bf16.mxu1 %v15151_v3  ;;  %v15235_v3 = vld [vmem:[#allocation7 + $0x284] ss:$24 sps:$4 sm:$0xff]  }
 0x382   : > { %2352 = vmatpush1.bf16.msra.mxu1 %v15149_v4  ;;  %v15233_v4 = vld [vmem:[#allocation7 + $0x280] ss:$24 sps:$4 sm:$0xff]  }
 0x383   : > { %2353 = vmatprep.subr.bf16.mxu1 %v15154_v5  ;;  %v15238_v5 = vld [vmem:[#allocation7 + $0x2b4] ss:$24 sps:$4 sm:$0xff]  }
 0x386   : > { %2354 = vmatpush1.bf16.msra.mxu1 %v15152_v6  ;;  %v15236_v6 = vld [vmem:[#allocation7 + $0x2b0] ss:$24 sps:$4 sm:$0xff]  }
 0x387   : > { %2355 = vmatprep.subr.bf16.mxu1 %v15157_v7  ;;  %v15241_v7 = vld [vmem:[#allocation7 + $0x2e4] ss:$24 sps:$4 sm:$0xff]  }
 0x38a   : > { %2356 = vmatpush1.bf16.msra.mxu1 %v15155_v8  ;;  %v15239_v8 = vld [vmem:[#allocation7 + $0x2e0] ss:$24 sps:$4 sm:$0xff]  }
 0x38b   : > { %2357 = vmatprep.subr.bf16.mxu1 %v15160_v9  ;;  %v16844_v9 = vmov 0.0  }
 0x38e   : > { %2358 = vmatpush1.bf16.msra.mxu1 %v15158_v10  ;;  %v1794_v10 = vld [vmem:[#allocation8] sm:$0x3f] }
 0x38f   : > { %2359 = vmatprep.subr.bf16.mxu1 %v15163_v11  ;;  %v1799_v11 = vrot.slane %v1794_v10, %v17372_v53 }
 0x392   : > { %2360 = vmatpush1.bf16.msra.mxu1 %v15161_v12 }
 0x393   : > { %2361 = vmatprep.subr.bf16.mxu1 %v15166_v13  ;;  %v1803_v13 = vrot.slane %v1794_v10, %v17369_v51 }
 0x396   : > { %2362 = vmatpush1.bf16.msra.mxu1 %v15164_v14 }
 0x397   : > { %2363 = vmatprep.subr.bf16.mxu1 %v15169_v15 }
 0x39a   : > { %2364 = vmatpush1.bf16.msra.mxu1 %v15167_v16 }
 0x39b   : > { %2365 = vmatprep.subr.bf16.mxu1 %v15172_v17 }
 0x39e   : > { %2366 = vmatpush1.bf16.msra.mxu1 %v15170_v18 }
 0x39f   : > { %2367 = vmatprep.subr.bf16.mxu1 %v15175_v19 }
 0x3a2   : > { %2368 = vmatpush1.bf16.msra.mxu1 %v15173_v20 }
 0x3a3   : > { %2369 = vmatprep.subr.bf16.mxu1 %v15178_v21 }
 0x3a6   : > { %2370 = vmatpush1.bf16.msra.mxu1 %v15176_v22  ;;  %v17408_v22 = vsub.s32 2, %v17366_v50 }
 0x3a7   : > { %2371 = vmatprep.subr.bf16.mxu1 %v15181_v23  ;;  %v17411_v23 = vsub.s32 3, %v17366_v50 }
 0x3aa   : > { %2372 = vmatpush1.bf16.msra.mxu1 %v15179_v24  ;;  %v1807_v24 = vrot.slane %v1794_v10, %v17408_v22 }
 0x3ab   : > { %2373 = vmatprep.subr.bf16.mxu1 %v15184_v25 }
 0x3ae   : > { %2374 = vmatpush1.bf16.msra.mxu1 %v15182_v26  ;;  %v1811_v26 = vrot.slane %v1794_v10, %v17411_v23 }
 0x3af   : > { %2375 = vmatprep.subr.bf16.mxu1 %v15187_v27 }
 0x3b2   : > { %2376 = vmatpush1.bf16.msra.mxu1 %v15185_v28 }
 0x3b3   : > { %2377 = vmatprep.subr.bf16.mxu1 %v15190_v29 }
 0x3b6   : > { %2378 = vmatpush1.bf16.msra.mxu1 %v15188_v30 }
 0x3b7   : > { %2379 = vmatprep.subr.bf16.mxu1 %v15193_v31 }
 0x3ba   : > { %2380 = vmatpush1.bf16.msra.mxu1 %v15191_v32 }
 0x3bb   : > { %2392 = vmatprep.subr.bf16.mxu1 %v15196_v33 }
 0x3bd   : > { %2382 = vmatmul.mubr.bf16.vlgmr.msra.gmra.mrb[8].mxu1 %v17390_v2 }
 0x3be   : > { %2393 = vmatpush1.bf16.msra.mxu1 %v15194_v34  ;;  %2424 = vmatprep.mubr.bf16.mxu1 %v17386_v0  ;;  %v15232_v0 = vld [vmem:[#allocation7 + $0x254] ss:$24 sps:$4 sm:$0xff]  }
 0x3bf   : > { %2394 = vmatprep.subr.bf16.mxu1 %v15199_v35 }
 0x3c2   : > { %2395 = vmatpush1.bf16.msra.mxu1 %v15197_v36 }
 0x3c3   : > { %2396 = vmatprep.subr.bf16.mxu1 %v15202_v37  ;;  %v17424_v37 = vsub.s32 4, %v17366_v50 }
 0x3c6   : > { %2397 = vmatpush1.bf16.msra.mxu1 %v15200_v38  ;;  %v17427_v38 = vsub.s32 5, %v17366_v50 }
 0x3c7   : > { %2398 = vmatprep.subr.bf16.mxu1 %v15205_v39  ;;  %v1815_v39 = vrot.slane %v1794_v10, %v17424_v37 }
 0x3ca   : > { %2399 = vmatpush1.bf16.msra.mxu1 %v15203_v40 }
 0x3cb   : > { %2400 = vmatprep.subr.bf16.mxu1 %v15208_v41  ;;  %v1819_v41 = vrot.slane %v1794_v10, %v17427_v38 }
 0x3ce   : > { %2401 = vmatpush1.bf16.msra.mxu1 %v15206_v42 }
 0x3cf   : > { %2402 = vmatprep.subr.bf16.mxu1 %v15211_v43 }
 0x3d2   : > { %2403 = vmatpush1.bf16.msra.mxu1 %v15209_v44 }
 0x3d3   : > { %2404 = vmatprep.subr.bf16.mxu1 %v15214_v45 }
 0x3d6   : > { %2405 = vmatpush1.bf16.msra.mxu1 %v15212_v46 }
 0x3d7   : > { %2406 = vmatprep.subr.bf16.mxu1 %v15217_v47 }
 0x3da   : > { %2407 = vmatpush1.bf16.msra.mxu1 %v15215_v48 }
 0x3db   : > { %2408 = vmatprep.subr.bf16.mxu1 %v15220_v49 }
 0x3de   : > { %2409 = vmatpush1.bf16.msra.mxu1 %v15218_v52 }
 0x3df   : > { %2410 = vmatprep.subr.bf16.mxu1 %v15223_v54 }
 0x3e2   : > { %2411 = vmatpush1.bf16.msra.mxu1 %v15221_v55 }
 0x3e3   : > { %2412 = vmatprep.subr.bf16.mxu1 %v15226_v56 }
 0x3e6   : > { %2413 = vmatpush1.bf16.msra.mxu1 %v15224_v57 }
 0x3e7   : > { %2414 = vmatprep.subr.bf16.mxu1 %v15229_v58 }
 0x3ea   : > { %2415 = vmatpush1.bf16.msra.mxu1 %v15227_v60 }
 0x3eb   : > { %2416 = vmatprep.subr.bf16.mxu1 %v15232_v0 }
 0x3ee   : > { %2417 = vmatpush1.bf16.msra.mxu1 %v15230_v1 }
 0x3ef   : > { %2418 = vmatprep.subr.bf16.mxu1 %v15235_v3 }
 0x3f2   : > { %2419 = vmatpush1.bf16.msra.mxu1 %v15233_v4 }
 0x3f3   : > { %2420 = vmatprep.subr.bf16.mxu1 %v15238_v5 }
 0x3f6   : > { %2421 = vmatpush1.bf16.msra.mxu1 %v15236_v6 }
 0x3f7   : > { %2422 = vmatprep.subr.bf16.mxu1 %v15241_v7 }
 0x3fa   : > { %2423 = vmatpush1.bf16.msra.mxu1 %v15239_v8 }
 0x3fb   : > { %14513 = vmatprep.subr.bf16.mxu1 %v16844_v9 }
 0x3fd   : > { %2425 = vmatmul.mubr.bf16.vlgmr.msra.gmra.mrb[12].mxu1 %v17390_v2 }
 0x3fe   : > { %14515 = vmatprep.mubr.msk.bf16.mxu1 %vm16845_vm0, %v16844_v9 }
 0x450   : > { %v2340_v12 = vpop.f32.mrb[4].mxu1 }
 0x451   : > { %v2342_v14 = vpop.f32.mrb[5].mxu1  ;;  %v2341_v16 = vadd.f32 %v2340_v12, %v1799_v11 }
 0x452   : > { %v2344_v15 = vpop.f32.mrb[6].mxu1  ;;  %v2343_v19 = vadd.f32 %v2342_v14, %v1803_v13 }
 0x453   : > { %v2345_v17 = vadd.f32 %v2344_v15, %v1799_v11  ;;  %v2346_v18 = vpop.f32.mrb[7].mxu1 }
 0x454   : > { %v2347_v2 = vadd.f32 %v2346_v18, %v1803_v13 }
 0x455   : > { %v17403_v20 = vpack.c.bf16 %v2345_v17, %v2341_v16 }
 0x456   : > { %v17405_v21 = vpack.c.bf16 %v2347_v2, %v2343_v19 }
 0x490   : > { %v2383_v25 = vpop.f32.mrb[8].mxu1 }
 0x491   : > { %v2385_v27 = vpop.f32.mrb[9].mxu1  ;;  %v2384_v29 = vadd.f32 %v2383_v25, %v1807_v24 }
 0x492   : > { %v2387_v28 = vpop.f32.mrb[10].mxu1  ;;  %v2386_v32 = vadd.f32 %v2385_v27, %v1811_v26 }
 0x493   : > { %v2388_v30 = vadd.f32 %v2387_v28, %v1807_v24  ;;  %v2389_v31 = vpop.f32.mrb[11].mxu1 }
 0x494   : > { %v2390_v33 = vadd.f32 %v2389_v31, %v1811_v26 }
 0x495   : > { %v2436_v34 = vpack.c.bf16 %v2388_v30, %v2384_v29 }
 0x496   : > { %v17415_v35 = vpack.c.bf16 %v2390_v33, %v2386_v32 }
 0x497   : > { %v2442_v36 = vsel %vm2437_vm1, %v2436_v34, 0 }
 0x498   : > { %14514 = vmatpush3.bf16.xpose.msra.mxu1 %v2442_v36 }
 0x499   : > { %14519 = vmatprep.subr.bf16.mxu1 %v16844_v9 }
 0x49f   : > { %14516 = vmatmul.mubr.msk.bf16.vlgmr.msra.gmra.mrb[16].mxu1 %vm2437_vm1, %v17403_v20 }
 0x4a0   : > { %14521 = vmatprep.mubr.msk.bf16.mxu1 %vm16845_vm0, %v16844_v9 }
 0x4d0   : > { %v2426_v40 = vpop.f32.mrb[12].mxu1 }
 0x4d1   : > { %v2428_v42 = vpop.f32.mrb[13].mxu1  ;;  %v2427_v44 = vadd.f32 %v2426_v40, %v1815_v39 }
 0x4d2   : > { %v2430_v43 = vpop.f32.mrb[14].mxu1  ;;  %v2429_v47 = vadd.f32 %v2428_v42, %v1819_v41 }
 0x4d3   : > { %v2431_v45 = vadd.f32 %v2430_v43, %v1815_v39  ;;  %v2432_v46 = vpop.f32.mrb[15].mxu1 }
 0x4d4   : > { %v2433_v48 = vadd.f32 %v2432_v46, %v1819_v41 }
 0x4d5   : > { %v17431_v49 = vpack.c.bf16 %v2431_v45, %v2427_v44 }
 0x4d6   : > { %v17433_v52 = vpack.c.bf16 %v2433_v48, %v2429_v47 }
 0x4d7   : > { %14520 = vmatpush3.bf16.msra.mxu1 %v17431_v49 }
 0x4d8   : > { %14525 = vmatprep.subr.bf16.mxu1 %v16844_v9 }
 0x572   : > { %v2478_v54 = vpop.f32.mrb[16].mxu1 }
 0x573   : > { %v2485_v55 = vmul.f32 0.125, %v2478_v54  ;;  %v14517_v56 = vpop.f32.mrb[17].mxu1 }
 0x574   : > { %v2481_v57 = vpop.f32.mrb[18].mxu1 }
 0x575   : > { %v2486_v58 = vmul.f32 0.125, %v2481_v57  ;;  %v14518_v60 = vpop.f32.mrb[19].mxu1  ;;  %v2488_v0 = vsel %vm2487_vm2, %v2485_v55, -inf }
 0x576   : > { %2489 = vmax.xlane.f32.xlu0 %v2488_v0 }
 0x577   : > { %v2491_v1 = vsel %vm2487_vm2, %v2486_v58, -inf }
 0x57a   : > { %2492 = vmax.xlane.f32.xlu0 %v2491_v1 }
 0x590   : > { %2560 = vrot.lane.b32.xlu0 %v2436_v34, %s16846_s27 }
 0x603   : > { %v2490_v3 = vpop.xlane.xlu0 %2489 }
 0x604   : > { %v2494_v4 = vsub.f32 %v2485_v55, %v2490_v3 }
 0x606   : > { %v2496_v5 = vmul.f32 1.442695, %v2494_v4 }
 0x607   : > { %v2493_v6 = vpop.xlane.xlu0 %2492 }
 0x608   : > { %16250 = vpow2.f32 %v2496_v5  ;;  %v2495_v7 = vsub.f32 %v2486_v58, %v2493_v6 }
 0x60a   : > { %v2498_v8 = vmul.f32 1.442695, %v2495_v7 }
 0x60b   : > { %v2561_v2 = vpop.permute.xlu0 %2560 }
 0x60c   : > { %16252 = vpow2.f32 %v2498_v8  ;;  %v2566_v25 = vsel %vm2437_vm1, %v2561_v2, 0 }
 0x612   : > { %v16251_v10 = vpop.eup %16250 }
 0x613   : > { %v2500_v11 = vsel %vm2487_vm2, %v16251_v10, 0.0 }
 0x614   : > { %2501 = vadd.xlane.f32.xlu1 %v2500_v11 }
 0x616   : > { %v16253_v12 = vpop.eup %16252 }
 0x617   : > { %v2503_v13 = vsel %vm2487_vm2, %v16253_v12, 0.0 }
 0x618   : > { %2504 = vadd.xlane.f32.xlu1 %v2503_v13 }
 0x629   : > { %2557 = vrot.lane.b32.xlu1 %v17403_v20, %s16846_s27 }
 0x6a1   : > { %v2502_v14 = vpop.xlane.xlu1 %2501 }
 0x6a2   : > { %16254 = vrcp.f32 %v2502_v14 }
 0x6a5   : > { %v2505_v15 = vpop.xlane.xlu1 %2504 }
 0x6a6   : > { %16256 = vrcp.f32 %v2505_v15 }
 0x6a9   : > { %v2558_v20 = vpop.permute.xlu1 %2557 }
 0x6ac   : > { %v16255_v16 = vpop.eup %16254 }
 0x6ad   : > { %v2508_v18 = vmul.f32 %v16255_v16, %v16251_v10 }
 0x6b0   : > { %v16257_v17 = vpop.eup %16256 }
 0x6b1   : > { %v2509_v19 = vmul.f32 %v16257_v17, %v16253_v12 }
 0x6b3   : > { %v2510_v24 = vpack.c.bf16 %v2509_v19, %v2508_v18 }
 0x6b5   : > { %14522 = vmatmul.mubr.msk.bf16.vlgmr.msra.gmra.mrb[20].mxu1 %vm2487_vm2, %v2510_v24 }
 0x6b6   : > { %14526 = vmatpush3.bf16.xpose.msra.mxu1 %v2566_v25  ;;  %14527 = vmatprep.mubr.msk.bf16.mxu1 %vm16845_vm0, %v16844_v9 }
 0x6b7   : > { %14531 = vmatprep.subr.bf16.mxu1 %v16844_v9 }
 0x6bd   : > { %14528 = vmatmul.mubr.msk.bf16.vlgmr.msra.gmra.mrb[24].mxu1 %vm2437_vm1, %v2558_v20 }
 0x6be   : > { %14533 = vmatprep.mubr.msk.bf16.mxu1 %vm16845_vm0, %v16844_v9 }
 0x788   : > { %v17452_v26 = vpop.f32.mrb[20].mxu1 }
 0x789   : > { %v14523_v27 = vpop.f32.mrb[21].mxu1 }
 0x78a   : > { %v17454_v28 = vpop.f32.mrb[22].mxu1 }
 0x78b   : > { %v14524_v29 = vpop.f32.mrb[23].mxu1 }
 0x790   : > { %v2602_v30 = vpop.f32.mrb[24].mxu1 }
 0x791   : > { %v2609_v31 = vmul.f32 0.125, %v2602_v30  ;;  %v14529_v32 = vpop.f32.mrb[25].mxu1 }
 0x792   : > { %v2605_v33 = vpop.f32.mrb[26].mxu1 }
 0x793   : > { %v2610_v34 = vmul.f32 0.125, %v2605_v33  ;;  %v14530_v36 = vpop.f32.mrb[27].mxu1  ;;  %v2611_v39 = vsel %vm2487_vm2, %v2609_v31, -inf }
 0x794   : > { %2612 = vmax.xlane.f32.xlu1 %v2611_v39 }
 0x795   : > { %v2614_v40 = vsel %vm2487_vm2, %v2610_v34, -inf }
 0x796   : > { %2615 = vmax.xlane.f32.xlu0 %v2614_v40 }
 0x821   : > { %v2613_v41 = vpop.xlane.xlu1 %2612 }
 0x822   : > { %v2617_v42 = vsub.f32 %v2609_v31, %v2613_v41 }
 0x823   : > { %v2616_v43 = vpop.xlane.xlu0 %2615 }
 0x824   : > { %v2619_v44 = vmul.f32 1.442695, %v2617_v42  ;;  %v2618_v45 = vsub.f32 %v2610_v34, %v2616_v43 }
 0x826   : > { %16258 = vpow2.f32 %v2619_v44  ;;  %v2621_v46 = vmul.f32 1.442695, %v2618_v45 }
 0x828   : > { %16260 = vpow2.f32 %v2621_v46 }
 0x830   : > { %v16259_v47 = vpop.eup %16258 }
 0x831   : > { %v2623_v48 = vsel %vm2487_vm2, %v16259_v47, 0.0 }
 0x832   : > { %v16261_v54 = vpop.eup %16260  ;;  %2624 = vadd.xlane.f32.xlu0 %v2623_v48 }
 0x833   : > { %v2626_v55 = vsel %vm2487_vm2, %v16261_v54, 0.0 }
 0x834   : > { %2627 = vadd.xlane.f32.xlu1 %v2626_v55 }
 0x848   : > { %2635 = vrot.lane.b32.xlu0 %v17431_v49, %s16846_s27  ;;  %v2688_v49 = vsel %vm2437_vm1, %v17415_v35, 0 }
 0x84c   : > { %2802 = vrot.lane.b32.xlu0 %v17405_v21, %s16846_s27 }
 0x8bf   : > { %v2625_v56 = vpop.xlane.xlu0 %2624 }
 0x8c0   : > { %16262 = vrcp.f32 %v2625_v56 }
 0x8c1   : > { %v2628_v57 = vpop.xlane.xlu1 %2627 }
 0x8c2   : > { %16264 = vrcp.f32 %v2628_v57 }
 0x8c3   : > { %v2636_v58 = vpop.permute.xlu0 %2635 }
 0x8c4   : > { %14532 = vmatpush3.bf16.msra.mxu1 %v2636_v58 }
 0x8c5   : > { %14537 = vmatprep.subr.bf16.mxu1 %v16844_v9 }
 0x8ca   : > { %v16263_v60 = vpop.eup %16262 }
 0x8cb   : > { %v2631_v1 = vmul.f32 %v16263_v60, %v16259_v47 }
 0x8cc   : > { %v16265_v0 = vpop.eup %16264 }
 0x8cd   : > { %v2632_v3 = vmul.f32 %v16265_v0, %v16261_v54 }
 0x8cf   : > { %v2633_v4 = vpack.c.bf16 %v2632_v3, %v2631_v1 }
 0x8d1   : > { %14534 = vmatmul.mubr.msk.bf16.vlgmr.msra.gmra.mrb[28].mxu1 %vm2487_vm2, %v2633_v4 }
 0x8d2   : > { %14538 = vmatpush3.bf16.xpose.msra.mxu1 %v2688_v49  ;;  %14539 = vmatprep.mubr.msk.bf16.mxu1 %vm16845_vm0, %v16844_v9 }
 0x8d3   : > { %14543 = vmatprep.subr.bf16.mxu1 %v16844_v9 }
 0x8d9   : > { %14540 = vmatmul.mubr.msk.bf16.vlgmr.msra.gmra.mrb[32].mxu1 %vm2437_vm1, %v17405_v21 }
 0x8da   : > { %14544 = vmatpush3.bf16.msra.mxu1 %v17433_v52  ;;  %14545 = vmatprep.mubr.msk.bf16.mxu1 %vm16845_vm0, %v16844_v9 }
 0x8db   : > { %14549 = vmatprep.subr.bf16.mxu1 %v16844_v9 }
 0x9a4   : > { %v17477_v5 = vpop.f32.mrb[28].mxu1 }
 0x9a5   : > { %v14535_v6 = vpop.f32.mrb[29].mxu1 }
 0x9a6   : > { %v17479_v7 = vpop.f32.mrb[30].mxu1 }
 0x9a7   : > { %v14891_v8 = vpack.i.bf16 %v17479_v7, %v17477_v5  ;;  %v14536_v10 = vpop.f32.mrb[31].mxu1 }
 0x9ac   : > { %v2724_v11 = vpop.f32.mrb[32].mxu1 }
 0x9ad   : > { %v2731_v12 = vmul.f32 0.125, %v2724_v11  ;;  %v14541_v13 = vpop.f32.mrb[33].mxu1 }
 0x9ae   : > { %v2727_v21 = vpop.f32.mrb[34].mxu1 }
 0x9af   : > { %v2732_v14 = vmul.f32 0.125, %v2727_v21  ;;  %v14542_v15 = vpop.f32.mrb[35].mxu1  ;;  %v2733_v16 = vsel %vm2487_vm2, %v2731_v12, -inf }
 0x9b0   : > { %2734 = vmax.xlane.f32.xlu1 %v2733_v16 }
 0x9b1   : > { %v2736_v17 = vsel %vm2487_vm2, %v2732_v14, -inf }
 0x9b4   : > { %2737 = vmax.xlane.f32.xlu1 %v2736_v17 }
 0xa3d   : > { %v2735_v18 = vpop.xlane.xlu1 %2734 }
 0xa3e   : > { %v2739_v19 = vsub.f32 %v2731_v12, %v2735_v18 }
 0xa40   : > { %v2741_v2 = vmul.f32 1.442695, %v2739_v19 }
 0xa41   : > { %v2738_v24 = vpop.xlane.xlu1 %2737 }
 0xa42   : > { %16266 = vpow2.f32 %v2741_v2  ;;  %v2740_v25 = vsub.f32 %v2732_v14, %v2738_v24 }
 0xa44   : > { %v2743_v20 = vmul.f32 1.442695, %v2740_v25  ;;  %v15242_v25 = vld [vmem:[#allocation10 + $0x4] ss:$8 sps:$4 sm:$0xff]  }
 0xa45   : > { %3153 = vmatprep.subr.bf16.mxu0 %v15242_v25 }
 0xa46   : > { %16268 = vpow2.f32 %v2743_v20  ;;  %v15244_v20 = vld [vmem:[#allocation10] ss:$8 sps:$4 sm:$0xff]  }
 0xa47   : > { %3154 = vmatpush1.bf16.msra.mxu0 %v15244_v20 }
 0xa4c   : > { %v16267_v27 = vpop.eup %16266 }
 0xa4d   : > { %v2745_v29 = vsel %vm2487_vm2, %v16267_v27, 0.0 }
 0xa4e   : > { %2746 = vadd.xlane.f32.xlu1 %v2745_v29  ;;  %v15247_v29 = vld [vmem:[#allocation10 + $0x10] ss:$8 sps:$4 sm:$0xff]  }
 0xa50   : > { %v16269_v30 = vpop.eup %16268 }
 0xa51   : > { %v2748_v31 = vsel %vm2487_vm2, %v16269_v30, 0.0 }
 0xa52   : > { %2749 = vadd.xlane.f32.xlu1 %v2748_v31  ;;  %v15251_v31 = vld [vmem:[#allocation10 + $0x34] ss:$8 sps:$4 sm:$0xff]  }
 0xa63   : > { %2805 = vrot.lane.b32.xlu1 %v17415_v35, %s16846_s27  ;;  %v2803_v35 = vpop.permute.xlu0 %2802 }
 0xadb   : > { %v2747_v32 = vpop.xlane.xlu1 %2746 }
 0xadc   : > { %16270 = vrcp.f32 %v2747_v32  ;;  %v15253_v32 = vld [vmem:[#allocation10 + $0x30] ss:$8 sps:$4 sm:$0xff]  }
 0xadf   : > { %v2750_v33 = vpop.xlane.xlu1 %2749 }
 0xae0   : > { %16272 = vrcp.f32 %v2750_v33  ;;  %v15254_v33 = vld [vmem:[#allocation10 + $0x44] ss:$8 sps:$4 sm:$0xff]  }
 0xae3   : > { %v2806_v41 = vpop.permute.xlu1 %2805 }
 0xae4   : > { %v2811_v43 = vsel %vm2437_vm1, %v2806_v41, 0  ;;  %v15262_v41 = vld [vmem:[#allocation10 + $0x60] ss:$8 sps:$4 sm:$0xff]  }
 0xae6   : > { %v16271_v34 = vpop.eup %16270 }
 0xae7   : > { %v2753_v39 = vmul.f32 %v16271_v34, %v16267_v27  ;;  %v15245_v27 = vld [vmem:[#allocation10 + $0x14] ss:$8 sps:$4 sm:$0xff]   ;;  %v15256_v34 = vld [vmem:[#allocation10 + $0x40] ss:$8 sps:$4 sm:$0xff]  }
 0xae8   : > { %3155 = vmatprep.subr.bf16.mxu0 %v15245_v27 }
 0xae9   : > { %3156 = vmatpush1.bf16.msra.mxu0 %v15247_v29 }
 0xaea   : > { %v16273_v36 = vpop.eup %16272 }
 0xaeb   : > { %v2754_v40 = vmul.f32 %v16273_v36, %v16269_v30  ;;  %v15250_v30 = vld [vmem:[#allocation10 + $0x20] ss:$8 sps:$4 sm:$0xff]   ;;  %v15257_v36 = vld [vmem:[#allocation10 + $0x54] ss:$8 sps:$4 sm:$0xff]  }
 0xaed   : > { %v2755_v42 = vpack.c.bf16 %v2754_v40, %v2753_v39  ;;  %v15259_v39 = vld [vmem:[#allocation10 + $0x50] ss:$8 sps:$4 sm:$0xff]   ;;  %v15260_v40 = vld [vmem:[#allocation10 + $0x64] ss:$8 sps:$4 sm:$0xff]  }
 0xaef   : > { %14546 = vmatmul.mubr.msk.bf16.vlgmr.msra.gmra.mrb[36].mxu1 %vm2487_vm2, %v2755_v42  ;;  %v15263_v42 = vld [vmem:[#allocation10 + $0x74] ss:$8 sps:$4 sm:$0xff]  }
 0xaf0   : > { %14550 = vmatpush3.bf16.xpose.msra.mxu1 %v2811_v43  ;;  %14551 = vmatprep.mubr.msk.bf16.mxu1 %vm16845_vm0, %v16844_v9  ;;  %v15265_v43 = vld [vmem:[#allocation10 + $0x70] ss:$8 sps:$4 sm:$0xff]  }
 0xaf1   : > { %14555 = vmatprep.subr.bf16.mxu1 %v16844_v9 }
 0xaf7   : > { %14552 = vmatmul.mubr.msk.bf16.vlgmr.msra.gmra.mrb[40].mxu1 %vm2437_vm1, %v2803_v35  ;;  %v15266_v35 = vld [vmem:[#allocation10 + $0x84] ss:$8 sps:$4 sm:$0xff]  }
 0xaf8   : > { %14557 = vmatprep.mubr.msk.bf16.mxu1 %vm16845_vm0, %v16844_v9 }
 0xbc2   : > { %v17497_v44 = vpop.f32.mrb[36].mxu1 }
 0xbc3   : > { %v14547_v45 = vpop.f32.mrb[37].mxu1 }
 0xbc4   : > { %v17499_v46 = vpop.f32.mrb[38].mxu1  ;;  %v15268_v45 = vld [vmem:[#allocation10 + $0x80] ss:$8 sps:$4 sm:$0xff]  }
 0xbc5   : > { %v14548_v47 = vpop.f32.mrb[39].mxu1 }
 0xbc6   : > { %v15269_v47 = vld [vmem:[#allocation10 + $0x94] ss:$8 sps:$4 sm:$0xff]  }
 0xbca   : > { %v2847_v48 = vpop.f32.mrb[40].mxu1 }
 0xbcb   : > { %v2854_v54 = vmul.f32 0.125, %v2847_v48  ;;  %v14553_v55 = vpop.f32.mrb[41].mxu1  ;;  %v15271_v48 = vld [vmem:[#allocation10 + $0x90] ss:$8 sps:$4 sm:$0xff]  }
 0xbcc   : > { %v2850_v56 = vpop.f32.mrb[42].mxu1  ;;  %v15274_v55 = vld [vmem:[#allocation10 + $0xa0] ss:$8 sps:$4 sm:$0xff]  }
 0xbcd   : > { %v2855_v57 = vmul.f32 0.125, %v2850_v56  ;;  %v14554_v58 = vpop.f32.mrb[43].mxu1  ;;  %v2856_v60 = vsel %vm2487_vm2, %v2854_v54, -inf  ;;  %v15275_v56 = vld [vmem:[#allocation10 + $0xb4] ss:$8 sps:$4 sm:$0xff]  }
 0xbce   : > { %2857 = vmax.xlane.f32.xlu0 %v2856_v60  ;;  %v15278_v58 = vld [vmem:[#allocation10 + $0xc4] ss:$8 sps:$4 sm:$0xff]   ;;  %v15280_v60 = vld [vmem:[#allocation10 + $0xc0] ss:$8 sps:$4 sm:$0xff]  }
 0xbcf   : > { %v2859_v0 = vsel %vm2487_vm2, %v2855_v57, -inf }
 0xbd0   : > { %2860 = vmax.xlane.f32.xlu1 %v2859_v0  ;;  %v15281_v0 = vld [vmem:[#allocation10 + $0xd4] ss:$8 sps:$4 sm:$0xff]  }
 0xc5b   : > { %v2858_v1 = vpop.xlane.xlu0 %2857 }
 0xc5c   : > { %v2862_v3 = vsub.f32 %v2854_v54, %v2858_v1  ;;  %v15272_v54 = vld [vmem:[#allocation10 + $0xa4] ss:$8 sps:$4 sm:$0xff]   ;;  %v15283_v1 = vld [vmem:[#allocation10 + $0xd0] ss:$8 sps:$4 sm:$0xff]  }
 0xc5d   : > { %v2861_v4 = vpop.xlane.xlu1 %2860 }
 0xc5e   : > { %v2864_v49 = vmul.f32 1.442695, %v2862_v3  ;;  %v2863_v6 = vsub.f32 %v2855_v57, %v2861_v4  ;;  %v15277_v57 = vld [vmem:[#allocation10 + $0xb0] ss:$8 sps:$4 sm:$0xff]   ;;  %v15284_v3 = vld [vmem:[#allocation10 + $0xe4] ss:$8 sps:$4 sm:$0xff]  }
 0xc5f   : > { %v15286_v4 = vld [vmem:[#allocation10 + $0xe0] ss:$8 sps:$4 sm:$0xff]  }
 0xc60   : > { %16274 = vpow2.f32 %v2864_v49  ;;  %v2866_v10 = vmul.f32 1.442695, %v2863_v6  ;;  %v15287_v49 = vld [vmem:[#allocation10 + $0xf4] ss:$8 sps:$4 sm:$0xff]   ;;  %v15289_v6 = vld [vmem:[#allocation10 + $0xf0] ss:$8 sps:$4 sm:$0xff]  }
 0xc62   : > { %16276 = vpow2.f32 %v2866_v10 }
 0xc6a   : > { %v16275_v11 = vpop.eup %16274 }
 0xc6b   : > { %v2868_v12 = vsel %vm2487_vm2, %v16275_v11, 0.0 }
 0xc6c   : > { %v16277_v13 = vpop.eup %16276  ;;  %2869 = vadd.xlane.f32.xlu0 %v2868_v12 }
 0xc6d   : > { %v2871_v21 = vsel %vm2487_vm2, %v16277_v13, 0.0 }
 0xc70   : > { %2872 = vadd.xlane.f32.xlu0 %v2871_v21 }
 0xc86   : > { %2880 = vrot.lane.b32.xlu0 %v17433_v52, %s16846_s27  ;;  %v15248_v52 = vld [vmem:[#allocation10 + $0x24] ss:$8 sps:$4 sm:$0xff]  }
 0xc87   : > { %3157 = vmatprep.subr.bf16.mxu0 %v15248_v52 }
 0xc88   : > { %3158 = vmatpush1.bf16.msra.mxu0 %v15250_v30 }
 0xc89   : > { %3159 = vmatprep.subr.bf16.mxu0 %v15251_v31 }
 0xc8c   : > { %3160 = vmatpush1.bf16.msra.mxu0 %v15253_v32 }
 0xc8d   : > { %3161 = vmatprep.subr.bf16.mxu0 %v15254_v33 }
 0xc90   : > { %3162 = vmatpush1.bf16.msra.mxu0 %v15256_v34 }
 0xc91   : > { %3163 = vmatprep.subr.bf16.mxu0 %v15257_v36 }
 0xc94   : > { %3164 = vmatpush1.bf16.msra.mxu0 %v15259_v39 }
 0xc95   : > { %3165 = vmatprep.subr.bf16.mxu0 %v15260_v40 }
 0xc98   : > { %3166 = vmatpush1.bf16.msra.mxu0 %v15262_v41  ;;  %v3267_v41 = vld [vmem:[#allocation16] sm:$0xff] }
 0xc99   : > { %3167 = vmatprep.subr.bf16.mxu0 %v15263_v42  ;;  %v3275_v42 = vld [vmem:[#allocation16 + $0x40] sm:$0xff] }
 0xc9c   : > { %3168 = vmatpush1.bf16.msra.mxu0 %v15265_v43  ;;  %v3268_v43 = vld [vmem:[#allocation16 + $0x8] sm:$0xff] }
 0xc9d   : > { %3169 = vmatprep.subr.bf16.mxu0 %v15266_v35  ;;  %v13315_v35 = vcombine.high %v3267_v41, %v3275_v42 }
 0xca0   : > { %3170 = vmatpush1.bf16.msra.mxu0 %v15268_v45  ;;  %v3276_v45 = vld [vmem:[#allocation16 + $0x48] sm:$0xff] }
 0xca1   : > { %3171 = vmatprep.subr.bf16.mxu0 %v15269_v47  ;;  %v3283_v47 = vld [vmem:[#allocation16 + $0x80] sm:$0xff] }
 0xca4   : > { %3172 = vmatpush1.bf16.msra.mxu0 %v15271_v48  ;;  %v13316_v48 = vcombine.low %v3268_v43, %v3276_v45 }
 0xca5   : > { %3173 = vmatprep.subr.bf16.mxu0 %v15272_v54  ;;  %v13317_v54 = vcombine.high %v3268_v43, %v3276_v45  ;;  %v3379_v43 = vld [vmem:[#allocation16 + $0x380] sm:$0xff]  ;;  %v3388_v45 = vld [vmem:[#allocation16 + $0x3c8] sm:$0xff] }
 0xca8   : > { %3174 = vmatpush1.bf16.msra.mxu0 %v15274_v55  ;;  %v3284_v55 = vld [vmem:[#allocation16 + $0x88] sm:$0xff] }
 0xca9   : > { %3175 = vmatprep.subr.bf16.mxu0 %v15275_v56  ;;  %v3292_v56 = vld [vmem:[#allocation16 + $0xc8] sm:$0xff] }
 0xcac   : > { %3176 = vmatpush1.bf16.msra.mxu0 %v15277_v57  ;;  %v3299_v57 = vld [vmem:[#allocation16 + $0x100] sm:$0xff] }
 0xcad   : > { %3177 = vmatprep.subr.bf16.mxu0 %v15278_v58  ;;  %v13333_v58 = vcombine.high %v3284_v55, %v3292_v56 }
 0xcb0   : > { %3178 = vmatpush1.bf16.msra.mxu0 %v15280_v60  ;;  %v3307_v60 = vld [vmem:[#allocation16 + $0x140] sm:$0xff] }
 0xcb1   : > { %3179 = vmatprep.subr.bf16.mxu0 %v15281_v0  ;;  %v3300_v0 = vld [vmem:[#allocation16 + $0x108] sm:$0xff] }
 0xcb4   : > { %3180 = vmatpush1.bf16.msra.mxu0 %v15283_v1  ;;  %v3308_v1 = vld [vmem:[#allocation16 + $0x148] sm:$0xff] }
 0xcb5   : > { %3181 = vmatprep.subr.bf16.mxu0 %v15284_v3 }
 0xcb8   : > { %3182 = vmatpush1.bf16.msra.mxu0 %v15286_v4  ;;  %v13332_v4 = vcombine.low %v3284_v55, %v3292_v56  ;;  %v3403_v55 = vld [vmem:[#allocation16 + $0x440] sm:$0xff]  ;;  %v3396_v56 = vld [vmem:[#allocation16 + $0x408] sm:$0xff] }
 0xcb9   : > { %3183 = vmatprep.subr.bf16.mxu0 %v15287_v49  ;;  %v13347_v49 = vcombine.high %v3299_v57, %v3307_v60 }
 0xcbc   : > { %3184 = vmatpush1.bf16.msra.mxu0 %v15289_v6  ;;  %v13349_v6 = vcombine.high %v3300_v0, %v3308_v1 }
 0xcbd   : > { %4930 = vmatprep.subr.bf16.mxu0 %v13317_v54 }
 0xcf9   : > { %v2870_v14 = vpop.xlane.xlu0 %2869 }
 0xcfa   : > { %16278 = vrcp.f32 %v2870_v14 }
 0xcfd   : > { %v2873_v15 = vpop.xlane.xlu0 %2872 }
 0xcfe   : > { %16280 = vrcp.f32 %v2873_v15 }
 0xd01   : > { %v2881_v16 = vpop.permute.xlu0 %2880 }
 0xd02   : > { %14556 = vmatpush3.bf16.msra.mxu1 %v2881_v16 }
 0xd03   : > { %4887 = vmatprep.subr.bf16.mxu1 %v13315_v35  ;;  %v3380_v35 = vld [vmem:[#allocation16 + $0x388] sm:$0xff] }
 0xd04   : > { %v16279_v17 = vpop.eup %16278  ;;  %v13429_v54 = vcombine.high %v3380_v35, %v3388_v45 }
 0xd05   : > { %v2876_v19 = vmul.f32 %v16279_v17, %v16275_v11 }
 0xd08   : > { %v16281_v18 = vpop.eup %16280 }
 0xd09   : > { %v2877_v2 = vmul.f32 %v16281_v18, %v16277_v13 }
 0xd0b   : > { %v2878_v24 = vpack.c.bf16 %v2877_v2, %v2876_v19 }
 0xd0d   : > { %14558 = vmatmul.mubr.msk.bf16.vlgmr.msra.gmra.mrb[44].mxu1 %vm2487_vm2, %v2878_v24 }
 0xde0   : > { %v2920_v10 = vpop.f32.mrb[44].mxu1 }
 0xde1   : > { %v14559_v11 = vpop.f32.mrb[45].mxu1 }
 0xde2   : > { %v2923_v12 = vpop.f32.mrb[46].mxu1  ;;  %v3323_v11 = vld [vmem:[#allocation16 + $0x1c0] sm:$0xff] }
 0xde3   : > { %v14886_v13 = vpack.i.bf16 %v2923_v12, %v2920_v10  ;;  %v14560_v21 = vpop.f32.mrb[47].mxu1  ;;  %v3315_v10 = vld [vmem:[#allocation16 + $0x180] sm:$0xff]  ;;  %v3316_v12 = vld [vmem:[#allocation16 + $0x188] sm:$0xff] }
 0xde4   : > { %v13346_v21 = vcombine.low %v3299_v57, %v3307_v60  ;;  %v3404_v57 = vld [vmem:[#allocation16 + $0x448] sm:$0xff]  ;;  %v13428_v60 = vcombine.low %v3380_v35, %v3388_v45 }
 0xde5   : > { %14887 = vrot.lane.b32.xlu1 %v14886_v13, %s16846_s27  ;;  %v3324_v13 = vld [vmem:[#allocation16 + $0x1c8] sm:$0xff] }
 0xde6   : > { %v3460_v35 = vld [vmem:[#allocation16 + $0x608] sm:$0xff] }
 0xde9   : > { %14892 = vrot.lane.b32.xlu1 %v14891_v8, %s16846_s27  ;;  %v2981_v8 = vld [vmem:[#allocation11] sm:$0x3] }
 0xdea   : > { %v2986_v27 = vrot.slane %v2981_v8, %v17372_v53 }
 0xe57   : > { %v14888_v14 = vpop.permute.xlu1 %14887 }
 0xe58   : > { %v14890_v15 = vunpack.i.h.bf16 %v14888_v14  ;;  %v14889_v16 = vunpack.i.l.bf16 %v14888_v14  ;;  %v13348_v14 = vcombine.low %v3300_v0, %v3308_v1  ;;  %v13445_v1 = vcombine.high %v3396_v56, %v3404_v57 }
 0xe5a   : > { %v2945_v17 = vsel %vm2437_vm1, %v17497_v44, %v14889_v16  ;;  %v2946_v18 = vsel %vm2437_vm1, %v17499_v46, %v14890_v15  ;;  %v2990_v44 = vrot.slane %v2981_v8, %v17369_v51  ;;  %v13363_v15 = vcombine.high %v3315_v10, %v3323_v11  ;;  %v3355_v8 = vld [vmem:[#allocation16 + $0x2c0] sm:$0xff] }
 0xe5b   : > { %v14893_v19 = vpop.permute.xlu1 %14892  ;;  %v2948_v2 = vpack.c.bf16 %v2946_v18, %v2945_v17  ;;  %v13365_v16 = vcombine.high %v3316_v12, %v3324_v13  ;;  %v3331_v17 = vld [vmem:[#allocation16 + $0x200] sm:$0xff] }
 0xe5c   : > { %v14895_v24 = vunpack.i.h.bf16 %v14893_v19  ;;  %v14894_v25 = vunpack.i.l.bf16 %v14893_v19  ;;  %v3339_v18 = vld [vmem:[#allocation16 + $0x240] sm:$0xff]  ;;  %v3332_v19 = vld [vmem:[#allocation16 + $0x208] sm:$0xff] }
 0xe5d   : > { %3185 = vmatprep.mubr.bf16.mxu0 %v2948_v2  ;;  %v3340_v2 = vld [vmem:[#allocation16 + $0x248] sm:$0xff] }
 0xe5e   : > { %v2943_v20 = vsel %vm2437_vm1, %v17452_v26, %v14894_v25  ;;  %v2944_v5 = vsel %vm2437_vm1, %v17454_v28, %v14895_v24  ;;  %v13362_v24 = vcombine.low %v3315_v10, %v3323_v11  ;;  %v13364_v25 = vcombine.low %v3316_v12, %v3324_v13 }
 0xe5f   : > { %v2947_v7 = vpack.c.bf16 %v2944_v5, %v2943_v20  ;;  %v13379_v20 = vcombine.high %v3331_v17, %v3339_v18  ;;  %v13381_v5 = vcombine.high %v3332_v19, %v3340_v2  ;;  %v13444_v11 = vcombine.low %v3396_v56, %v3404_v57  ;;  %v3476_v56 = vld [vmem:[#allocation16 + $0x688] sm:$0xff] }
 0xe61   : > { %3186 = vmatmul.mubr.bf16.vlgmr.msra.gmra.mrb[0].mxu0 %v2947_v7  ;;  %v3347_v7 = vld [vmem:[#allocation16 + $0x280] sm:$0xff] }
 0xe62   : > { %4931 = vmatpush1.bf16.msra.mxu0 %v13316_v48 }
 0xe63   : > { %4932 = vmatprep.subr.bf16.mxu0 %v13333_v58 }
 0xe66   : > { %4933 = vmatpush1.bf16.msra.mxu0 %v13332_v4  ;;  %v3419_v4 = vld [vmem:[#allocation16 + $0x4c0] sm:$0xff] }
 0xe67   : > { %4934 = vmatprep.subr.bf16.mxu0 %v13349_v6  ;;  %v3420_v6 = vld [vmem:[#allocation16 + $0x4c8] sm:$0xff] }
 0xe6a   : > { %4935 = vmatpush1.bf16.msra.mxu0 %v13348_v14 }
 0xe6b   : > { %4936 = vmatprep.subr.bf16.mxu0 %v13365_v16 }
 0xe6e   : > { %4937 = vmatpush1.bf16.msra.mxu0 %v13364_v25 }
 0xe6f   : > { %4938 = vmatprep.subr.bf16.mxu0 %v13381_v5 }
 0xf34   : > { %v3187_v29 = vpop.f32.mrb[0].mxu0 }
 0xf35   : > { %v3188_v46 = vadd.f32 %v3187_v29, %v2986_v27  ;;  %v3189_v52 = vpop.f32.mrb[1].mxu0  ;;  %v13378_v29 = vcombine.low %v3331_v17, %v3339_v18 }
 0xf36   : > { %v3190_v30 = vadd.f32 %v3189_v52, %v2990_v44  ;;  %v3191_v31 = vpop.f32.mrb[2].mxu0  ;;  %v13395_v52 = vcombine.high %v3347_v7, %v3355_v8 }
 0xf37   : > { %v17524_v32 = vadd.f32 %v17382_v63, %v3188_v46  ;;  %v3192_v33 = vadd.f32 %v3191_v31, %v2986_v27  ;;  %v3193_v26 = vpop.f32.mrb[3].mxu0  ;;  %v3348_v27 = vld [vmem:[#allocation16 + $0x288] sm:$0xff]  ;;  %v13380_v46 = vcombine.low %v3332_v19, %v3340_v2  ;;  %v3363_v31 = vld [vmem:[#allocation16 + $0x300] sm:$0xff] }
 0xf38   : > { %v17527_v34 = vadd.f32 %v17378_v61, %v3190_v30  ;;  %v3194_v28 = vadd.f32 %v3193_v26, %v2990_v44  ;;  %v13314_v61 = vcombine.low %v3267_v41, %v3275_v42  ;;  %v3356_v44 = vld [vmem:[#allocation16 + $0x2c8] sm:$0xff] }
 0xf39   : > { %v17530_v36 = vadd.f32 %v17376_v59, %v3192_v33  ;;  %v3291_v59 = vld [vmem:[#allocation16 + $0xc0] sm:$0xff]  ;;  %v13397_v30 = vcombine.high %v3348_v27, %v3356_v44  ;;  %v3364_v26 = vld [vmem:[#allocation16 + $0x308] sm:$0xff]  ;;  %4939 = vmatpush1.bf16.msra.mxu0 %v13380_v46 }
 0xf3a   : > { %v17533_v39 = vadd.f32 %v17380_v62, %v3194_v28  ;;  %v3202_v40 = vadd.f32 %v17527_v34, %v17524_v32  ;;  %v13331_v62 = vcombine.high %v3283_v47, %v3291_v59  ;;  %4888 = vmatpush1.bf16.msra.mxu1 %v13314_v61  ;;  %v13330_v3 = vcombine.low %v3283_v47, %v3291_v59  ;;  %v3371_v33 = vld [vmem:[#allocation16 + $0x340] sm:$0xff]  ;;  %v3372_v28 = vld [vmem:[#allocation16 + $0x348] sm:$0xff] }
 0xf3b   : > { %v13411_v41 = vcombine.high %v3363_v31, %v3371_v33  ;;  %4940 = vmatprep.subr.bf16.mxu0 %v13397_v30  ;;  %v13413_v42 = vcombine.high %v3364_v26, %v3372_v28  ;;  %v3387_v61 = vld [vmem:[#allocation16 + $0x3c0] sm:$0xff]  ;;  %v13410_v47 = vcombine.low %v3363_v31, %v3371_v33  ;;  %v13412_v59 = vcombine.low %v3364_v26, %v3372_v28  ;;  %v3444_v26 = vld [vmem:[#allocation16 + $0x588] sm:$0xff] }
 0xf3c   : > { %3203 = vadd.xlane.f32.xlu0 %v3202_v40  ;;  %v3205_v63 = vadd.f32 %v17533_v39, %v17530_v36  ;;  %4889 = vmatprep.subr.bf16.mxu1 %v13331_v62  ;;  %v13394_v40 = vcombine.low %v3347_v7, %v3355_v8  ;;  %v13427_v48 = vcombine.high %v3379_v43, %v3387_v61  ;;  %v3395_v62 = vld [vmem:[#allocation16 + $0x400] sm:$0xff] }
 0xf3d   : > { %v13426_v58 = vcombine.low %v3379_v43, %v3387_v61  ;;  %v13443_v0 = vcombine.high %v3395_v62, %v3403_v55  ;;  %v13442_v10 = vcombine.low %v3395_v62, %v3403_v55  ;;  %v3443_v31 = vld [vmem:[#allocation16 + $0x580] sm:$0xff] }
 0xf3e   : > { %3206 = vadd.xlane.f32.xlu1 %v3205_v63  ;;  %4890 = vmatpush1.bf16.msra.mxu1 %v13330_v3  ;;  %v13396_v63 = vcombine.low %v3348_v27, %v3356_v44  ;;  %v3411_v3 = vld [vmem:[#allocation16 + $0x480] sm:$0xff] }
 0xf3f   : > { %4891 = vmatprep.subr.bf16.mxu1 %v13347_v49  ;;  %v3412_v49 = vld [vmem:[#allocation16 + $0x488] sm:$0xff]  ;;  %v13459_v12 = vcombine.high %v3411_v3, %v3419_v4  ;;  %v3435_v27 = vld [vmem:[#allocation16 + $0x540] sm:$0xff] }
 0xf40   : > { %4941 = vmatpush1.bf16.msra.mxu0 %v13396_v63  ;;  %v13461_v13 = vcombine.high %v3412_v49, %v3420_v6  ;;  %v13460_v14 = vcombine.low %v3412_v49, %v3420_v6  ;;  %v3451_v33 = vld [vmem:[#allocation16 + $0x5c0] sm:$0xff]  ;;  %v3492_v49 = vld [vmem:[#allocation16 + $0x708] sm:$0xff] }
 0xf41   : > { %4942 = vmatprep.subr.bf16.mxu0 %v13413_v42  ;;  %v13491_v28 = vcombine.high %v3443_v31, %v3451_v33  ;;  %v13490_v63 = vcombine.low %v3443_v31, %v3451_v33  ;;  %v3459_v43 = vld [vmem:[#allocation16 + $0x600] sm:$0xff] }
 0xf42   : > { %4892 = vmatpush1.bf16.msra.mxu1 %v13346_v21  ;;  %v13458_v21 = vcombine.low %v3411_v3, %v3419_v4  ;;  %v3467_v61 = vld [vmem:[#allocation16 + $0x640] sm:$0xff] }
 0xf43   : > { %4893 = vmatprep.subr.bf16.mxu1 %v13363_v15  ;;  %v13507_v45 = vcombine.high %v3459_v43, %v3467_v61  ;;  %v3475_v62 = vld [vmem:[#allocation16 + $0x680] sm:$0xff] }
 0xf44   : > { %4943 = vmatpush1.bf16.msra.mxu0 %v13412_v59  ;;  %v13506_v59 = vcombine.low %v3459_v43, %v3467_v61  ;;  %v3483_v55 = vld [vmem:[#allocation16 + $0x6c0] sm:$0xff] }
 0xf45   : > { %4944 = vmatprep.subr.bf16.mxu0 %v13429_v54  ;;  %v13523_v57 = vcombine.high %v3475_v62, %v3483_v55  ;;  %v3491_v3 = vld [vmem:[#allocation16 + $0x700] sm:$0xff] }
 0xf46   : > { %4894 = vmatpush1.bf16.msra.mxu1 %v13362_v24  ;;  %v3499_v4 = vld [vmem:[#allocation16 + $0x740] sm:$0xff] }
 0xf47   : > { %4895 = vmatprep.subr.bf16.mxu1 %v13379_v20  ;;  %v13539_v6 = vcombine.high %v3491_v3, %v3499_v4 }
 0xf48   : > { %4945 = vmatpush1.bf16.msra.mxu0 %v13428_v60  ;;  %v13522_v60 = vcombine.low %v3475_v62, %v3483_v55 }
 0xf49   : > { %4946 = vmatprep.subr.bf16.mxu0 %v13445_v1 }
 0xf4a   : > { %4896 = vmatpush1.bf16.msra.mxu1 %v13378_v29  ;;  %v3436_v29 = vld [vmem:[#allocation16 + $0x548] sm:$0xff] }
 0xf4b   : > { %4897 = vmatprep.subr.bf16.mxu1 %v13395_v52 }
 0xf4c   : > { %4947 = vmatpush1.bf16.msra.mxu0 %v13444_v11  ;;  %v13538_v11 = vcombine.low %v3491_v3, %v3499_v4 }
 0xf4d   : > { %4948 = vmatprep.subr.bf16.mxu0 %v13461_v13 }
 0xf4e   : > { %4898 = vmatpush1.bf16.msra.mxu1 %v13394_v40  ;;  %v3452_v40 = vld [vmem:[#allocation16 + $0x5c8] sm:$0xff] }
 0xf4f   : > { %4899 = vmatprep.subr.bf16.mxu1 %v13411_v41  ;;  %v13492_v41 = vcombine.low %v3444_v26, %v3452_v40  ;;  %v13493_v42 = vcombine.high %v3444_v26, %v3452_v40  ;;  %v3200_v26 = vld [vmem:[#allocation13] sm:$0x3]  ;;  %v3201_v40 = vld [vmem:[#allocation14] sm:$0x3] }
 0xf50   : > { %4949 = vmatpush1.bf16.msra.mxu0 %v13460_v14  ;;  %v3515_v14 = vld [vmem:[#allocation16 + $0x7c0] sm:$0xff] }
 0xf52   : > { %4900 = vmatpush1.bf16.msra.mxu1 %v13410_v47  ;;  %v3468_v47 = vld [vmem:[#allocation16 + $0x648] sm:$0xff] }
 0xf53   : > { %4901 = vmatprep.subr.bf16.mxu1 %v13427_v48  ;;  %v13508_v48 = vcombine.low %v3460_v35, %v3468_v47  ;;  %v13509_v54 = vcombine.high %v3460_v35, %v3468_v47  ;;  %v3254_v35 = vrot.slane %v3201_v40, %v17372_v53 }
 0xf56   : > { %4902 = vmatpush1.bf16.msra.mxu1 %v13426_v58  ;;  %v3484_v58 = vld [vmem:[#allocation16 + $0x6c8] sm:$0xff] }
 0xf57   : > { %4903 = vmatprep.subr.bf16.mxu1 %v13443_v0  ;;  %v13524_v0 = vcombine.low %v3476_v56, %v3484_v58  ;;  %v13525_v1 = vcombine.high %v3476_v56, %v3484_v58  ;;  %v3285_v58 = vld [vmem:[#allocation16 + $0x90] sm:$0xff] }
 0xf5a   : > { %4904 = vmatpush1.bf16.msra.mxu1 %v13442_v10  ;;  %v3500_v10 = vld [vmem:[#allocation16 + $0x748] sm:$0xff] }
 0xf5b   : > { %4905 = vmatprep.subr.bf16.mxu1 %v13459_v12  ;;  %v13540_v12 = vcombine.low %v3492_v49, %v3500_v10  ;;  %v13541_v13 = vcombine.high %v3492_v49, %v3500_v10  ;;  %v3302_v10 = vld [vmem:[#allocation16 + $0x118] sm:$0xff] }
 0xf5e   : > { %4906 = vmatpush1.bf16.msra.mxu1 %v13458_v21  ;;  %v3507_v21 = vld [vmem:[#allocation16 + $0x780] sm:$0xff] }
 0xfc9   : > { %v3204_v15 = vpop.xlane.xlu0 %3203 }
 0xfca   : > { %v3209_v16 = vmul.f32 0.00390625, %v3204_v15  ;;  %v3508_v15 = vld [vmem:[#allocation16 + $0x788] sm:$0xff] }
 0xfcb   : > { %v3207_v17 = vpop.xlane.xlu1 %3206 }
 0xfcc   : > { %v17540_v18 = vsub.f32 %v17524_v32, %v3209_v16  ;;  %v17543_v19 = vsub.f32 %v17527_v34, %v3209_v16  ;;  %v3210_v2 = vmul.f32 0.00390625, %v3207_v17  ;;  %v13555_v16 = vcombine.high %v3507_v21, %v3515_v14  ;;  %v3516_v17 = vld [vmem:[#allocation16 + $0x7c8] sm:$0xff] }
 0xfce   : > { %v17546_v24 = vsub.f32 %v17530_v36, %v3210_v2  ;;  %v17549_v25 = vsub.f32 %v17533_v39, %v3210_v2  ;;  %v3215_v20 = vmul.f32 %v17540_v18, %v17540_v18  ;;  %v3216_v5 = vmul.f32 %v17543_v19, %v17543_v19  ;;  %v3427_v36 = vld [vmem:[#allocation16 + $0x500] sm:$0xff]  ;;  %v3428_v39 = vld [vmem:[#allocation16 + $0x508] sm:$0xff] }
 0xfcf   : > { %v13475_v44 = vcombine.high %v3427_v36, %v3435_v27  ;;  %v13474_v46 = vcombine.low %v3427_v36, %v3435_v27  ;;  %v13476_v52 = vcombine.low %v3428_v39, %v3436_v29  ;;  %v13477_v30 = vcombine.high %v3428_v39, %v3436_v29  ;;  %v3278_v36 = vld [vmem:[#allocation16 + $0x58] sm:$0xff] }
 0xfd0   : > { %v3219_v7 = vadd.f32 %v3216_v5, %v3215_v20  ;;  %v3217_v32 = vmul.f32 %v17546_v24, %v17546_v24  ;;  %v3218_v34 = vmul.f32 %v17549_v25, %v17549_v25  ;;  %v13554_v2 = vcombine.low %v3507_v21, %v3515_v14 }
 0xfd1   : > { %4907 = vmatprep.subr.bf16.mxu1 %v13475_v44  ;;  %4950 = vmatprep.subr.bf16.mxu0 %v13477_v30  ;;  %v13556_v20 = vcombine.low %v3508_v15, %v3516_v17  ;;  %v13557_v5 = vcombine.high %v3508_v15, %v3516_v17  ;;  %v3317_v15 = vld [vmem:[#allocation16 + $0x190] sm:$0xff]  ;;  %v3318_v17 = vld [vmem:[#allocation16 + $0x198] sm:$0xff] }
 0xfd2   : > { %3220 = vadd.xlane.f32.xlu0 %v3219_v7  ;;  %v3222_v8 = vadd.f32 %v3218_v34, %v3217_v32  ;;  %4908 = vmatpush1.bf16.msra.mxu1 %v13474_v46  ;;  %v3269_v7 = vld [vmem:[#allocation16 + $0x10] sm:$0xff]  ;;  %v3270_v34 = vld [vmem:[#allocation16 + $0x18] sm:$0xff] }
 0xfd3   : > { %4951 = vmatpush1.bf16.msra.mxu0 %v13476_v52  ;;  %4909 = vmatprep.subr.bf16.mxu1 %v13491_v28  ;;  %v3277_v32 = vld [vmem:[#allocation16 + $0x50] sm:$0xff]  ;;  %v13320_v39 = vcombine.low %v3270_v34, %v3278_v36  ;;  %v13321_v44 = vcombine.high %v3270_v34, %v3278_v36  ;;  %v3334_v36 = vld [vmem:[#allocation16 + $0x218] sm:$0xff] }
 0xfd4   : > { %4952 = vmatprep.subr.bf16.mxu0 %v13493_v42  ;;  %v13318_v27 = vcombine.low %v3269_v7, %v3277_v32  ;;  %v3333_v34 = vld [vmem:[#allocation16 + $0x210] sm:$0xff] }
 0xfd6   : > { %3223 = vadd.xlane.f32.xlu0 %v3222_v8  ;;  %4910 = vmatpush1.bf16.msra.mxu1 %v13490_v63  ;;  %v13319_v8 = vcombine.high %v3269_v7, %v3277_v32  ;;  %v3239_v63 = vrot.slane %v3200_v26, %v17372_v53 }
 0xfd7   : > { %4953 = vmatpush1.bf16.msra.mxu0 %v13492_v41  ;;  %4911 = vmatprep.subr.bf16.mxu1 %v13507_v45  ;;  %v3243_v41 = vrot.slane %v3200_v26, %v17369_v51  ;;  %v3258_v45 = vrot.slane %v3201_v40, %v17369_v51 }
 0xfd8   : > { %4954 = vmatprep.subr.bf16.mxu0 %v13509_v54 }
 0xfda   : > { %4912 = vmatpush1.bf16.msra.mxu1 %v13506_v59 }
 0xfdb   : > { %4955 = vmatpush1.bf16.msra.mxu0 %v13508_v48  ;;  %4913 = vmatprep.subr.bf16.mxu1 %v13523_v57 }
 0xfdc   : > { %4956 = vmatprep.subr.bf16.mxu0 %v13525_v1  ;;  %v3294_v1 = vld [vmem:[#allocation16 + $0xd8] sm:$0xff] }
 0xfde   : > { %4914 = vmatpush1.bf16.msra.mxu1 %v13522_v60  ;;  %v3293_v60 = vld [vmem:[#allocation16 + $0xd0] sm:$0xff] }
 0xfdf   : > { %4957 = vmatpush1.bf16.msra.mxu0 %v13524_v0  ;;  %4915 = vmatprep.subr.bf16.mxu1 %v13539_v6  ;;  %v3286_v0 = vld [vmem:[#allocation16 + $0x98] sm:$0xff]  ;;  %v13335_v4 = vcombine.high %v3285_v58, %v3293_v60  ;;  %v3309_v6 = vld [vmem:[#allocation16 + $0x150] sm:$0xff] }
 0xfe0   : > { %4958 = vmatprep.subr.bf16.mxu0 %v13541_v13  ;;  %v13337_v49 = vcombine.high %v3286_v0, %v3294_v1  ;;  %v13336_v13 = vcombine.low %v3286_v0, %v3294_v1 }
 0xfe2   : > { %4916 = vmatpush1.bf16.msra.mxu1 %v13538_v11  ;;  %v3310_v11 = vld [vmem:[#allocation16 + $0x158] sm:$0xff] }
 0xfe3   : > { %4959 = vmatpush1.bf16.msra.mxu0 %v13540_v12  ;;  %4917 = vmatprep.subr.bf16.mxu1 %v13555_v16  ;;  %v13334_v12 = vcombine.low %v3285_v58, %v3293_v60  ;;  %v13353_v14 = vcombine.high %v3302_v10, %v3310_v11  ;;  %v3325_v16 = vld [vmem:[#allocation16 + $0x1d0] sm:$0xff] }
 0xfe4   : > { %4960 = vmatprep.subr.bf16.mxu0 %v13557_v5  ;;  %v13352_v5 = vcombine.low %v3302_v10, %v3310_v11  ;;  %v13367_v7 = vcombine.high %v3317_v15, %v3325_v16 }
 0xfe6   : > { %4918 = vmatpush1.bf16.msra.mxu1 %v13554_v2  ;;  %v3326_v2 = vld [vmem:[#allocation16 + $0x1d8] sm:$0xff] }
 0xfe7   : > { %4961 = vmatpush1.bf16.msra.mxu0 %v13556_v20  ;;  %4973 = vmatprep.subr.bf16.mxu1 %v13319_v8  ;;  %v13369_v32 = vcombine.high %v3318_v17, %v3326_v2  ;;  %v3341_v8 = vld [vmem:[#allocation16 + $0x250] sm:$0xff] }
 0xfe8   : > { %5016 = vmatprep.subr.bf16.mxu0 %v13321_v44  ;;  %v13368_v44 = vcombine.low %v3318_v17, %v3326_v2  ;;  %v13382_v26 = vcombine.low %v3333_v34, %v3341_v8 }
0x105f   : > { %v3221_v29 = vpop.xlane.xlu0 %3220 }
0x1060   : > { %v3225_v46 = vmul.f32 0.00390625, %v3221_v29  ;;  %v13383_v29 = vcombine.high %v3333_v34, %v3341_v8  ;;  %v3430_v34 = vld [vmem:[#allocation16 + $0x518] sm:$0xff] }
0x1061   : > { %v3438_v8 = vld [vmem:[#allocation16 + $0x558] sm:$0xff] }
0x1062   : > { %v3227_v52 = vadd.f32 1e-05, %v3225_v46 }
0x1063   : > { %v3224_v30 = vpop.xlane.xlu0 %3223 }
0x1064   : > { %16282 = vrsqrt.f32 %v3227_v52  ;;  %v3226_v31 = vmul.f32 0.00390625, %v3224_v30  ;;  %v3349_v52 = vld [vmem:[#allocation16 + $0x290] sm:$0xff] }
0x1065   : > { %v3357_v30 = vld [vmem:[#allocation16 + $0x2d0] sm:$0xff] }
0x1066   : > { %v3228_v33 = vadd.f32 1e-05, %v3226_v31  ;;  %v3350_v31 = vld [vmem:[#allocation16 + $0x298] sm:$0xff]  ;;  %v13399_v40 = vcombine.high %v3349_v52, %v3357_v30 }
0x1068   : > { %16284 = vrsqrt.f32 %v3228_v33  ;;  %v3358_v33 = vld [vmem:[#allocation16 + $0x2d8] sm:$0xff] }
0x106e   : > { %v16283_v28 = vpop.eup %16282 }
0x106f   : > { %v3231_v42 = vmul.f32 %v16283_v28, %v17540_v18  ;;  %v3232_v43 = vmul.f32 %v16283_v28, %v17543_v19 }
0x1071   : > { %v3246_v47 = vmul.f32 %v3239_v63, %v3231_v42  ;;  %v3247_v59 = vmul.f32 %v3243_v41, %v3232_v43  ;;  %v3373_v42 = vld [vmem:[#allocation16 + $0x350] sm:$0xff]  ;;  %v3366_v43 = vld [vmem:[#allocation16 + $0x318] sm:$0xff] }
0x1072   : > { %v16285_v61 = vpop.eup %16284 }
0x1073   : > { %v3233_v48 = vmul.f32 %v16285_v61, %v17546_v24  ;;  %v3234_v54 = vmul.f32 %v16285_v61, %v17549_v25  ;;  %v17567_v56 = vadd.f32 %v3254_v35, %v3246_v47  ;;  %v17569_v57 = vadd.f32 %v3258_v45, %v3247_v59  ;;  %v3301_v25 = vld [vmem:[#allocation16 + $0x110] sm:$0xff]  ;;  %v3374_v61 = vld [vmem:[#allocation16 + $0x358] sm:$0xff] }
0x1074   : > { %v13351_v21 = vcombine.high %v3301_v25, %v3309_v6  ;;  %v13350_v20 = vcombine.low %v3301_v25, %v3309_v6  ;;  %v13417_v59 = vcombine.high %v3366_v43, %v3374_v61  ;;  %v13416_v60 = vcombine.low %v3366_v43, %v3374_v61  ;;  %v3397_v25 = vld [vmem:[#allocation16 + $0x410] sm:$0xff]  ;;  %v3406_v6 = vld [vmem:[#allocation16 + $0x458] sm:$0xff] }
0x1075   : > { %v3248_v62 = vmul.f32 %v3239_v63, %v3233_v48  ;;  %v3249_v55 = vmul.f32 %v3243_v41, %v3234_v54  ;;  %v13401_v63 = vcombine.high %v3350_v31, %v3358_v33  ;;  %v3365_v41 = vld [vmem:[#allocation16 + $0x310] sm:$0xff] }
0x1076   : > { %v13415_v47 = vcombine.high %v3365_v41, %v3373_v42  ;;  %v3381_v48 = vld [vmem:[#allocation16 + $0x390] sm:$0xff]  ;;  %v13414_v58 = vcombine.low %v3365_v41, %v3373_v42  ;;  %v3462_v41 = vld [vmem:[#allocation16 + $0x618] sm:$0xff] }
0x1077   : > { %v17571_v18 = vadd.f32 %v3254_v35, %v3248_v62  ;;  %v17573_v19 = vadd.f32 %v3258_v45, %v3249_v55  ;;  %v13398_v35 = vcombine.low %v3349_v52, %v3357_v30  ;;  %v13400_v45 = vcombine.low %v3350_v31, %v3358_v33  ;;  %v3389_v54 = vld [vmem:[#allocation16 + $0x3d0] sm:$0xff]  ;;  %v3382_v62 = vld [vmem:[#allocation16 + $0x398] sm:$0xff] }
0x1078   : > { %v3390_v55 = vld [vmem:[#allocation16 + $0x3d8] sm:$0xff]  ;;  %v13431_v0 = vcombine.high %v3381_v48, %v3389_v54  ;;  %v13430_v10 = vcombine.low %v3381_v48, %v3389_v54  ;;  %v13480_v33 = vcombine.low %v3430_v34, %v3438_v8 }
0x1079   : > { %v17577_v3 = vpack.c.bf16 %v17571_v18, %v17567_v56  ;;  %v17581_v24 = vpack.c.bf16 %v17573_v19, %v17569_v57  ;;  %v13433_v1 = vcombine.high %v3382_v62, %v3390_v55  ;;  %v13432_v11 = vcombine.low %v3382_v62, %v3390_v55  ;;  %v3446_v52 = vld [vmem:[#allocation16 + $0x598] sm:$0xff] }
0x107a   : > { %v3454_v30 = vld [vmem:[#allocation16 + $0x5d8] sm:$0xff] }
0x107b   : > { %4919 = vmatprep.mubr.bf16.mxu1 %v17581_v24  ;;  %4962 = vmatprep.mubr.bf16.mxu0 %v17581_v24  ;;  %v3470_v42 = vld [vmem:[#allocation16 + $0x658] sm:$0xff]  ;;  %v13496_v61 = vcombine.low %v3446_v52, %v3454_v30 }
0x107c   : > { %4920 = vmatmul.mubr.bf16.vlgmr.msra.gmra.mrb[48].mxu1 %v17577_v3  ;;  %4963 = vmatmul.mubr.bf16.vlgmr.msra.gmra.mrb[4].mxu0 %v17577_v3  ;;  %v3478_v48 = vld [vmem:[#allocation16 + $0x698] sm:$0xff]  ;;  %v13512_v55 = vcombine.low %v3462_v41, %v3470_v42 }
0x107d   : > { %4974 = vmatpush1.bf16.msra.mxu1 %v13318_v27  ;;  %5017 = vmatpush1.bf16.msra.mxu0 %v13320_v39  ;;  %v3342_v27 = vld [vmem:[#allocation16 + $0x258] sm:$0xff]  ;;  %v13366_v39 = vcombine.low %v3317_v15, %v3325_v16 }
0x107e   : > { %5005 = vmatprep.mubr.bf16.mxu1 %v17581_v24  ;;  %5048 = vmatprep.mubr.bf16.mxu0 %v17581_v24  ;;  %v13385_v46 = vcombine.high %v3334_v36, %v3342_v27  ;;  %v13384_v28 = vcombine.low %v3334_v36, %v3342_v27  ;;  %v3414_v15 = vld [vmem:[#allocation16 + $0x498] sm:$0xff] }
0x107f   : > { %4975 = vmatprep.subr.bf16.mxu1 %v13335_v4  ;;  %5018 = vmatprep.subr.bf16.mxu0 %v13337_v49  ;;  %v3405_v4 = vld [vmem:[#allocation16 + $0x450] sm:$0xff]  ;;  %v3398_v49 = vld [vmem:[#allocation16 + $0x418] sm:$0xff] }
0x1080   : > { %v3422_v16 = vld [vmem:[#allocation16 + $0x4d8] sm:$0xff]  ;;  %v13446_v17 = vcombine.low %v3397_v25, %v3405_v4  ;;  %v13448_v2 = vcombine.low %v3398_v49, %v3406_v6 }
0x1081   : > { %4976 = vmatpush1.bf16.msra.mxu1 %v13334_v12  ;;  %5019 = vmatpush1.bf16.msra.mxu0 %v13336_v13  ;;  %v13447_v12 = vcombine.high %v3397_v25, %v3405_v4  ;;  %v13449_v13 = vcombine.high %v3398_v49, %v3406_v6  ;;  %v13464_v27 = vcombine.low %v3414_v15, %v3422_v16  ;;  %v3486_v54 = vld [vmem:[#allocation16 + $0x6d8] sm:$0xff] }
0x1082   : > { %4977 = vmatprep.subr.bf16.mxu1 %v13351_v21  ;;  %5020 = vmatprep.subr.bf16.mxu0 %v13353_v14  ;;  %v3413_v21 = vld [vmem:[#allocation16 + $0x490] sm:$0xff]  ;;  %v3494_v25 = vld [vmem:[#allocation16 + $0x718] sm:$0xff]  ;;  %v13528_v6 = vcombine.low %v3478_v48, %v3486_v54 }
0x1083   : > { %v3421_v14 = vld [vmem:[#allocation16 + $0x4d0] sm:$0xff]  ;;  %v3502_v4 = vld [vmem:[#allocation16 + $0x758] sm:$0xff] }
0x1084   : > { %v13462_v36 = vcombine.low %v3413_v21, %v3421_v14 }
0x1085   : > { %4978 = vmatpush1.bf16.msra.mxu1 %v13350_v20  ;;  %5021 = vmatpush1.bf16.msra.mxu0 %v13352_v5  ;;  %v13463_v20 = vcombine.high %v3413_v21, %v3421_v14  ;;  %v13465_v5 = vcombine.high %v3414_v15, %v3422_v16  ;;  %v3510_v21 = vld [vmem:[#allocation16 + $0x798] sm:$0xff]  ;;  %v13544_v16 = vcombine.low %v3494_v25, %v3502_v4 }
0x1086   : > { %4979 = vmatprep.subr.bf16.mxu1 %v13367_v7  ;;  %5022 = vmatprep.subr.bf16.mxu0 %v13369_v32  ;;  %v3429_v7 = vld [vmem:[#allocation16 + $0x510] sm:$0xff]  ;;  %v3518_v14 = vld [vmem:[#allocation16 + $0x7d8] sm:$0xff] }
0x1087   : > { %v3437_v32 = vld [vmem:[#allocation16 + $0x550] sm:$0xff] }
0x1088   : > { %v13478_v31 = vcombine.low %v3429_v7, %v3437_v32 }
0x1089   : > { %4980 = vmatpush1.bf16.msra.mxu1 %v13366_v39  ;;  %5023 = vmatpush1.bf16.msra.mxu0 %v13368_v44  ;;  %v13479_v39 = vcombine.high %v3429_v7, %v3437_v32  ;;  %v13481_v44 = vcombine.high %v3430_v34, %v3438_v8  ;;  %v3272_v7 = vld [vmem:[#allocation16 + $0x28] sm:$0xff]  ;;  %v13560_v8 = vcombine.low %v3510_v21, %v3518_v14 }
0x108a   : > { %4981 = vmatprep.subr.bf16.mxu1 %v13383_v29  ;;  %5024 = vmatprep.subr.bf16.mxu0 %v13385_v46  ;;  %v3445_v29 = vld [vmem:[#allocation16 + $0x590] sm:$0xff]  ;;  %v3280_v32 = vld [vmem:[#allocation16 + $0x68] sm:$0xff] }
0x108b   : > { %v3453_v46 = vld [vmem:[#allocation16 + $0x5d0] sm:$0xff] }
0x108c   : > { %v13494_v43 = vcombine.low %v3445_v29, %v3453_v46 }
0x108d   : > { %4982 = vmatpush1.bf16.msra.mxu1 %v13382_v26  ;;  %5025 = vmatpush1.bf16.msra.mxu0 %v13384_v28  ;;  %v13495_v26 = vcombine.high %v3445_v29, %v3453_v46  ;;  %v13497_v28 = vcombine.high %v3446_v52, %v3454_v30  ;;  %v3288_v29 = vld [vmem:[#allocation16 + $0xa8] sm:$0xff]  ;;  %v13324_v30 = vcombine.low %v3272_v7, %v3280_v32 }
0x108e   : > { %4983 = vmatprep.subr.bf16.mxu1 %v13399_v40  ;;  %5026 = vmatprep.subr.bf16.mxu0 %v13401_v63  ;;  %v3461_v40 = vld [vmem:[#allocation16 + $0x610] sm:$0xff]  ;;  %v3296_v46 = vld [vmem:[#allocation16 + $0xe8] sm:$0xff] }
0x108f   : > { %v3469_v63 = vld [vmem:[#allocation16 + $0x650] sm:$0xff] }
0x1090   : > { %v13510_v62 = vcombine.low %v3461_v40, %v3469_v63 }
0x1091   : > { %4984 = vmatpush1.bf16.msra.mxu1 %v13398_v35  ;;  %5027 = vmatpush1.bf16.msra.mxu0 %v13400_v45  ;;  %v13511_v35 = vcombine.high %v3461_v40, %v3469_v63  ;;  %v13513_v45 = vcombine.high %v3462_v41, %v3470_v42  ;;  %v3304_v40 = vld [vmem:[#allocation16 + $0x128] sm:$0xff]  ;;  %v13340_v42 = vcombine.low %v3288_v29, %v3296_v46 }
0x1092   : > { %4985 = vmatprep.subr.bf16.mxu1 %v13415_v47  ;;  %5028 = vmatprep.subr.bf16.mxu0 %v13417_v59  ;;  %v3477_v47 = vld [vmem:[#allocation16 + $0x690] sm:$0xff]  ;;  %v3312_v63 = vld [vmem:[#allocation16 + $0x168] sm:$0xff] }
0x1093   : > { %v3485_v59 = vld [vmem:[#allocation16 + $0x6d0] sm:$0xff] }
0x1094   : > { %v13526_v49 = vcombine.low %v3477_v47, %v3485_v59 }
0x1095   : > { %4986 = vmatpush1.bf16.msra.mxu1 %v13414_v58  ;;  %5029 = vmatpush1.bf16.msra.mxu0 %v13416_v60  ;;  %v13527_v58 = vcombine.high %v3477_v47, %v3485_v59  ;;  %v13529_v60 = vcombine.high %v3478_v48, %v3486_v54  ;;  %v3320_v47 = vld [vmem:[#allocation16 + $0x1a8] sm:$0xff]  ;;  %v13356_v54 = vcombine.low %v3304_v40, %v3312_v63 }
0x1096   : > { %4987 = vmatprep.subr.bf16.mxu1 %v13431_v0  ;;  %5030 = vmatprep.subr.bf16.mxu0 %v13433_v1  ;;  %v3493_v0 = vld [vmem:[#allocation16 + $0x710] sm:$0xff]  ;;  %v3328_v59 = vld [vmem:[#allocation16 + $0x1e8] sm:$0xff] }
0x1097   : > { %v3501_v1 = vld [vmem:[#allocation16 + $0x750] sm:$0xff] }
0x1098   : > { %v13542_v15 = vcombine.low %v3493_v0, %v3501_v1 }
0x1099   : > { %4988 = vmatpush1.bf16.msra.mxu1 %v13430_v10  ;;  %5031 = vmatpush1.bf16.msra.mxu0 %v13432_v11  ;;  %v13543_v10 = vcombine.high %v3493_v0, %v3501_v1  ;;  %v13545_v11 = vcombine.high %v3494_v25, %v3502_v4  ;;  %v3336_v0 = vld [vmem:[#allocation16 + $0x228] sm:$0xff]  ;;  %v13372_v4 = vcombine.low %v3320_v47, %v3328_v59 }
0x109a   : > { %4989 = vmatprep.subr.bf16.mxu1 %v13447_v12  ;;  %5032 = vmatprep.subr.bf16.mxu0 %v13449_v13  ;;  %v3509_v12 = vld [vmem:[#allocation16 + $0x790] sm:$0xff]  ;;  %v3344_v1 = vld [vmem:[#allocation16 + $0x268] sm:$0xff] }
0x109b   : > { %v3517_v13 = vld [vmem:[#allocation16 + $0x7d0] sm:$0xff] }
0x109c   : > { %v13558_v34 = vcombine.low %v3509_v12, %v3517_v13 }
0x109d   : > { %4990 = vmatpush1.bf16.msra.mxu1 %v13446_v17  ;;  %5033 = vmatpush1.bf16.msra.mxu0 %v13448_v2  ;;  %v13559_v17 = vcombine.high %v3509_v12, %v3517_v13  ;;  %v13561_v2 = vcombine.high %v3510_v21, %v3518_v14  ;;  %v3352_v12 = vld [vmem:[#allocation16 + $0x2a8] sm:$0xff]  ;;  %v13388_v14 = vcombine.low %v3336_v0, %v3344_v1 }
0x109e   : > { %4991 = vmatprep.subr.bf16.mxu1 %v13463_v20  ;;  %5034 = vmatprep.subr.bf16.mxu0 %v13465_v5  ;;  %v3271_v20 = vld [vmem:[#allocation16 + $0x20] sm:$0xff]  ;;  %v3360_v13 = vld [vmem:[#allocation16 + $0x2e8] sm:$0xff] }
0x109f   : > { %v3279_v5 = vld [vmem:[#allocation16 + $0x60] sm:$0xff] }
0x10a0   : > { %v13322_v52 = vcombine.low %v3271_v20, %v3279_v5 }
0x10a1   : > { %4992 = vmatpush1.bf16.msra.mxu1 %v13462_v36  ;;  %5035 = vmatpush1.bf16.msra.mxu0 %v13464_v27  ;;  %v13323_v36 = vcombine.high %v3271_v20, %v3279_v5  ;;  %v13325_v27 = vcombine.high %v3272_v7, %v3280_v32  ;;  %v3368_v20 = vld [vmem:[#allocation16 + $0x328] sm:$0xff]  ;;  %v13404_v32 = vcombine.low %v3352_v12, %v3360_v13 }
0x10a2   : > { %4993 = vmatprep.subr.bf16.mxu1 %v13479_v39  ;;  %5036 = vmatprep.subr.bf16.mxu0 %v13481_v44  ;;  %v3287_v39 = vld [vmem:[#allocation16 + $0xa0] sm:$0xff]  ;;  %v3376_v5 = vld [vmem:[#allocation16 + $0x368] sm:$0xff] }
0x10a3   : > { %v3295_v44 = vld [vmem:[#allocation16 + $0xe0] sm:$0xff] }
0x10a4   : > { %v13338_v41 = vcombine.low %v3287_v39, %v3295_v44 }
0x10a5   : > { %4994 = vmatpush1.bf16.msra.mxu1 %v13478_v31  ;;  %5037 = vmatpush1.bf16.msra.mxu0 %v13480_v33  ;;  %v13339_v31 = vcombine.high %v3287_v39, %v3295_v44  ;;  %v13341_v33 = vcombine.high %v3288_v29, %v3296_v46  ;;  %v3384_v39 = vld [vmem:[#allocation16 + $0x3a8] sm:$0xff]  ;;  %v13420_v46 = vcombine.low %v3368_v20, %v3376_v5 }
0x10a6   : > { %4995 = vmatprep.subr.bf16.mxu1 %v13495_v26  ;;  %5038 = vmatprep.subr.bf16.mxu0 %v13497_v28  ;;  %v3303_v26 = vld [vmem:[#allocation16 + $0x120] sm:$0xff]  ;;  %v3392_v44 = vld [vmem:[#allocation16 + $0x3e8] sm:$0xff] }
0x10a7   : > { %v3311_v28 = vld [vmem:[#allocation16 + $0x160] sm:$0xff] }
0x10a8   : > { %v13354_v48 = vcombine.low %v3303_v26, %v3311_v28 }
0x10a9   : > { %4996 = vmatpush1.bf16.msra.mxu1 %v13494_v43  ;;  %5039 = vmatpush1.bf16.msra.mxu0 %v13496_v61  ;;  %v13355_v43 = vcombine.high %v3303_v26, %v3311_v28  ;;  %v13357_v61 = vcombine.high %v3304_v40, %v3312_v63  ;;  %v3400_v26 = vld [vmem:[#allocation16 + $0x428] sm:$0xff]  ;;  %v13436_v63 = vcombine.low %v3384_v39, %v3392_v44 }
0x10aa   : > { %4997 = vmatprep.subr.bf16.mxu1 %v13511_v35  ;;  %5040 = vmatprep.subr.bf16.mxu0 %v13513_v45  ;;  %v3319_v35 = vld [vmem:[#allocation16 + $0x1a0] sm:$0xff]  ;;  %v3408_v28 = vld [vmem:[#allocation16 + $0x468] sm:$0xff] }
0x10ab   : > { %v3327_v45 = vld [vmem:[#allocation16 + $0x1e0] sm:$0xff] }
0x10ac   : > { %v13370_v25 = vcombine.low %v3319_v35, %v3327_v45 }
0x10ad   : > { %4998 = vmatpush1.bf16.msra.mxu1 %v13510_v62  ;;  %5041 = vmatpush1.bf16.msra.mxu0 %v13512_v55  ;;  %v13371_v62 = vcombine.high %v3319_v35, %v3327_v45  ;;  %v13373_v55 = vcombine.high %v3320_v47, %v3328_v59  ;;  %v3416_v35 = vld [vmem:[#allocation16 + $0x4a8] sm:$0xff]  ;;  %v13452_v59 = vcombine.low %v3400_v26, %v3408_v28 }
0x10ae   : > { %4999 = vmatprep.subr.bf16.mxu1 %v13527_v58  ;;  %5042 = vmatprep.subr.bf16.mxu0 %v13529_v60  ;;  %v3335_v58 = vld [vmem:[#allocation16 + $0x220] sm:$0xff]  ;;  %v3424_v45 = vld [vmem:[#allocation16 + $0x4e8] sm:$0xff] }
0x10af   : > { %v3343_v60 = vld [vmem:[#allocation16 + $0x260] sm:$0xff] }
0x10b0   : > { %v13386_v21 = vcombine.low %v3335_v58, %v3343_v60 }
0x10b1   : > { %5000 = vmatpush1.bf16.msra.mxu1 %v13526_v49  ;;  %5043 = vmatpush1.bf16.msra.mxu0 %v13528_v6  ;;  %v13387_v49 = vcombine.high %v3335_v58, %v3343_v60  ;;  %v13389_v6 = vcombine.high %v3336_v0, %v3344_v1  ;;  %v3432_v58 = vld [vmem:[#allocation16 + $0x528] sm:$0xff]  ;;  %v13468_v1 = vcombine.low %v3416_v35, %v3424_v45 }
0x10b2   : > { %5001 = vmatprep.subr.bf16.mxu1 %v13543_v10  ;;  %5044 = vmatprep.subr.bf16.mxu0 %v13545_v11  ;;  %v3351_v10 = vld [vmem:[#allocation16 + $0x2a0] sm:$0xff]  ;;  %v3440_v60 = vld [vmem:[#allocation16 + $0x568] sm:$0xff] }
0x10b3   : > { %v3359_v11 = vld [vmem:[#allocation16 + $0x2e0] sm:$0xff] }
0x10b4   : > { %v13402_v7 = vcombine.low %v3351_v10, %v3359_v11 }
0x10b5   : > { %5002 = vmatpush1.bf16.msra.mxu1 %v13542_v15  ;;  %5045 = vmatpush1.bf16.msra.mxu0 %v13544_v16  ;;  %v13403_v15 = vcombine.high %v3351_v10, %v3359_v11  ;;  %v13405_v16 = vcombine.high %v3352_v12, %v3360_v13  ;;  %v3448_v10 = vld [vmem:[#allocation16 + $0x5a8] sm:$0xff]  ;;  %v13484_v13 = vcombine.low %v3432_v58, %v3440_v60 }
0x10b6   : > { %5003 = vmatprep.subr.bf16.mxu1 %v13559_v17  ;;  %5046 = vmatprep.subr.bf16.mxu0 %v13561_v2  ;;  %v3367_v17 = vld [vmem:[#allocation16 + $0x320] sm:$0xff]  ;;  %v3456_v11 = vld [vmem:[#allocation16 + $0x5e8] sm:$0xff] }
0x10b7   : > { %v3375_v2 = vld [vmem:[#allocation16 + $0x360] sm:$0xff] }
0x10b8   : > { %v13418_v29 = vcombine.low %v3367_v17, %v3375_v2 }
0x10b9   : > { %5004 = vmatpush1.bf16.msra.mxu1 %v13558_v34  ;;  %5047 = vmatpush1.bf16.msra.mxu0 %v13560_v8  ;;  %v13419_v34 = vcombine.high %v3367_v17, %v3375_v2  ;;  %v13421_v8 = vcombine.high %v3368_v20, %v3376_v5  ;;  %v3464_v17 = vld [vmem:[#allocation16 + $0x628] sm:$0xff]  ;;  %v13500_v5 = vcombine.low %v3448_v10, %v3456_v11 }
0x10ba   : > { %5059 = vmatprep.subr.bf16.mxu1 %v13323_v36  ;;  %5102 = vmatprep.subr.bf16.mxu0 %v13325_v27  ;;  %v3383_v36 = vld [vmem:[#allocation16 + $0x3a0] sm:$0xff]  ;;  %v3472_v2 = vld [vmem:[#allocation16 + $0x668] sm:$0xff] }
0x10bb   : > { %v3391_v27 = vld [vmem:[#allocation16 + $0x3e0] sm:$0xff] }
0x10bc   : > { %5006 = vmatmul.mubr.bf16.vlgmr.msra.gmra.mrb[52].mxu1 %v17577_v3  ;;  %5049 = vmatmul.mubr.bf16.vlgmr.msra.gmra.mrb[8].mxu0 %v17577_v3  ;;  %v13434_v40 = vcombine.low %v3383_v36, %v3391_v27 }
0x10bd   : > { %5060 = vmatpush1.bf16.msra.mxu1 %v13322_v52  ;;  %5091 = vmatprep.mubr.bf16.mxu1 %v17581_v24  ;;  %v13435_v52 = vcombine.high %v3383_v36, %v3391_v27  ;;  %v3480_v36 = vld [vmem:[#allocation16 + $0x6a8] sm:$0xff] }
0x10be   : > { %5103 = vmatpush1.bf16.msra.mxu0 %v13324_v30  ;;  %5134 = vmatprep.mubr.bf16.mxu0 %v17581_v24  ;;  %v13437_v30 = vcombine.high %v3384_v39, %v3392_v44  ;;  %v3488_v27 = vld [vmem:[#allocation16 + $0x6e8] sm:$0xff]  ;;  %v13516_v44 = vcombine.low %v3464_v17, %v3472_v2 }
0x10bf   : > { %5061 = vmatprep.subr.bf16.mxu1 %v13339_v31  ;;  %5104 = vmatprep.subr.bf16.mxu0 %v13341_v33  ;;  %v3399_v31 = vld [vmem:[#allocation16 + $0x420] sm:$0xff] }
0x10c0   : > { %v3407_v33 = vld [vmem:[#allocation16 + $0x460] sm:$0xff] }
0x10c1   : > { %5062 = vmatpush1.bf16.msra.mxu1 %v13338_v41  ;;  %v13451_v41 = vcombine.high %v3399_v31, %v3407_v33  ;;  %v13450_v47 = vcombine.low %v3399_v31, %v3407_v33  ;;  %v3496_v31 = vld [vmem:[#allocation16 + $0x728] sm:$0xff] }
0x10c2   : > { %5105 = vmatpush1.bf16.msra.mxu0 %v13340_v42  ;;  %5063 = vmatprep.subr.bf16.mxu1 %v13355_v43  ;;  %v13453_v42 = vcombine.high %v3400_v26, %v3408_v28  ;;  %v3415_v43 = vld [vmem:[#allocation16 + $0x4a0] sm:$0xff]  ;;  %v3504_v33 = vld [vmem:[#allocation16 + $0x768] sm:$0xff]  ;;  %v13532_v28 = vcombine.low %v3480_v36, %v3488_v27 }
0x10c3   : > { %5106 = vmatprep.subr.bf16.mxu0 %v13357_v61  ;;  %v3423_v61 = vld [vmem:[#allocation16 + $0x4e0] sm:$0xff] }
0x10c4   : > { %v13466_v0 = vcombine.low %v3415_v43, %v3423_v61 }
0x10c5   : > { %5064 = vmatpush1.bf16.msra.mxu1 %v13354_v48  ;;  %v13467_v48 = vcombine.high %v3415_v43, %v3423_v61  ;;  %v3512_v43 = vld [vmem:[#allocation16 + $0x7a8] sm:$0xff] }
0x10c6   : > { %5107 = vmatpush1.bf16.msra.mxu0 %v13356_v54  ;;  %5065 = vmatprep.subr.bf16.mxu1 %v13371_v62  ;;  %v13469_v54 = vcombine.high %v3416_v35, %v3424_v45  ;;  %v3431_v62 = vld [vmem:[#allocation16 + $0x520] sm:$0xff]  ;;  %v3520_v61 = vld [vmem:[#allocation16 + $0x7e8] sm:$0xff]  ;;  %v13548_v45 = vcombine.low %v3496_v31, %v3504_v33 }
0x10c7   : > { %5108 = vmatprep.subr.bf16.mxu0 %v13373_v55  ;;  %v3439_v55 = vld [vmem:[#allocation16 + $0x560] sm:$0xff] }
0x10c8   : > { %v13482_v12 = vcombine.low %v3431_v62, %v3439_v55 }
0x10c9   : > { %5066 = vmatpush1.bf16.msra.mxu1 %v13370_v25  ;;  %v13483_v25 = vcombine.high %v3431_v62, %v3439_v55  ;;  %v3274_v62 = vld [vmem:[#allocation16 + $0x38] sm:$0xff] }
0x10ca   : > { %5109 = vmatpush1.bf16.msra.mxu0 %v13372_v4  ;;  %5067 = vmatprep.subr.bf16.mxu1 %v13387_v49  ;;  %v13485_v4 = vcombine.high %v3432_v58, %v3440_v60  ;;  %v3447_v49 = vld [vmem:[#allocation16 + $0x5a0] sm:$0xff]  ;;  %v3282_v55 = vld [vmem:[#allocation16 + $0x78] sm:$0xff]  ;;  %v13564_v60 = vcombine.low %v3512_v43, %v3520_v61 }
0x10cb   : > { %5110 = vmatprep.subr.bf16.mxu0 %v13389_v6  ;;  %v3455_v6 = vld [vmem:[#allocation16 + $0x5e0] sm:$0xff] }
0x10cc   : > { %v13498_v20 = vcombine.low %v3447_v49, %v3455_v6 }
0x10cd   : > { %5068 = vmatpush1.bf16.msra.mxu1 %v13386_v21  ;;  %v13499_v21 = vcombine.high %v3447_v49, %v3455_v6  ;;  %v3290_v6 = vld [vmem:[#allocation16 + $0xb8] sm:$0xff] }
0x10ce   : > { %5111 = vmatpush1.bf16.msra.mxu0 %v13388_v14  ;;  %5069 = vmatprep.subr.bf16.mxu1 %v13403_v15  ;;  %v13501_v14 = vcombine.high %v3448_v10, %v3456_v11  ;;  %v3463_v15 = vld [vmem:[#allocation16 + $0x620] sm:$0xff]  ;;  %v3298_v10 = vld [vmem:[#allocation16 + $0xf8] sm:$0xff]  ;;  %v13328_v11 = vcombine.low %v3274_v62, %v3282_v55 }
0x10cf   : > { %5112 = vmatprep.subr.bf16.mxu0 %v13405_v16  ;;  %v3471_v16 = vld [vmem:[#allocation16 + $0x660] sm:$0xff] }
0x10d0   : > { %v13514_v39 = vcombine.low %v3463_v15, %v3471_v16 }
0x10d1   : > { %5070 = vmatpush1.bf16.msra.mxu1 %v13402_v7  ;;  %v13515_v7 = vcombine.high %v3463_v15, %v3471_v16  ;;  %v3306_v15 = vld [vmem:[#allocation16 + $0x138] sm:$0xff] }
0x10d2   : > { %5113 = vmatpush1.bf16.msra.mxu0 %v13404_v32  ;;  %5071 = vmatprep.subr.bf16.mxu1 %v13419_v34  ;;  %v13517_v32 = vcombine.high %v3464_v17, %v3472_v2  ;;  %v3479_v34 = vld [vmem:[#allocation16 + $0x6a0] sm:$0xff]  ;;  %v3314_v16 = vld [vmem:[#allocation16 + $0x178] sm:$0xff]  ;;  %v13344_v2 = vcombine.low %v3290_v6, %v3298_v10 }
0x10d3   : > { %5114 = vmatprep.subr.bf16.mxu0 %v13421_v8  ;;  %v3487_v8 = vld [vmem:[#allocation16 + $0x6e0] sm:$0xff] }
0x10d4   : > { %v13530_v26 = vcombine.low %v3479_v34, %v3487_v8 }
0x10d5   : > { %5072 = vmatpush1.bf16.msra.mxu1 %v13418_v29  ;;  %v13531_v29 = vcombine.high %v3479_v34, %v3487_v8  ;;  %v3322_v34 = vld [vmem:[#allocation16 + $0x1b8] sm:$0xff] }
0x10d6   : > { %5115 = vmatpush1.bf16.msra.mxu0 %v13420_v46  ;;  %5073 = vmatprep.subr.bf16.mxu1 %v13435_v52  ;;  %v13533_v46 = vcombine.high %v3480_v36, %v3488_v27  ;;  %v3495_v52 = vld [vmem:[#allocation16 + $0x720] sm:$0xff]  ;;  %v3330_v8 = vld [vmem:[#allocation16 + $0x1f8] sm:$0xff]  ;;  %v13360_v27 = vcombine.low %v3306_v15, %v3314_v16 }
0x10d7   : > { %5116 = vmatprep.subr.bf16.mxu0 %v13437_v30  ;;  %v3503_v30 = vld [vmem:[#allocation16 + $0x760] sm:$0xff] }
0x10d8   : > { %v13546_v35 = vcombine.low %v3495_v52, %v3503_v30 }
0x10d9   : > { %5074 = vmatpush1.bf16.msra.mxu1 %v13434_v40  ;;  %v13547_v40 = vcombine.high %v3495_v52, %v3503_v30  ;;  %v3338_v52 = vld [vmem:[#allocation16 + $0x238] sm:$0xff] }
0x10da   : > { %5117 = vmatpush1.bf16.msra.mxu0 %v13436_v63  ;;  %5075 = vmatprep.subr.bf16.mxu1 %v13451_v41  ;;  %v13549_v63 = vcombine.high %v3496_v31, %v3504_v33  ;;  %v3511_v41 = vld [vmem:[#allocation16 + $0x7a0] sm:$0xff]  ;;  %v3346_v30 = vld [vmem:[#allocation16 + $0x278] sm:$0xff]  ;;  %v13376_v31 = vcombine.low %v3322_v34, %v3330_v8 }
0x10db   : > { %5118 = vmatprep.subr.bf16.mxu0 %v13453_v42  ;;  %v3519_v42 = vld [vmem:[#allocation16 + $0x7e0] sm:$0xff] }
0x10dc   : > { %v13562_v58 = vcombine.low %v3511_v41, %v3519_v42 }
0x10dd   : > { %5076 = vmatpush1.bf16.msra.mxu1 %v13450_v47  ;;  %v13563_v47 = vcombine.high %v3511_v41, %v3519_v42  ;;  %v3362_v41 = vld [vmem:[#allocation16 + $0x2f8] sm:$0xff] }
0x10de   : > { %5119 = vmatpush1.bf16.msra.mxu0 %v13452_v59  ;;  %5077 = vmatprep.subr.bf16.mxu1 %v13467_v48  ;;  %v13565_v59 = vcombine.high %v3512_v43, %v3520_v61  ;;  %v3273_v48 = vld [vmem:[#allocation16 + $0x30] sm:$0xff]  ;;  %v13392_v43 = vcombine.low %v3338_v52, %v3346_v30 }
0x10df   : > { %5120 = vmatprep.subr.bf16.mxu0 %v13469_v54  ;;  %v3281_v54 = vld [vmem:[#allocation16 + $0x70] sm:$0xff] }
0x10e0   : > { %v13326_v49 = vcombine.low %v3273_v48, %v3281_v54 }
0x10e1   : > { %5078 = vmatpush1.bf16.msra.mxu1 %v13466_v0  ;;  %v13327_v0 = vcombine.high %v3273_v48, %v3281_v54  ;;  %v3378_v48 = vld [vmem:[#allocation16 + $0x378] sm:$0xff] }
0x10e2   : > { %5121 = vmatpush1.bf16.msra.mxu0 %v13468_v1  ;;  %5079 = vmatprep.subr.bf16.mxu1 %v13483_v25  ;;  %v13329_v1 = vcombine.high %v3274_v62, %v3282_v55  ;;  %v3289_v25 = vld [vmem:[#allocation16 + $0xb0] sm:$0xff] }
0x10e3   : > { %5122 = vmatprep.subr.bf16.mxu0 %v13485_v4  ;;  %v3297_v4 = vld [vmem:[#allocation16 + $0xf0] sm:$0xff] }
0x10e4   : > { %v13342_v17 = vcombine.low %v3289_v25, %v3297_v4 }
0x10e5   : > { %5080 = vmatpush1.bf16.msra.mxu1 %v13482_v12  ;;  %v13343_v12 = vcombine.high %v3289_v25, %v3297_v4  ;;  %v3394_v25 = vld [vmem:[#allocation16 + $0x3f8] sm:$0xff] }
0x10e6   : > { %5123 = vmatpush1.bf16.msra.mxu0 %v13484_v13  ;;  %5081 = vmatprep.subr.bf16.mxu1 %v13499_v21  ;;  %v3305_v13 = vld [vmem:[#allocation16 + $0x130] sm:$0xff] }
0x10e7   : > { %5124 = vmatprep.subr.bf16.mxu0 %v13501_v14  ;;  %v3313_v21 = vld [vmem:[#allocation16 + $0x170] sm:$0xff]  ;;  %v13345_v14 = vcombine.high %v3290_v6, %v3298_v10 }
0x10e8   : > { %v13358_v36 = vcombine.low %v3305_v13, %v3313_v21 }
0x10e9   : > { %5082 = vmatpush1.bf16.msra.mxu1 %v13498_v20  ;;  %v13359_v20 = vcombine.high %v3305_v13, %v3313_v21  ;;  %v3402_v13 = vld [vmem:[#allocation16 + $0x438] sm:$0xff] }
0x10ea   : > { %5125 = vmatpush1.bf16.msra.mxu0 %v13500_v5  ;;  %5083 = vmatprep.subr.bf16.mxu1 %v13515_v7  ;;  %v13361_v5 = vcombine.high %v3306_v15, %v3314_v16  ;;  %v3321_v7 = vld [vmem:[#allocation16 + $0x1b0] sm:$0xff]  ;;  %v3410_v21 = vld [vmem:[#allocation16 + $0x478] sm:$0xff] }
0x10eb   : > { %5126 = vmatprep.subr.bf16.mxu0 %v13517_v32  ;;  %v3329_v32 = vld [vmem:[#allocation16 + $0x1f0] sm:$0xff] }
0x10ed   : > { %5084 = vmatpush1.bf16.msra.mxu1 %v13514_v39  ;;  %v13375_v39 = vcombine.high %v3321_v7, %v3329_v32 }
0x10ee   : > { %5127 = vmatpush1.bf16.msra.mxu0 %v13516_v44  ;;  %5085 = vmatprep.subr.bf16.mxu1 %v13531_v29  ;;  %v13377_v44 = vcombine.high %v3322_v34, %v3330_v8  ;;  %v3337_v29 = vld [vmem:[#allocation16 + $0x230] sm:$0xff]  ;;  %v13456_v34 = vcombine.low %v3402_v13, %v3410_v21 }
0x10ef   : > { %5128 = vmatprep.subr.bf16.mxu0 %v13533_v46  ;;  %v3345_v46 = vld [vmem:[#allocation16 + $0x270] sm:$0xff] }
0x10f0   : > { %v13391_v33 = vcombine.high %v3337_v29, %v3345_v46  ;;  %v13390_v42 = vcombine.low %v3337_v29, %v3345_v46  ;;  %v3442_v29 = vld [vmem:[#allocation16 + $0x578] sm:$0xff] }
0x10f1   : > { %5086 = vmatpush1.bf16.msra.mxu1 %v13530_v26  ;;  %v13393_v26 = vcombine.high %v3338_v52, %v3346_v30 }
0x10f2   : > { %5129 = vmatpush1.bf16.msra.mxu0 %v13532_v28  ;;  %5087 = vmatprep.subr.bf16.mxu1 %v13547_v40  ;;  %v3353_v28 = vld [vmem:[#allocation16 + $0x2b0] sm:$0xff] }
0x10f3   : > { %5130 = vmatprep.subr.bf16.mxu0 %v13549_v63  ;;  %v3361_v40 = vld [vmem:[#allocation16 + $0x2f0] sm:$0xff]  ;;  %v3354_v63 = vld [vmem:[#allocation16 + $0x2b8] sm:$0xff] }
0x10f4   : > { %v13407_v61 = vcombine.high %v3353_v28, %v3361_v40  ;;  %v13406_v54 = vcombine.low %v3353_v28, %v3361_v40  ;;  %v13408_v62 = vcombine.low %v3354_v63, %v3362_v41  ;;  %v3458_v28 = vld [vmem:[#allocation16 + $0x5f8] sm:$0xff] }
0x10f5   : > { %5088 = vmatpush1.bf16.msra.mxu1 %v13546_v35  ;;  %v13409_v35 = vcombine.high %v3354_v63, %v3362_v41 }
0x10f6   : > { %5131 = vmatpush1.bf16.msra.mxu0 %v13548_v45  ;;  %5089 = vmatprep.subr.bf16.mxu1 %v13563_v47  ;;  %v3369_v45 = vld [vmem:[#allocation16 + $0x330] sm:$0xff] }
0x10f7   : > { %5132 = vmatprep.subr.bf16.mxu0 %v13565_v59  ;;  %v3377_v47 = vld [vmem:[#allocation16 + $0x370] sm:$0xff]  ;;  %v3370_v59 = vld [vmem:[#allocation16 + $0x338] sm:$0xff] }
0x10f8   : > { %v13423_v55 = vcombine.high %v3369_v45, %v3377_v47  ;;  %v13422_v4 = vcombine.low %v3369_v45, %v3377_v47  ;;  %v3474_v45 = vld [vmem:[#allocation16 + $0x678] sm:$0xff] }
0x10f9   : > { %5090 = vmatpush1.bf16.msra.mxu1 %v13562_v58  ;;  %v13425_v58 = vcombine.high %v3370_v59, %v3378_v48 }
0x10fa   : > { %5133 = vmatpush1.bf16.msra.mxu0 %v13564_v60  ;;  %5145 = vmatprep.subr.bf16.mxu1 %v13327_v0  ;;  %v3385_v60 = vld [vmem:[#allocation16 + $0x3b0] sm:$0xff] }
0x10fb   : > { %5188 = vmatprep.subr.bf16.mxu0 %v13329_v1  ;;  %v3393_v0 = vld [vmem:[#allocation16 + $0x3f0] sm:$0xff]  ;;  %v3386_v1 = vld [vmem:[#allocation16 + $0x3b8] sm:$0xff] }
0x10fc   : > { %5092 = vmatmul.mubr.bf16.vlgmr.msra.gmra.mrb[56].mxu1 %v17577_v3  ;;  %v13439_v6 = vcombine.high %v3385_v60, %v3393_v0  ;;  %v13441_v10 = vcombine.high %v3386_v1, %v3394_v25  ;;  %v13440_v15 = vcombine.low %v3386_v1, %v3394_v25 }
0x10fd   : > { %5135 = vmatmul.mubr.bf16.vlgmr.msra.gmra.mrb[12].mxu0 %v17577_v3  ;;  %5146 = vmatpush1.bf16.msra.mxu1 %v13326_v49  ;;  %v13424_v49 = vcombine.low %v3370_v59, %v3378_v48 }
0x10fe   : > { %5177 = vmatprep.mubr.bf16.mxu1 %v17581_v24  ;;  %5189 = vmatpush1.bf16.msra.mxu0 %v13328_v11  ;;  %v3401_v11 = vld [vmem:[#allocation16 + $0x430] sm:$0xff] }
0x10ff   : > { %5220 = vmatprep.mubr.bf16.mxu0 %v17581_v24  ;;  %5147 = vmatprep.subr.bf16.mxu1 %v13343_v12  ;;  %v13374_v24 = vcombine.low %v3321_v7, %v3329_v32  ;;  %v3409_v12 = vld [vmem:[#allocation16 + $0x470] sm:$0xff]  ;;  %v3426_v7 = vld [vmem:[#allocation16 + $0x4f8] sm:$0xff] }
0x1100   : > { %5190 = vmatprep.subr.bf16.mxu0 %v13345_v14  ;;  %v13438_v14 = vcombine.low %v3385_v60, %v3393_v0  ;;  %v13455_v16 = vcombine.high %v3401_v11, %v3409_v12  ;;  %v13454_v32 = vcombine.low %v3401_v11, %v3409_v12  ;;  %v3490_v60 = vld [vmem:[#allocation16 + $0x6f8] sm:$0xff] }
0x1101   : > { %5148 = vmatpush1.bf16.msra.mxu1 %v13342_v17  ;;  %v13457_v17 = vcombine.high %v3402_v13, %v3410_v21  ;;  %v3506_v11 = vld [vmem:[#allocation16 + $0x778] sm:$0xff] }
0x1102   : > { %5191 = vmatpush1.bf16.msra.mxu0 %v13344_v2  ;;  %5149 = vmatprep.subr.bf16.mxu1 %v13359_v20  ;;  %v3417_v2 = vld [vmem:[#allocation16 + $0x4b0] sm:$0xff] }
0x1103   : > { %5192 = vmatprep.subr.bf16.mxu0 %v13361_v5  ;;  %v3425_v20 = vld [vmem:[#allocation16 + $0x4f0] sm:$0xff]  ;;  %v3418_v5 = vld [vmem:[#allocation16 + $0x4b8] sm:$0xff] }
0x1104   : > { %v13471_v8 = vcombine.high %v3417_v2, %v3425_v20  ;;  %v13470_v46 = vcombine.low %v3417_v2, %v3425_v20  ;;  %v13472_v52 = vcombine.low %v3418_v5, %v3426_v7  ;;  %v3522_v2 = vld [vmem:[#allocation16 + $0x7f8] sm:$0xff] }
0x1105   : > { %5150 = vmatpush1.bf16.msra.mxu1 %v13358_v36  ;;  %v13473_v36 = vcombine.high %v3418_v5, %v3426_v7 }
0x1106   : > { %5193 = vmatpush1.bf16.msra.mxu0 %v13360_v27  ;;  %5151 = vmatprep.subr.bf16.mxu1 %v13375_v39  ;;  %v3433_v27 = vld [vmem:[#allocation16 + $0x530] sm:$0xff] }
0x1107   : > { %5194 = vmatprep.subr.bf16.mxu0 %v13377_v44  ;;  %v3441_v39 = vld [vmem:[#allocation16 + $0x570] sm:$0xff]  ;;  %v3434_v44 = vld [vmem:[#allocation16 + $0x538] sm:$0xff] }
0x1108   : > { %v13487_v30 = vcombine.high %v3433_v27, %v3441_v39  ;;  %v13486_v40 = vcombine.low %v3433_v27, %v3441_v39  ;;  %v13488_v63 = vcombine.low %v3434_v44, %v3442_v29  ;;  %v15290_v27 = vld [vmem:[#allocation19] ss:$8 sps:$4 sm:$0xff]   ;;  %v15295_v39 = vld [vmem:[#allocation19 + $0x14] ss:$8 sps:$4 sm:$0xff]  }
0x1109   : > { %5152 = vmatpush1.bf16.msra.mxu1 %v13374_v24  ;;  %v13489_v24 = vcombine.high %v3434_v44, %v3442_v29  ;;  %v15293_v44 = vld [vmem:[#allocation19 + $0x10] ss:$8 sps:$4 sm:$0xff]   ;;  %v15298_v29 = vld [vmem:[#allocation19 + $0x24] ss:$8 sps:$4 sm:$0xff]  }
0x110a   : > { %5195 = vmatpush1.bf16.msra.mxu0 %v13376_v31  ;;  %5153 = vmatprep.subr.bf16.mxu1 %v13391_v33  ;;  %v3449_v31 = vld [vmem:[#allocation16 + $0x5b0] sm:$0xff] }
0x110b   : > { %5196 = vmatprep.subr.bf16.mxu0 %v13393_v26  ;;  %v3457_v33 = vld [vmem:[#allocation16 + $0x5f0] sm:$0xff]  ;;  %v3450_v26 = vld [vmem:[#allocation16 + $0x5b8] sm:$0xff] }
0x110c   : > { %v13503_v41 = vcombine.high %v3449_v31, %v3457_v33  ;;  %v13502_v47 = vcombine.low %v3449_v31, %v3457_v33  ;;  %v13504_v59 = vcombine.low %v3450_v26, %v3458_v28  ;;  %v15302_v31 = vld [vmem:[#allocation19 + $0x40] ss:$8 sps:$4 sm:$0xff]  }
0x110d   : > { %5154 = vmatpush1.bf16.msra.mxu1 %v13390_v42  ;;  %v13505_v42 = vcombine.high %v3450_v26, %v3458_v28  ;;  %v17599_v33 = vld [vmem:[#allocation17] sm:$0xff]  ;;  %v15307_v26 = vld [vmem:[#allocation19 + $0x54] ss:$8 sps:$4 sm:$0xff]  }
0x110e   : > { %5197 = vmatpush1.bf16.msra.mxu0 %v13392_v43  ;;  %5155 = vmatprep.subr.bf16.mxu1 %v13407_v61  ;;  %v3465_v43 = vld [vmem:[#allocation16 + $0x630] sm:$0xff]  ;;  %v3538_v28 = vrot.slane %v17599_v33, %v17408_v22 }
0x110f   : > { %5198 = vmatprep.subr.bf16.mxu0 %v13409_v35  ;;  %v3473_v61 = vld [vmem:[#allocation16 + $0x670] sm:$0xff]  ;;  %v3466_v35 = vld [vmem:[#allocation16 + $0x638] sm:$0xff] }
0x1110   : > { %v13519_v48 = vcombine.high %v3465_v43, %v3473_v61  ;;  %v13518_v0 = vcombine.low %v3465_v43, %v3473_v61  ;;  %v13520_v1 = vcombine.low %v3466_v35, %v3474_v45 }
0x1111   : > { %5156 = vmatpush1.bf16.msra.mxu1 %v13406_v54  ;;  %v13521_v54 = vcombine.high %v3466_v35, %v3474_v45 }
0x1112   : > { %5199 = vmatpush1.bf16.msra.mxu0 %v13408_v62  ;;  %5157 = vmatprep.subr.bf16.mxu1 %v13423_v55  ;;  %v3481_v62 = vld [vmem:[#allocation16 + $0x6b0] sm:$0xff] }
0x1113   : > { %5200 = vmatprep.subr.bf16.mxu0 %v13425_v58  ;;  %v3489_v55 = vld [vmem:[#allocation16 + $0x6f0] sm:$0xff]  ;;  %v3482_v58 = vld [vmem:[#allocation16 + $0x6b8] sm:$0xff] }
0x1114   : > { %v13535_v25 = vcombine.high %v3481_v62, %v3489_v55  ;;  %v13534_v12 = vcombine.low %v3481_v62, %v3489_v55  ;;  %v13536_v13 = vcombine.low %v3482_v58, %v3490_v60 }
0x1115   : > { %5158 = vmatpush1.bf16.msra.mxu1 %v13422_v4  ;;  %v13537_v4 = vcombine.high %v3482_v58, %v3490_v60  ;;  %v15308_v58 = vld [vmem:[#allocation19 + $0x60] ss:$8 sps:$4 sm:$0xff]  }
0x1116   : > { %5201 = vmatpush1.bf16.msra.mxu0 %v13424_v49  ;;  %5159 = vmatprep.subr.bf16.mxu1 %v13439_v6  ;;  %v3497_v49 = vld [vmem:[#allocation16 + $0x730] sm:$0xff] }
0x1117   : > { %5202 = vmatprep.subr.bf16.mxu0 %v13441_v10  ;;  %v3505_v6 = vld [vmem:[#allocation16 + $0x770] sm:$0xff]  ;;  %v3498_v10 = vld [vmem:[#allocation16 + $0x738] sm:$0xff] }
0x1118   : > { %v13551_v21 = vcombine.high %v3497_v49, %v3505_v6  ;;  %v13550_v20 = vcombine.low %v3497_v49, %v3505_v6  ;;  %v13552_v5 = vcombine.low %v3498_v10, %v3506_v11 }
0x1119   : > { %5160 = vmatpush1.bf16.msra.mxu1 %v13438_v14  ;;  %v13553_v14 = vcombine.high %v3498_v10, %v3506_v11 }
0x111a   : > { %5203 = vmatpush1.bf16.msra.mxu0 %v13440_v15  ;;  %5161 = vmatprep.subr.bf16.mxu1 %v13455_v16  ;;  %v3513_v15 = vld [vmem:[#allocation16 + $0x7b0] sm:$0xff] }
0x111b   : > { %5204 = vmatprep.subr.bf16.mxu0 %v13457_v17  ;;  %v3521_v16 = vld [vmem:[#allocation16 + $0x7f0] sm:$0xff]  ;;  %v3514_v17 = vld [vmem:[#allocation16 + $0x7b8] sm:$0xff] }
0x111c   : > { %v13567_v7 = vcombine.high %v3513_v15, %v3521_v16 }
0x111d   : > { %5162 = vmatpush1.bf16.msra.mxu1 %v13454_v32  ;;  %v13569_v32 = vcombine.high %v3514_v17, %v3522_v2 }
0x111e   : > { %5205 = vmatpush1.bf16.msra.mxu0 %v13456_v34  ;;  %5163 = vmatprep.subr.bf16.mxu1 %v13471_v8  ;;  %v13566_v34 = vcombine.low %v3513_v15, %v3521_v16  ;;  %v13568_v8 = vcombine.low %v3514_v17, %v3522_v2  ;;  %v15311_v17 = vld [vmem:[#allocation19 + $0x70] ss:$8 sps:$4 sm:$0xff]  }
0x111f   : > { %5206 = vmatprep.subr.bf16.mxu0 %v13473_v36  ;;  %v15292_v36 = vld [vmem:[#allocation19 + $0x4] ss:$8 sps:$4 sm:$0xff]  }
0x1121   : > { %5164 = vmatpush1.bf16.msra.mxu1 %v13470_v46  ;;  %v15296_v46 = vld [vmem:[#allocation19 + $0x20] ss:$8 sps:$4 sm:$0xff]  }
0x1122   : > { %5207 = vmatpush1.bf16.msra.mxu0 %v13472_v52  ;;  %5165 = vmatprep.subr.bf16.mxu1 %v13487_v30  ;;  %v15301_v52 = vld [vmem:[#allocation19 + $0x34] ss:$8 sps:$4 sm:$0xff]   ;;  %v15299_v30 = vld [vmem:[#allocation19 + $0x30] ss:$8 sps:$4 sm:$0xff]  }
0x1123   : > { %5208 = vmatprep.subr.bf16.mxu0 %v13489_v24  ;;  %v15304_v24 = vld [vmem:[#allocation19 + $0x44] ss:$8 sps:$4 sm:$0xff]  }
0x1125   : > { %5166 = vmatpush1.bf16.msra.mxu1 %v13486_v40  ;;  %v15305_v40 = vld [vmem:[#allocation19 + $0x50] ss:$8 sps:$4 sm:$0xff]  }
0x1126   : > { %5209 = vmatpush1.bf16.msra.mxu0 %v13488_v63  ;;  %5167 = vmatprep.subr.bf16.mxu1 %v13503_v41  ;;  %v3534_v63 = vrot.slane %v17599_v33, %v17369_v51  ;;  %v3542_v41 = vrot.slane %v17599_v33, %v17411_v23 }
0x1127   : > { %5210 = vmatprep.subr.bf16.mxu0 %v13505_v42  ;;  %v15310_v42 = vld [vmem:[#allocation19 + $0x64] ss:$8 sps:$4 sm:$0xff]  }
0x1129   : > { %5168 = vmatpush1.bf16.msra.mxu1 %v13502_v47 }
0x112a   : > { %5211 = vmatpush1.bf16.msra.mxu0 %v13504_v59  ;;  %5169 = vmatprep.subr.bf16.mxu1 %v13519_v48 }
0x112b   : > { %5212 = vmatprep.subr.bf16.mxu0 %v13521_v54 }
0x112d   : > { %5170 = vmatpush1.bf16.msra.mxu1 %v13518_v0 }
0x112e   : > { %5213 = vmatpush1.bf16.msra.mxu0 %v13520_v1  ;;  %5171 = vmatprep.subr.bf16.mxu1 %v13535_v25 }
0x112f   : > { %5214 = vmatprep.subr.bf16.mxu0 %v13537_v4  ;;  %v15313_v4 = vld [vmem:[#allocation19 + $0x74] ss:$8 sps:$4 sm:$0xff]  }
0x1131   : > { %5172 = vmatpush1.bf16.msra.mxu1 %v13534_v12 }
0x1132   : > { %5215 = vmatpush1.bf16.msra.mxu0 %v13536_v13  ;;  %5173 = vmatprep.subr.bf16.mxu1 %v13551_v21 }
0x1133   : > { %5216 = vmatprep.subr.bf16.mxu0 %v13553_v14 }
0x1135   : > { %5174 = vmatpush1.bf16.msra.mxu1 %v13550_v20 }
0x1136   : > { %5217 = vmatpush1.bf16.msra.mxu0 %v13552_v5  ;;  %5175 = vmatprep.subr.bf16.mxu1 %v13567_v7  ;;  %v15316_v5 = vld [vmem:[#allocation19 + $0x84] ss:$8 sps:$4 sm:$0xff]  }
0x1137   : > { %5218 = vmatprep.subr.bf16.mxu0 %v13569_v32 }
0x1139   : > { %5176 = vmatpush1.bf16.msra.mxu1 %v13566_v34  ;;  %v15314_v34 = vld [vmem:[#allocation19 + $0x80] ss:$8 sps:$4 sm:$0xff]  }
0x113a   : > { %5219 = vmatpush1.bf16.msra.mxu0 %v13568_v8  ;;  %6827 = vmatprep.subr.bf16.mxu1 %v15292_v36  ;;  %v15319_v8 = vld [vmem:[#allocation19 + $0x94] ss:$8 sps:$4 sm:$0xff]   ;;  %v15317_v36 = vld [vmem:[#allocation19 + $0x90] ss:$8 sps:$4 sm:$0xff]  }
0x113c   : > { %5178 = vmatmul.mubr.bf16.vlgmr.msra.gmra.mrb[60].mxu1 %v17577_v3 }
0x113d   : > { %5221 = vmatmul.mubr.bf16.vlgmr.msra.gmra.mrb[16].mxu0 %v17577_v3  ;;  %6828 = vmatpush1.bf16.msra.mxu1 %v15290_v27  ;;  %v3530_v3 = vrot.slane %v17599_v33, %v17372_v53  ;;  %v15322_v27 = vld [vmem:[#allocation19 + $0xa4] ss:$8 sps:$4 sm:$0xff]  }
0x113e   : > { %6829 = vmatprep.subr.bf16.mxu1 %v15295_v39  ;;  %v15320_v39 = vld [vmem:[#allocation19 + $0xa0] ss:$8 sps:$4 sm:$0xff]  }
0x1141   : > { %6830 = vmatpush1.bf16.msra.mxu1 %v15293_v44  ;;  %v15325_v44 = vld [vmem:[#allocation19 + $0xb4] ss:$8 sps:$4 sm:$0xff]  }
0x1142   : > { %6831 = vmatprep.subr.bf16.mxu1 %v15298_v29  ;;  %v15323_v29 = vld [vmem:[#allocation19 + $0xb0] ss:$8 sps:$4 sm:$0xff]  }
0x1145   : > { %6832 = vmatpush1.bf16.msra.mxu1 %v15296_v46  ;;  %v15328_v46 = vld [vmem:[#allocation19 + $0xc4] ss:$8 sps:$4 sm:$0xff]  }
0x1146   : > { %6833 = vmatprep.subr.bf16.mxu1 %v15301_v52  ;;  %v15326_v52 = vld [vmem:[#allocation19 + $0xc0] ss:$8 sps:$4 sm:$0xff]  }
0x1149   : > { %6834 = vmatpush1.bf16.msra.mxu1 %v15299_v30  ;;  %v15331_v30 = vld [vmem:[#allocation19 + $0xd4] ss:$8 sps:$4 sm:$0xff]  }
0x114a   : > { %6835 = vmatprep.subr.bf16.mxu1 %v15304_v24  ;;  %v15329_v24 = vld [vmem:[#allocation19 + $0xd0] ss:$8 sps:$4 sm:$0xff]  }
0x114d   : > { %6836 = vmatpush1.bf16.msra.mxu1 %v15302_v31  ;;  %v15334_v31 = vld [vmem:[#allocation19 + $0xe4] ss:$8 sps:$4 sm:$0xff]  }
0x114e   : > { %6837 = vmatprep.subr.bf16.mxu1 %v15307_v26  ;;  %v15332_v26 = vld [vmem:[#allocation19 + $0xe0] ss:$8 sps:$4 sm:$0xff]  }
0x114f   : > { %v4921_v43 = vpop.f32.mrb[48].mxu1  ;;  %v4964_v61 = vpop.f32.mrb[4].mxu0 }
0x1150   : > { %v4922_v35 = vadd.f32 %v4921_v43, %v3530_v3  ;;  %v4965_v45 = vadd.f32 %v4964_v61, %v3538_v28  ;;  %v4923_v47 = vpop.f32.mrb[49].mxu1  ;;  %v4966_v59 = vpop.f32.mrb[5].mxu0  ;;  %v15346_v43 = vld [vmem:[#allocation19 + $0x124] ss:$8 sps:$4 sm:$0xff]   ;;  %v15344_v61 = vld [vmem:[#allocation19 + $0x120] ss:$8 sps:$4 sm:$0xff]  }
0x1151   : > { %v4924_v48 = vadd.f32 %v4923_v47, %v3534_v63  ;;  %v4967_v54 = vadd.f32 %v4966_v59, %v3542_v41  ;;  %6838 = vmatpush1.bf16.msra.mxu1 %v15305_v40  ;;  %v4925_v62 = vpop.f32.mrb[50].mxu1  ;;  %v4968_v55 = vpop.f32.mrb[6].mxu0  ;;  %v15340_v40 = vld [vmem:[#allocation19 + $0x104] ss:$8 sps:$4 sm:$0xff]   ;;  %v17612_v59 = vsub.s32 6, %v17366_v50 }
0x1152   : > { %v4926_v60 = vadd.f32 %v4925_v62, %v3530_v3  ;;  %v4969_v0 = vadd.f32 %v4968_v55, %v3538_v28  ;;  %v4927_v1 = vpop.f32.mrb[51].mxu1  ;;  %v4970_v25 = vpop.f32.mrb[7].mxu0  ;;  %6839 = vmatprep.subr.bf16.mxu1 %v15310_v42  ;;  %v5231_v10 = vmax.f32 %v4922_v35, 0.0  ;;  %v5233_v11 = vmax.f32 %v4965_v45, 0.0  ;;  %v15337_v3 = vld [vmem:[#allocation19 + $0xf4] ss:$8 sps:$4 sm:$0xff]  }
0x1153   : > { %v4928_v49 = vadd.f32 %v4927_v1, %v3534_v63  ;;  %v4971_v6 = vadd.f32 %v4970_v25, %v3542_v41  ;;  %v5232_v21 = vmax.f32 %v4924_v48, 0.0  ;;  %v5234_v14 = vmax.f32 %v4967_v54, 0.0  ;;  %v15335_v28 = vld [vmem:[#allocation19 + $0xf0] ss:$8 sps:$4 sm:$0xff]   ;;  %v15338_v63 = vld [vmem:[#allocation19 + $0x100] ss:$8 sps:$4 sm:$0xff]  }
0x1154   : > { %v5247_v12 = vmax.f32 %v4926_v60, 0.0  ;;  %v5249_v13 = vmax.f32 %v4969_v0, 0.0  ;;  %v15343_v41 = vld [vmem:[#allocation19 + $0x114] ss:$8 sps:$4 sm:$0xff]   ;;  %v15341_v42 = vld [vmem:[#allocation19 + $0x110] ss:$8 sps:$4 sm:$0xff]   ;;  %v3546_v55 = vrot.slane %v17599_v33, %v17424_v37  ;;  %v3550_v60 = vrot.slane %v17599_v33, %v17427_v38 }
0x1155   : > { %v5248_v15 = vmax.f32 %v4928_v49, 0.0  ;;  %v5250_v16 = vmax.f32 %v4971_v6, 0.0  ;;  %6840 = vmatpush1.bf16.msra.mxu1 %v15308_v58  ;;  %v15349_v35 = vld [vmem:[#allocation19 + $0x134] ss:$8 sps:$4 sm:$0xff]   ;;  %v15347_v45 = vld [vmem:[#allocation19 + $0x130] ss:$8 sps:$4 sm:$0xff]   ;;  %v3554_v58 = vrot.slane %v17599_v33, %v17612_v59 }
0x1156   : > { %v5263_v2 = vpack.c.bf16 %v5247_v12, %v5231_v10  ;;  %v17609_v20 = vpack.c.bf16 %v5249_v13, %v5233_v11  ;;  %6841 = vmatprep.subr.bf16.mxu1 %v15313_v4  ;;  %v15352_v47 = vld [vmem:[#allocation19 + $0x144] ss:$8 sps:$4 sm:$0xff]   ;;  %v15350_v48 = vld [vmem:[#allocation19 + $0x140] ss:$8 sps:$4 sm:$0xff]   ;;  %v17615_v54 = vsub.s32 7, %v17366_v50 }
0x1157   : > { %v5264_v7 = vpack.c.bf16 %v5248_v15, %v5232_v21  ;;  %v5266_v32 = vpack.c.bf16 %v5250_v16, %v5234_v14  ;;  %v15355_v62 = vld [vmem:[#allocation19 + $0x154] ss:$8 sps:$4 sm:$0xff]   ;;  %v15353_v1 = vld [vmem:[#allocation19 + $0x150] ss:$8 sps:$4 sm:$0xff]   ;;  %v15358_v25 = vld [vmem:[#allocation19 + $0x164] ss:$8 sps:$4 sm:$0xff]  }
0x1158   : > { %v3558_v0 = vrot.slane %v17599_v33, %v17615_v54  ;;  %v15356_v15 = vld [vmem:[#allocation19 + $0x160] ss:$8 sps:$4 sm:$0xff]   ;;  %v15361_v33 = vld [vmem:[#allocation19 + $0x174] ss:$8 sps:$4 sm:$0xff]  }
0x1159   : > { %6842 = vmatpush1.bf16.msra.mxu1 %v15311_v17  ;;  %6859 = vmatprep.mubr.bf16.mxu1 %v5264_v7 }
0x115a   : > { %6843 = vmatprep.subr.bf16.mxu1 %v15316_v5 }
0x115d   : > { %6844 = vmatpush1.bf16.msra.mxu1 %v15314_v34 }
0x115e   : > { %6845 = vmatprep.subr.bf16.mxu1 %v15319_v8 }
0x1161   : > { %6846 = vmatpush1.bf16.msra.mxu1 %v15317_v36 }
0x1162   : > { %6847 = vmatprep.subr.bf16.mxu1 %v15322_v27 }
0x1165   : > { %6848 = vmatpush1.bf16.msra.mxu1 %v15320_v39 }
0x1166   : > { %6849 = vmatprep.subr.bf16.mxu1 %v15325_v44 }
0x1169   : > { %6850 = vmatpush1.bf16.msra.mxu1 %v15323_v29 }
0x116a   : > { %6851 = vmatprep.subr.bf16.mxu1 %v15328_v46 }
0x116d   : > { %6852 = vmatpush1.bf16.msra.mxu1 %v15326_v52  ;;  %v15359_v52 = vld [vmem:[#allocation19 + $0x170] ss:$8 sps:$4 sm:$0xff]  }
0x116e   : > { %6853 = vmatprep.subr.bf16.mxu1 %v15331_v30 }
0x1171   : > { %6854 = vmatpush1.bf16.msra.mxu1 %v15329_v24 }
0x1172   : > { %6855 = vmatprep.subr.bf16.mxu1 %v15334_v31  ;;  %v15364_v31 = vld [vmem:[#allocation19 + $0x184] ss:$8 sps:$4 sm:$0xff]  }
0x1175   : > { %6856 = vmatpush1.bf16.msra.mxu1 %v15332_v26 }
0x1176   : > { %6857 = vmatprep.subr.bf16.mxu1 %v15337_v3 }
0x1179   : > { %6858 = vmatpush1.bf16.msra.mxu1 %v15335_v28  ;;  %v15362_v28 = vld [vmem:[#allocation19 + $0x180] ss:$8 sps:$4 sm:$0xff]  }
0x117a   : > { %6870 = vmatprep.subr.bf16.mxu1 %v15340_v40  ;;  %v15367_v40 = vld [vmem:[#allocation19 + $0x194] ss:$8 sps:$4 sm:$0xff]  }
0x117c   : > { %6860 = vmatmul.mubr.bf16.vlgmr.msra.gmra.mrb[64].mxu1 %v5263_v2 }
0x117d   : > { %6871 = vmatpush1.bf16.msra.mxu1 %v15338_v63  ;;  %6902 = vmatprep.mubr.bf16.mxu1 %v5266_v32  ;;  %v15365_v63 = vld [vmem:[#allocation19 + $0x190] ss:$8 sps:$4 sm:$0xff]  }
0x117e   : > { %6872 = vmatprep.subr.bf16.mxu1 %v15343_v41  ;;  %v15370_v41 = vld [vmem:[#allocation19 + $0x1a4] ss:$8 sps:$4 sm:$0xff]  }
0x1181   : > { %6873 = vmatpush1.bf16.msra.mxu1 %v15341_v42  ;;  %v15368_v42 = vld [vmem:[#allocation19 + $0x1a0] ss:$8 sps:$4 sm:$0xff]  }
0x1182   : > { %6874 = vmatprep.subr.bf16.mxu1 %v15346_v43  ;;  %v15373_v43 = vld [vmem:[#allocation19 + $0x1b4] ss:$8 sps:$4 sm:$0xff]  }
0x1185   : > { %6875 = vmatpush1.bf16.msra.mxu1 %v15344_v61  ;;  %v15371_v61 = vld [vmem:[#allocation19 + $0x1b0] ss:$8 sps:$4 sm:$0xff]  }
0x1186   : > { %6876 = vmatprep.subr.bf16.mxu1 %v15349_v35  ;;  %v15376_v35 = vld [vmem:[#allocation19 + $0x1c4] ss:$8 sps:$4 sm:$0xff]  }
0x1189   : > { %6877 = vmatpush1.bf16.msra.mxu1 %v15347_v45  ;;  %v15374_v45 = vld [vmem:[#allocation19 + $0x1c0] ss:$8 sps:$4 sm:$0xff]  }
0x118a   : > { %6878 = vmatprep.subr.bf16.mxu1 %v15352_v47  ;;  %v15379_v47 = vld [vmem:[#allocation19 + $0x1d4] ss:$8 sps:$4 sm:$0xff]  }
0x118d   : > { %6879 = vmatpush1.bf16.msra.mxu1 %v15350_v48  ;;  %v15377_v48 = vld [vmem:[#allocation19 + $0x1d0] ss:$8 sps:$4 sm:$0xff]  }
0x118e   : > { %6880 = vmatprep.subr.bf16.mxu1 %v15355_v62  ;;  %v15382_v62 = vld [vmem:[#allocation19 + $0x1e4] ss:$8 sps:$4 sm:$0xff]  }
0x118f   : > { %v5007_v50 = vpop.f32.mrb[52].mxu1  ;;  %v5050_v4 = vpop.f32.mrb[8].mxu0 }
0x1190   : > { %v5008_v49 = vadd.f32 %v5007_v50, %v3546_v55  ;;  %v5051_v6 = vadd.f32 %v5050_v4, %v3554_v58  ;;  %v5009_v10 = vpop.f32.mrb[53].mxu1  ;;  %v5052_v11 = vpop.f32.mrb[9].mxu0  ;;  %v15389_v50 = vld [vmem:[#allocation19 + $0x210] ss:$8 sps:$4 sm:$0xff]   ;;  %v15394_v4 = vld [vmem:[#allocation19 + $0x224] ss:$8 sps:$4 sm:$0xff]  }
0x1191   : > { %v5010_v12 = vadd.f32 %v5009_v10, %v3550_v60  ;;  %v5053_v13 = vadd.f32 %v5052_v11, %v3558_v0  ;;  %v5011_v21 = vpop.f32.mrb[54].mxu1  ;;  %v5054_v14 = vpop.f32.mrb[10].mxu0  ;;  %6881 = vmatpush1.bf16.msra.mxu1 %v15353_v1  ;;  %v15386_v1 = vld [vmem:[#allocation19 + $0x200] ss:$8 sps:$4 sm:$0xff]   ;;  %v15395_v10 = vld [vmem:[#allocation19 + $0x230] ss:$8 sps:$4 sm:$0xff]  }
0x1192   : > { %v5012_v16 = vadd.f32 %v5011_v21, %v3546_v55  ;;  %v5055_v17 = vadd.f32 %v5054_v14, %v3554_v58  ;;  %v5013_v2 = vpop.f32.mrb[55].mxu1  ;;  %v5056_v5 = vpop.f32.mrb[11].mxu0  ;;  %6882 = vmatprep.subr.bf16.mxu1 %v15358_v25  ;;  %v5235_v34 = vmax.f32 %v5008_v49, 0.0  ;;  %v5237_v8 = vmax.f32 %v5051_v6, 0.0  ;;  %v15380_v55 = vld [vmem:[#allocation19 + $0x1e0] ss:$8 sps:$4 sm:$0xff]  }
0x1193   : > { %v5014_v7 = vadd.f32 %v5013_v2, %v3550_v60  ;;  %v5057_v32 = vadd.f32 %v5056_v5, %v3558_v0  ;;  %v5236_v39 = vmax.f32 %v5010_v12, 0.0  ;;  %v5238_v44 = vmax.f32 %v5053_v13, 0.0  ;;  %v15385_v58 = vld [vmem:[#allocation19 + $0x1f4] ss:$8 sps:$4 sm:$0xff]   ;;  %v15383_v60 = vld [vmem:[#allocation19 + $0x1f0] ss:$8 sps:$4 sm:$0xff]  }
0x1194   : > { %v5251_v36 = vmax.f32 %v5012_v16, 0.0  ;;  %v5253_v27 = vmax.f32 %v5055_v17, 0.0  ;;  %v15388_v0 = vld [vmem:[#allocation19 + $0x204] ss:$8 sps:$4 sm:$0xff]   ;;  %v15391_v25 = vld [vmem:[#allocation19 + $0x214] ss:$8 sps:$4 sm:$0xff]  }
0x1195   : > { %v5252_v29 = vmax.f32 %v5014_v7, 0.0  ;;  %v5254_v46 = vmax.f32 %v5057_v32, 0.0  ;;  %6883 = vmatpush1.bf16.msra.mxu1 %v15356_v15  ;;  %v15392_v49 = vld [vmem:[#allocation19 + $0x220] ss:$8 sps:$4 sm:$0xff]   ;;  %v15397_v6 = vld [vmem:[#allocation19 + $0x234] ss:$8 sps:$4 sm:$0xff]  }
0x1196   : > { %v17625_v30 = vpack.c.bf16 %v5251_v36, %v5235_v34  ;;  %v17627_v24 = vpack.c.bf16 %v5253_v27, %v5237_v8  ;;  %6884 = vmatprep.subr.bf16.mxu1 %v15361_v33  ;;  %v15400_v11 = vld [vmem:[#allocation19 + $0x244] ss:$8 sps:$4 sm:$0xff]   ;;  %v15398_v12 = vld [vmem:[#allocation19 + $0x240] ss:$8 sps:$4 sm:$0xff]   ;;  %v15403_v21 = vld [vmem:[#allocation19 + $0x254] ss:$8 sps:$4 sm:$0xff]  }
0x1197   : > { %v5268_v26 = vpack.c.bf16 %v5252_v29, %v5236_v39  ;;  %v17629_v3 = vpack.c.bf16 %v5254_v46, %v5238_v44  ;;  %v17632_v13 = vld [vmem:[#allocation17 + $0x8] sm:$0xff]  ;;  %v15401_v16 = vld [vmem:[#allocation19 + $0x250] ss:$8 sps:$4 sm:$0xff]  }
0x1198   : > { %v3570_v14 = vrot.slane %v17632_v13, %v17408_v22  ;;  %v3566_v15 = vrot.slane %v17632_v13, %v17369_v51  ;;  %v3574_v17 = vrot.slane %v17632_v13, %v17411_v23  ;;  %v15406_v2 = vld [vmem:[#allocation19 + $0x264] ss:$8 sps:$4 sm:$0xff]   ;;  %v15404_v39 = vld [vmem:[#allocation19 + $0x260] ss:$8 sps:$4 sm:$0xff]  }
0x1199   : > { %6885 = vmatpush1.bf16.msra.mxu1 %v15359_v52 }
0x119a   : > { %6886 = vmatprep.subr.bf16.mxu1 %v15364_v31  ;;  %v15409_v31 = vld [vmem:[#allocation19 + $0x274] ss:$8 sps:$4 sm:$0xff]  }
0x119d   : > { %6887 = vmatpush1.bf16.msra.mxu1 %v15362_v28 }
0x119e   : > { %6888 = vmatprep.subr.bf16.mxu1 %v15367_v40 }
0x11a1   : > { %6889 = vmatpush1.bf16.msra.mxu1 %v15365_v63 }
0x11a2   : > { %6890 = vmatprep.subr.bf16.mxu1 %v15370_v41 }
0x11a5   : > { %6891 = vmatpush1.bf16.msra.mxu1 %v15368_v42 }
0x11a6   : > { %6892 = vmatprep.subr.bf16.mxu1 %v15373_v43 }
0x11a9   : > { %6893 = vmatpush1.bf16.msra.mxu1 %v15371_v61 }
0x11aa   : > { %6894 = vmatprep.subr.bf16.mxu1 %v15376_v35 }
0x11ad   : > { %6895 = vmatpush1.bf16.msra.mxu1 %v15374_v45 }
0x11ae   : > { %6896 = vmatprep.subr.bf16.mxu1 %v15379_v47  ;;  %v15407_v47 = vld [vmem:[#allocation19 + $0x270] ss:$8 sps:$4 sm:$0xff]  }
0x11b1   : > { %6897 = vmatpush1.bf16.msra.mxu1 %v15377_v48 }
0x11b2   : > { %6898 = vmatprep.subr.bf16.mxu1 %v15382_v62 }
0x11b5   : > { %6899 = vmatpush1.bf16.msra.mxu1 %v15380_v55 }
0x11b6   : > { %6900 = vmatprep.subr.bf16.mxu1 %v15385_v58  ;;  %v15412_v58 = vld [vmem:[#allocation19 + $0x284] ss:$8 sps:$4 sm:$0xff]  }
0x11b9   : > { %6901 = vmatpush1.bf16.msra.mxu1 %v15383_v60 }
0x11ba   : > { %6913 = vmatprep.subr.bf16.mxu1 %v15388_v0 }
0x11bc   : > { %6903 = vmatmul.mubr.bf16.vlgmr.msra.gmra.mrb[64].mxu1 %v17609_v20  ;;  %v3562_v20 = vrot.slane %v17632_v13, %v17372_v53 }
0x11bd   : > { %6914 = vmatpush1.bf16.msra.mxu1 %v15386_v1  ;;  %6945 = vmatprep.mubr.bf16.mxu1 %v5268_v26 }
0x11be   : > { %6915 = vmatprep.subr.bf16.mxu1 %v15391_v25  ;;  %v15410_v25 = vld [vmem:[#allocation19 + $0x280] ss:$8 sps:$4 sm:$0xff]  }
0x11c1   : > { %6916 = vmatpush1.bf16.msra.mxu1 %v15389_v50  ;;  %v15415_v50 = vld [vmem:[#allocation19 + $0x294] ss:$8 sps:$4 sm:$0xff]  }
0x11c2   : > { %6917 = vmatprep.subr.bf16.mxu1 %v15394_v4  ;;  %v15413_v4 = vld [vmem:[#allocation19 + $0x290] ss:$8 sps:$4 sm:$0xff]  }
0x11c5   : > { %6918 = vmatpush1.bf16.msra.mxu1 %v15392_v49  ;;  %v15418_v49 = vld [vmem:[#allocation19 + $0x2a4] ss:$8 sps:$4 sm:$0xff]  }
0x11c6   : > { %6919 = vmatprep.subr.bf16.mxu1 %v15397_v6  ;;  %v15416_v6 = vld [vmem:[#allocation19 + $0x2a0] ss:$8 sps:$4 sm:$0xff]  }
0x11c9   : > { %6920 = vmatpush1.bf16.msra.mxu1 %v15395_v10  ;;  %v15421_v10 = vld [vmem:[#allocation19 + $0x2b4] ss:$8 sps:$4 sm:$0xff]  }
0x11ca   : > { %6921 = vmatprep.subr.bf16.mxu1 %v15400_v11  ;;  %v15419_v11 = vld [vmem:[#allocation19 + $0x2b0] ss:$8 sps:$4 sm:$0xff]  }
0x11cd   : > { %6922 = vmatpush1.bf16.msra.mxu1 %v15398_v12  ;;  %v15424_v12 = vld [vmem:[#allocation19 + $0x2c4] ss:$8 sps:$4 sm:$0xff]  }
0x11ce   : > { %6923 = vmatprep.subr.bf16.mxu1 %v15403_v21  ;;  %v15422_v21 = vld [vmem:[#allocation19 + $0x2c0] ss:$8 sps:$4 sm:$0xff]  }
0x11cf   : > { %v5093_v5 = vpop.f32.mrb[56].mxu1 }
0x11d0   : > { %v5094_v33 = vadd.f32 %v5093_v5, %v3562_v20  ;;  %v5136_v7 = vpop.f32.mrb[12].mxu0  ;;  %v5095_v32 = vpop.f32.mrb[57].mxu1  ;;  %v15436_v5 = vld [vmem:[#allocation19 + $0x304] ss:$8 sps:$4 sm:$0xff]  }
0x11d1   : > { %v5137_v34 = vadd.f32 %v5136_v7, %v3570_v14  ;;  %v5096_v8 = vadd.f32 %v5095_v32, %v3566_v15  ;;  %v5138_v36 = vpop.f32.mrb[13].mxu0  ;;  %v5097_v27 = vpop.f32.mrb[58].mxu1  ;;  %6924 = vmatpush1.bf16.msra.mxu1 %v15401_v16  ;;  %v15428_v16 = vld [vmem:[#allocation19 + $0x2e0] ss:$8 sps:$4 sm:$0xff]   ;;  %v15439_v7 = vld [vmem:[#allocation19 + $0x314] ss:$8 sps:$4 sm:$0xff]  }
0x11d2   : > { %v5139_v44 = vadd.f32 %v5138_v36, %v3574_v17  ;;  %v5098_v29 = vadd.f32 %v5097_v27, %v3562_v20  ;;  %v5140_v46 = vpop.f32.mrb[14].mxu0  ;;  %v5099_v52 = vpop.f32.mrb[59].mxu1  ;;  %6925 = vmatprep.subr.bf16.mxu1 %v15406_v2  ;;  %v5239_v63 = vmax.f32 %v5094_v33, 0.0  ;;  %v15427_v20 = vld [vmem:[#allocation19 + $0x2d4] ss:$8 sps:$4 sm:$0xff]  }
0x11d3   : > { %v5141_v26 = vadd.f32 %v5140_v46, %v3570_v14  ;;  %v5100_v28 = vadd.f32 %v5099_v52, %v3566_v15  ;;  %v5142_v40 = vpop.f32.mrb[15].mxu0  ;;  %v5241_v43 = vmax.f32 %v5137_v34, 0.0  ;;  %v5240_v61 = vmax.f32 %v5096_v8, 0.0  ;;  %v15425_v14 = vld [vmem:[#allocation19 + $0x2d0] ss:$8 sps:$4 sm:$0xff]  }
0x11d4   : > { %v5255_v41 = vmax.f32 %v5098_v29, 0.0  ;;  %v5143_v42 = vadd.f32 %v5142_v40, %v3574_v17  ;;  %v5242_v48 = vmax.f32 %v5139_v44, 0.0  ;;  %v15430_v15 = vld [vmem:[#allocation19 + $0x2e4] ss:$8 sps:$4 sm:$0xff]   ;;  %v15433_v17 = vld [vmem:[#allocation19 + $0x2f4] ss:$8 sps:$4 sm:$0xff]   ;;  %v3582_v46 = vrot.slane %v17632_v13, %v17427_v38 }
0x11d5   : > { %v5257_v35 = vmax.f32 %v5141_v26, 0.0  ;;  %v5256_v45 = vmax.f32 %v5100_v28, 0.0  ;;  %6926 = vmatpush1.bf16.msra.mxu1 %v15404_v39  ;;  %v15431_v2 = vld [vmem:[#allocation19 + $0x2f0] ss:$8 sps:$4 sm:$0xff]   ;;  %v15434_v33 = vld [vmem:[#allocation19 + $0x300] ss:$8 sps:$4 sm:$0xff]  }
0x11d6   : > { %v17642_v62 = vpack.c.bf16 %v5255_v41, %v5239_v63  ;;  %v5258_v55 = vmax.f32 %v5143_v42, 0.0  ;;  %6927 = vmatprep.subr.bf16.mxu1 %v15409_v31  ;;  %v15437_v32 = vld [vmem:[#allocation19 + $0x310] ss:$8 sps:$4 sm:$0xff]   ;;  %v15442_v34 = vld [vmem:[#allocation19 + $0x324] ss:$8 sps:$4 sm:$0xff]   ;;  %v3590_v31 = vrot.slane %v17632_v13, %v17615_v54 }
0x11d7   : > { %v17644_v60 = vpack.c.bf16 %v5257_v35, %v5241_v43  ;;  %v17646_v0 = vpack.c.bf16 %v5256_v45, %v5240_v61  ;;  %v15440_v8 = vld [vmem:[#allocation19 + $0x320] ss:$8 sps:$4 sm:$0xff]   ;;  %v15445_v36 = vld [vmem:[#allocation19 + $0x334] ss:$8 sps:$4 sm:$0xff]   ;;  %v15443_v27 = vld [vmem:[#allocation19 + $0x330] ss:$8 sps:$4 sm:$0xff]  }
0x11d8   : > { %v17648_v1 = vpack.c.bf16 %v5258_v55, %v5242_v48  ;;  %v15448_v39 = vld [vmem:[#allocation19 + $0x344] ss:$8 sps:$4 sm:$0xff]   ;;  %v15446_v44 = vld [vmem:[#allocation19 + $0x340] ss:$8 sps:$4 sm:$0xff]   ;;  %v15451_v29 = vld [vmem:[#allocation19 + $0x354] ss:$8 sps:$4 sm:$0xff]  }
0x11d9   : > { %6928 = vmatpush1.bf16.msra.mxu1 %v15407_v47  ;;  %v15449_v52 = vld [vmem:[#allocation19 + $0x350] ss:$8 sps:$4 sm:$0xff]   ;;  %v15454_v26 = vld [vmem:[#allocation19 + $0x364] ss:$8 sps:$4 sm:$0xff]   ;;  %v15452_v45 = vld [vmem:[#allocation19 + $0x360] ss:$8 sps:$4 sm:$0xff]  }
0x11da   : > { %6929 = vmatprep.subr.bf16.mxu1 %v15412_v58 }
0x11dd   : > { %6930 = vmatpush1.bf16.msra.mxu1 %v15410_v25  ;;  %v15457_v25 = vld [vmem:[#allocation19 + $0x374] ss:$8 sps:$4 sm:$0xff]  }
0x11de   : > { %6931 = vmatprep.subr.bf16.mxu1 %v15415_v50 }
0x11e1   : > { %6932 = vmatpush1.bf16.msra.mxu1 %v15413_v4 }
0x11e2   : > { %6933 = vmatprep.subr.bf16.mxu1 %v15418_v49 }
0x11e5   : > { %6934 = vmatpush1.bf16.msra.mxu1 %v15416_v6 }
0x11e6   : > { %6935 = vmatprep.subr.bf16.mxu1 %v15421_v10 }
0x11e9   : > { %6936 = vmatpush1.bf16.msra.mxu1 %v15419_v11 }
0x11ea   : > { %6937 = vmatprep.subr.bf16.mxu1 %v15424_v12 }
0x11ed   : > { %6938 = vmatpush1.bf16.msra.mxu1 %v15422_v21 }
0x11ee   : > { %6939 = vmatprep.subr.bf16.mxu1 %v15427_v20 }
0x11f1   : > { %6940 = vmatpush1.bf16.msra.mxu1 %v15425_v14  ;;  %v15455_v14 = vld [vmem:[#allocation19 + $0x370] ss:$8 sps:$4 sm:$0xff]  }
0x11f2   : > { %6941 = vmatprep.subr.bf16.mxu1 %v15430_v15 }
0x11f5   : > { %6942 = vmatpush1.bf16.msra.mxu1 %v15428_v16 }
0x11f6   : > { %6943 = vmatprep.subr.bf16.mxu1 %v15433_v17 }
0x11f9   : > { %6944 = vmatpush1.bf16.msra.mxu1 %v15431_v2  ;;  %v15460_v2 = vld [vmem:[#allocation19 + $0x384] ss:$8 sps:$4 sm:$0xff]  }
0x11fa   : > { %6956 = vmatprep.subr.bf16.mxu1 %v15436_v5 }
0x11fc   : > { %6946 = vmatmul.mubr.bf16.vlgmr.msra.gmra.mrb[64].mxu1 %v17625_v30  ;;  %v3578_v30 = vrot.slane %v17632_v13, %v17424_v37 }
0x11fd   : > { %6957 = vmatpush1.bf16.msra.mxu1 %v15434_v33  ;;  %6988 = vmatprep.mubr.bf16.mxu1 %v17629_v3  ;;  %v3586_v3 = vrot.slane %v17632_v13, %v17612_v59 }
0x11fe   : > { %6958 = vmatprep.subr.bf16.mxu1 %v15439_v7 }
0x1201   : > { %6959 = vmatpush1.bf16.msra.mxu1 %v15437_v32  ;;  %v15458_v32 = vld [vmem:[#allocation19 + $0x380] ss:$8 sps:$4 sm:$0xff]  }
0x1202   : > { %6960 = vmatprep.subr.bf16.mxu1 %v15442_v34  ;;  %v15463_v34 = vld [vmem:[#allocation19 + $0x394] ss:$8 sps:$4 sm:$0xff]  }
0x1205   : > { %6961 = vmatpush1.bf16.msra.mxu1 %v15440_v8  ;;  %v15461_v8 = vld [vmem:[#allocation19 + $0x390] ss:$8 sps:$4 sm:$0xff]  }
0x1206   : > { %6962 = vmatprep.subr.bf16.mxu1 %v15445_v36  ;;  %v15466_v36 = vld [vmem:[#allocation19 + $0x3a4] ss:$8 sps:$4 sm:$0xff]  }
0x1209   : > { %6963 = vmatpush1.bf16.msra.mxu1 %v15443_v27  ;;  %v15464_v27 = vld [vmem:[#allocation19 + $0x3a0] ss:$8 sps:$4 sm:$0xff]  }
0x120a   : > { %6964 = vmatprep.subr.bf16.mxu1 %v15448_v39  ;;  %v15469_v39 = vld [vmem:[#allocation19 + $0x3b4] ss:$8 sps:$4 sm:$0xff]  }
0x120d   : > { %6965 = vmatpush1.bf16.msra.mxu1 %v15446_v44  ;;  %v15467_v44 = vld [vmem:[#allocation19 + $0x3b0] ss:$8 sps:$4 sm:$0xff]  }
0x120e   : > { %6966 = vmatprep.subr.bf16.mxu1 %v15451_v29  ;;  %v15472_v29 = vld [vmem:[#allocation19 + $0x3c4] ss:$8 sps:$4 sm:$0xff]  }
0x120f   : > { %v5179_v28 = vpop.f32.mrb[60].mxu1 }
0x1210   : > { %v5180_v40 = vadd.f32 %v5179_v28, %v3578_v30  ;;  %v5222_v63 = vpop.f32.mrb[16].mxu0  ;;  %v5181_v41 = vpop.f32.mrb[61].mxu1  ;;  %v15479_v28 = vld [vmem:[#allocation19 + $0x3f0] ss:$8 sps:$4 sm:$0xff]  }
0x1211   : > { %v5223_v42 = vadd.f32 %v5222_v63, %v3586_v3  ;;  %v5182_v43 = vadd.f32 %v5181_v41, %v3582_v46  ;;  %v5224_v61 = vpop.f32.mrb[17].mxu0  ;;  %v5183_v35 = vpop.f32.mrb[62].mxu1  ;;  %6967 = vmatpush1.bf16.msra.mxu1 %v15449_v52  ;;  %v15478_v52 = vld [vmem:[#allocation19 + $0x3e4] ss:$8 sps:$4 sm:$0xff]   ;;  %v15482_v63 = vld [vmem:[#allocation19 + $0x400] ss:$8 sps:$4 sm:$0xff]  }
0x1212   : > { %v5225_v47 = vadd.f32 %v5224_v61, %v3590_v31  ;;  %v5184_v48 = vadd.f32 %v5183_v35, %v3578_v30  ;;  %v5226_v55 = vpop.f32.mrb[18].mxu0  ;;  %v5185_v58 = vpop.f32.mrb[63].mxu1  ;;  %6968 = vmatprep.subr.bf16.mxu1 %v15454_v26  ;;  %v5243_v49 = vmax.f32 %v5180_v40, 0.0  ;;  %v15470_v30 = vld [vmem:[#allocation19 + $0x3c0] ss:$8 sps:$4 sm:$0xff]  }
0x1213   : > { %v5227_v50 = vadd.f32 %v5226_v55, %v3586_v3  ;;  %v5186_v13 = vadd.f32 %v5185_v58, %v3582_v46  ;;  %v5228_v4 = vpop.f32.mrb[19].mxu0  ;;  %v5245_v11 = vmax.f32 %v5223_v42, 0.0  ;;  %v5244_v12 = vmax.f32 %v5182_v43, 0.0  ;;  %v15475_v3 = vld [vmem:[#allocation19 + $0x3d4] ss:$8 sps:$4 sm:$0xff]  }
0x1214   : > { %v5259_v6 = vmax.f32 %v5184_v48, 0.0  ;;  %v5229_v10 = vadd.f32 %v5228_v4, %v3590_v31  ;;  %v5246_v15 = vmax.f32 %v5225_v47, 0.0  ;;  %v15473_v46 = vld [vmem:[#allocation19 + $0x3d0] ss:$8 sps:$4 sm:$0xff]   ;;  %v15476_v31 = vld [vmem:[#allocation19 + $0x3e0] ss:$8 sps:$4 sm:$0xff]  }
0x1215   : > { %v5261_v21 = vmax.f32 %v5227_v50, 0.0  ;;  %v5260_v20 = vmax.f32 %v5186_v13, 0.0  ;;  %6969 = vmatpush1.bf16.msra.mxu1 %v15452_v45  ;;  %v15481_v26 = vld [vmem:[#allocation19 + $0x3f4] ss:$8 sps:$4 sm:$0xff]   ;;  %v15484_v40 = vld [vmem:[#allocation19 + $0x404] ss:$8 sps:$4 sm:$0xff]  }
0x1216   : > { %v17660_v16 = vpack.c.bf16 %v5259_v6, %v5243_v49  ;;  %v5262_v17 = vmax.f32 %v5229_v10, 0.0  ;;  %6970 = vmatprep.subr.bf16.mxu1 %v15457_v25  ;;  %v15487_v41 = vld [vmem:[#allocation19 + $0x414] ss:$8 sps:$4 sm:$0xff]   ;;  %v15485_v42 = vld [vmem:[#allocation19 + $0x410] ss:$8 sps:$4 sm:$0xff]  }
0x1217   : > { %v17662_v5 = vpack.c.bf16 %v5261_v21, %v5245_v11  ;;  %v17664_v33 = vpack.c.bf16 %v5260_v20, %v5244_v12  ;;  %v15490_v43 = vld [vmem:[#allocation19 + $0x424] ss:$8 sps:$4 sm:$0xff]   ;;  %v15488_v61 = vld [vmem:[#allocation19 + $0x420] ss:$8 sps:$4 sm:$0xff]   ;;  %v15493_v35 = vld [vmem:[#allocation19 + $0x434] ss:$8 sps:$4 sm:$0xff]  }
0x1218   : > { %v17666_v7 = vpack.c.bf16 %v5262_v17, %v5246_v15  ;;  %v15491_v45 = vld [vmem:[#allocation19 + $0x430] ss:$8 sps:$4 sm:$0xff]   ;;  %v15496_v47 = vld [vmem:[#allocation19 + $0x444] ss:$8 sps:$4 sm:$0xff]   ;;  %v15494_v48 = vld [vmem:[#allocation19 + $0x440] ss:$8 sps:$4 sm:$0xff]  }
0x1219   : > { %6971 = vmatpush1.bf16.msra.mxu1 %v15455_v14  ;;  %v15499_v55 = vld [vmem:[#allocation19 + $0x454] ss:$8 sps:$4 sm:$0xff]   ;;  %v15502_v58 = vld [vmem:[#allocation19 + $0x464] ss:$8 sps:$4 sm:$0xff]   ;;  %v15503_v50 = vld [vmem:[#allocation19 + $0x470] ss:$8 sps:$4 sm:$0xff]  }
0x121a   : > { %6972 = vmatprep.subr.bf16.mxu1 %v15460_v2  ;;  %v15505_v25 = vld [vmem:[#allocation19 + $0x474] ss:$8 sps:$4 sm:$0xff]   ;;  %v15508_v13 = vld [vmem:[#allocation19 + $0x484] ss:$8 sps:$4 sm:$0xff]   ;;  %v15506_v4 = vld [vmem:[#allocation19 + $0x480] ss:$8 sps:$4 sm:$0xff]  }
0x121b   : > { %v15511_v49 = vld [vmem:[#allocation19 + $0x494] ss:$8 sps:$4 sm:$0xff]   ;;  %v15509_v6 = vld [vmem:[#allocation19 + $0x490] ss:$8 sps:$4 sm:$0xff]   ;;  %v15514_v10 = vld [vmem:[#allocation19 + $0x4a4] ss:$8 sps:$4 sm:$0xff]  }
0x121c   : > { %v15512_v11 = vld [vmem:[#allocation19 + $0x4a0] ss:$8 sps:$4 sm:$0xff]   ;;  %v15517_v12 = vld [vmem:[#allocation19 + $0x4b4] ss:$8 sps:$4 sm:$0xff]   ;;  %v15515_v21 = vld [vmem:[#allocation19 + $0x4b0] ss:$8 sps:$4 sm:$0xff]  }
0x121d   : > { %6973 = vmatpush1.bf16.msra.mxu1 %v15458_v32  ;;  %v15520_v20 = vld [vmem:[#allocation19 + $0x4c4] ss:$8 sps:$4 sm:$0xff]   ;;  %v15518_v14 = vld [vmem:[#allocation19 + $0x4c0] ss:$8 sps:$4 sm:$0xff]   ;;  %v15523_v15 = vld [vmem:[#allocation19 + $0x4d4] ss:$8 sps:$4 sm:$0xff]  }
0x121e   : > { %6974 = vmatprep.subr.bf16.mxu1 %v15463_v34  ;;  %v15521_v17 = vld [vmem:[#allocation19 + $0x4d0] ss:$8 sps:$4 sm:$0xff]   ;;  %v15526_v2 = vld [vmem:[#allocation19 + $0x4e4] ss:$8 sps:$4 sm:$0xff]   ;;  %v15524_v32 = vld [vmem:[#allocation19 + $0x4e0] ss:$8 sps:$4 sm:$0xff]  }
0x121f   : > { %v15529_v34 = vld [vmem:[#allocation19 + $0x4f4] ss:$8 sps:$4 sm:$0xff]  }
0x1221   : > { %6975 = vmatpush1.bf16.msra.mxu1 %v15461_v8  ;;  %v15527_v8 = vld [vmem:[#allocation19 + $0x4f0] ss:$8 sps:$4 sm:$0xff]  }
0x1222   : > { %6976 = vmatprep.subr.bf16.mxu1 %v15466_v36  ;;  %v15532_v36 = vld [vmem:[#allocation19 + $0x504] ss:$8 sps:$4 sm:$0xff]  }
0x1225   : > { %6977 = vmatpush1.bf16.msra.mxu1 %v15464_v27  ;;  %v15530_v27 = vld [vmem:[#allocation19 + $0x500] ss:$8 sps:$4 sm:$0xff]  }
0x1226   : > { %6978 = vmatprep.subr.bf16.mxu1 %v15469_v39  ;;  %v15535_v39 = vld [vmem:[#allocation19 + $0x514] ss:$8 sps:$4 sm:$0xff]  }
0x1229   : > { %6979 = vmatpush1.bf16.msra.mxu1 %v15467_v44  ;;  %v15533_v44 = vld [vmem:[#allocation19 + $0x510] ss:$8 sps:$4 sm:$0xff]  }
0x122a   : > { %6980 = vmatprep.subr.bf16.mxu1 %v15472_v29  ;;  %v15538_v29 = vld [vmem:[#allocation19 + $0x524] ss:$8 sps:$4 sm:$0xff]  }
0x122d   : > { %6981 = vmatpush1.bf16.msra.mxu1 %v15470_v30  ;;  %v15536_v30 = vld [vmem:[#allocation19 + $0x520] ss:$8 sps:$4 sm:$0xff]  }
0x122e   : > { %6982 = vmatprep.subr.bf16.mxu1 %v15475_v3  ;;  %v15541_v3 = vld [vmem:[#allocation19 + $0x534] ss:$8 sps:$4 sm:$0xff]  }
0x1231   : > { %6983 = vmatpush1.bf16.msra.mxu1 %v15473_v46  ;;  %v15539_v46 = vld [vmem:[#allocation19 + $0x530] ss:$8 sps:$4 sm:$0xff]  }
0x1232   : > { %6984 = vmatprep.subr.bf16.mxu1 %v15478_v52  ;;  %v15544_v52 = vld [vmem:[#allocation19 + $0x544] ss:$8 sps:$4 sm:$0xff]  }
0x1235   : > { %6985 = vmatpush1.bf16.msra.mxu1 %v15476_v31  ;;  %v15542_v31 = vld [vmem:[#allocation19 + $0x540] ss:$8 sps:$4 sm:$0xff]  }
0x1236   : > { %6986 = vmatprep.subr.bf16.mxu1 %v15481_v26  ;;  %v15547_v26 = vld [vmem:[#allocation19 + $0x554] ss:$8 sps:$4 sm:$0xff]  }
0x1239   : > { %6987 = vmatpush1.bf16.msra.mxu1 %v15479_v28  ;;  %v15550_v28 = vld [vmem:[#allocation19 + $0x564] ss:$8 sps:$4 sm:$0xff]  }
0x123a   : > { %6999 = vmatprep.subr.bf16.mxu1 %v15484_v40  ;;  %v15553_v40 = vld [vmem:[#allocation19 + $0x574] ss:$8 sps:$4 sm:$0xff]  }
0x123c   : > { %6989 = vmatmul.mubr.bf16.vlgmr.msra.gmra.mrb[64].mxu1 %v17627_v24  ;;  %v15497_v24 = vld [vmem:[#allocation19 + $0x450] ss:$8 sps:$4 sm:$0xff]  }
0x123d   : > { %7000 = vmatpush1.bf16.msra.mxu1 %v15482_v63  ;;  %7031 = vmatprep.mubr.bf16.mxu1 %v17646_v0  ;;  %v15500_v0 = vld [vmem:[#allocation19 + $0x460] ss:$8 sps:$4 sm:$0xff]   ;;  %v15551_v63 = vld [vmem:[#allocation19 + $0x570] ss:$8 sps:$4 sm:$0xff]  }
0x123e   : > { %7001 = vmatprep.subr.bf16.mxu1 %v15487_v41  ;;  %v15556_v41 = vld [vmem:[#allocation19 + $0x584] ss:$8 sps:$4 sm:$0xff]  }
0x1241   : > { %7002 = vmatpush1.bf16.msra.mxu1 %v15485_v42  ;;  %v15554_v42 = vld [vmem:[#allocation19 + $0x580] ss:$8 sps:$4 sm:$0xff]  }
0x1242   : > { %7003 = vmatprep.subr.bf16.mxu1 %v15490_v43  ;;  %v15559_v43 = vld [vmem:[#allocation19 + $0x594] ss:$8 sps:$4 sm:$0xff]  }
0x1245   : > { %7004 = vmatpush1.bf16.msra.mxu1 %v15488_v61  ;;  %v15557_v61 = vld [vmem:[#allocation19 + $0x590] ss:$8 sps:$4 sm:$0xff]  }
0x1246   : > { %7005 = vmatprep.subr.bf16.mxu1 %v15493_v35  ;;  %v15562_v35 = vld [vmem:[#allocation19 + $0x5a4] ss:$8 sps:$4 sm:$0xff]  }
0x1249   : > { %7006 = vmatpush1.bf16.msra.mxu1 %v15491_v45  ;;  %v15560_v45 = vld [vmem:[#allocation19 + $0x5a0] ss:$8 sps:$4 sm:$0xff]  }
0x124a   : > { %7007 = vmatprep.subr.bf16.mxu1 %v15496_v47  ;;  %v15565_v47 = vld [vmem:[#allocation19 + $0x5b4] ss:$8 sps:$4 sm:$0xff]  }
0x124d   : > { %7008 = vmatpush1.bf16.msra.mxu1 %v15494_v48  ;;  %v15563_v48 = vld [vmem:[#allocation19 + $0x5b0] ss:$8 sps:$4 sm:$0xff]  }
0x124e   : > { %7009 = vmatprep.subr.bf16.mxu1 %v15499_v55  ;;  %v15568_v55 = vld [vmem:[#allocation19 + $0x5c4] ss:$8 sps:$4 sm:$0xff]  }
0x1251   : > { %7010 = vmatpush1.bf16.msra.mxu1 %v15497_v24  ;;  %v15566_v24 = vld [vmem:[#allocation19 + $0x5c0] ss:$8 sps:$4 sm:$0xff]  }
0x1252   : > { %7011 = vmatprep.subr.bf16.mxu1 %v15502_v58  ;;  %v15571_v58 = vld [vmem:[#allocation19 + $0x5d4] ss:$8 sps:$4 sm:$0xff]  }
0x1255   : > { %7012 = vmatpush1.bf16.msra.mxu1 %v15500_v0  ;;  %v15569_v0 = vld [vmem:[#allocation19 + $0x5d0] ss:$8 sps:$4 sm:$0xff]  }
0x1256   : > { %7013 = vmatprep.subr.bf16.mxu1 %v15505_v25  ;;  %v15574_v25 = vld [vmem:[#allocation19 + $0x5e4] ss:$8 sps:$4 sm:$0xff]  }
0x1259   : > { %7014 = vmatpush1.bf16.msra.mxu1 %v15503_v50  ;;  %v15572_v50 = vld [vmem:[#allocation19 + $0x5e0] ss:$8 sps:$4 sm:$0xff]  }
0x125a   : > { %7015 = vmatprep.subr.bf16.mxu1 %v15508_v13  ;;  %v15577_v13 = vld [vmem:[#allocation19 + $0x5f4] ss:$8 sps:$4 sm:$0xff]  }
0x125d   : > { %7016 = vmatpush1.bf16.msra.mxu1 %v15506_v4  ;;  %v15575_v4 = vld [vmem:[#allocation19 + $0x5f0] ss:$8 sps:$4 sm:$0xff]  }
0x125e   : > { %7017 = vmatprep.subr.bf16.mxu1 %v15511_v49  ;;  %v15580_v49 = vld [vmem:[#allocation19 + $0x604] ss:$8 sps:$4 sm:$0xff]  }
0x1261   : > { %7018 = vmatpush1.bf16.msra.mxu1 %v15509_v6  ;;  %v15578_v6 = vld [vmem:[#allocation19 + $0x600] ss:$8 sps:$4 sm:$0xff]  }
0x1262   : > { %7019 = vmatprep.subr.bf16.mxu1 %v15514_v10  ;;  %v15583_v10 = vld [vmem:[#allocation19 + $0x614] ss:$8 sps:$4 sm:$0xff]  }
0x1265   : > { %7020 = vmatpush1.bf16.msra.mxu1 %v15512_v11  ;;  %v15581_v11 = vld [vmem:[#allocation19 + $0x610] ss:$8 sps:$4 sm:$0xff]  }
0x1266   : > { %7021 = vmatprep.subr.bf16.mxu1 %v15517_v12  ;;  %v15586_v12 = vld [vmem:[#allocation19 + $0x624] ss:$8 sps:$4 sm:$0xff]  }
0x1269   : > { %7022 = vmatpush1.bf16.msra.mxu1 %v15515_v21  ;;  %v15584_v21 = vld [vmem:[#allocation19 + $0x620] ss:$8 sps:$4 sm:$0xff]  }
0x126a   : > { %7023 = vmatprep.subr.bf16.mxu1 %v15520_v20  ;;  %v15589_v20 = vld [vmem:[#allocation19 + $0x634] ss:$8 sps:$4 sm:$0xff]  }
0x126d   : > { %7024 = vmatpush1.bf16.msra.mxu1 %v15518_v14  ;;  %v15587_v14 = vld [vmem:[#allocation19 + $0x630] ss:$8 sps:$4 sm:$0xff]  }
0x126e   : > { %7025 = vmatprep.subr.bf16.mxu1 %v15523_v15  ;;  %v15592_v15 = vld [vmem:[#allocation19 + $0x644] ss:$8 sps:$4 sm:$0xff]  }
0x1271   : > { %7026 = vmatpush1.bf16.msra.mxu1 %v15521_v17  ;;  %v15590_v17 = vld [vmem:[#allocation19 + $0x640] ss:$8 sps:$4 sm:$0xff]  }
0x1272   : > { %7027 = vmatprep.subr.bf16.mxu1 %v15526_v2  ;;  %v15595_v2 = vld [vmem:[#allocation19 + $0x654] ss:$8 sps:$4 sm:$0xff]  }
0x1275   : > { %7028 = vmatpush1.bf16.msra.mxu1 %v15524_v32  ;;  %v15598_v32 = vld [vmem:[#allocation19 + $0x664] ss:$8 sps:$4 sm:$0xff]  }
0x1276   : > { %7029 = vmatprep.subr.bf16.mxu1 %v15529_v34  ;;  %v15601_v34 = vld [vmem:[#allocation19 + $0x674] ss:$8 sps:$4 sm:$0xff]  }
0x1279   : > { %7030 = vmatpush1.bf16.msra.mxu1 %v15527_v8  ;;  %v15599_v8 = vld [vmem:[#allocation19 + $0x670] ss:$8 sps:$4 sm:$0xff]  }
0x127a   : > { %7042 = vmatprep.subr.bf16.mxu1 %v15532_v36  ;;  %v15604_v36 = vld [vmem:[#allocation19 + $0x684] ss:$8 sps:$4 sm:$0xff]  }
0x127c   : > { %7032 = vmatmul.mubr.bf16.vlgmr.msra.gmra.mrb[64].mxu1 %v17642_v62  ;;  %v15545_v62 = vld [vmem:[#allocation19 + $0x550] ss:$8 sps:$4 sm:$0xff]  }
0x127d   : > { %7043 = vmatpush1.bf16.msra.mxu1 %v15530_v27  ;;  %7074 = vmatprep.mubr.bf16.mxu1 %v17648_v1  ;;  %v15548_v1 = vld [vmem:[#allocation19 + $0x560] ss:$8 sps:$4 sm:$0xff]  }
0x127e   : > { %7044 = vmatprep.subr.bf16.mxu1 %v15535_v39  ;;  %v15602_v27 = vld [vmem:[#allocation19 + $0x680] ss:$8 sps:$4 sm:$0xff]   ;;  %v15607_v39 = vld [vmem:[#allocation19 + $0x694] ss:$8 sps:$4 sm:$0xff]  }
0x1281   : > { %7045 = vmatpush1.bf16.msra.mxu1 %v15533_v44  ;;  %v15605_v44 = vld [vmem:[#allocation19 + $0x690] ss:$8 sps:$4 sm:$0xff]  }
0x1282   : > { %7046 = vmatprep.subr.bf16.mxu1 %v15538_v29  ;;  %v15610_v29 = vld [vmem:[#allocation19 + $0x6a4] ss:$8 sps:$4 sm:$0xff]  }
0x1285   : > { %7047 = vmatpush1.bf16.msra.mxu1 %v15536_v30  ;;  %v15608_v30 = vld [vmem:[#allocation19 + $0x6a0] ss:$8 sps:$4 sm:$0xff]  }
0x1286   : > { %7048 = vmatprep.subr.bf16.mxu1 %v15541_v3  ;;  %v15613_v3 = vld [vmem:[#allocation19 + $0x6b4] ss:$8 sps:$4 sm:$0xff]  }
0x1289   : > { %7049 = vmatpush1.bf16.msra.mxu1 %v15539_v46  ;;  %v15611_v46 = vld [vmem:[#allocation19 + $0x6b0] ss:$8 sps:$4 sm:$0xff]  }
0x128a   : > { %7050 = vmatprep.subr.bf16.mxu1 %v15544_v52  ;;  %v15616_v52 = vld [vmem:[#allocation19 + $0x6c4] ss:$8 sps:$4 sm:$0xff]  }
0x128d   : > { %7051 = vmatpush1.bf16.msra.mxu1 %v15542_v31  ;;  %v15614_v31 = vld [vmem:[#allocation19 + $0x6c0] ss:$8 sps:$4 sm:$0xff]  }
0x128e   : > { %7052 = vmatprep.subr.bf16.mxu1 %v15547_v26  ;;  %v15619_v26 = vld [vmem:[#allocation19 + $0x6d4] ss:$8 sps:$4 sm:$0xff]  }
0x1291   : > { %7053 = vmatpush1.bf16.msra.mxu1 %v15545_v62  ;;  %v15617_v62 = vld [vmem:[#allocation19 + $0x6d0] ss:$8 sps:$4 sm:$0xff]  }
0x1292   : > { %7054 = vmatprep.subr.bf16.mxu1 %v15550_v28  ;;  %v15622_v28 = vld [vmem:[#allocation19 + $0x6e4] ss:$8 sps:$4 sm:$0xff]  }
0x1295   : > { %7055 = vmatpush1.bf16.msra.mxu1 %v15548_v1  ;;  %v15620_v1 = vld [vmem:[#allocation19 + $0x6e0] ss:$8 sps:$4 sm:$0xff]  }
0x1296   : > { %7056 = vmatprep.subr.bf16.mxu1 %v15553_v40  ;;  %v15625_v40 = vld [vmem:[#allocation19 + $0x6f4] ss:$8 sps:$4 sm:$0xff]  }
0x1299   : > { %7057 = vmatpush1.bf16.msra.mxu1 %v15551_v63  ;;  %v15623_v63 = vld [vmem:[#allocation19 + $0x6f0] ss:$8 sps:$4 sm:$0xff]  }
0x129a   : > { %7058 = vmatprep.subr.bf16.mxu1 %v15556_v41  ;;  %v15628_v41 = vld [vmem:[#allocation19 + $0x704] ss:$8 sps:$4 sm:$0xff]  }
0x129d   : > { %7059 = vmatpush1.bf16.msra.mxu1 %v15554_v42  ;;  %v15626_v42 = vld [vmem:[#allocation19 + $0x700] ss:$8 sps:$4 sm:$0xff]  }
0x129e   : > { %7060 = vmatprep.subr.bf16.mxu1 %v15559_v43  ;;  %v15631_v43 = vld [vmem:[#allocation19 + $0x714] ss:$8 sps:$4 sm:$0xff]  }
0x12a1   : > { %7061 = vmatpush1.bf16.msra.mxu1 %v15557_v61  ;;  %v15629_v61 = vld [vmem:[#allocation19 + $0x710] ss:$8 sps:$4 sm:$0xff]  }
0x12a2   : > { %7062 = vmatprep.subr.bf16.mxu1 %v15562_v35  ;;  %v15634_v35 = vld [vmem:[#allocation19 + $0x724] ss:$8 sps:$4 sm:$0xff]  }
0x12a5   : > { %7063 = vmatpush1.bf16.msra.mxu1 %v15560_v45  ;;  %v15632_v45 = vld [vmem:[#allocation19 + $0x720] ss:$8 sps:$4 sm:$0xff]  }
0x12a6   : > { %7064 = vmatprep.subr.bf16.mxu1 %v15565_v47  ;;  %v15637_v47 = vld [vmem:[#allocation19 + $0x734] ss:$8 sps:$4 sm:$0xff]  }
0x12a9   : > { %7065 = vmatpush1.bf16.msra.mxu1 %v15563_v48  ;;  %v15635_v48 = vld [vmem:[#allocation19 + $0x730] ss:$8 sps:$4 sm:$0xff]  }
0x12aa   : > { %7066 = vmatprep.subr.bf16.mxu1 %v15568_v55  ;;  %v15640_v55 = vld [vmem:[#allocation19 + $0x744] ss:$8 sps:$4 sm:$0xff]  }
0x12ad   : > { %7067 = vmatpush1.bf16.msra.mxu1 %v15566_v24  ;;  %v15638_v24 = vld [vmem:[#allocation19 + $0x740] ss:$8 sps:$4 sm:$0xff]  }
0x12ae   : > { %7068 = vmatprep.subr.bf16.mxu1 %v15571_v58  ;;  %v15643_v58 = vld [vmem:[#allocation19 + $0x754] ss:$8 sps:$4 sm:$0xff]  }
0x12b1   : > { %7069 = vmatpush1.bf16.msra.mxu1 %v15569_v0  ;;  %v15646_v0 = vld [vmem:[#allocation19 + $0x764] ss:$8 sps:$4 sm:$0xff]  }
0x12b2   : > { %7070 = vmatprep.subr.bf16.mxu1 %v15574_v25  ;;  %v15649_v25 = vld [vmem:[#allocation19 + $0x774] ss:$8 sps:$4 sm:$0xff]  }
0x12b5   : > { %7071 = vmatpush1.bf16.msra.mxu1 %v15572_v50  ;;  %v15647_v50 = vld [vmem:[#allocation19 + $0x770] ss:$8 sps:$4 sm:$0xff]  }
0x12b6   : > { %7072 = vmatprep.subr.bf16.mxu1 %v15577_v13  ;;  %v15652_v13 = vld [vmem:[#allocation19 + $0x784] ss:$8 sps:$4 sm:$0xff]  }
0x12b9   : > { %7073 = vmatpush1.bf16.msra.mxu1 %v15575_v4  ;;  %v15650_v4 = vld [vmem:[#allocation19 + $0x780] ss:$8 sps:$4 sm:$0xff]  }
0x12ba   : > { %7085 = vmatprep.subr.bf16.mxu1 %v15580_v49  ;;  %v15655_v49 = vld [vmem:[#allocation19 + $0x794] ss:$8 sps:$4 sm:$0xff]  }
0x12bc   : > { %7075 = vmatmul.mubr.bf16.vlgmr.msra.gmra.mrb[64].mxu1 %v17644_v60  ;;  %v15593_v60 = vld [vmem:[#allocation19 + $0x650] ss:$8 sps:$4 sm:$0xff]  }
0x12bd   : > { %7086 = vmatpush1.bf16.msra.mxu1 %v15578_v6  ;;  %7117 = vmatprep.mubr.bf16.mxu1 %v17664_v33  ;;  %v15596_v33 = vld [vmem:[#allocation19 + $0x660] ss:$8 sps:$4 sm:$0xff]   ;;  %v15653_v6 = vld [vmem:[#allocation19 + $0x790] ss:$8 sps:$4 sm:$0xff]  }
0x12be   : > { %7087 = vmatprep.subr.bf16.mxu1 %v15583_v10  ;;  %v15658_v10 = vld [vmem:[#allocation19 + $0x7a4] ss:$8 sps:$4 sm:$0xff]  }
0x12c1   : > { %7088 = vmatpush1.bf16.msra.mxu1 %v15581_v11  ;;  %v15656_v11 = vld [vmem:[#allocation19 + $0x7a0] ss:$8 sps:$4 sm:$0xff]  }
0x12c2   : > { %7089 = vmatprep.subr.bf16.mxu1 %v15586_v12  ;;  %v15661_v12 = vld [vmem:[#allocation19 + $0x7b4] ss:$8 sps:$4 sm:$0xff]  }
0x12c5   : > { %7090 = vmatpush1.bf16.msra.mxu1 %v15584_v21  ;;  %v15659_v21 = vld [vmem:[#allocation19 + $0x7b0] ss:$8 sps:$4 sm:$0xff]  }
0x12c6   : > { %7091 = vmatprep.subr.bf16.mxu1 %v15589_v20  ;;  %v15664_v20 = vld [vmem:[#allocation19 + $0x7c4] ss:$8 sps:$4 sm:$0xff]  }
0x12c9   : > { %7092 = vmatpush1.bf16.msra.mxu1 %v15587_v14  ;;  %v15662_v14 = vld [vmem:[#allocation19 + $0x7c0] ss:$8 sps:$4 sm:$0xff]  }
0x12ca   : > { %7093 = vmatprep.subr.bf16.mxu1 %v15592_v15  ;;  %v15667_v15 = vld [vmem:[#allocation19 + $0x7d4] ss:$8 sps:$4 sm:$0xff]  }
0x12cd   : > { %7094 = vmatpush1.bf16.msra.mxu1 %v15590_v17  ;;  %v15665_v17 = vld [vmem:[#allocation19 + $0x7d0] ss:$8 sps:$4 sm:$0xff]  }
0x12ce   : > { %7095 = vmatprep.subr.bf16.mxu1 %v15595_v2  ;;  %v15670_v2 = vld [vmem:[#allocation19 + $0x7e4] ss:$8 sps:$4 sm:$0xff]  }
0x12d1   : > { %7096 = vmatpush1.bf16.msra.mxu1 %v15593_v60  ;;  %v15668_v60 = vld [vmem:[#allocation19 + $0x7e0] ss:$8 sps:$4 sm:$0xff]  }
0x12d2   : > { %7097 = vmatprep.subr.bf16.mxu1 %v15598_v32  ;;  %v15673_v32 = vld [vmem:[#allocation19 + $0x7f4] ss:$8 sps:$4 sm:$0xff]  }
0x12d5   : > { %7098 = vmatpush1.bf16.msra.mxu1 %v15596_v33  ;;  %v15671_v33 = vld [vmem:[#allocation19 + $0x7f0] ss:$8 sps:$4 sm:$0xff]  }
0x12d6   : > { %7099 = vmatprep.subr.bf16.mxu1 %v15601_v34  ;;  %v5535_v34 = vld [vmem:[#allocation20] sm:$0x3] }
0x12d9   : > { %7100 = vmatpush1.bf16.msra.mxu1 %v15599_v8  ;;  %v5540_v8 = vrot.slane %v5535_v34, %v17372_v53 }
0x12da   : > { %7101 = vmatprep.subr.bf16.mxu1 %v15604_v36  ;;  %v5544_v36 = vrot.slane %v5535_v34, %v17369_v51  ;;  %v15712_v34 = vld [vmem:[#allocation7 + $0x544] ss:$24 sps:$4 sm:$0xff]  }
0x12dd   : > { %7102 = vmatpush1.bf16.msra.mxu1 %v15602_v27 }
0x12de   : > { %7103 = vmatprep.subr.bf16.mxu1 %v15607_v39 }
0x12e1   : > { %7104 = vmatpush1.bf16.msra.mxu1 %v15605_v44 }
0x12e2   : > { %7105 = vmatprep.subr.bf16.mxu1 %v15610_v29 }
0x12e5   : > { %7106 = vmatpush1.bf16.msra.mxu1 %v15608_v30 }
0x12e6   : > { %7107 = vmatprep.subr.bf16.mxu1 %v15613_v3 }
0x12e9   : > { %7108 = vmatpush1.bf16.msra.mxu1 %v15611_v46 }
0x12ea   : > { %7109 = vmatprep.subr.bf16.mxu1 %v15616_v52 }
0x12ed   : > { %7110 = vmatpush1.bf16.msra.mxu1 %v15614_v31 }
0x12ee   : > { %7111 = vmatprep.subr.bf16.mxu1 %v15619_v26 }
0x12f1   : > { %7112 = vmatpush1.bf16.msra.mxu1 %v15617_v62 }
0x12f2   : > { %7113 = vmatprep.subr.bf16.mxu1 %v15622_v28 }
0x12f5   : > { %7114 = vmatpush1.bf16.msra.mxu1 %v15620_v1 }
0x12f6   : > { %7115 = vmatprep.subr.bf16.mxu1 %v15625_v40  ;;  %v15674_v40 = vld [vmem:[#allocation7 + $0x300] ss:$24 sps:$4 sm:$0xff]  }
0x12f9   : > { %7116 = vmatpush1.bf16.msra.mxu1 %v15623_v63  ;;  %v15676_v63 = vld [vmem:[#allocation7 + $0x304] ss:$24 sps:$4 sm:$0xff]  }
0x12fa   : > { %7128 = vmatprep.subr.bf16.mxu1 %v15628_v41  ;;  %v15679_v41 = vld [vmem:[#allocation7 + $0x334] ss:$24 sps:$4 sm:$0xff]   ;;  %7851 = vmatprep.subr.bf16.mxu0 %v15676_v63 }
0x12fb   : > { %7852 = vmatpush1.bf16.msra.mxu0 %v15674_v40 }
0x12fc   : > { %7118 = vmatmul.mubr.bf16.vlgmr.msra.gmra.mrb[64].mxu1 %v17660_v16  ;;  %v15641_v16 = vld [vmem:[#allocation19 + $0x750] ss:$8 sps:$4 sm:$0xff]   ;;  %7853 = vmatprep.subr.bf16.mxu0 %v15679_v41 }
0x12fd   : > { %7129 = vmatpush1.bf16.msra.mxu1 %v15626_v42  ;;  %7160 = vmatprep.mubr.bf16.mxu1 %v17666_v7  ;;  %v15644_v7 = vld [vmem:[#allocation19 + $0x760] ss:$8 sps:$4 sm:$0xff]   ;;  %v15677_v42 = vld [vmem:[#allocation7 + $0x330] ss:$24 sps:$4 sm:$0xff]  }
0x12fe   : > { %7130 = vmatprep.subr.bf16.mxu1 %v15631_v43  ;;  %v15680_v43 = vld [vmem:[#allocation7 + $0x360] ss:$24 sps:$4 sm:$0xff]  }
0x12ff   : > { %7854 = vmatpush1.bf16.msra.mxu0 %v15677_v42 }
0x1301   : > { %7131 = vmatpush1.bf16.msra.mxu1 %v15629_v61  ;;  %v15686_v61 = vld [vmem:[#allocation7 + $0x3c0] ss:$24 sps:$4 sm:$0xff]  }
0x1302   : > { %7132 = vmatprep.subr.bf16.mxu1 %v15634_v35  ;;  %v15691_v35 = vld [vmem:[#allocation7 + $0x3f4] ss:$24 sps:$4 sm:$0xff]  }
0x1305   : > { %7133 = vmatpush1.bf16.msra.mxu1 %v15632_v45  ;;  %v15689_v45 = vld [vmem:[#allocation7 + $0x3f0] ss:$24 sps:$4 sm:$0xff]  }
0x1306   : > { %7134 = vmatprep.subr.bf16.mxu1 %v15637_v47  ;;  %v15694_v47 = vld [vmem:[#allocation7 + $0x424] ss:$24 sps:$4 sm:$0xff]  }
0x1309   : > { %7135 = vmatpush1.bf16.msra.mxu1 %v15635_v48  ;;  %v15692_v48 = vld [vmem:[#allocation7 + $0x420] ss:$24 sps:$4 sm:$0xff]  }
0x130a   : > { %7136 = vmatprep.subr.bf16.mxu1 %v15640_v55  ;;  %v15697_v55 = vld [vmem:[#allocation7 + $0x454] ss:$24 sps:$4 sm:$0xff]  }
0x130d   : > { %7137 = vmatpush1.bf16.msra.mxu1 %v15638_v24  ;;  %v15695_v24 = vld [vmem:[#allocation7 + $0x450] ss:$24 sps:$4 sm:$0xff]  }
0x130e   : > { %7138 = vmatprep.subr.bf16.mxu1 %v15643_v58  ;;  %v15700_v58 = vld [vmem:[#allocation7 + $0x484] ss:$24 sps:$4 sm:$0xff]  }
0x1311   : > { %7139 = vmatpush1.bf16.msra.mxu1 %v15641_v16  ;;  %v15698_v16 = vld [vmem:[#allocation7 + $0x480] ss:$24 sps:$4 sm:$0xff]  }
0x1312   : > { %7140 = vmatprep.subr.bf16.mxu1 %v15646_v0  ;;  %v15703_v0 = vld [vmem:[#allocation7 + $0x4b4] ss:$24 sps:$4 sm:$0xff]  }
0x1315   : > { %7141 = vmatpush1.bf16.msra.mxu1 %v15644_v7  ;;  %v15701_v7 = vld [vmem:[#allocation7 + $0x4b0] ss:$24 sps:$4 sm:$0xff]  }
0x1316   : > { %7142 = vmatprep.subr.bf16.mxu1 %v15649_v25 }
0x1319   : > { %7143 = vmatpush1.bf16.msra.mxu1 %v15647_v50 }
0x131a   : > { %7144 = vmatprep.subr.bf16.mxu1 %v15652_v13 }
0x131d   : > { %7145 = vmatpush1.bf16.msra.mxu1 %v15650_v4 }
0x131e   : > { %7146 = vmatprep.subr.bf16.mxu1 %v15655_v49 }
0x1321   : > { %7147 = vmatpush1.bf16.msra.mxu1 %v15653_v6 }
0x1322   : > { %7148 = vmatprep.subr.bf16.mxu1 %v15658_v10 }
0x1325   : > { %7149 = vmatpush1.bf16.msra.mxu1 %v15656_v11 }
0x1326   : > { %7150 = vmatprep.subr.bf16.mxu1 %v15661_v12 }
0x1329   : > { %7151 = vmatpush1.bf16.msra.mxu1 %v15659_v21 }
0x132a   : > { %7152 = vmatprep.subr.bf16.mxu1 %v15664_v20 }
0x132d   : > { %7153 = vmatpush1.bf16.msra.mxu1 %v15662_v14 }
0x132e   : > { %7154 = vmatprep.subr.bf16.mxu1 %v15667_v15 }
0x1331   : > { %7155 = vmatpush1.bf16.msra.mxu1 %v15665_v17 }
0x1332   : > { %7156 = vmatprep.subr.bf16.mxu1 %v15670_v2  ;;  %v15706_v2 = vld [vmem:[#allocation7 + $0x4e4] ss:$24 sps:$4 sm:$0xff]  }
0x1335   : > { %7157 = vmatpush1.bf16.msra.mxu1 %v15668_v60  ;;  %v15704_v60 = vld [vmem:[#allocation7 + $0x4e0] ss:$24 sps:$4 sm:$0xff]  }
0x1336   : > { %7158 = vmatprep.subr.bf16.mxu1 %v15673_v32  ;;  %v15709_v32 = vld [vmem:[#allocation7 + $0x514] ss:$24 sps:$4 sm:$0xff]  }
0x1339   : > { %7159 = vmatpush1.bf16.msra.mxu1 %v15671_v33  ;;  %v15707_v33 = vld [vmem:[#allocation7 + $0x510] ss:$24 sps:$4 sm:$0xff]  }
0x133c   : > { %7161 = vmatmul.mubr.bf16.vlgmr.msra.gmra.mrb[64].mxu1 %v17662_v5 }
0x140f   : > { %v7162_v27 = vpop.f32.mrb[64].mxu1 }
0x1410   : > { %v14613_v39 = vadd.f32 %v7162_v27, %v5540_v8  ;;  %v7164_v44 = vpop.f32.mrb[65].mxu1  ;;  %v15713_v27 = vld [vmem:[#allocation7 + $0x570] ss:$24 sps:$4 sm:$0xff]  }
0x1411   : > { %v14614_v29 = vadd.f32 %v7164_v44, %v5544_v36  ;;  %v7166_v30 = vpop.f32.mrb[66].mxu1  ;;  %v15718_v44 = vld [vmem:[#allocation7 + $0x5a4] ss:$24 sps:$4 sm:$0xff]  }
0x1412   : > { %v7171_v3 = vadd.f32 %v14613_v39, %v17567_v56  ;;  %v14615_v46 = vadd.f32 %v7166_v30, %v5540_v8  ;;  %v7168_v52 = vpop.f32.mrb[67].mxu1  ;;  %v15682_v56 = vld [vmem:[#allocation7 + $0x364] ss:$24 sps:$4 sm:$0xff]   ;;  %v15710_v8 = vld [vmem:[#allocation7 + $0x540] ss:$24 sps:$4 sm:$0xff]  }
0x1413   : > { %v7172_v31 = vadd.f32 %v14614_v29, %v17569_v57  ;;  %v14616_v26 = vadd.f32 %v7168_v52, %v5544_v36  ;;  %7855 = vmatprep.subr.bf16.mxu0 %v15682_v56  ;;  %v15685_v57 = vld [vmem:[#allocation7 + $0x394] ss:$24 sps:$4 sm:$0xff]   ;;  %v15716_v39 = vld [vmem:[#allocation7 + $0x5a0] ss:$24 sps:$4 sm:$0xff]   ;;  %v15719_v30 = vld [vmem:[#allocation7 + $0x5d0] ss:$24 sps:$4 sm:$0xff]  }
0x1414   : > { %v7173_v62 = vadd.f32 %v14615_v46, %v17571_v18  ;;  %7856 = vmatpush1.bf16.msra.mxu0 %v15680_v43  ;;  %v15683_v18 = vld [vmem:[#allocation7 + $0x390] ss:$24 sps:$4 sm:$0xff]   ;;  %v15715_v36 = vld [vmem:[#allocation7 + $0x574] ss:$24 sps:$4 sm:$0xff]  }
0x1415   : > { %v7174_v5 = vadd.f32 %v14616_v26, %v17573_v19  ;;  %v7177_v28 = vadd.f32 %v7172_v31, %v7171_v3  ;;  %7857 = vmatprep.subr.bf16.mxu0 %v15685_v57  ;;  %v15688_v19 = vld [vmem:[#allocation7 + $0x3c4] ss:$24 sps:$4 sm:$0xff]   ;;  %v15721_v29 = vld [vmem:[#allocation7 + $0x5d4] ss:$24 sps:$4 sm:$0xff]  }
0x1417   : > { %7178 = vadd.xlane.f32.xlu0 %v7177_v28  ;;  %v7180_v1 = vadd.f32 %v7174_v5, %v7173_v62  ;;  %v7175_v28 = vld [vmem:[#allocation22] sm:$0x3] }
0x1418   : > { %7858 = vmatpush1.bf16.msra.mxu0 %v15683_v18  ;;  %v7213_v40 = vrot.slane %v7175_v28, %v17372_v53  ;;  %v7217_v63 = vrot.slane %v7175_v28, %v17369_v51  ;;  %v15775_v28 = vld [vmem:[#allocation7 + $0x344] ss:$24 sps:$4 sm:$0xff]  }
0x1419   : > { %7181 = vadd.xlane.f32.xlu1 %v7180_v1  ;;  %7859 = vmatprep.subr.bf16.mxu0 %v15688_v19  ;;  %v7176_v1 = vld [vmem:[#allocation23] sm:$0x3] }
0x141a   : > { %v7228_v57 = vrot.slane %v7176_v1, %v17372_v53  ;;  %v7232_v18 = vrot.slane %v7176_v1, %v17369_v51  ;;  %v15773_v1 = vld [vmem:[#allocation7 + $0x340] ss:$24 sps:$4 sm:$0xff]  }
0x141c   : > { %7860 = vmatpush1.bf16.msra.mxu0 %v15686_v61 }
0x141d   : > { %7861 = vmatprep.subr.bf16.mxu0 %v15691_v35 }
0x1420   : > { %7862 = vmatpush1.bf16.msra.mxu0 %v15689_v45 }
0x1421   : > { %7863 = vmatprep.subr.bf16.mxu0 %v15694_v47 }
0x1424   : > { %7864 = vmatpush1.bf16.msra.mxu0 %v15692_v48 }
0x1425   : > { %7865 = vmatprep.subr.bf16.mxu0 %v15697_v55 }
0x1428   : > { %7866 = vmatpush1.bf16.msra.mxu0 %v15695_v24 }
0x1429   : > { %7867 = vmatprep.subr.bf16.mxu0 %v15700_v58 }
0x142c   : > { %7868 = vmatpush1.bf16.msra.mxu0 %v15698_v16 }
0x142d   : > { %7869 = vmatprep.subr.bf16.mxu0 %v15703_v0 }
0x1430   : > { %7870 = vmatpush1.bf16.msra.mxu0 %v15701_v7  ;;  %v15722_v7 = vld [vmem:[#allocation7 + $0x308] ss:$24 sps:$4 sm:$0xff]  }
0x1431   : > { %7871 = vmatprep.subr.bf16.mxu0 %v15706_v2  ;;  %v15743_v2 = vld [vmem:[#allocation7 + $0x458] ss:$24 sps:$4 sm:$0xff]  }
0x1434   : > { %7872 = vmatpush1.bf16.msra.mxu0 %v15704_v60  ;;  %v15748_v60 = vld [vmem:[#allocation7 + $0x48c] ss:$24 sps:$4 sm:$0xff]  }
0x1435   : > { %7873 = vmatprep.subr.bf16.mxu0 %v15709_v32  ;;  %v15746_v32 = vld [vmem:[#allocation7 + $0x488] ss:$24 sps:$4 sm:$0xff]  }
0x1438   : > { %7874 = vmatpush1.bf16.msra.mxu0 %v15707_v33  ;;  %v15751_v33 = vld [vmem:[#allocation7 + $0x4bc] ss:$24 sps:$4 sm:$0xff]  }
0x1439   : > { %7875 = vmatprep.subr.bf16.mxu0 %v15712_v34  ;;  %v15749_v34 = vld [vmem:[#allocation7 + $0x4b8] ss:$24 sps:$4 sm:$0xff]  }
0x143c   : > { %7876 = vmatpush1.bf16.msra.mxu0 %v15710_v8  ;;  %v15754_v8 = vld [vmem:[#allocation7 + $0x4ec] ss:$24 sps:$4 sm:$0xff]  }
0x143d   : > { %7877 = vmatprep.subr.bf16.mxu0 %v15715_v36  ;;  %v15752_v36 = vld [vmem:[#allocation7 + $0x4e8] ss:$24 sps:$4 sm:$0xff]  }
0x1440   : > { %7878 = vmatpush1.bf16.msra.mxu0 %v15713_v27  ;;  %v15757_v27 = vld [vmem:[#allocation7 + $0x51c] ss:$24 sps:$4 sm:$0xff]  }
0x1441   : > { %7879 = vmatprep.subr.bf16.mxu0 %v15718_v44  ;;  %v15760_v44 = vld [vmem:[#allocation7 + $0x54c] ss:$24 sps:$4 sm:$0xff]  }
0x1444   : > { %7880 = vmatpush1.bf16.msra.mxu0 %v15716_v39  ;;  %v15755_v39 = vld [vmem:[#allocation7 + $0x518] ss:$24 sps:$4 sm:$0xff]  }
0x1445   : > { %7881 = vmatprep.subr.bf16.mxu0 %v15721_v29  ;;  %v15758_v29 = vld [vmem:[#allocation7 + $0x548] ss:$24 sps:$4 sm:$0xff]  }
0x1448   : > { %7882 = vmatpush1.bf16.msra.mxu0 %v15719_v30  ;;  %v15763_v30 = vld [vmem:[#allocation7 + $0x57c] ss:$24 sps:$4 sm:$0xff]  }
0x14a4   : > { %v7179_v25 = vpop.xlane.xlu0 %7178 }
0x14a5   : > { %v7183_v50 = vmul.f32 0.00390625, %v7179_v25 }
0x14a6   : > { %v7182_v13 = vpop.xlane.xlu1 %7181 }
0x14a7   : > { %v7185_v4 = vsub.f32 %v7171_v3, %v7183_v50  ;;  %v7186_v49 = vsub.f32 %v7172_v31, %v7183_v50  ;;  %v7184_v6 = vmul.f32 0.00390625, %v7182_v13  ;;  %v15724_v3 = vld [vmem:[#allocation7 + $0x30c] ss:$24 sps:$4 sm:$0xff]   ;;  %v15727_v50 = vld [vmem:[#allocation7 + $0x33c] ss:$24 sps:$4 sm:$0xff]  }
0x14a8   : > { %7894 = vmatprep.subr.bf16.mxu0 %v15724_v3  ;;  %v15725_v13 = vld [vmem:[#allocation7 + $0x338] ss:$24 sps:$4 sm:$0xff]  }
0x14a9   : > { %v7187_v10 = vsub.f32 %v7173_v62, %v7184_v6  ;;  %v7188_v11 = vsub.f32 %v7174_v5, %v7184_v6  ;;  %v7189_v12 = vmul.f32 %v7185_v4, %v7185_v4  ;;  %v7190_v21 = vmul.f32 %v7186_v49, %v7186_v49  ;;  %v15733_v6 = vld [vmem:[#allocation7 + $0x39c] ss:$24 sps:$4 sm:$0xff]   ;;  %v15761_v3 = vld [vmem:[#allocation7 + $0x578] ss:$24 sps:$4 sm:$0xff]  }
0x14ab   : > { %v7193_v20 = vadd.f32 %v7190_v21, %v7189_v12  ;;  %v7191_v14 = vmul.f32 %v7187_v10, %v7187_v10  ;;  %v7192_v15 = vmul.f32 %v7188_v11, %v7188_v11  ;;  %v15734_v12 = vld [vmem:[#allocation7 + $0x3c8] ss:$24 sps:$4 sm:$0xff]   ;;  %v15739_v21 = vld [vmem:[#allocation7 + $0x3fc] ss:$24 sps:$4 sm:$0xff]  }
0x14ad   : > { %7194 = vadd.xlane.f32.xlu0 %v7193_v20  ;;  %v7196_v17 = vadd.f32 %v7192_v15, %v7191_v14  ;;  %v15737_v20 = vld [vmem:[#allocation7 + $0x3f8] ss:$24 sps:$4 sm:$0xff]   ;;  %v15742_v14 = vld [vmem:[#allocation7 + $0x42c] ss:$24 sps:$4 sm:$0xff]   ;;  %v15740_v15 = vld [vmem:[#allocation7 + $0x428] ss:$24 sps:$4 sm:$0xff]  }
0x14af   : > { %7197 = vadd.xlane.f32.xlu1 %v7196_v17  ;;  %v15745_v17 = vld [vmem:[#allocation7 + $0x45c] ss:$24 sps:$4 sm:$0xff]  }
0x153a   : > { %v7195_v46 = vpop.xlane.xlu0 %7194 }
0x153b   : > { %v7199_v52 = vmul.f32 0.00390625, %v7195_v46  ;;  %v15766_v46 = vld [vmem:[#allocation7 + $0x5ac] ss:$24 sps:$4 sm:$0xff]  }
0x153c   : > { %v7198_v31 = vpop.xlane.xlu1 %7197 }
0x153d   : > { %v7201_v26 = vadd.f32 1e-05, %v7199_v52  ;;  %v7200_v62 = vmul.f32 0.00390625, %v7198_v31  ;;  %v15764_v52 = vld [vmem:[#allocation7 + $0x5a8] ss:$24 sps:$4 sm:$0xff]  }
0x153e   : > { %v15769_v31 = vld [vmem:[#allocation7 + $0x5dc] ss:$24 sps:$4 sm:$0xff]  }
0x153f   : > { %16286 = vrsqrt.f32 %v7201_v26  ;;  %v7202_v5 = vadd.f32 1e-05, %v7200_v62  ;;  %v15767_v26 = vld [vmem:[#allocation7 + $0x5d8] ss:$24 sps:$4 sm:$0xff]   ;;  %v15772_v62 = vld [vmem:[#allocation7 + $0x314] ss:$24 sps:$4 sm:$0xff]  }
0x1541   : > { %16288 = vrsqrt.f32 %v7202_v5  ;;  %v15770_v5 = vld [vmem:[#allocation7 + $0x310] ss:$24 sps:$4 sm:$0xff]  }
0x1549   : > { %v16287_v41 = vpop.eup %16286 }
0x154a   : > { %v7205_v42 = vmul.f32 %v16287_v41, %v7185_v4  ;;  %v7206_v56 = vmul.f32 %v16287_v41, %v7186_v49  ;;  %v15730_v4 = vld [vmem:[#allocation7 + $0x36c] ss:$24 sps:$4 sm:$0xff]   ;;  %v15728_v49 = vld [vmem:[#allocation7 + $0x368] ss:$24 sps:$4 sm:$0xff]  }
0x154b   : > { %v16289_v43 = vpop.eup %16288  ;;  %v15781_v41 = vld [vmem:[#allocation7 + $0x3a4] ss:$24 sps:$4 sm:$0xff]  }
0x154c   : > { %v7207_v19 = vmul.f32 %v16289_v43, %v7187_v10  ;;  %v7208_v61 = vmul.f32 %v16289_v43, %v7188_v11  ;;  %v7221_v35 = vmul.f32 %v7217_v63, %v7206_v56  ;;  %v7220_v45 = vmul.f32 %v7213_v40, %v7205_v42  ;;  %v15731_v10 = vld [vmem:[#allocation7 + $0x398] ss:$24 sps:$4 sm:$0xff]   ;;  %v15736_v11 = vld [vmem:[#allocation7 + $0x3cc] ss:$24 sps:$4 sm:$0xff]  }
0x154d   : > { %v15779_v42 = vld [vmem:[#allocation7 + $0x3a0] ss:$24 sps:$4 sm:$0xff]   ;;  %v15784_v56 = vld [vmem:[#allocation7 + $0x3d4] ss:$24 sps:$4 sm:$0xff]   ;;  %v15782_v43 = vld [vmem:[#allocation7 + $0x3d0] ss:$24 sps:$4 sm:$0xff]  }
0x154e   : > { %v7223_v47 = vmul.f32 %v7217_v63, %v7208_v61  ;;  %v7222_v48 = vmul.f32 %v7213_v40, %v7207_v19  ;;  %v17687_v55 = vadd.f32 %v7232_v18, %v7221_v35  ;;  %v17691_v58 = vadd.f32 %v7228_v57, %v7220_v45  ;;  %v15778_v40 = vld [vmem:[#allocation7 + $0x374] ss:$24 sps:$4 sm:$0xff]   ;;  %v15776_v63 = vld [vmem:[#allocation7 + $0x370] ss:$24 sps:$4 sm:$0xff]   ;;  %v15793_v35 = vld [vmem:[#allocation7 + $0x464] ss:$24 sps:$4 sm:$0xff]  }
0x154f   : > { %v15790_v19 = vld [vmem:[#allocation7 + $0x434] ss:$24 sps:$4 sm:$0xff]   ;;  %v15788_v61 = vld [vmem:[#allocation7 + $0x430] ss:$24 sps:$4 sm:$0xff]   ;;  %v15791_v45 = vld [vmem:[#allocation7 + $0x460] ss:$24 sps:$4 sm:$0xff]  }
0x1550   : > { %v17689_v24 = vadd.f32 %v7232_v18, %v7223_v47  ;;  %v17693_v16 = vadd.f32 %v7228_v57, %v7222_v48  ;;  %v15787_v57 = vld [vmem:[#allocation7 + $0x404] ss:$24 sps:$4 sm:$0xff]   ;;  %v15785_v18 = vld [vmem:[#allocation7 + $0x400] ss:$24 sps:$4 sm:$0xff]   ;;  %v15796_v47 = vld [vmem:[#allocation7 + $0x494] ss:$24 sps:$4 sm:$0xff]  }
0x1551   : > { %v15794_v48 = vld [vmem:[#allocation7 + $0x490] ss:$24 sps:$4 sm:$0xff]  }
0x1552   : > { %v17697_v0 = vpack.c.bf16 %v17689_v24, %v17687_v55  ;;  %v17701_v25 = vpack.c.bf16 %v17693_v16, %v17691_v58 }
0x1554   : > { %7883 = vmatprep.mubr.bf16.mxu0 %v17697_v0 }
0x1555   : > { %7884 = vmatmul.mubr.bf16.vlgmr.msra.gmra.mrb[20].mxu0 %v17701_v25 }
0x1556   : > { %7895 = vmatpush1.bf16.msra.mxu0 %v15722_v7  ;;  %7926 = vmatprep.mubr.bf16.mxu0 %v17697_v0  ;;  %v15797_v7 = vld [vmem:[#allocation7 + $0x4c0] ss:$24 sps:$4 sm:$0xff]  }
0x1557   : > { %7896 = vmatprep.subr.bf16.mxu0 %v15727_v50  ;;  %v15802_v50 = vld [vmem:[#allocation7 + $0x4f4] ss:$24 sps:$4 sm:$0xff]  }
0x155a   : > { %7897 = vmatpush1.bf16.msra.mxu0 %v15725_v13  ;;  %v15800_v13 = vld [vmem:[#allocation7 + $0x4f0] ss:$24 sps:$4 sm:$0xff]  }
0x155b   : > { %7898 = vmatprep.subr.bf16.mxu0 %v15730_v4  ;;  %v15805_v4 = vld [vmem:[#allocation7 + $0x524] ss:$24 sps:$4 sm:$0xff]  }
0x155e   : > { %7899 = vmatpush1.bf16.msra.mxu0 %v15728_v49  ;;  %v15803_v49 = vld [vmem:[#allocation7 + $0x520] ss:$24 sps:$4 sm:$0xff]  }
0x155f   : > { %7900 = vmatprep.subr.bf16.mxu0 %v15733_v6  ;;  %v15808_v6 = vld [vmem:[#allocation7 + $0x554] ss:$24 sps:$4 sm:$0xff]  }
0x1562   : > { %7901 = vmatpush1.bf16.msra.mxu0 %v15731_v10  ;;  %v15806_v10 = vld [vmem:[#allocation7 + $0x550] ss:$24 sps:$4 sm:$0xff]  }
0x1563   : > { %7902 = vmatprep.subr.bf16.mxu0 %v15736_v11  ;;  %v15811_v11 = vld [vmem:[#allocation7 + $0x584] ss:$24 sps:$4 sm:$0xff]  }
0x1566   : > { %7903 = vmatpush1.bf16.msra.mxu0 %v15734_v12  ;;  %v15809_v12 = vld [vmem:[#allocation7 + $0x580] ss:$24 sps:$4 sm:$0xff]  }
0x1567   : > { %7904 = vmatprep.subr.bf16.mxu0 %v15739_v21  ;;  %v15814_v21 = vld [vmem:[#allocation7 + $0x5b4] ss:$24 sps:$4 sm:$0xff]  }
0x156a   : > { %7905 = vmatpush1.bf16.msra.mxu0 %v15737_v20  ;;  %v15812_v20 = vld [vmem:[#allocation7 + $0x5b0] ss:$24 sps:$4 sm:$0xff]  }
0x156b   : > { %7906 = vmatprep.subr.bf16.mxu0 %v15742_v14  ;;  %v15817_v14 = vld [vmem:[#allocation7 + $0x5e4] ss:$24 sps:$4 sm:$0xff]  }
0x156e   : > { %7907 = vmatpush1.bf16.msra.mxu0 %v15740_v15  ;;  %v15815_v15 = vld [vmem:[#allocation7 + $0x5e0] ss:$24 sps:$4 sm:$0xff]  }
0x156f   : > { %7908 = vmatprep.subr.bf16.mxu0 %v15745_v17  ;;  %v7339_v17 = vld [vmem:[#allocation8 + $0x6] sm:$0x3f] }
0x1572   : > { %7909 = vmatpush1.bf16.msra.mxu0 %v15743_v2  ;;  %v7344_v2 = vrot.slane %v7339_v17, %v17372_v53 }
0x1573   : > { %7910 = vmatprep.subr.bf16.mxu0 %v15748_v60 }
0x1576   : > { %7911 = vmatpush1.bf16.msra.mxu0 %v15746_v32  ;;  %v7348_v32 = vrot.slane %v7339_v17, %v17369_v51 }
0x1577   : > { %7912 = vmatprep.subr.bf16.mxu0 %v15751_v33 }
0x157a   : > { %7913 = vmatpush1.bf16.msra.mxu0 %v15749_v34 }
0x157b   : > { %7914 = vmatprep.subr.bf16.mxu0 %v15754_v8 }
0x157e   : > { %7915 = vmatpush1.bf16.msra.mxu0 %v15752_v36 }
0x157f   : > { %7916 = vmatprep.subr.bf16.mxu0 %v15757_v27 }
0x1582   : > { %7917 = vmatpush1.bf16.msra.mxu0 %v15755_v39 }
0x1583   : > { %7918 = vmatprep.subr.bf16.mxu0 %v15760_v44 }
0x1586   : > { %7919 = vmatpush1.bf16.msra.mxu0 %v15758_v29 }
0x1587   : > { %7920 = vmatprep.subr.bf16.mxu0 %v15763_v30 }
0x158a   : > { %7921 = vmatpush1.bf16.msra.mxu0 %v15761_v3 }
0x158b   : > { %7922 = vmatprep.subr.bf16.mxu0 %v15766_v46  ;;  %v7356_v46 = vrot.slane %v7339_v17, %v17411_v23 }
0x158e   : > { %7923 = vmatpush1.bf16.msra.mxu0 %v15764_v52 }
0x158f   : > { %7924 = vmatprep.subr.bf16.mxu0 %v15769_v31 }
0x1592   : > { %7925 = vmatpush1.bf16.msra.mxu0 %v15767_v26 }
0x1593   : > { %7937 = vmatprep.subr.bf16.mxu0 %v15772_v62 }
0x1595   : > { %7927 = vmatmul.mubr.bf16.vlgmr.msra.gmra.mrb[24].mxu0 %v17701_v25 }
0x1596   : > { %7938 = vmatpush1.bf16.msra.mxu0 %v15770_v5  ;;  %7969 = vmatprep.mubr.bf16.mxu0 %v17697_v0  ;;  %v15799_v0 = vld [vmem:[#allocation7 + $0x4c4] ss:$24 sps:$4 sm:$0xff]  }
0x1597   : > { %7939 = vmatprep.subr.bf16.mxu0 %v15775_v28 }
0x159a   : > { %7940 = vmatpush1.bf16.msra.mxu0 %v15773_v1 }
0x159b   : > { %7941 = vmatprep.subr.bf16.mxu0 %v15778_v40 }
0x159e   : > { %7942 = vmatpush1.bf16.msra.mxu0 %v15776_v63 }
0x159f   : > { %7943 = vmatprep.subr.bf16.mxu0 %v15781_v41 }
0x15a2   : > { %7944 = vmatpush1.bf16.msra.mxu0 %v15779_v42  ;;  %v7360_v42 = vrot.slane %v7339_v17, %v17424_v37 }
0x15a3   : > { %7945 = vmatprep.subr.bf16.mxu0 %v15784_v56 }
0x15a6   : > { %7946 = vmatpush1.bf16.msra.mxu0 %v15782_v43  ;;  %v7364_v43 = vrot.slane %v7339_v17, %v17427_v38 }
0x15a7   : > { %7947 = vmatprep.subr.bf16.mxu0 %v15787_v57 }
0x15aa   : > { %7948 = vmatpush1.bf16.msra.mxu0 %v15785_v18 }
0x15ab   : > { %7949 = vmatprep.subr.bf16.mxu0 %v15790_v19 }
0x15ae   : > { %7950 = vmatpush1.bf16.msra.mxu0 %v15788_v61 }
0x15af   : > { %7951 = vmatprep.subr.bf16.mxu0 %v15793_v35 }
0x15b2   : > { %7952 = vmatpush1.bf16.msra.mxu0 %v15791_v45 }
0x15b3   : > { %7953 = vmatprep.subr.bf16.mxu0 %v15796_v47 }
0x15b6   : > { %7954 = vmatpush1.bf16.msra.mxu0 %v15794_v48 }
0x15b7   : > { %7955 = vmatprep.subr.bf16.mxu0 %v15799_v0 }
0x15ba   : > { %7956 = vmatpush1.bf16.msra.mxu0 %v15797_v7 }
0x15bb   : > { %7957 = vmatprep.subr.bf16.mxu0 %v15802_v50 }
0x15be   : > { %7958 = vmatpush1.bf16.msra.mxu0 %v15800_v13 }
0x15bf   : > { %7959 = vmatprep.subr.bf16.mxu0 %v15805_v4 }
0x15c2   : > { %7960 = vmatpush1.bf16.msra.mxu0 %v15803_v49 }
0x15c3   : > { %7961 = vmatprep.subr.bf16.mxu0 %v15808_v6 }
0x15c6   : > { %7962 = vmatpush1.bf16.msra.mxu0 %v15806_v10 }
0x15c7   : > { %7963 = vmatprep.subr.bf16.mxu0 %v15811_v11 }
0x15ca   : > { %7964 = vmatpush1.bf16.msra.mxu0 %v15809_v12 }
0x15cb   : > { %7965 = vmatprep.subr.bf16.mxu0 %v15814_v21 }
0x15ce   : > { %7966 = vmatpush1.bf16.msra.mxu0 %v15812_v20 }
0x15cf   : > { %7967 = vmatprep.subr.bf16.mxu0 %v15817_v14 }
0x15d2   : > { %7968 = vmatpush1.bf16.msra.mxu0 %v15815_v15 }
0x15d3   : > { %14561 = vmatprep.subr.bf16.mxu0 %v16844_v9 }
0x15d5   : > { %7970 = vmatmul.mubr.bf16.vlgmr.msra.gmra.mrb[28].mxu0 %v17701_v25  ;;  %v7352_v25 = vrot.slane %v7339_v17, %v17408_v22 }
0x15d6   : > { %14563 = vmatprep.mubr.msk.bf16.mxu0 %vm16845_vm0, %v16844_v9 }
0x1628   : > { %v7885_v60 = vpop.f32.mrb[20].mxu0 }
0x1629   : > { %v7887_v33 = vpop.f32.mrb[21].mxu0  ;;  %v7886_v8 = vadd.f32 %v7885_v60, %v7344_v2 }
0x162a   : > { %v7889_v34 = vpop.f32.mrb[22].mxu0  ;;  %v7888_v39 = vadd.f32 %v7887_v33, %v7348_v32 }
0x162b   : > { %v7890_v36 = vadd.f32 %v7889_v34, %v7344_v2  ;;  %v7891_v27 = vpop.f32.mrb[23].mxu0 }
0x162c   : > { %v7892_v44 = vadd.f32 %v7891_v27, %v7348_v32 }
0x162d   : > { %v7980_v29 = vpack.c.bf16 %v7890_v36, %v7886_v8 }
0x162e   : > { %v17714_v30 = vpack.c.bf16 %v7892_v44, %v7888_v39 }
0x1668   : > { %v7928_v3 = vpop.f32.mrb[24].mxu0 }
0x1669   : > { %v7930_v52 = vpop.f32.mrb[25].mxu0  ;;  %v7929_v26 = vadd.f32 %v7928_v3, %v7352_v25 }
0x166a   : > { %v7932_v31 = vpop.f32.mrb[26].mxu0  ;;  %v7931_v28 = vadd.f32 %v7930_v52, %v7356_v46 }
0x166b   : > { %v7933_v62 = vadd.f32 %v7932_v31, %v7352_v25  ;;  %v7934_v5 = vpop.f32.mrb[27].mxu0 }
0x166c   : > { %v7935_v1 = vadd.f32 %v7934_v5, %v7356_v46 }
0x166d   : > { %v7981_v40 = vpack.c.bf16 %v7933_v62, %v7929_v26 }
0x166e   : > { %v17718_v63 = vpack.c.bf16 %v7935_v1, %v7931_v28 }
0x166f   : > { %v7986_v41 = vsel %vm2437_vm1, %v7981_v40, 0 }
0x1670   : > { %14562 = vmatpush3.bf16.xpose.msra.mxu0 %v7986_v41 }
0x1671   : > { %14567 = vmatprep.subr.bf16.mxu0 %v16844_v9 }
0x1677   : > { %14564 = vmatmul.mubr.msk.bf16.vlgmr.msra.gmra.mrb[32].mxu0 %vm2437_vm1, %v7980_v29 }
0x1678   : > { %14569 = vmatprep.mubr.msk.bf16.mxu0 %vm16845_vm0, %v16844_v9 }
0x16a8   : > { %v7971_v56 = vpop.f32.mrb[28].mxu0 }
0x16a9   : > { %v7973_v57 = vpop.f32.mrb[29].mxu0  ;;  %v7972_v19 = vadd.f32 %v7971_v56, %v7360_v42 }
0x16aa   : > { %v7975_v18 = vpop.f32.mrb[30].mxu0  ;;  %v7974_v45 = vadd.f32 %v7973_v57, %v7364_v43 }
0x16ab   : > { %v7976_v61 = vadd.f32 %v7975_v18, %v7360_v42  ;;  %v7977_v35 = vpop.f32.mrb[31].mxu0 }
0x16ac   : > { %v7978_v47 = vadd.f32 %v7977_v35, %v7364_v43 }
0x16ad   : > { %v17727_v48 = vpack.c.bf16 %v7976_v61, %v7972_v19 }
0x16ae   : > { %v17729_v0 = vpack.c.bf16 %v7978_v47, %v7974_v45 }
0x16af   : > { %14568 = vmatpush3.bf16.msra.mxu0 %v17727_v48 }
0x16b0   : > { %14573 = vmatprep.subr.bf16.mxu0 %v16844_v9 }
0x174a   : > { %v8022_v7 = vpop.f32.mrb[32].mxu0 }
0x174b   : > { %v8029_v50 = vmul.f32 0.125, %v8022_v7  ;;  %v14565_v13 = vpop.f32.mrb[33].mxu0 }
0x174c   : > { %v8025_v4 = vpop.f32.mrb[34].mxu0 }
0x174d   : > { %v8030_v49 = vmul.f32 0.125, %v8025_v4  ;;  %v14566_v6 = vpop.f32.mrb[35].mxu0  ;;  %v8031_v10 = vsel %vm2487_vm2, %v8029_v50, -inf }
0x174e   : > { %8032 = vmax.xlane.f32.xlu0 %v8031_v10 }
0x174f   : > { %v8034_v11 = vsel %vm2487_vm2, %v8030_v49, -inf }
0x1750   : > { %8035 = vmax.xlane.f32.xlu1 %v8034_v11 }
0x17db   : > { %v8033_v12 = vpop.xlane.xlu0 %8032 }
0x17dc   : > { %v8037_v21 = vsub.f32 %v8029_v50, %v8033_v12 }
0x17dd   : > { %v8036_v20 = vpop.xlane.xlu1 %8035 }
0x17de   : > { %v8039_v14 = vmul.f32 1.442695, %v8037_v21  ;;  %v8038_v15 = vsub.f32 %v8030_v49, %v8036_v20 }
0x17e0   : > { %16290 = vpow2.f32 %v8039_v14  ;;  %v8041_v17 = vmul.f32 1.442695, %v8038_v15 }
0x17e2   : > { %16292 = vpow2.f32 %v8041_v17 }
0x17ea   : > { %v16291_v2 = vpop.eup %16290 }
0x17eb   : > { %v8043_v60 = vsel %vm2487_vm2, %v16291_v2, 0.0 }
0x17ec   : > { %v16293_v32 = vpop.eup %16292  ;;  %8044 = vadd.xlane.f32.xlu0 %v8043_v60 }
0x17ed   : > { %v8046_v33 = vsel %vm2487_vm2, %v16293_v32, 0.0 }
0x17ee   : > { %8047 = vadd.xlane.f32.xlu1 %v8046_v33 }
0x17ff   : > { %8100 = vrot.lane.b32.xlu1 %v7980_v29, %s16846_s27 }
0x1802   : > { %8103 = vrot.lane.b32.xlu0 %v7981_v40, %s16846_s27 }
0x1879   : > { %v8045_v34 = vpop.xlane.xlu0 %8044 }
0x187a   : > { %16294 = vrcp.f32 %v8045_v34 }
0x187b   : > { %v8048_v8 = vpop.xlane.xlu1 %8047 }
0x187c   : > { %16296 = vrcp.f32 %v8048_v8 }
0x187d   : > { %v8104_v25 = vpop.permute.xlu0 %8103 }
0x187e   : > { %v8109_v46 = vsel %vm2437_vm1, %v8104_v25, 0 }
0x187f   : > { %v8101_v29 = vpop.permute.xlu1 %8100 }
0x1884   : > { %v16295_v36 = vpop.eup %16294 }
0x1885   : > { %v8051_v39 = vmul.f32 %v16295_v36, %v16291_v2 }
0x1886   : > { %v16297_v27 = vpop.eup %16296 }
0x1887   : > { %v8052_v44 = vmul.f32 %v16297_v27, %v16293_v32 }
0x1889   : > { %v8053_v3 = vpack.c.bf16 %v8052_v44, %v8051_v39 }
0x188b   : > { %14570 = vmatmul.mubr.msk.bf16.vlgmr.msra.gmra.mrb[36].mxu0 %vm2487_vm2, %v8053_v3 }
0x188c   : > { %14574 = vmatpush3.bf16.xpose.msra.mxu0 %v8109_v46  ;;  %14575 = vmatprep.mubr.msk.bf16.mxu0 %vm16845_vm0, %v16844_v9 }
0x188d   : > { %14579 = vmatprep.subr.bf16.mxu0 %v16844_v9 }
0x1893   : > { %14576 = vmatmul.mubr.msk.bf16.vlgmr.msra.gmra.mrb[40].mxu0 %vm2437_vm1, %v8101_v29 }
0x1894   : > { %14581 = vmatprep.mubr.msk.bf16.mxu0 %vm16845_vm0, %v16844_v9 }
0x195e   : > { %v17747_v52 = vpop.f32.mrb[36].mxu0 }
0x195f   : > { %v14571_v31 = vpop.f32.mrb[37].mxu0 }
0x1960   : > { %v17749_v26 = vpop.f32.mrb[38].mxu0 }
0x1961   : > { %v14572_v62 = vpop.f32.mrb[39].mxu0 }
0x1966   : > { %v8145_v5 = vpop.f32.mrb[40].mxu0 }
0x1967   : > { %v8152_v28 = vmul.f32 0.125, %v8145_v5  ;;  %v14577_v1 = vpop.f32.mrb[41].mxu0 }
0x1968   : > { %v8148_v40 = vpop.f32.mrb[42].mxu0 }
0x1969   : > { %v8153_v41 = vmul.f32 0.125, %v8148_v40  ;;  %v14578_v42 = vpop.f32.mrb[43].mxu0  ;;  %v8154_v56 = vsel %vm2487_vm2, %v8152_v28, -inf }
0x196a   : > { %8155 = vmax.xlane.f32.xlu1 %v8154_v56 }
0x196b   : > { %v8157_v43 = vsel %vm2487_vm2, %v8153_v41, -inf }
0x196c   : > { %8158 = vmax.xlane.f32.xlu0 %v8157_v43 }
0x19f7   : > { %v8156_v57 = vpop.xlane.xlu1 %8155 }
0x19f8   : > { %v8160_v18 = vsub.f32 %v8152_v28, %v8156_v57 }
0x19f9   : > { %v8159_v19 = vpop.xlane.xlu0 %8158 }
0x19fa   : > { %v8162_v61 = vmul.f32 1.442695, %v8160_v18  ;;  %v8161_v35 = vsub.f32 %v8153_v41, %v8159_v19 }
0x19fc   : > { %16298 = vpow2.f32 %v8162_v61  ;;  %v8164_v45 = vmul.f32 1.442695, %v8161_v35 }
0x19fe   : > { %16300 = vpow2.f32 %v8164_v45 }
0x1a06   : > { %v16299_v47 = vpop.eup %16298 }
0x1a07   : > { %v8166_v7 = vsel %vm2487_vm2, %v16299_v47, 0.0 }
0x1a08   : > { %v16301_v50 = vpop.eup %16300  ;;  %8167 = vadd.xlane.f32.xlu0 %v8166_v7 }
0x1a09   : > { %v8169_v13 = vsel %vm2487_vm2, %v16301_v50, 0.0 }
0x1a0a   : > { %8170 = vadd.xlane.f32.xlu1 %v8169_v13 }
0x1a1e   : > { %8178 = vrot.lane.b32.xlu0 %v17727_v48, %s16846_s27  ;;  %v8231_v48 = vsel %vm2437_vm1, %v17718_v63, 0 }
0x1a22   : > { %8345 = vrot.lane.b32.xlu0 %v17714_v30, %s16846_s27 }
0x1a95   : > { %v8168_v4 = vpop.xlane.xlu0 %8167 }
0x1a96   : > { %16302 = vrcp.f32 %v8168_v4 }
0x1a97   : > { %v8171_v49 = vpop.xlane.xlu1 %8170 }
0x1a98   : > { %16304 = vrcp.f32 %v8171_v49 }
0x1a99   : > { %v8179_v6 = vpop.permute.xlu0 %8178 }
0x1a9a   : > { %14580 = vmatpush3.bf16.msra.mxu0 %v8179_v6 }
0x1a9b   : > { %14585 = vmatprep.subr.bf16.mxu0 %v16844_v9 }
0x1aa0   : > { %v16303_v10 = vpop.eup %16302 }
0x1aa1   : > { %v8174_v12 = vmul.f32 %v16303_v10, %v16299_v47 }
0x1aa2   : > { %v16305_v11 = vpop.eup %16304 }
0x1aa3   : > { %v8175_v21 = vmul.f32 %v16305_v11, %v16301_v50 }
0x1aa5   : > { %v8176_v20 = vpack.c.bf16 %v8175_v21, %v8174_v12 }
0x1aa7   : > { %14582 = vmatmul.mubr.msk.bf16.vlgmr.msra.gmra.mrb[44].mxu0 %vm2487_vm2, %v8176_v20 }
0x1aa8   : > { %14586 = vmatpush3.bf16.xpose.msra.mxu0 %v8231_v48  ;;  %14587 = vmatprep.mubr.msk.bf16.mxu0 %vm16845_vm0, %v16844_v9 }
0x1aa9   : > { %14591 = vmatprep.subr.bf16.mxu0 %v16844_v9 }
0x1aaf   : > { %14588 = vmatmul.mubr.msk.bf16.vlgmr.msra.gmra.mrb[48].mxu0 %vm2437_vm1, %v17714_v30 }
0x1ab0   : > { %14592 = vmatpush3.bf16.msra.mxu0 %v17729_v0  ;;  %14593 = vmatprep.mubr.msk.bf16.mxu0 %vm16845_vm0, %v16844_v9 }
0x1ab1   : > { %14597 = vmatprep.subr.bf16.mxu0 %v16844_v9 }
0x1b7a   : > { %v17772_v14 = vpop.f32.mrb[44].mxu0 }
0x1b7b   : > { %v14583_v15 = vpop.f32.mrb[45].mxu0 }
0x1b7c   : > { %v17774_v17 = vpop.f32.mrb[46].mxu0 }
0x1b7d   : > { %v14901_v2 = vpack.i.bf16 %v17774_v17, %v17772_v14  ;;  %v14584_v60 = vpop.f32.mrb[47].mxu0 }
0x1b82   : > { %v8267_v32 = vpop.f32.mrb[48].mxu0 }
0x1b83   : > { %v8274_v33 = vmul.f32 0.125, %v8267_v32  ;;  %v14589_v34 = vpop.f32.mrb[49].mxu0 }
0x1b84   : > { %v8270_v30 = vpop.f32.mrb[50].mxu0 }
0x1b85   : > { %v8275_v8 = vmul.f32 0.125, %v8270_v30  ;;  %v14590_v36 = vpop.f32.mrb[51].mxu0  ;;  %v8276_v27 = vsel %vm2487_vm2, %v8274_v33, -inf }
0x1b86   : > { %8277 = vmax.xlane.f32.xlu1 %v8276_v27 }
0x1b87   : > { %v8279_v39 = vsel %vm2487_vm2, %v8275_v8, -inf }
0x1b8a   : > { %8280 = vmax.xlane.f32.xlu1 %v8279_v39 }
0x1c13   : > { %v8278_v44 = vpop.xlane.xlu1 %8277 }
0x1c14   : > { %v8282_v25 = vsub.f32 %v8274_v33, %v8278_v44 }
0x1c16   : > { %v8284_v3 = vmul.f32 1.442695, %v8282_v25 }
0x1c17   : > { %v8281_v46 = vpop.xlane.xlu1 %8280 }
0x1c18   : > { %16306 = vpow2.f32 %v8284_v3  ;;  %v8283_v29 = vsub.f32 %v8275_v8, %v8281_v46 }
0x1c1a   : > { %v8286_v31 = vmul.f32 1.442695, %v8283_v29  ;;  %v15818_v29 = vld [vmem:[#allocation10 + $0x100] ss:$8 sps:$4 sm:$0xff]  }
0x1c1c   : > { %16308 = vpow2.f32 %v8286_v31  ;;  %v15820_v31 = vld [vmem:[#allocation10 + $0x104] ss:$8 sps:$4 sm:$0xff]  }
0x1c22   : > { %v16307_v62 = vpop.eup %16306 }
0x1c23   : > { %v8288_v5 = vsel %vm2487_vm2, %v16307_v62, 0.0 }
0x1c24   : > { %8289 = vadd.xlane.f32.xlu1 %v8288_v5  ;;  %v15821_v5 = vld [vmem:[#allocation10 + $0x110] ss:$8 sps:$4 sm:$0xff]  }
0x1c26   : > { %v16309_v28 = vpop.eup %16308 }
0x1c27   : > { %v8291_v1 = vsel %vm2487_vm2, %v16309_v28, 0.0 }
0x1c28   : > { %8292 = vadd.xlane.f32.xlu1 %v8291_v1  ;;  %v15829_v1 = vld [vmem:[#allocation10 + $0x134] ss:$8 sps:$4 sm:$0xff]  }
0x1c39   : > { %8348 = vrot.lane.b32.xlu1 %v17718_v63, %s16846_s27  ;;  %v8346_v63 = vpop.permute.xlu0 %8345 }
0x1cb1   : > { %v8290_v40 = vpop.xlane.xlu1 %8289 }
0x1cb2   : > { %16310 = vrcp.f32 %v8290_v40  ;;  %v15827_v40 = vld [vmem:[#allocation10 + $0x130] ss:$8 sps:$4 sm:$0xff]  }
0x1cb5   : > { %v8293_v41 = vpop.xlane.xlu1 %8292 }
0x1cb6   : > { %16312 = vrcp.f32 %v8293_v41  ;;  %v15832_v41 = vld [vmem:[#allocation10 + $0x144] ss:$8 sps:$4 sm:$0xff]  }
0x1cb9   : > { %v8349_v18 = vpop.permute.xlu1 %8348 }
0x1cba   : > { %v8354_v61 = vsel %vm2437_vm1, %v8349_v18, 0  ;;  %v15836_v18 = vld [vmem:[#allocation10 + $0x160] ss:$8 sps:$4 sm:$0xff]  }
0x1cbc   : > { %v16311_v42 = vpop.eup %16310 }
0x1cbd   : > { %v8296_v43 = vmul.f32 %v16311_v42, %v16307_v62  ;;  %v15823_v62 = vld [vmem:[#allocation10 + $0x114] ss:$8 sps:$4 sm:$0xff]   ;;  %v15830_v42 = vld [vmem:[#allocation10 + $0x140] ss:$8 sps:$4 sm:$0xff]  }
0x1cc0   : > { %v16313_v56 = vpop.eup %16312 }
0x1cc1   : > { %v8297_v57 = vmul.f32 %v16313_v56, %v16309_v28  ;;  %v15824_v28 = vld [vmem:[#allocation10 + $0x120] ss:$8 sps:$4 sm:$0xff]   ;;  %v15835_v56 = vld [vmem:[#allocation10 + $0x154] ss:$8 sps:$4 sm:$0xff]  }
0x1cc3   : > { %v8298_v19 = vpack.c.bf16 %v8297_v57, %v8296_v43  ;;  %v15833_v43 = vld [vmem:[#allocation10 + $0x150] ss:$8 sps:$4 sm:$0xff]   ;;  %v15838_v57 = vld [vmem:[#allocation10 + $0x164] ss:$8 sps:$4 sm:$0xff]  }
0x1cc5   : > { %14594 = vmatmul.mubr.msk.bf16.vlgmr.msra.gmra.mrb[52].mxu0 %vm2487_vm2, %v8298_v19  ;;  %v15841_v19 = vld [vmem:[#allocation10 + $0x174] ss:$8 sps:$4 sm:$0xff]  }
0x1cc6   : > { %14598 = vmatpush3.bf16.xpose.msra.mxu0 %v8354_v61  ;;  %14599 = vmatprep.mubr.msk.bf16.mxu0 %vm16845_vm0, %v16844_v9  ;;  %v15839_v61 = vld [vmem:[#allocation10 + $0x170] ss:$8 sps:$4 sm:$0xff]  }
0x1cc7   : > { %14603 = vmatprep.subr.bf16.mxu0 %v16844_v9 }
0x1ccd   : > { %14600 = vmatmul.mubr.msk.bf16.vlgmr.msra.gmra.mrb[56].mxu0 %vm2437_vm1, %v8346_v63  ;;  %v15844_v63 = vld [vmem:[#allocation10 + $0x184] ss:$8 sps:$4 sm:$0xff]  }
0x1cce   : > { %14605 = vmatprep.mubr.msk.bf16.mxu0 %vm16845_vm0, %v16844_v9 }
0x1d98   : > { %v17792_v35 = vpop.f32.mrb[52].mxu0 }
0x1d99   : > { %v14595_v45 = vpop.f32.mrb[53].mxu0 }
0x1d9a   : > { %v17794_v47 = vpop.f32.mrb[54].mxu0  ;;  %v15842_v45 = vld [vmem:[#allocation10 + $0x180] ss:$8 sps:$4 sm:$0xff]  }
0x1d9b   : > { %v14596_v7 = vpop.f32.mrb[55].mxu0 }
0x1d9c   : > { %v15847_v7 = vld [vmem:[#allocation10 + $0x194] ss:$8 sps:$4 sm:$0xff]  }
0x1da0   : > { %v8390_v50 = vpop.f32.mrb[56].mxu0 }
0x1da1   : > { %v8397_v13 = vmul.f32 0.125, %v8390_v50  ;;  %v14601_v4 = vpop.f32.mrb[57].mxu0  ;;  %v15845_v50 = vld [vmem:[#allocation10 + $0x190] ss:$8 sps:$4 sm:$0xff]  }
0x1da2   : > { %v8393_v49 = vpop.f32.mrb[58].mxu0  ;;  %v15848_v4 = vld [vmem:[#allocation10 + $0x1a0] ss:$8 sps:$4 sm:$0xff]  }
0x1da3   : > { %v8398_v6 = vmul.f32 0.125, %v8393_v49  ;;  %v14602_v10 = vpop.f32.mrb[59].mxu0  ;;  %v8399_v11 = vsel %vm2487_vm2, %v8397_v13, -inf  ;;  %v15853_v49 = vld [vmem:[#allocation10 + $0x1b4] ss:$8 sps:$4 sm:$0xff]  }
0x1da4   : > { %8400 = vmax.xlane.f32.xlu0 %v8399_v11  ;;  %v15856_v10 = vld [vmem:[#allocation10 + $0x1c4] ss:$8 sps:$4 sm:$0xff]   ;;  %v15854_v11 = vld [vmem:[#allocation10 + $0x1c0] ss:$8 sps:$4 sm:$0xff]  }
0x1da5   : > { %v8402_v12 = vsel %vm2487_vm2, %v8398_v6, -inf }
0x1da6   : > { %8403 = vmax.xlane.f32.xlu1 %v8402_v12  ;;  %v15859_v12 = vld [vmem:[#allocation10 + $0x1d4] ss:$8 sps:$4 sm:$0xff]  }
0x1e31   : > { %v8401_v21 = vpop.xlane.xlu0 %8400 }
0x1e32   : > { %v8405_v9 = vsub.f32 %v8397_v13, %v8401_v21  ;;  %v15850_v13 = vld [vmem:[#allocation10 + $0x1a4] ss:$8 sps:$4 sm:$0xff]   ;;  %v15857_v21 = vld [vmem:[#allocation10 + $0x1d0] ss:$8 sps:$4 sm:$0xff]  }
0x1e33   : > { %v8404_v20 = vpop.xlane.xlu1 %8403 }
0x1e34   : > { %v8407_v48 = vmul.f32 1.442695, %v8405_v9  ;;  %v8406_v15 = vsub.f32 %v8398_v6, %v8404_v20  ;;  %v15851_v6 = vld [vmem:[#allocation10 + $0x1b0] ss:$8 sps:$4 sm:$0xff]   ;;  %v15860_v9 = vld [vmem:[#allocation10 + $0x1e0] ss:$8 sps:$4 sm:$0xff]  }
0x1e35   : > { %v15862_v20 = vld [vmem:[#allocation10 + $0x1e4] ss:$8 sps:$4 sm:$0xff]  }
0x1e36   : > { %16314 = vpow2.f32 %v8407_v48  ;;  %v8409_v60 = vmul.f32 1.442695, %v8406_v15  ;;  %v15865_v48 = vld [vmem:[#allocation10 + $0x1f4] ss:$8 sps:$4 sm:$0xff]   ;;  %v15863_v15 = vld [vmem:[#allocation10 + $0x1f0] ss:$8 sps:$4 sm:$0xff]  }
0x1e38   : > { %16316 = vpow2.f32 %v8409_v60 }
0x1e40   : > { %v16315_v32 = vpop.eup %16314 }
0x1e41   : > { %v8411_v33 = vsel %vm2487_vm2, %v16315_v32, 0.0 }
0x1e42   : > { %v16317_v34 = vpop.eup %16316  ;;  %8412 = vadd.xlane.f32.xlu0 %v8411_v33 }
0x1e43   : > { %v8414_v30 = vsel %vm2487_vm2, %v16317_v34, 0.0 }
0x1e46   : > { %8415 = vadd.xlane.f32.xlu0 %v8414_v30 }
0x1e5c   : > { %8423 = vrot.lane.b32.xlu0 %v17729_v0, %s16846_s27  ;;  %v15826_v0 = vld [vmem:[#allocation10 + $0x124] ss:$8 sps:$4 sm:$0xff]  }
0x1ecf   : > { %v8413_v8 = vpop.xlane.xlu0 %8412 }
0x1ed0   : > { %16318 = vrcp.f32 %v8413_v8 }
0x1ed3   : > { %v8416_v36 = vpop.xlane.xlu0 %8415 }
0x1ed4   : > { %16320 = vrcp.f32 %v8416_v36 }
0x1ed7   : > { %v8424_v27 = vpop.permute.xlu0 %8423 }
0x1ed8   : > { %14604 = vmatpush3.bf16.msra.mxu0 %v8424_v27 }
0x1ed9   : > { %8698 = vmatprep.subr.bf16.mxu0 %v15820_v31 }
0x1eda   : > { %v16319_v39 = vpop.eup %16318 }
0x1edb   : > { %v8419_v25 = vmul.f32 %v16319_v39, %v16315_v32 }
0x1ede   : > { %v16321_v44 = vpop.eup %16320 }
0x1edf   : > { %v8420_v3 = vmul.f32 %v16321_v44, %v16317_v34 }
0x1ee1   : > { %v8421_v46 = vpack.c.bf16 %v8420_v3, %v8419_v25 }
0x1ee3   : > { %14606 = vmatmul.mubr.msk.bf16.vlgmr.msra.gmra.mrb[60].mxu0 %vm2487_vm2, %v8421_v46 }
0x1ee4   : > { %8699 = vmatpush1.bf16.msra.mxu0 %v15818_v29 }
0x1ee5   : > { %8700 = vmatprep.subr.bf16.mxu0 %v15823_v62 }
0x1ee8   : > { %8701 = vmatpush1.bf16.msra.mxu0 %v15821_v5 }
0x1ee9   : > { %8702 = vmatprep.subr.bf16.mxu0 %v15826_v0 }
0x1eec   : > { %8703 = vmatpush1.bf16.msra.mxu0 %v15824_v28 }
0x1eed   : > { %8704 = vmatprep.subr.bf16.mxu0 %v15829_v1 }
0x1ef0   : > { %8705 = vmatpush1.bf16.msra.mxu0 %v15827_v40 }
0x1ef1   : > { %8706 = vmatprep.subr.bf16.mxu0 %v15832_v41 }
0x1ef4   : > { %8707 = vmatpush1.bf16.msra.mxu0 %v15830_v42 }
0x1ef5   : > { %8708 = vmatprep.subr.bf16.mxu0 %v15835_v56 }
0x1ef8   : > { %8709 = vmatpush1.bf16.msra.mxu0 %v15833_v43 }
0x1ef9   : > { %8710 = vmatprep.subr.bf16.mxu0 %v15838_v57 }
0x1efc   : > { %8711 = vmatpush1.bf16.msra.mxu0 %v15836_v18  ;;  %v8814_v18 = vld [vmem:[#allocation16 + $0x800] sm:$0xff] }
0x1efd   : > { %8712 = vmatprep.subr.bf16.mxu0 %v15841_v19  ;;  %v8822_v19 = vld [vmem:[#allocation16 + $0x840] sm:$0xff] }
0x1f00   : > { %8713 = vmatpush1.bf16.msra.mxu0 %v15839_v61  ;;  %v8817_v61 = vld [vmem:[#allocation16 + $0x818] sm:$0xff] }
0x1f01   : > { %8714 = vmatprep.subr.bf16.mxu0 %v15844_v63  ;;  %v13963_v63 = vcombine.high %v8814_v18, %v8822_v19 }
0x1f04   : > { %8715 = vmatpush1.bf16.msra.mxu0 %v15842_v45  ;;  %v8825_v45 = vld [vmem:[#allocation16 + $0x858] sm:$0xff] }
0x1f05   : > { %8716 = vmatprep.subr.bf16.mxu0 %v15847_v7  ;;  %v8830_v7 = vld [vmem:[#allocation16 + $0x880] sm:$0xff] }
0x1f08   : > { %8717 = vmatpush1.bf16.msra.mxu0 %v15845_v50  ;;  %v13968_v50 = vcombine.low %v8817_v61, %v8825_v45 }
0x1f09   : > { %8718 = vmatprep.subr.bf16.mxu0 %v15850_v13  ;;  %v13969_v13 = vcombine.high %v8817_v61, %v8825_v45  ;;  %v8926_v61 = vld [vmem:[#allocation16 + $0xb80] sm:$0xff]  ;;  %v8937_v45 = vld [vmem:[#allocation16 + $0xbd8] sm:$0xff] }
0x1f0b   : > { %10564 = vmatprep.subr.bf16.mxu1 %v13969_v13 }
0x1f0c   : > { %8719 = vmatpush1.bf16.msra.mxu0 %v15848_v4  ;;  %v8833_v4 = vld [vmem:[#allocation16 + $0x898] sm:$0xff]  ;;  %10565 = vmatpush1.bf16.msra.mxu1 %v13968_v50 }
0x1f0d   : > { %8720 = vmatprep.subr.bf16.mxu0 %v15853_v49  ;;  %v8841_v49 = vld [vmem:[#allocation16 + $0x8d8] sm:$0xff] }
0x1f10   : > { %8721 = vmatpush1.bf16.msra.mxu0 %v15851_v6  ;;  %v8846_v6 = vld [vmem:[#allocation16 + $0x900] sm:$0xff] }
0x1f11   : > { %8722 = vmatprep.subr.bf16.mxu0 %v15856_v10  ;;  %v13985_v10 = vcombine.high %v8833_v4, %v8841_v49 }
0x1f13   : > { %10566 = vmatprep.subr.bf16.mxu1 %v13985_v10 }
0x1f14   : > { %8723 = vmatpush1.bf16.msra.mxu0 %v15854_v11  ;;  %v8854_v11 = vld [vmem:[#allocation16 + $0x940] sm:$0xff] }
0x1f15   : > { %8724 = vmatprep.subr.bf16.mxu0 %v15859_v12  ;;  %v8849_v12 = vld [vmem:[#allocation16 + $0x918] sm:$0xff] }
0x1f18   : > { %8725 = vmatpush1.bf16.msra.mxu0 %v15857_v21  ;;  %v8857_v21 = vld [vmem:[#allocation16 + $0x958] sm:$0xff] }
0x1f19   : > { %8726 = vmatprep.subr.bf16.mxu0 %v15862_v20  ;;  %v13984_v20 = vcombine.low %v8833_v4, %v8841_v49  ;;  %v8950_v4 = vld [vmem:[#allocation16 + $0xc40] sm:$0xff]  ;;  %v8945_v49 = vld [vmem:[#allocation16 + $0xc18] sm:$0xff] }
0x1f1b   : > { %10567 = vmatpush1.bf16.msra.mxu1 %v13984_v20  ;;  %v8966_v20 = vld [vmem:[#allocation16 + $0xcc0] sm:$0xff] }
0x1f1c   : > { %8727 = vmatpush1.bf16.msra.mxu0 %v15860_v9 }
0x1f1d   : > { %8728 = vmatprep.subr.bf16.mxu0 %v15865_v48  ;;  %v13995_v48 = vcombine.high %v8846_v6, %v8854_v11 }
0x1f20   : > { %8729 = vmatpush1.bf16.msra.mxu0 %v15863_v15  ;;  %v14001_v15 = vcombine.high %v8849_v12, %v8857_v21 }
0x1f21   : > { %10435 = vmatprep.subr.bf16.mxu0 %v13963_v63  ;;  %v8929_v63 = vld [vmem:[#allocation16 + $0xb98] sm:$0xff] }
0x1f22   : > { %10568 = vmatprep.subr.bf16.mxu1 %v14001_v15  ;;  %v14081_v13 = vcombine.high %v8929_v63, %v8937_v45  ;;  %v8969_v15 = vld [vmem:[#allocation16 + $0xcd8] sm:$0xff] }
0x1fb6   : > { %v8463_v60 = vpop.f32.mrb[60].mxu0 }
0x1fb7   : > { %v14607_v32 = vpop.f32.mrb[61].mxu0 }
0x1fb8   : > { %v8466_v33 = vpop.f32.mrb[62].mxu0  ;;  %v8870_v32 = vld [vmem:[#allocation16 + $0x9c0] sm:$0xff] }
0x1fb9   : > { %v14896_v34 = vpack.i.bf16 %v8466_v33, %v8463_v60  ;;  %v14608_v30 = vpop.f32.mrb[63].mxu0  ;;  %v8862_v60 = vld [vmem:[#allocation16 + $0x980] sm:$0xff]  ;;  %v8865_v33 = vld [vmem:[#allocation16 + $0x998] sm:$0xff] }
0x1fba   : > { %v13994_v30 = vcombine.low %v8846_v6, %v8854_v11  ;;  %v8953_v6 = vld [vmem:[#allocation16 + $0xc58] sm:$0xff]  ;;  %v14080_v11 = vcombine.low %v8929_v63, %v8937_v45 }
0x1fbb   : > { %14897 = vrot.lane.b32.xlu1 %v14896_v34, %s16846_s27  ;;  %v8873_v34 = vld [vmem:[#allocation16 + $0x9d8] sm:$0xff] }
0x1fbc   : > { %v9009_v63 = vld [vmem:[#allocation16 + $0xe18] sm:$0xff] }
0x1fbf   : > { %14902 = vrot.lane.b32.xlu1 %v14901_v2, %s16846_s27  ;;  %v8526_v2 = vld [vmem:[#allocation11 + $0x2] sm:$0x3] }
0x1fc0   : > { %v8531_v62 = vrot.slane %v8526_v2, %v17372_v53 }
0x202d   : > { %v14898_v8 = vpop.permute.xlu1 %14897 }
0x202e   : > { %v14900_v36 = vunpack.i.h.bf16 %v14898_v8  ;;  %v14899_v27 = vunpack.i.l.bf16 %v14898_v8  ;;  %v14000_v8 = vcombine.low %v8849_v12, %v8857_v21  ;;  %v14097_v21 = vcombine.high %v8945_v49, %v8953_v6 }
0x2030   : > { %v8488_v39 = vsel %vm2437_vm1, %v17792_v35, %v14899_v27  ;;  %v8489_v44 = vsel %vm2437_vm1, %v17794_v47, %v14900_v36  ;;  %v8535_v35 = vrot.slane %v8526_v2, %v17369_v51  ;;  %v14011_v36 = vcombine.high %v8862_v60, %v8870_v32  ;;  %10569 = vmatpush1.bf16.msra.mxu1 %v14000_v8  ;;  %v8902_v2 = vld [vmem:[#allocation16 + $0xac0] sm:$0xff] }
0x2031   : > { %v14903_v25 = vpop.permute.xlu1 %14902  ;;  %v8491_v3 = vpack.c.bf16 %v8489_v44, %v8488_v39  ;;  %v14017_v27 = vcombine.high %v8865_v33, %v8873_v34  ;;  %v8878_v39 = vld [vmem:[#allocation16 + $0xa00] sm:$0xff] }
0x2032   : > { %v14905_v46 = vunpack.i.h.bf16 %v14903_v25  ;;  %v14904_v29 = vunpack.i.l.bf16 %v14903_v25  ;;  %v8886_v44 = vld [vmem:[#allocation16 + $0xa40] sm:$0xff]  ;;  %v8881_v25 = vld [vmem:[#allocation16 + $0xa18] sm:$0xff] }
0x2033   : > { %8730 = vmatprep.mubr.bf16.mxu0 %v8491_v3  ;;  %v8889_v3 = vld [vmem:[#allocation16 + $0xa58] sm:$0xff]  ;;  %10570 = vmatprep.subr.bf16.mxu1 %v14017_v27 }
0x2034   : > { %v8487_v31 = vsel %vm2437_vm1, %v17749_v26, %v14905_v46  ;;  %v8486_v14 = vsel %vm2437_vm1, %v17747_v52, %v14904_v29  ;;  %v14010_v46 = vcombine.low %v8862_v60, %v8870_v32  ;;  %v14016_v29 = vcombine.low %v8865_v33, %v8873_v34 }
0x2035   : > { %v8490_v17 = vpack.c.bf16 %v8487_v31, %v8486_v14  ;;  %v14027_v31 = vcombine.high %v8878_v39, %v8886_v44  ;;  %v14033_v14 = vcombine.high %v8881_v25, %v8889_v3  ;;  %v14096_v32 = vcombine.low %v8945_v49, %v8953_v6  ;;  %v9025_v49 = vld [vmem:[#allocation16 + $0xe98] sm:$0xff] }
0x2036   : > { %10571 = vmatpush1.bf16.msra.mxu1 %v14016_v29 }
0x2037   : > { %8731 = vmatmul.mubr.bf16.vlgmr.msra.gmra.mrb[64].mxu0 %v8490_v17  ;;  %v8894_v17 = vld [vmem:[#allocation16 + $0xa80] sm:$0xff]  ;;  %10572 = vmatprep.subr.bf16.mxu1 %v14033_v14 }
0x210a   : > { %v8732_v5 = vpop.f32.mrb[64].mxu0 }
0x210b   : > { %v8733_v47 = vadd.f32 %v8732_v5, %v8531_v62  ;;  %v8734_v0 = vpop.f32.mrb[65].mxu0  ;;  %v14026_v5 = vcombine.low %v8878_v39, %v8886_v44 }
0x210c   : > { %v8735_v28 = vadd.f32 %v8734_v0, %v8535_v35  ;;  %v8736_v1 = vpop.f32.mrb[66].mxu0  ;;  %v14043_v0 = vcombine.high %v8894_v17, %v8902_v2 }
0x210d   : > { %v17819_v40 = vadd.f32 %v8733_v47, %v17691_v58  ;;  %v8737_v41 = vadd.f32 %v8736_v1, %v8531_v62  ;;  %v8738_v26 = vpop.f32.mrb[67].mxu0  ;;  %v8897_v62 = vld [vmem:[#allocation16 + $0xa98] sm:$0xff]  ;;  %v14032_v47 = vcombine.low %v8881_v25, %v8889_v3  ;;  %v8910_v1 = vld [vmem:[#allocation16 + $0xb00] sm:$0xff] }
0x210e   : > { %v17822_v42 = vadd.f32 %v8735_v28, %v17687_v55  ;;  %v8739_v52 = vadd.f32 %v8738_v26, %v8535_v35  ;;  %v13962_v55 = vcombine.low %v8814_v18, %v8822_v19  ;;  %v8905_v35 = vld [vmem:[#allocation16 + $0xad8] sm:$0xff] }
0x210f   : > { %v17825_v56 = vadd.f32 %v8737_v41, %v17693_v16  ;;  %v8838_v16 = vld [vmem:[#allocation16 + $0x8c0] sm:$0xff]  ;;  %v14049_v28 = vcombine.high %v8897_v62, %v8905_v35  ;;  %v8913_v26 = vld [vmem:[#allocation16 + $0xb18] sm:$0xff]  ;;  %10573 = vmatpush1.bf16.msra.mxu1 %v14032_v47 }
0x2110   : > { %v17828_v43 = vadd.f32 %v8739_v52, %v17689_v24  ;;  %v8749_v57 = vadd.f32 %v17822_v42, %v17819_v40  ;;  %v13979_v24 = vcombine.high %v8830_v7, %v8838_v16  ;;  %10436 = vmatpush1.bf16.msra.mxu0 %v13962_v55  ;;  %v13978_v9 = vcombine.low %v8830_v7, %v8838_v16  ;;  %v8918_v41 = vld [vmem:[#allocation16 + $0xb40] sm:$0xff]  ;;  %v8921_v52 = vld [vmem:[#allocation16 + $0xb58] sm:$0xff] }
0x2111   : > { %v14059_v18 = vcombine.high %v8910_v1, %v8918_v41  ;;  %10574 = vmatprep.subr.bf16.mxu1 %v14049_v28  ;;  %v14065_v19 = vcombine.high %v8913_v26, %v8921_v52  ;;  %v8934_v55 = vld [vmem:[#allocation16 + $0xbc0] sm:$0xff]  ;;  %v14058_v7 = vcombine.low %v8910_v1, %v8918_v41  ;;  %v14064_v16 = vcombine.low %v8913_v26, %v8921_v52  ;;  %v8993_v26 = vld [vmem:[#allocation16 + $0xd98] sm:$0xff] }
0x2112   : > { %8750 = vadd.xlane.f32.xlu0 %v8749_v57  ;;  %v8752_v58 = vadd.f32 %v17828_v43, %v17825_v56  ;;  %10437 = vmatprep.subr.bf16.mxu0 %v13979_v24  ;;  %v14042_v57 = vcombine.low %v8894_v17, %v8902_v2  ;;  %v14075_v50 = vcombine.high %v8926_v61, %v8934_v55  ;;  %v8942_v24 = vld [vmem:[#allocation16 + $0xc00] sm:$0xff] }
0x2113   : > { %v14074_v10 = vcombine.low %v8926_v61, %v8934_v55  ;;  %v14091_v12 = vcombine.high %v8942_v24, %v8950_v4  ;;  %v14090_v60 = vcombine.low %v8942_v24, %v8950_v4  ;;  %v8990_v1 = vld [vmem:[#allocation16 + $0xd80] sm:$0xff] }
0x2114   : > { %8753 = vadd.xlane.f32.xlu1 %v8752_v58  ;;  %10438 = vmatpush1.bf16.msra.mxu0 %v13978_v9  ;;  %v14048_v58 = vcombine.low %v8897_v62, %v8905_v35  ;;  %v8958_v9 = vld [vmem:[#allocation16 + $0xc80] sm:$0xff] }
0x2115   : > { %10439 = vmatprep.subr.bf16.mxu0 %v13995_v48  ;;  %v8961_v48 = vld [vmem:[#allocation16 + $0xc98] sm:$0xff]  ;;  %v14107_v33 = vcombine.high %v8958_v9, %v8966_v20  ;;  %v8982_v62 = vld [vmem:[#allocation16 + $0xd40] sm:$0xff] }
0x2116   : > { %10575 = vmatpush1.bf16.msra.mxu1 %v14048_v58  ;;  %v14113_v34 = vcombine.high %v8961_v48, %v8969_v15  ;;  %v14112_v8 = vcombine.low %v8961_v48, %v8969_v15  ;;  %v8998_v41 = vld [vmem:[#allocation16 + $0xdc0] sm:$0xff]  ;;  %v9041_v48 = vld [vmem:[#allocation16 + $0xf18] sm:$0xff] }
0x2117   : > { %10576 = vmatprep.subr.bf16.mxu1 %v14065_v19  ;;  %v14139_v52 = vcombine.high %v8990_v1, %v8998_v41  ;;  %v14138_v58 = vcombine.low %v8990_v1, %v8998_v41  ;;  %v9006_v61 = vld [vmem:[#allocation16 + $0xe00] sm:$0xff] }
0x2118   : > { %10440 = vmatpush1.bf16.msra.mxu0 %v13994_v30  ;;  %v14106_v30 = vcombine.low %v8958_v9, %v8966_v20  ;;  %v9014_v55 = vld [vmem:[#allocation16 + $0xe40] sm:$0xff] }
0x2119   : > { %10441 = vmatprep.subr.bf16.mxu0 %v14011_v36  ;;  %v14155_v45 = vcombine.high %v9006_v61, %v9014_v55  ;;  %v9022_v24 = vld [vmem:[#allocation16 + $0xe80] sm:$0xff] }
0x211a   : > { %10577 = vmatpush1.bf16.msra.mxu1 %v14064_v16  ;;  %v14154_v16 = vcombine.low %v9006_v61, %v9014_v55  ;;  %v9030_v4 = vld [vmem:[#allocation16 + $0xec0] sm:$0xff] }
0x211b   : > { %10578 = vmatprep.subr.bf16.mxu1 %v14081_v13  ;;  %v14171_v6 = vcombine.high %v9022_v24, %v9030_v4  ;;  %v9038_v9 = vld [vmem:[#allocation16 + $0xf00] sm:$0xff] }
0x211c   : > { %10442 = vmatpush1.bf16.msra.mxu0 %v14010_v46  ;;  %v9046_v20 = vld [vmem:[#allocation16 + $0xf40] sm:$0xff] }
0x211d   : > { %10443 = vmatprep.subr.bf16.mxu0 %v14027_v31  ;;  %v14187_v15 = vcombine.high %v9038_v9, %v9046_v20 }
0x211e   : > { %10579 = vmatpush1.bf16.msra.mxu1 %v14080_v11  ;;  %v14170_v11 = vcombine.low %v9022_v24, %v9030_v4 }
0x211f   : > { %10580 = vmatprep.subr.bf16.mxu1 %v14097_v21 }
0x2120   : > { %10444 = vmatpush1.bf16.msra.mxu0 %v14026_v5  ;;  %v8985_v5 = vld [vmem:[#allocation16 + $0xd58] sm:$0xff] }
0x2121   : > { %10445 = vmatprep.subr.bf16.mxu0 %v14043_v0 }
0x2122   : > { %10581 = vmatpush1.bf16.msra.mxu1 %v14096_v32  ;;  %v14186_v32 = vcombine.low %v9038_v9, %v9046_v20 }
0x2123   : > { %10582 = vmatprep.subr.bf16.mxu1 %v14113_v34 }
0x2124   : > { %10446 = vmatpush1.bf16.msra.mxu0 %v14042_v57  ;;  %v9001_v57 = vld [vmem:[#allocation16 + $0xdd8] sm:$0xff] }
0x2125   : > { %10447 = vmatprep.subr.bf16.mxu0 %v14059_v18  ;;  %v14144_v18 = vcombine.low %v8993_v26, %v9001_v57  ;;  %v14145_v19 = vcombine.high %v8993_v26, %v9001_v57  ;;  %v8746_v26 = vld [vmem:[#allocation13 + $0x2] sm:$0x3]  ;;  %v8748_v57 = vld [vmem:[#allocation14 + $0x2] sm:$0x3] }
0x2126   : > { %10583 = vmatpush1.bf16.msra.mxu1 %v14112_v8  ;;  %v9062_v8 = vld [vmem:[#allocation16 + $0xfc0] sm:$0xff] }
0x2128   : > { %10448 = vmatpush1.bf16.msra.mxu0 %v14058_v7  ;;  %v9017_v7 = vld [vmem:[#allocation16 + $0xe58] sm:$0xff] }
0x2129   : > { %10449 = vmatprep.subr.bf16.mxu0 %v14075_v50  ;;  %v14160_v50 = vcombine.low %v9009_v63, %v9017_v7  ;;  %v14161_v13 = vcombine.high %v9009_v63, %v9017_v7  ;;  %v8800_v63 = vrot.slane %v8748_v57, %v17372_v53 }
0x212c   : > { %10450 = vmatpush1.bf16.msra.mxu0 %v14074_v10  ;;  %v9033_v10 = vld [vmem:[#allocation16 + $0xed8] sm:$0xff] }
0x212d   : > { %10451 = vmatprep.subr.bf16.mxu0 %v14091_v12  ;;  %v14176_v12 = vcombine.low %v9025_v49, %v9033_v10  ;;  %v14177_v21 = vcombine.high %v9025_v49, %v9033_v10  ;;  %v8831_v10 = vld [vmem:[#allocation16 + $0x888] sm:$0xff] }
0x2130   : > { %10452 = vmatpush1.bf16.msra.mxu0 %v14090_v60  ;;  %v9049_v60 = vld [vmem:[#allocation16 + $0xf58] sm:$0xff] }
0x2131   : > { %10453 = vmatprep.subr.bf16.mxu0 %v14107_v33  ;;  %v14192_v33 = vcombine.low %v9041_v48, %v9049_v60  ;;  %v14193_v34 = vcombine.high %v9041_v48, %v9049_v60  ;;  %v8851_v60 = vld [vmem:[#allocation16 + $0x928] sm:$0xff] }
0x2134   : > { %10454 = vmatpush1.bf16.msra.mxu0 %v14106_v30  ;;  %v9054_v30 = vld [vmem:[#allocation16 + $0xf80] sm:$0xff] }
0x219f   : > { %v8751_v36 = vpop.xlane.xlu0 %8750 }
0x21a0   : > { %v8755_v27 = vmul.f32 0.00390625, %v8751_v36  ;;  %v9057_v36 = vld [vmem:[#allocation16 + $0xf98] sm:$0xff] }
0x21a1   : > { %v8754_v39 = vpop.xlane.xlu1 %8753 }
0x21a2   : > { %v17835_v44 = vsub.f32 %v17819_v40, %v8755_v27  ;;  %v17838_v25 = vsub.f32 %v17822_v42, %v8755_v27  ;;  %v8756_v3 = vmul.f32 0.00390625, %v8754_v39  ;;  %v14203_v27 = vcombine.high %v9054_v30, %v9062_v8  ;;  %v9065_v39 = vld [vmem:[#allocation16 + $0xfd8] sm:$0xff] }
0x21a4   : > { %v17841_v46 = vsub.f32 %v17825_v56, %v8756_v3  ;;  %v17844_v29 = vsub.f32 %v17828_v43, %v8756_v3  ;;  %v8761_v31 = vmul.f32 %v17835_v44, %v17835_v44  ;;  %v8762_v14 = vmul.f32 %v17838_v25, %v17838_v25  ;;  %v8974_v56 = vld [vmem:[#allocation16 + $0xd00] sm:$0xff]  ;;  %v8977_v43 = vld [vmem:[#allocation16 + $0xd18] sm:$0xff] }
0x21a5   : > { %v14123_v35 = vcombine.high %v8974_v56, %v8982_v62  ;;  %v14122_v47 = vcombine.low %v8974_v56, %v8982_v62  ;;  %v14128_v0 = vcombine.low %v8977_v43, %v8985_v5  ;;  %v14129_v28 = vcombine.high %v8977_v43, %v8985_v5  ;;  %v8827_v56 = vld [vmem:[#allocation16 + $0x868] sm:$0xff] }
0x21a6   : > { %v8765_v17 = vadd.f32 %v8762_v14, %v8761_v31  ;;  %v8763_v40 = vmul.f32 %v17841_v46, %v17841_v46  ;;  %v8764_v42 = vmul.f32 %v17844_v29, %v17844_v29  ;;  %v14202_v3 = vcombine.low %v9054_v30, %v9062_v8 }
0x21a7   : > { %10455 = vmatprep.subr.bf16.mxu0 %v14123_v35  ;;  %10584 = vmatprep.subr.bf16.mxu1 %v14129_v28  ;;  %v14208_v31 = vcombine.low %v9057_v36, %v9065_v39  ;;  %v14209_v14 = vcombine.high %v9057_v36, %v9065_v39  ;;  %v8863_v36 = vld [vmem:[#allocation16 + $0x988] sm:$0xff] }
0x21a8   : > { %8766 = vadd.xlane.f32.xlu0 %v8765_v17  ;;  %v8768_v2 = vadd.f32 %v8764_v42, %v8763_v40  ;;  %10456 = vmatpush1.bf16.msra.mxu0 %v14122_v47  ;;  %v8815_v17 = vld [vmem:[#allocation16 + $0x808] sm:$0xff] }
0x21a9   : > { %10585 = vmatpush1.bf16.msra.mxu1 %v14128_v0  ;;  %10457 = vmatprep.subr.bf16.mxu0 %v14139_v52  ;;  %v8823_v40 = vld [vmem:[#allocation16 + $0x848] sm:$0xff] }
0x21aa   : > { %10586 = vmatprep.subr.bf16.mxu1 %v14145_v19  ;;  %v8819_v42 = vld [vmem:[#allocation16 + $0x828] sm:$0xff]  ;;  %v13964_v62 = vcombine.low %v8815_v17, %v8823_v40 }
0x21ab   : > { %v13972_v43 = vcombine.low %v8819_v42, %v8827_v56  ;;  %v13973_v35 = vcombine.high %v8819_v42, %v8827_v56  ;;  %v8867_v39 = vld [vmem:[#allocation16 + $0x9a8] sm:$0xff] }
0x21ac   : > { %8769 = vadd.xlane.f32.xlu0 %v8768_v2  ;;  %10458 = vmatpush1.bf16.msra.mxu0 %v14138_v58  ;;  %v13965_v2 = vcombine.high %v8815_v17, %v8823_v40  ;;  %v8785_v58 = vrot.slane %v8746_v26, %v17372_v53  ;;  %v8879_v42 = vld [vmem:[#allocation16 + $0xa08] sm:$0xff] }
0x21ad   : > { %10587 = vmatpush1.bf16.msra.mxu1 %v14144_v18  ;;  %10459 = vmatprep.subr.bf16.mxu0 %v14155_v45  ;;  %v8789_v18 = vrot.slane %v8746_v26, %v17369_v51  ;;  %v8804_v45 = vrot.slane %v8748_v57, %v17369_v51  ;;  %v8883_v56 = vld [vmem:[#allocation16 + $0xa28] sm:$0xff] }
0x21ae   : > { %10588 = vmatprep.subr.bf16.mxu1 %v14161_v13 }
0x21b0   : > { %10460 = vmatpush1.bf16.msra.mxu0 %v14154_v16 }
0x21b1   : > { %10589 = vmatpush1.bf16.msra.mxu1 %v14160_v50  ;;  %10461 = vmatprep.subr.bf16.mxu0 %v14171_v6 }
0x21b2   : > { %10590 = vmatprep.subr.bf16.mxu1 %v14177_v21  ;;  %v8843_v21 = vld [vmem:[#allocation16 + $0x8e8] sm:$0xff] }
0x21b4   : > { %10462 = vmatpush1.bf16.msra.mxu0 %v14170_v11  ;;  %v8839_v11 = vld [vmem:[#allocation16 + $0x8c8] sm:$0xff] }
0x21b5   : > { %10591 = vmatpush1.bf16.msra.mxu1 %v14176_v12  ;;  %10463 = vmatprep.subr.bf16.mxu0 %v14187_v15  ;;  %v8835_v12 = vld [vmem:[#allocation16 + $0x8a8] sm:$0xff]  ;;  %v13981_v20 = vcombine.high %v8831_v10, %v8839_v11 }
0x21b6   : > { %10592 = vmatprep.subr.bf16.mxu1 %v14193_v34  ;;  %v13989_v48 = vcombine.high %v8835_v12, %v8843_v21  ;;  %v8855_v15 = vld [vmem:[#allocation16 + $0x948] sm:$0xff]  ;;  %v13988_v34 = vcombine.low %v8835_v12, %v8843_v21 }
0x21b8   : > { %10464 = vmatpush1.bf16.msra.mxu0 %v14186_v32  ;;  %v8859_v32 = vld [vmem:[#allocation16 + $0x968] sm:$0xff] }
0x21b9   : > { %10593 = vmatpush1.bf16.msra.mxu1 %v14192_v33  ;;  %10465 = vmatprep.subr.bf16.mxu0 %v14203_v27  ;;  %v13980_v33 = vcombine.low %v8831_v10, %v8839_v11  ;;  %v14005_v8 = vcombine.high %v8851_v60, %v8859_v32  ;;  %v8871_v27 = vld [vmem:[#allocation16 + $0x9c8] sm:$0xff] }
0x21ba   : > { %10594 = vmatprep.subr.bf16.mxu1 %v14209_v14  ;;  %v14004_v14 = vcombine.low %v8851_v60, %v8859_v32  ;;  %v14013_v17 = vcombine.high %v8863_v36, %v8871_v27 }
0x21bc   : > { %10466 = vmatpush1.bf16.msra.mxu0 %v14202_v3  ;;  %v8875_v3 = vld [vmem:[#allocation16 + $0x9e8] sm:$0xff] }
0x21bd   : > { %10595 = vmatpush1.bf16.msra.mxu1 %v14208_v31  ;;  %10478 = vmatprep.subr.bf16.mxu0 %v13965_v2  ;;  %v14021_v40 = vcombine.high %v8867_v39, %v8875_v3  ;;  %v8887_v2 = vld [vmem:[#allocation16 + $0xa48] sm:$0xff] }
0x21be   : > { %10650 = vmatprep.subr.bf16.mxu1 %v13973_v35  ;;  %v14020_v35 = vcombine.low %v8867_v39, %v8875_v3  ;;  %v14028_v26 = vcombine.low %v8879_v42, %v8887_v2 }
0x2235   : > { %v8767_v5 = vpop.xlane.xlu0 %8766 }
0x2236   : > { %v8771_v47 = vmul.f32 0.00390625, %v8767_v5  ;;  %v14029_v5 = vcombine.high %v8879_v42, %v8887_v2  ;;  %v8979_v42 = vld [vmem:[#allocation16 + $0xd28] sm:$0xff] }
0x2237   : > { %v8987_v2 = vld [vmem:[#allocation16 + $0xd68] sm:$0xff] }
0x2238   : > { %v8773_v0 = vadd.f32 1e-05, %v8771_v47 }
0x2239   : > { %v8770_v28 = vpop.xlane.xlu0 %8769 }
0x223a   : > { %16322 = vrsqrt.f32 %v8773_v0  ;;  %v8772_v1 = vmul.f32 0.00390625, %v8770_v28  ;;  %v8895_v0 = vld [vmem:[#allocation16 + $0xa88] sm:$0xff] }
0x223b   : > { %v8903_v28 = vld [vmem:[#allocation16 + $0xac8] sm:$0xff] }
0x223c   : > { %v8774_v41 = vadd.f32 1e-05, %v8772_v1  ;;  %v8899_v1 = vld [vmem:[#allocation16 + $0xaa8] sm:$0xff]  ;;  %v14045_v57 = vcombine.high %v8895_v0, %v8903_v28 }
0x223e   : > { %16324 = vrsqrt.f32 %v8774_v41  ;;  %v8907_v41 = vld [vmem:[#allocation16 + $0xae8] sm:$0xff] }
0x2244   : > { %v16323_v52 = vpop.eup %16322 }
0x2245   : > { %v8777_v19 = vmul.f32 %v16323_v52, %v17835_v44  ;;  %v8778_v61 = vmul.f32 %v16323_v52, %v17838_v25 }
0x2247   : > { %v8792_v7 = vmul.f32 %v8785_v58, %v8777_v19  ;;  %v8793_v16 = vmul.f32 %v8789_v18, %v8778_v61  ;;  %v8919_v19 = vld [vmem:[#allocation16 + $0xb48] sm:$0xff] }
0x2248   : > { %v16325_v55 = vpop.eup %16324  ;;  %v8915_v61 = vld [vmem:[#allocation16 + $0xb28] sm:$0xff] }
0x2249   : > { %v8779_v50 = vmul.f32 %v16325_v55, %v17841_v46  ;;  %v8780_v13 = vmul.f32 %v16325_v55, %v17844_v29  ;;  %v17862_v49 = vadd.f32 %v8800_v63, %v8792_v7  ;;  %v17864_v6 = vadd.f32 %v8804_v45, %v8793_v16  ;;  %v8847_v29 = vld [vmem:[#allocation16 + $0x908] sm:$0xff] }
0x224a   : > { %v13997_v30 = vcombine.high %v8847_v29, %v8855_v15  ;;  %v13996_v31 = vcombine.low %v8847_v29, %v8855_v15  ;;  %v8923_v55 = vld [vmem:[#allocation16 + $0xb68] sm:$0xff] }
0x224b   : > { %v8794_v24 = vmul.f32 %v8785_v58, %v8779_v50  ;;  %v8795_v4 = vmul.f32 %v8789_v18, %v8780_v13  ;;  %v14053_v58 = vcombine.high %v8899_v1, %v8907_v41  ;;  %v8911_v18 = vld [vmem:[#allocation16 + $0xb08] sm:$0xff]  ;;  %v14069_v16 = vcombine.high %v8915_v61, %v8923_v55 }
0x224c   : > { %v14061_v7 = vcombine.high %v8911_v18, %v8919_v19  ;;  %v8927_v50 = vld [vmem:[#allocation16 + $0xb88] sm:$0xff]  ;;  %v14060_v10 = vcombine.low %v8911_v18, %v8919_v19  ;;  %v14068_v11 = vcombine.low %v8915_v61, %v8923_v55 }
0x224d   : > { %v17866_v44 = vadd.f32 %v8800_v63, %v8794_v24  ;;  %v17868_v25 = vadd.f32 %v8804_v45, %v8795_v4  ;;  %v14044_v63 = vcombine.low %v8895_v0, %v8903_v28  ;;  %v14052_v45 = vcombine.low %v8899_v1, %v8907_v41  ;;  %v8935_v13 = vld [vmem:[#allocation16 + $0xbc8] sm:$0xff] }
0x224e   : > { %v8931_v24 = vld [vmem:[#allocation16 + $0xba8] sm:$0xff]  ;;  %v14077_v12 = vcombine.high %v8927_v50, %v8935_v13  ;;  %v14076_v60 = vcombine.low %v8927_v50, %v8935_v13  ;;  %v14132_v41 = vcombine.low %v8979_v42, %v8987_v2 }
0x224f   : > { %v17872_v9 = vpack.c.bf16 %v17866_v44, %v17862_v49  ;;  %v17876_v46 = vpack.c.bf16 %v17868_v25, %v17864_v6  ;;  %v8939_v4 = vld [vmem:[#allocation16 + $0xbe8] sm:$0xff] }
0x2250   : > { %v14085_v21 = vcombine.high %v8931_v24, %v8939_v4  ;;  %v8943_v29 = vld [vmem:[#allocation16 + $0xc08] sm:$0xff]  ;;  %v14084_v32 = vcombine.low %v8931_v24, %v8939_v4 }
0x2251   : > { %10467 = vmatprep.mubr.bf16.mxu0 %v17876_v46  ;;  %10596 = vmatprep.mubr.bf16.mxu1 %v17876_v46  ;;  %v8955_v15 = vld [vmem:[#allocation16 + $0xc68] sm:$0xff] }
0x2252   : > { %10468 = vmatmul.mubr.bf16.vlgmr.msra.gmra.mrb[68].mxu0 %v17872_v9  ;;  %10597 = vmatmul.mubr.bf16.vlgmr.msra.gmra.mrb[68].mxu1 %v17872_v9  ;;  %v8995_v0 = vld [vmem:[#allocation16 + $0xda8] sm:$0xff] }
0x2253   : > { %10479 = vmatpush1.bf16.msra.mxu0 %v13964_v62  ;;  %10651 = vmatpush1.bf16.msra.mxu1 %v13972_v43  ;;  %v8891_v62 = vld [vmem:[#allocation16 + $0xa68] sm:$0xff]  ;;  %v14012_v43 = vcombine.low %v8863_v36, %v8871_v27 }
0x2254   : > { %10510 = vmatprep.mubr.bf16.mxu0 %v17876_v46  ;;  %10682 = vmatprep.mubr.bf16.mxu1 %v17876_v46  ;;  %v14037_v47 = vcombine.high %v8883_v56, %v8891_v62  ;;  %v14036_v52 = vcombine.low %v8883_v56, %v8891_v62  ;;  %v8963_v36 = vld [vmem:[#allocation16 + $0xca8] sm:$0xff] }
0x2255   : > { %10480 = vmatprep.subr.bf16.mxu0 %v13981_v20  ;;  %10652 = vmatprep.subr.bf16.mxu1 %v13989_v48  ;;  %v8951_v20 = vld [vmem:[#allocation16 + $0xc48] sm:$0xff] }
0x2256   : > { %v8947_v48 = vld [vmem:[#allocation16 + $0xc28] sm:$0xff]  ;;  %v14092_v39 = vcombine.low %v8943_v29, %v8951_v20 }
0x2257   : > { %10481 = vmatpush1.bf16.msra.mxu0 %v13980_v33  ;;  %10653 = vmatpush1.bf16.msra.mxu1 %v13988_v34  ;;  %v14093_v33 = vcombine.high %v8943_v29, %v8951_v20  ;;  %v14101_v34 = vcombine.high %v8947_v48, %v8955_v15  ;;  %v8971_v27 = vld [vmem:[#allocation16 + $0xce8] sm:$0xff]  ;;  %v14100_v3 = vcombine.low %v8947_v48, %v8955_v15 }
0x2258   : > { %10482 = vmatprep.subr.bf16.mxu0 %v13997_v30  ;;  %10654 = vmatprep.subr.bf16.mxu1 %v14005_v8  ;;  %v8959_v30 = vld [vmem:[#allocation16 + $0xc88] sm:$0xff]  ;;  %v14116_v62 = vcombine.low %v8963_v36, %v8971_v27 }
0x2259   : > { %v8967_v8 = vld [vmem:[#allocation16 + $0xcc8] sm:$0xff] }
0x225a   : > { %v14108_v56 = vcombine.low %v8959_v30, %v8967_v8  ;;  %v9003_v28 = vld [vmem:[#allocation16 + $0xde8] sm:$0xff] }
0x225b   : > { %10483 = vmatpush1.bf16.msra.mxu0 %v13996_v31  ;;  %10655 = vmatpush1.bf16.msra.mxu1 %v14004_v14  ;;  %v14109_v31 = vcombine.high %v8959_v30, %v8967_v8  ;;  %v14117_v14 = vcombine.high %v8963_v36, %v8971_v27  ;;  %v9011_v18 = vld [vmem:[#allocation16 + $0xe28] sm:$0xff]  ;;  %v14148_v55 = vcombine.low %v8995_v0, %v9003_v28 }
0x225c   : > { %10484 = vmatprep.subr.bf16.mxu0 %v14013_v17  ;;  %10656 = vmatprep.subr.bf16.mxu1 %v14021_v40  ;;  %v8975_v17 = vld [vmem:[#allocation16 + $0xd08] sm:$0xff] }
0x225d   : > { %v8983_v40 = vld [vmem:[#allocation16 + $0xd48] sm:$0xff] }
0x225e   : > { %v14124_v1 = vcombine.low %v8975_v17, %v8983_v40  ;;  %v9019_v19 = vld [vmem:[#allocation16 + $0xe68] sm:$0xff] }
0x225f   : > { %10485 = vmatpush1.bf16.msra.mxu0 %v14012_v43  ;;  %10657 = vmatpush1.bf16.msra.mxu1 %v14020_v35  ;;  %v14125_v43 = vcombine.high %v8975_v17, %v8983_v40  ;;  %v14133_v35 = vcombine.high %v8979_v42, %v8987_v2  ;;  %v9027_v50 = vld [vmem:[#allocation16 + $0xea8] sm:$0xff]  ;;  %v14164_v4 = vcombine.low %v9011_v18, %v9019_v19  ;;  %v8821_v17 = vld [vmem:[#allocation16 + $0x838] sm:$0xff] }
0x2260   : > { %10486 = vmatprep.subr.bf16.mxu0 %v14029_v5  ;;  %10658 = vmatprep.subr.bf16.mxu1 %v14037_v47  ;;  %v8991_v5 = vld [vmem:[#allocation16 + $0xd88] sm:$0xff]  ;;  %v8829_v40 = vld [vmem:[#allocation16 + $0x878] sm:$0xff] }
0x2261   : > { %v8999_v47 = vld [vmem:[#allocation16 + $0xdc8] sm:$0xff] }
0x2262   : > { %v14140_v61 = vcombine.low %v8991_v5, %v8999_v47  ;;  %v9035_v13 = vld [vmem:[#allocation16 + $0xee8] sm:$0xff] }
0x2263   : > { %10487 = vmatpush1.bf16.msra.mxu0 %v14028_v26  ;;  %10659 = vmatpush1.bf16.msra.mxu1 %v14036_v52  ;;  %v14141_v26 = vcombine.high %v8991_v5, %v8999_v47  ;;  %v14149_v52 = vcombine.high %v8995_v0, %v9003_v28  ;;  %v9043_v29 = vld [vmem:[#allocation16 + $0xf28] sm:$0xff]  ;;  %v14180_v15 = vcombine.low %v9027_v50, %v9035_v13  ;;  %v8837_v5 = vld [vmem:[#allocation16 + $0x8b8] sm:$0xff] }
0x2264   : > { %10488 = vmatprep.subr.bf16.mxu0 %v14045_v57  ;;  %10660 = vmatprep.subr.bf16.mxu1 %v14053_v58  ;;  %v9007_v57 = vld [vmem:[#allocation16 + $0xe08] sm:$0xff]  ;;  %v8845_v47 = vld [vmem:[#allocation16 + $0x8f8] sm:$0xff]  ;;  %v13976_v28 = vcombine.low %v8821_v17, %v8829_v40 }
0x2265   : > { %v9015_v58 = vld [vmem:[#allocation16 + $0xe48] sm:$0xff] }
0x2266   : > { %v14156_v24 = vcombine.low %v9007_v57, %v9015_v58  ;;  %v9051_v20 = vld [vmem:[#allocation16 + $0xf68] sm:$0xff] }
0x2267   : > { %10489 = vmatpush1.bf16.msra.mxu0 %v14044_v63  ;;  %10661 = vmatpush1.bf16.msra.mxu1 %v14052_v45  ;;  %v14157_v63 = vcombine.high %v9007_v57, %v9015_v58  ;;  %v14165_v45 = vcombine.high %v9011_v18, %v9019_v19  ;;  %v9059_v30 = vld [vmem:[#allocation16 + $0xfa8] sm:$0xff]  ;;  %v14196_v27 = vcombine.low %v9043_v29, %v9051_v20  ;;  %v8853_v57 = vld [vmem:[#allocation16 + $0x938] sm:$0xff] }
0x2268   : > { %10490 = vmatprep.subr.bf16.mxu0 %v14061_v7  ;;  %10662 = vmatprep.subr.bf16.mxu1 %v14069_v16  ;;  %v9023_v7 = vld [vmem:[#allocation16 + $0xe88] sm:$0xff]  ;;  %v8861_v58 = vld [vmem:[#allocation16 + $0x978] sm:$0xff]  ;;  %v13992_v19 = vcombine.low %v8837_v5, %v8845_v47 }
0x2269   : > { %v9031_v16 = vld [vmem:[#allocation16 + $0xec8] sm:$0xff] }
0x226a   : > { %v14172_v48 = vcombine.low %v9023_v7, %v9031_v16  ;;  %v9067_v8 = vld [vmem:[#allocation16 + $0xfe8] sm:$0xff] }
0x226b   : > { %10491 = vmatpush1.bf16.msra.mxu0 %v14060_v10  ;;  %10663 = vmatpush1.bf16.msra.mxu1 %v14068_v11  ;;  %v14173_v10 = vcombine.high %v9023_v7, %v9031_v16  ;;  %v14181_v11 = vcombine.high %v9027_v50, %v9035_v13  ;;  %v14212_v2 = vcombine.low %v9059_v30, %v9067_v8  ;;  %v8869_v7 = vld [vmem:[#allocation16 + $0x9b8] sm:$0xff] }
0x226c   : > { %10492 = vmatprep.subr.bf16.mxu0 %v14077_v12  ;;  %10664 = vmatprep.subr.bf16.mxu1 %v14085_v21  ;;  %v9039_v12 = vld [vmem:[#allocation16 + $0xf08] sm:$0xff]  ;;  %v8877_v16 = vld [vmem:[#allocation16 + $0x9f8] sm:$0xff]  ;;  %v14008_v13 = vcombine.low %v8853_v57, %v8861_v58 }
0x226d   : > { %v9047_v21 = vld [vmem:[#allocation16 + $0xf48] sm:$0xff] }
0x226e   : > { %v14188_v36 = vcombine.low %v9039_v12, %v9047_v21 }
0x226f   : > { %10493 = vmatpush1.bf16.msra.mxu0 %v14076_v60  ;;  %10665 = vmatpush1.bf16.msra.mxu1 %v14084_v32  ;;  %v14189_v60 = vcombine.high %v9039_v12, %v9047_v21  ;;  %v14197_v32 = vcombine.high %v9043_v29, %v9051_v20  ;;  %v8885_v12 = vld [vmem:[#allocation16 + $0xa38] sm:$0xff]  ;;  %v14024_v20 = vcombine.low %v8869_v7, %v8877_v16 }
0x2270   : > { %10494 = vmatprep.subr.bf16.mxu0 %v14093_v33  ;;  %10666 = vmatprep.subr.bf16.mxu1 %v14101_v34  ;;  %v9055_v33 = vld [vmem:[#allocation16 + $0xf88] sm:$0xff]  ;;  %v8893_v21 = vld [vmem:[#allocation16 + $0xa78] sm:$0xff] }
0x2271   : > { %v9063_v34 = vld [vmem:[#allocation16 + $0xfc8] sm:$0xff] }
0x2272   : > { %v14204_v42 = vcombine.low %v9055_v33, %v9063_v34 }
0x2273   : > { %10495 = vmatpush1.bf16.msra.mxu0 %v14092_v39  ;;  %10667 = vmatpush1.bf16.msra.mxu1 %v14100_v3  ;;  %v14205_v39 = vcombine.high %v9055_v33, %v9063_v34  ;;  %v14213_v3 = vcombine.high %v9059_v30, %v9067_v8  ;;  %v8901_v33 = vld [vmem:[#allocation16 + $0xab8] sm:$0xff]  ;;  %v14040_v8 = vcombine.low %v8885_v12, %v8893_v21 }
0x2274   : > { %10496 = vmatprep.subr.bf16.mxu0 %v14109_v31  ;;  %10668 = vmatprep.subr.bf16.mxu1 %v14117_v14  ;;  %v8816_v31 = vld [vmem:[#allocation16 + $0x810] sm:$0xff]  ;;  %v8909_v34 = vld [vmem:[#allocation16 + $0xaf8] sm:$0xff] }
0x2275   : > { %v8824_v14 = vld [vmem:[#allocation16 + $0x850] sm:$0xff] }
0x2276   : > { %v13966_v0 = vcombine.low %v8816_v31, %v8824_v14 }
0x2277   : > { %10497 = vmatpush1.bf16.msra.mxu0 %v14108_v56  ;;  %10669 = vmatpush1.bf16.msra.mxu1 %v14116_v62  ;;  %v13967_v56 = vcombine.high %v8816_v31, %v8824_v14  ;;  %v13977_v62 = vcombine.high %v8821_v17, %v8829_v40  ;;  %v8917_v31 = vld [vmem:[#allocation16 + $0xb38] sm:$0xff]  ;;  %v14056_v40 = vcombine.low %v8901_v33, %v8909_v34 }
0x2278   : > { %10498 = vmatprep.subr.bf16.mxu0 %v14125_v43  ;;  %10670 = vmatprep.subr.bf16.mxu1 %v14133_v35  ;;  %v8832_v43 = vld [vmem:[#allocation16 + $0x890] sm:$0xff]  ;;  %v8925_v14 = vld [vmem:[#allocation16 + $0xb78] sm:$0xff] }
0x2279   : > { %v8840_v35 = vld [vmem:[#allocation16 + $0x8d0] sm:$0xff] }
0x227a   : > { %v13982_v18 = vcombine.low %v8832_v43, %v8840_v35 }
0x227b   : > { %10499 = vmatpush1.bf16.msra.mxu0 %v14124_v1  ;;  %10671 = vmatpush1.bf16.msra.mxu1 %v14132_v41  ;;  %v13983_v1 = vcombine.high %v8832_v43, %v8840_v35  ;;  %v13993_v41 = vcombine.high %v8837_v5, %v8845_v47  ;;  %v8933_v43 = vld [vmem:[#allocation16 + $0xbb8] sm:$0xff]  ;;  %v14072_v47 = vcombine.low %v8917_v31, %v8925_v14 }
0x227c   : > { %10500 = vmatprep.subr.bf16.mxu0 %v14141_v26  ;;  %10672 = vmatprep.subr.bf16.mxu1 %v14149_v52  ;;  %v8848_v26 = vld [vmem:[#allocation16 + $0x910] sm:$0xff]  ;;  %v8941_v35 = vld [vmem:[#allocation16 + $0xbf8] sm:$0xff] }
0x227d   : > { %v8856_v52 = vld [vmem:[#allocation16 + $0x950] sm:$0xff] }
0x227e   : > { %v13998_v50 = vcombine.low %v8848_v26, %v8856_v52 }
0x227f   : > { %10501 = vmatpush1.bf16.msra.mxu0 %v14140_v61  ;;  %10673 = vmatpush1.bf16.msra.mxu1 %v14148_v55  ;;  %v13999_v61 = vcombine.high %v8848_v26, %v8856_v52  ;;  %v14009_v55 = vcombine.high %v8853_v57, %v8861_v58  ;;  %v8949_v26 = vld [vmem:[#allocation16 + $0xc38] sm:$0xff]  ;;  %v14088_v58 = vcombine.low %v8933_v43, %v8941_v35 }
0x2280   : > { %10502 = vmatprep.subr.bf16.mxu0 %v14157_v63  ;;  %10674 = vmatprep.subr.bf16.mxu1 %v14165_v45  ;;  %v8864_v63 = vld [vmem:[#allocation16 + $0x990] sm:$0xff]  ;;  %v8957_v52 = vld [vmem:[#allocation16 + $0xc78] sm:$0xff] }
0x2281   : > { %v8872_v45 = vld [vmem:[#allocation16 + $0x9d0] sm:$0xff] }
0x2282   : > { %v14014_v29 = vcombine.low %v8864_v63, %v8872_v45 }
0x2283   : > { %10503 = vmatpush1.bf16.msra.mxu0 %v14156_v24  ;;  %10675 = vmatpush1.bf16.msra.mxu1 %v14164_v4  ;;  %v14015_v24 = vcombine.high %v8864_v63, %v8872_v45  ;;  %v14025_v4 = vcombine.high %v8869_v7, %v8877_v16  ;;  %v8965_v63 = vld [vmem:[#allocation16 + $0xcb8] sm:$0xff]  ;;  %v14104_v16 = vcombine.low %v8949_v26, %v8957_v52 }
0x2284   : > { %10504 = vmatprep.subr.bf16.mxu0 %v14173_v10  ;;  %10676 = vmatprep.subr.bf16.mxu1 %v14181_v11  ;;  %v8880_v10 = vld [vmem:[#allocation16 + $0xa10] sm:$0xff]  ;;  %v8973_v45 = vld [vmem:[#allocation16 + $0xcf8] sm:$0xff] }
0x2285   : > { %v8888_v11 = vld [vmem:[#allocation16 + $0xa50] sm:$0xff] }
0x2286   : > { %v14030_v30 = vcombine.low %v8880_v10, %v8888_v11 }
0x2287   : > { %10505 = vmatpush1.bf16.msra.mxu0 %v14172_v48  ;;  %10677 = vmatpush1.bf16.msra.mxu1 %v14180_v15  ;;  %v14031_v48 = vcombine.high %v8880_v10, %v8888_v11  ;;  %v14041_v15 = vcombine.high %v8885_v12, %v8893_v21  ;;  %v8981_v10 = vld [vmem:[#allocation16 + $0xd38] sm:$0xff]  ;;  %v14120_v21 = vcombine.low %v8965_v63, %v8973_v45 }
0x2288   : > { %10506 = vmatprep.subr.bf16.mxu0 %v14189_v60  ;;  %10678 = vmatprep.subr.bf16.mxu1 %v14197_v32  ;;  %v8896_v60 = vld [vmem:[#allocation16 + $0xa90] sm:$0xff]  ;;  %v8989_v11 = vld [vmem:[#allocation16 + $0xd78] sm:$0xff] }
0x2289   : > { %v8904_v32 = vld [vmem:[#allocation16 + $0xad0] sm:$0xff] }
0x228a   : > { %v14046_v17 = vcombine.low %v8896_v60, %v8904_v32 }
0x228b   : > { %10507 = vmatpush1.bf16.msra.mxu0 %v14188_v36  ;;  %10679 = vmatpush1.bf16.msra.mxu1 %v14196_v27  ;;  %v14047_v36 = vcombine.high %v8896_v60, %v8904_v32  ;;  %v14057_v27 = vcombine.high %v8901_v33, %v8909_v34  ;;  %v8997_v60 = vld [vmem:[#allocation16 + $0xdb8] sm:$0xff]  ;;  %v14136_v34 = vcombine.low %v8981_v10, %v8989_v11 }
0x228c   : > { %10508 = vmatprep.subr.bf16.mxu0 %v14205_v39  ;;  %10680 = vmatprep.subr.bf16.mxu1 %v14213_v3  ;;  %v8912_v39 = vld [vmem:[#allocation16 + $0xb10] sm:$0xff]  ;;  %v9005_v32 = vld [vmem:[#allocation16 + $0xdf8] sm:$0xff] }
0x228d   : > { %v8920_v3 = vld [vmem:[#allocation16 + $0xb50] sm:$0xff] }
0x228e   : > { %v14062_v5 = vcombine.low %v8912_v39, %v8920_v3 }
0x228f   : > { %10509 = vmatpush1.bf16.msra.mxu0 %v14204_v42  ;;  %10681 = vmatpush1.bf16.msra.mxu1 %v14212_v2  ;;  %v14063_v42 = vcombine.high %v8912_v39, %v8920_v3  ;;  %v14073_v2 = vcombine.high %v8917_v31, %v8925_v14  ;;  %v9013_v39 = vld [vmem:[#allocation16 + $0xe38] sm:$0xff]  ;;  %v14152_v14 = vcombine.low %v8997_v60, %v9005_v32 }
0x2290   : > { %10521 = vmatprep.subr.bf16.mxu0 %v13967_v56  ;;  %10736 = vmatprep.subr.bf16.mxu1 %v13977_v62  ;;  %v8928_v56 = vld [vmem:[#allocation16 + $0xb90] sm:$0xff]  ;;  %v9021_v3 = vld [vmem:[#allocation16 + $0xe78] sm:$0xff] }
0x2291   : > { %v8936_v62 = vld [vmem:[#allocation16 + $0xbd0] sm:$0xff] }
0x2292   : > { %10511 = vmatmul.mubr.bf16.vlgmr.msra.gmra.mrb[72].mxu0 %v17872_v9  ;;  %10683 = vmatmul.mubr.bf16.vlgmr.msra.gmra.mrb[72].mxu1 %v17872_v9  ;;  %v14078_v57 = vcombine.low %v8928_v56, %v8936_v62 }
0x2293   : > { %10522 = vmatpush1.bf16.msra.mxu0 %v13966_v0  ;;  %10553 = vmatprep.mubr.bf16.mxu0 %v17876_v46  ;;  %v14079_v0 = vcombine.high %v8928_v56, %v8936_v62  ;;  %v9029_v56 = vld [vmem:[#allocation16 + $0xeb8] sm:$0xff] }
0x2294   : > { %10737 = vmatpush1.bf16.msra.mxu1 %v13976_v28  ;;  %10768 = vmatprep.mubr.bf16.mxu1 %v17876_v46  ;;  %v14089_v28 = vcombine.high %v8933_v43, %v8941_v35  ;;  %v9037_v62 = vld [vmem:[#allocation16 + $0xef8] sm:$0xff]  ;;  %v14168_v35 = vcombine.low %v9013_v39, %v9021_v3 }
0x2295   : > { %10523 = vmatprep.subr.bf16.mxu0 %v13983_v1  ;;  %10738 = vmatprep.subr.bf16.mxu1 %v13993_v41  ;;  %v8944_v1 = vld [vmem:[#allocation16 + $0xc10] sm:$0xff] }
0x2296   : > { %v8952_v41 = vld [vmem:[#allocation16 + $0xc50] sm:$0xff] }
0x2297   : > { %10524 = vmatpush1.bf16.msra.mxu0 %v13982_v18  ;;  %v14095_v18 = vcombine.high %v8944_v1, %v8952_v41  ;;  %v14094_v7 = vcombine.low %v8944_v1, %v8952_v41  ;;  %v9045_v1 = vld [vmem:[#allocation16 + $0xf38] sm:$0xff] }
0x2298   : > { %10739 = vmatpush1.bf16.msra.mxu1 %v13992_v19  ;;  %10525 = vmatprep.subr.bf16.mxu0 %v13999_v61  ;;  %v14105_v19 = vcombine.high %v8949_v26, %v8957_v52  ;;  %v8960_v61 = vld [vmem:[#allocation16 + $0xc90] sm:$0xff]  ;;  %v9053_v41 = vld [vmem:[#allocation16 + $0xf78] sm:$0xff]  ;;  %v14184_v52 = vcombine.low %v9029_v56, %v9037_v62 }
0x2299   : > { %10740 = vmatprep.subr.bf16.mxu1 %v14009_v55  ;;  %v8968_v55 = vld [vmem:[#allocation16 + $0xcd0] sm:$0xff] }
0x229a   : > { %v14110_v12 = vcombine.low %v8960_v61, %v8968_v55 }
0x229b   : > { %10526 = vmatpush1.bf16.msra.mxu0 %v13998_v50  ;;  %v14111_v50 = vcombine.high %v8960_v61, %v8968_v55  ;;  %v9061_v61 = vld [vmem:[#allocation16 + $0xfb8] sm:$0xff] }
0x229c   : > { %10741 = vmatpush1.bf16.msra.mxu1 %v14008_v13  ;;  %10527 = vmatprep.subr.bf16.mxu0 %v14015_v24  ;;  %v14121_v13 = vcombine.high %v8965_v63, %v8973_v45  ;;  %v8976_v24 = vld [vmem:[#allocation16 + $0xd10] sm:$0xff]  ;;  %v9069_v55 = vld [vmem:[#allocation16 + $0xff8] sm:$0xff]  ;;  %v14200_v45 = vcombine.low %v9045_v1, %v9053_v41 }
0x229d   : > { %10742 = vmatprep.subr.bf16.mxu1 %v14025_v4  ;;  %v8984_v4 = vld [vmem:[#allocation16 + $0xd50] sm:$0xff] }
0x229e   : > { %v14126_v33 = vcombine.low %v8976_v24, %v8984_v4 }
0x229f   : > { %10528 = vmatpush1.bf16.msra.mxu0 %v14014_v29  ;;  %v14127_v29 = vcombine.high %v8976_v24, %v8984_v4  ;;  %v14216_v4 = vcombine.low %v9061_v61, %v9069_v55 }
0x22a0   : > { %10743 = vmatpush1.bf16.msra.mxu1 %v14024_v20  ;;  %10529 = vmatprep.subr.bf16.mxu0 %v14031_v48  ;;  %v14137_v20 = vcombine.high %v8981_v10, %v8989_v11  ;;  %v8992_v48 = vld [vmem:[#allocation16 + $0xd90] sm:$0xff]  ;;  %v8834_v11 = vld [vmem:[#allocation16 + $0x8a0] sm:$0xff] }
0x22a1   : > { %10744 = vmatprep.subr.bf16.mxu1 %v14041_v15  ;;  %v9000_v15 = vld [vmem:[#allocation16 + $0xdd0] sm:$0xff] }
0x22a2   : > { %v14142_v31 = vcombine.low %v8992_v48, %v9000_v15 }
0x22a3   : > { %10530 = vmatpush1.bf16.msra.mxu0 %v14030_v30  ;;  %v14143_v30 = vcombine.high %v8992_v48, %v9000_v15  ;;  %v8858_v48 = vld [vmem:[#allocation16 + $0x960] sm:$0xff] }
0x22a4   : > { %10745 = vmatpush1.bf16.msra.mxu1 %v14040_v8  ;;  %10531 = vmatprep.subr.bf16.mxu0 %v14047_v36  ;;  %v14153_v8 = vcombine.high %v8997_v60, %v9005_v32  ;;  %v9008_v36 = vld [vmem:[#allocation16 + $0xe10] sm:$0xff]  ;;  %v8866_v32 = vld [vmem:[#allocation16 + $0x9a0] sm:$0xff] }
0x22a5   : > { %10746 = vmatprep.subr.bf16.mxu1 %v14057_v27  ;;  %v9016_v27 = vld [vmem:[#allocation16 + $0xe50] sm:$0xff] }
0x22a6   : > { %v14158_v43 = vcombine.low %v9008_v36, %v9016_v27 }
0x22a7   : > { %10532 = vmatpush1.bf16.msra.mxu0 %v14046_v17  ;;  %v14159_v17 = vcombine.high %v9008_v36, %v9016_v27  ;;  %v8890_v36 = vld [vmem:[#allocation16 + $0xa60] sm:$0xff] }
0x22a8   : > { %10747 = vmatpush1.bf16.msra.mxu1 %v14056_v40  ;;  %10533 = vmatprep.subr.bf16.mxu0 %v14063_v42  ;;  %v14169_v40 = vcombine.high %v9013_v39, %v9021_v3  ;;  %v9024_v42 = vld [vmem:[#allocation16 + $0xe90] sm:$0xff]  ;;  %v8898_v3 = vld [vmem:[#allocation16 + $0xaa0] sm:$0xff] }
0x22a9   : > { %10748 = vmatprep.subr.bf16.mxu1 %v14073_v2  ;;  %v9032_v2 = vld [vmem:[#allocation16 + $0xed0] sm:$0xff] }
0x22aa   : > { %v14174_v26 = vcombine.low %v9024_v42, %v9032_v2 }
0x22ab   : > { %10534 = vmatpush1.bf16.msra.mxu0 %v14062_v5  ;;  %v14175_v5 = vcombine.high %v9024_v42, %v9032_v2  ;;  %v8922_v42 = vld [vmem:[#allocation16 + $0xb60] sm:$0xff] }
0x22ac   : > { %10749 = vmatpush1.bf16.msra.mxu1 %v14072_v47  ;;  %10535 = vmatprep.subr.bf16.mxu0 %v14079_v0  ;;  %v14185_v47 = vcombine.high %v9029_v56, %v9037_v62  ;;  %v9040_v0 = vld [vmem:[#allocation16 + $0xf10] sm:$0xff]  ;;  %v8930_v62 = vld [vmem:[#allocation16 + $0xba0] sm:$0xff] }
0x22ad   : > { %10750 = vmatprep.subr.bf16.mxu1 %v14089_v28  ;;  %v9048_v28 = vld [vmem:[#allocation16 + $0xf50] sm:$0xff] }
0x22ae   : > { %v14190_v63 = vcombine.low %v9040_v0, %v9048_v28 }
0x22af   : > { %10536 = vmatpush1.bf16.msra.mxu0 %v14078_v57  ;;  %v14191_v57 = vcombine.high %v9040_v0, %v9048_v28  ;;  %v8954_v0 = vld [vmem:[#allocation16 + $0xc60] sm:$0xff] }
0x22b0   : > { %10751 = vmatpush1.bf16.msra.mxu1 %v14088_v58  ;;  %10537 = vmatprep.subr.bf16.mxu0 %v14095_v18  ;;  %v14201_v58 = vcombine.high %v9045_v1, %v9053_v41  ;;  %v9056_v18 = vld [vmem:[#allocation16 + $0xf90] sm:$0xff]  ;;  %v8962_v41 = vld [vmem:[#allocation16 + $0xca0] sm:$0xff] }
0x22b1   : > { %10752 = vmatprep.subr.bf16.mxu1 %v14105_v19  ;;  %v9064_v19 = vld [vmem:[#allocation16 + $0xfd0] sm:$0xff] }
0x22b2   : > { %v14206_v24 = vcombine.low %v9056_v18, %v9064_v19 }
0x22b3   : > { %10538 = vmatpush1.bf16.msra.mxu0 %v14094_v7  ;;  %v14207_v7 = vcombine.high %v9056_v18, %v9064_v19  ;;  %v8986_v18 = vld [vmem:[#allocation16 + $0xd60] sm:$0xff] }
0x22b4   : > { %10753 = vmatpush1.bf16.msra.mxu1 %v14104_v16  ;;  %10539 = vmatprep.subr.bf16.mxu0 %v14111_v50  ;;  %v14217_v16 = vcombine.high %v9061_v61, %v9069_v55  ;;  %v8818_v50 = vld [vmem:[#allocation16 + $0x820] sm:$0xff] }
0x22b5   : > { %10754 = vmatprep.subr.bf16.mxu1 %v14121_v13  ;;  %v8826_v13 = vld [vmem:[#allocation16 + $0x860] sm:$0xff] }
0x22b6   : > { %v13971_v10 = vcombine.high %v8818_v50, %v8826_v13  ;;  %v8994_v55 = vld [vmem:[#allocation16 + $0xda0] sm:$0xff] }
0x22b7   : > { %10540 = vmatpush1.bf16.msra.mxu0 %v14110_v12  ;;  %v8842_v12 = vld [vmem:[#allocation16 + $0x8e0] sm:$0xff] }
0x22b8   : > { %10755 = vmatpush1.bf16.msra.mxu1 %v14120_v21  ;;  %10541 = vmatprep.subr.bf16.mxu0 %v14127_v29  ;;  %v13970_v21 = vcombine.low %v8818_v50, %v8826_v13  ;;  %v13987_v29 = vcombine.high %v8834_v11, %v8842_v12  ;;  %v13986_v15 = vcombine.low %v8834_v11, %v8842_v12  ;;  %v9018_v50 = vld [vmem:[#allocation16 + $0xe60] sm:$0xff] }
0x22b9   : > { %10756 = vmatprep.subr.bf16.mxu1 %v14137_v20  ;;  %v8850_v20 = vld [vmem:[#allocation16 + $0x920] sm:$0xff] }
0x22ba   : > { %v14003_v60 = vcombine.high %v8850_v20, %v8858_v48 }
0x22bb   : > { %10542 = vmatpush1.bf16.msra.mxu0 %v14126_v33  ;;  %v8874_v33 = vld [vmem:[#allocation16 + $0x9e0] sm:$0xff] }
0x22bc   : > { %10757 = vmatpush1.bf16.msra.mxu1 %v14136_v34  ;;  %10543 = vmatprep.subr.bf16.mxu0 %v14143_v30  ;;  %v14002_v34 = vcombine.low %v8850_v20, %v8858_v48  ;;  %v14019_v30 = vcombine.high %v8866_v32, %v8874_v33  ;;  %v14018_v27 = vcombine.low %v8866_v32, %v8874_v33 }
0x22bd   : > { %10758 = vmatprep.subr.bf16.mxu1 %v14153_v8  ;;  %v8882_v8 = vld [vmem:[#allocation16 + $0xa20] sm:$0xff] }
0x22be   : > { %v14035_v39 = vcombine.high %v8882_v8, %v8890_v36 }
0x22bf   : > { %10544 = vmatpush1.bf16.msra.mxu0 %v14142_v31  ;;  %v8906_v31 = vld [vmem:[#allocation16 + $0xae0] sm:$0xff] }
0x22c0   : > { %10759 = vmatpush1.bf16.msra.mxu1 %v14152_v14  ;;  %10545 = vmatprep.subr.bf16.mxu0 %v14159_v17  ;;  %v14034_v14 = vcombine.low %v8882_v8, %v8890_v36  ;;  %v14051_v17 = vcombine.high %v8898_v3, %v8906_v31  ;;  %v14050_v2 = vcombine.low %v8898_v3, %v8906_v31 }
0x22c1   : > { %10760 = vmatprep.subr.bf16.mxu1 %v14169_v40  ;;  %v8914_v40 = vld [vmem:[#allocation16 + $0xb20] sm:$0xff] }
0x22c2   : > { %v14067_v56 = vcombine.high %v8914_v40, %v8922_v42 }
0x22c3   : > { %10546 = vmatpush1.bf16.msra.mxu0 %v14158_v43  ;;  %v8938_v43 = vld [vmem:[#allocation16 + $0xbe0] sm:$0xff] }
0x22c4   : > { %10761 = vmatpush1.bf16.msra.mxu1 %v14168_v35  ;;  %10547 = vmatprep.subr.bf16.mxu0 %v14175_v5  ;;  %v14066_v35 = vcombine.low %v8914_v40, %v8922_v42  ;;  %v14083_v5 = vcombine.high %v8930_v62, %v8938_v43  ;;  %v14082_v28 = vcombine.low %v8930_v62, %v8938_v43 }
0x22c5   : > { %10762 = vmatprep.subr.bf16.mxu1 %v14185_v47  ;;  %v8946_v47 = vld [vmem:[#allocation16 + $0xc20] sm:$0xff] }
0x22c6   : > { %v14099_v1 = vcombine.high %v8946_v47, %v8954_v0 }
0x22c7   : > { %10548 = vmatpush1.bf16.msra.mxu0 %v14174_v26  ;;  %v8970_v26 = vld [vmem:[#allocation16 + $0xce0] sm:$0xff] }
0x22c8   : > { %10763 = vmatpush1.bf16.msra.mxu1 %v14184_v52  ;;  %10549 = vmatprep.subr.bf16.mxu0 %v14191_v57  ;;  %v14098_v52 = vcombine.low %v8946_v47, %v8954_v0  ;;  %v14115_v57 = vcombine.high %v8962_v41, %v8970_v26  ;;  %v14114_v19 = vcombine.low %v8962_v41, %v8970_v26 }
0x22c9   : > { %10764 = vmatprep.subr.bf16.mxu1 %v14201_v58  ;;  %v8978_v58 = vld [vmem:[#allocation16 + $0xd20] sm:$0xff] }
0x22ca   : > { %v14131_v61 = vcombine.high %v8978_v58, %v8986_v18 }
0x22cb   : > { %10550 = vmatpush1.bf16.msra.mxu0 %v14190_v63  ;;  %v9002_v63 = vld [vmem:[#allocation16 + $0xde0] sm:$0xff] }
0x22cc   : > { %10765 = vmatpush1.bf16.msra.mxu1 %v14200_v45  ;;  %10551 = vmatprep.subr.bf16.mxu0 %v14207_v7  ;;  %v14130_v45 = vcombine.low %v8978_v58, %v8986_v18  ;;  %v14147_v7 = vcombine.high %v8994_v55, %v9002_v63  ;;  %v14146_v13 = vcombine.low %v8994_v55, %v9002_v63 }
0x22cd   : > { %10766 = vmatprep.subr.bf16.mxu1 %v14217_v16  ;;  %v9010_v16 = vld [vmem:[#allocation16 + $0xe20] sm:$0xff] }
0x22ce   : > { %v14162_v11 = vcombine.low %v9010_v16, %v9018_v50 }
0x22cf   : > { %10552 = vmatpush1.bf16.msra.mxu0 %v14206_v24  ;;  %v14163_v24 = vcombine.high %v9010_v16, %v9018_v50  ;;  %v8932_v16 = vld [vmem:[#allocation16 + $0xbb0] sm:$0xff] }
0x22d0   : > { %10767 = vmatpush1.bf16.msra.mxu1 %v14216_v4  ;;  %10607 = vmatprep.subr.bf16.mxu0 %v13971_v10  ;;  %v9026_v4 = vld [vmem:[#allocation16 + $0xea0] sm:$0xff]  ;;  %v8940_v50 = vld [vmem:[#allocation16 + $0xbf0] sm:$0xff] }
0x22d1   : > { %v9034_v10 = vld [vmem:[#allocation16 + $0xee0] sm:$0xff] }
0x22d2   : > { %10554 = vmatmul.mubr.bf16.vlgmr.msra.gmra.mrb[76].mxu0 %v17872_v9  ;;  %v14179_v12 = vcombine.high %v9026_v4, %v9034_v10  ;;  %v14178_v20 = vcombine.low %v9026_v4, %v9034_v10 }
0x22d3   : > { %10769 = vmatmul.mubr.bf16.vlgmr.msra.gmra.mrb[76].mxu1 %v17872_v9  ;;  %10608 = vmatpush1.bf16.msra.mxu0 %v13970_v21  ;;  %v9042_v21 = vld [vmem:[#allocation16 + $0xf20] sm:$0xff] }
0x22d4   : > { %10639 = vmatprep.mubr.bf16.mxu0 %v17876_v46  ;;  %10609 = vmatprep.subr.bf16.mxu0 %v13987_v29  ;;  %v9050_v29 = vld [vmem:[#allocation16 + $0xf60] sm:$0xff] }
0x22d5   : > { %v14195_v48 = vcombine.high %v9042_v21, %v9050_v29  ;;  %v14194_v32 = vcombine.low %v9042_v21, %v9050_v29 }
0x22d7   : > { %10610 = vmatpush1.bf16.msra.mxu0 %v13986_v15  ;;  %v9058_v15 = vld [vmem:[#allocation16 + $0xfa0] sm:$0xff] }
0x22d8   : > { %10611 = vmatprep.subr.bf16.mxu0 %v14003_v60  ;;  %v9066_v60 = vld [vmem:[#allocation16 + $0xfe0] sm:$0xff] }
0x22d9   : > { %v14211_v33 = vcombine.high %v9058_v15, %v9066_v60  ;;  %v14210_v8 = vcombine.low %v9058_v15, %v9066_v60 }
0x22db   : > { %10612 = vmatpush1.bf16.msra.mxu0 %v14002_v34  ;;  %v8820_v34 = vld [vmem:[#allocation16 + $0x830] sm:$0xff] }
0x22dc   : > { %10613 = vmatprep.subr.bf16.mxu0 %v14019_v30  ;;  %v8828_v30 = vld [vmem:[#allocation16 + $0x870] sm:$0xff] }
0x22dd   : > { %v13975_v36 = vcombine.high %v8820_v34, %v8828_v30  ;;  %v13974_v3 = vcombine.low %v8820_v34, %v8828_v30 }
0x22df   : > { %10614 = vmatpush1.bf16.msra.mxu0 %v14018_v27  ;;  %v8836_v27 = vld [vmem:[#allocation16 + $0x8b0] sm:$0xff] }
0x22e0   : > { %10615 = vmatprep.subr.bf16.mxu0 %v14035_v39  ;;  %v8844_v39 = vld [vmem:[#allocation16 + $0x8f0] sm:$0xff] }
0x22e1   : > { %v13991_v31 = vcombine.high %v8836_v27, %v8844_v39  ;;  %v13990_v40 = vcombine.low %v8836_v27, %v8844_v39  ;;  %v8956_v27 = vld [vmem:[#allocation16 + $0xc70] sm:$0xff] }
0x22e3   : > { %10616 = vmatpush1.bf16.msra.mxu0 %v14034_v14  ;;  %v8852_v14 = vld [vmem:[#allocation16 + $0x930] sm:$0xff] }
0x22e4   : > { %10617 = vmatprep.subr.bf16.mxu0 %v14051_v17  ;;  %v8860_v17 = vld [vmem:[#allocation16 + $0x970] sm:$0xff] }
0x22e5   : > { %v14007_v42 = vcombine.high %v8852_v14, %v8860_v17  ;;  %v14006_v62 = vcombine.low %v8852_v14, %v8860_v17 }
0x22e7   : > { %10618 = vmatpush1.bf16.msra.mxu0 %v14050_v2  ;;  %v8868_v2 = vld [vmem:[#allocation16 + $0x9b0] sm:$0xff] }
0x22e8   : > { %10619 = vmatprep.subr.bf16.mxu0 %v14067_v56  ;;  %v8876_v56 = vld [vmem:[#allocation16 + $0x9f0] sm:$0xff] }
0x22e9   : > { %v14023_v43 = vcombine.high %v8868_v2, %v8876_v56  ;;  %v14022_v47 = vcombine.low %v8868_v2, %v8876_v56 }
0x22eb   : > { %10620 = vmatpush1.bf16.msra.mxu0 %v14066_v35  ;;  %v8884_v35 = vld [vmem:[#allocation16 + $0xa30] sm:$0xff] }
0x22ec   : > { %10621 = vmatprep.subr.bf16.mxu0 %v14083_v5  ;;  %v8892_v5 = vld [vmem:[#allocation16 + $0xa70] sm:$0xff] }
0x22ed   : > { %v14039_v0 = vcombine.high %v8884_v35, %v8892_v5  ;;  %v14038_v41 = vcombine.low %v8884_v35, %v8892_v5 }
0x22ef   : > { %10622 = vmatpush1.bf16.msra.mxu0 %v14082_v28  ;;  %v8900_v28 = vld [vmem:[#allocation16 + $0xab0] sm:$0xff] }
0x22f0   : > { %10623 = vmatprep.subr.bf16.mxu0 %v14099_v1  ;;  %v8908_v1 = vld [vmem:[#allocation16 + $0xaf0] sm:$0xff] }
0x22f1   : > { %v14055_v26 = vcombine.high %v8900_v28, %v8908_v1 }
0x22f3   : > { %10624 = vmatpush1.bf16.msra.mxu0 %v14098_v52  ;;  %v8916_v52 = vld [vmem:[#allocation16 + $0xb30] sm:$0xff] }
0x22f4   : > { %10625 = vmatprep.subr.bf16.mxu0 %v14115_v57  ;;  %v8924_v57 = vld [vmem:[#allocation16 + $0xb70] sm:$0xff] }
0x22f5   : > { %v14071_v63 = vcombine.high %v8916_v52, %v8924_v57 }
0x22f7   : > { %10626 = vmatpush1.bf16.msra.mxu0 %v14114_v19  ;;  %v14054_v19 = vcombine.low %v8900_v28, %v8908_v1 }
0x22f8   : > { %10627 = vmatprep.subr.bf16.mxu0 %v14131_v61 }
0x22fb   : > { %10628 = vmatpush1.bf16.msra.mxu0 %v14130_v45 }
0x22fc   : > { %10629 = vmatprep.subr.bf16.mxu0 %v14147_v7 }
0x22ff   : > { %10630 = vmatpush1.bf16.msra.mxu0 %v14146_v13 }
0x2300   : > { %10631 = vmatprep.subr.bf16.mxu0 %v14163_v24 }
0x2303   : > { %10632 = vmatpush1.bf16.msra.mxu0 %v14162_v11 }
0x2304   : > { %10633 = vmatprep.subr.bf16.mxu0 %v14179_v12 }
0x2307   : > { %10634 = vmatpush1.bf16.msra.mxu0 %v14178_v20  ;;  %v14070_v20 = vcombine.low %v8916_v52, %v8924_v57 }
0x2308   : > { %10635 = vmatprep.subr.bf16.mxu0 %v14195_v48 }
0x230b   : > { %10636 = vmatpush1.bf16.msra.mxu0 %v14194_v32 }
0x230c   : > { %10637 = vmatprep.subr.bf16.mxu0 %v14211_v33  ;;  %v14087_v33 = vcombine.high %v8932_v16, %v8940_v50 }
0x230f   : > { %10638 = vmatpush1.bf16.msra.mxu0 %v14210_v8  ;;  %v14086_v8 = vcombine.low %v8932_v16, %v8940_v50  ;;  %v9028_v16 = vld [vmem:[#allocation16 + $0xeb0] sm:$0xff] }
0x2310   : > { %10693 = vmatprep.subr.bf16.mxu0 %v13975_v36  ;;  %v8948_v36 = vld [vmem:[#allocation16 + $0xc30] sm:$0xff] }
0x2311   : > { %v14102_v28 = vcombine.low %v8948_v36, %v8956_v27  ;;  %v9036_v50 = vld [vmem:[#allocation16 + $0xef0] sm:$0xff] }
0x2312   : > { %10640 = vmatmul.mubr.bf16.vlgmr.msra.gmra.mrb[80].mxu0 %v17872_v9 }
0x2313   : > { %10694 = vmatpush1.bf16.msra.mxu0 %v13974_v3  ;;  %10725 = vmatprep.mubr.bf16.mxu0 %v17876_v46  ;;  %v17893_v46 = vld [vmem:[#allocation17 + $0x10] sm:$0xff] }
0x2314   : > { %10695 = vmatprep.subr.bf16.mxu0 %v13991_v31  ;;  %v9078_v58 = vrot.slane %v17893_v46, %v17372_v53  ;;  %v9102_v18 = vrot.slane %v17893_v46, %v17612_v59  ;;  %v9082_v61 = vrot.slane %v17893_v46, %v17369_v51  ;;  %v9106_v55 = vrot.slane %v17893_v46, %v17615_v54 }
0x2317   : > { %10696 = vmatpush1.bf16.msra.mxu0 %v13990_v40 }
0x2318   : > { %10697 = vmatprep.subr.bf16.mxu0 %v14007_v42 }
0x231b   : > { %10698 = vmatpush1.bf16.msra.mxu0 %v14006_v62 }
0x231c   : > { %10699 = vmatprep.subr.bf16.mxu0 %v14023_v43  ;;  %v14103_v43 = vcombine.high %v8948_v36, %v8956_v27  ;;  %v15877_v36 = vld [vmem:[#allocation19 + $0x834] ss:$8 sps:$4 sm:$0xff]   ;;  %v15875_v27 = vld [vmem:[#allocation19 + $0x830] ss:$8 sps:$4 sm:$0xff]  }
0x231f   : > { %10700 = vmatpush1.bf16.msra.mxu0 %v14022_v47  ;;  %v8964_v47 = vld [vmem:[#allocation16 + $0xcb0] sm:$0xff] }
0x2320   : > { %10701 = vmatprep.subr.bf16.mxu0 %v14039_v0  ;;  %v8972_v0 = vld [vmem:[#allocation16 + $0xcf0] sm:$0xff] }
0x2321   : > { %v14119_v1 = vcombine.high %v8964_v47, %v8972_v0  ;;  %v14118_v52 = vcombine.low %v8964_v47, %v8972_v0 }
0x2323   : > { %10702 = vmatpush1.bf16.msra.mxu0 %v14038_v41  ;;  %v8980_v41 = vld [vmem:[#allocation16 + $0xd30] sm:$0xff] }
0x2324   : > { %10703 = vmatprep.subr.bf16.mxu0 %v14055_v26  ;;  %v8988_v26 = vld [vmem:[#allocation16 + $0xd70] sm:$0xff] }
0x2325   : > { %v10469_v45 = vpop.f32.mrb[68].mxu0  ;;  %v10598_v7 = vpop.f32.mrb[68].mxu1  ;;  %v14135_v57 = vcombine.high %v8980_v41, %v8988_v26 }
0x2326   : > { %v10470_v13 = vadd.f32 %v10469_v45, %v9078_v58  ;;  %v10599_v24 = vadd.f32 %v10598_v7, %v9102_v18  ;;  %v10471_v4 = vpop.f32.mrb[69].mxu0  ;;  %v10600_v10 = vpop.f32.mrb[69].mxu1 }
0x2327   : > { %v10472_v11 = vadd.f32 %v10471_v4, %v9082_v61  ;;  %v10601_v12 = vadd.f32 %v10600_v10, %v9106_v55  ;;  %10704 = vmatpush1.bf16.msra.mxu0 %v14054_v19  ;;  %v10473_v21 = vpop.f32.mrb[70].mxu0  ;;  %v10602_v29 = vpop.f32.mrb[70].mxu1  ;;  %v14134_v19 = vcombine.low %v8980_v41, %v8988_v26  ;;  %v9044_v4 = vld [vmem:[#allocation16 + $0xf30] sm:$0xff] }
0x2328   : > { %v10474_v48 = vadd.f32 %v10473_v21, %v9078_v58  ;;  %v10603_v15 = vadd.f32 %v10602_v29, %v9102_v18  ;;  %v10475_v60 = vpop.f32.mrb[71].mxu0  ;;  %v10604_v32 = vpop.f32.mrb[71].mxu1  ;;  %10705 = vmatprep.subr.bf16.mxu0 %v14071_v63  ;;  %v10779_v39 = vmax.f32 %v10470_v13, 0.0  ;;  %v10785_v3 = vmax.f32 %v10599_v24, 0.0  ;;  %v8996_v58 = vld [vmem:[#allocation16 + $0xdb0] sm:$0xff] }
0x2329   : > { %v10476_v34 = vadd.f32 %v10475_v60, %v9082_v61  ;;  %v10605_v30 = vadd.f32 %v10604_v32, %v9106_v55  ;;  %v10780_v17 = vmax.f32 %v10472_v11, 0.0  ;;  %v10786_v40 = vmax.f32 %v10601_v12, 0.0  ;;  %v9004_v18 = vld [vmem:[#allocation16 + $0xdf0] sm:$0xff]  ;;  %v15868_v60 = vld [vmem:[#allocation19 + $0x804] ss:$8 sps:$4 sm:$0xff]  }
0x232a   : > { %v10795_v31 = vmax.f32 %v10474_v48, 0.0  ;;  %v10801_v14 = vmax.f32 %v10603_v15, 0.0  ;;  %v14151_v61 = vcombine.high %v8996_v58, %v9004_v18  ;;  %v9012_v55 = vld [vmem:[#allocation16 + $0xe30] sm:$0xff]  ;;  %v14150_v45 = vcombine.low %v8996_v58, %v9004_v18  ;;  %v15866_v32 = vld [vmem:[#allocation19 + $0x800] ss:$8 sps:$4 sm:$0xff]  }
0x232b   : > { %v10796_v42 = vmax.f32 %v10476_v34, 0.0  ;;  %v10802_v2 = vmax.f32 %v10605_v30, 0.0  ;;  %10706 = vmatpush1.bf16.msra.mxu0 %v14070_v20  ;;  %v9020_v63 = vld [vmem:[#allocation16 + $0xe70] sm:$0xff]  ;;  %v14183_v24 = vcombine.high %v9028_v16, %v9036_v50  ;;  %v14182_v11 = vcombine.low %v9028_v16, %v9036_v50  ;;  %v15874_v30 = vld [vmem:[#allocation19 + $0x824] ss:$8 sps:$4 sm:$0xff]  }
0x232c   : > { %v17903_v56 = vpack.c.bf16 %v10795_v31, %v10779_v39  ;;  %v17905_v62 = vpack.c.bf16 %v10801_v14, %v10785_v3  ;;  %10707 = vmatprep.subr.bf16.mxu0 %v14087_v33  ;;  %v14167_v7 = vcombine.high %v9012_v55, %v9020_v63  ;;  %v14166_v13 = vcombine.low %v9012_v55, %v9020_v63  ;;  %v9052_v10 = vld [vmem:[#allocation16 + $0xf70] sm:$0xff]  ;;  %v15880_v39 = vld [vmem:[#allocation19 + $0x844] ss:$8 sps:$4 sm:$0xff]   ;;  %v15878_v3 = vld [vmem:[#allocation19 + $0x840] ss:$8 sps:$4 sm:$0xff]  }
0x232d   : > { %v10812_v35 = vpack.c.bf16 %v10796_v42, %v10780_v17  ;;  %v17907_v5 = vpack.c.bf16 %v10802_v2, %v10786_v40  ;;  %v14199_v12 = vcombine.high %v9044_v4, %v9052_v10  ;;  %v9060_v21 = vld [vmem:[#allocation16 + $0xfb0] sm:$0xff]  ;;  %v14198_v20 = vcombine.low %v9044_v4, %v9052_v10  ;;  %v17910_v31 = vld [vmem:[#allocation17 + $0x18] sm:$0xff]  ;;  %v15884_v58 = vld [vmem:[#allocation19 + $0x860] ss:$8 sps:$4 sm:$0xff]  }
0x232e   : > { %v9068_v29 = vld [vmem:[#allocation16 + $0xff0] sm:$0xff]  ;;  %v9118_v17 = vrot.slane %v17910_v31, %v17408_v22  ;;  %v9090_v40 = vrot.slane %v17893_v46, %v17411_v23  ;;  %v9122_v42 = vrot.slane %v17910_v31, %v17411_v23 }
0x232f   : > { %10708 = vmatpush1.bf16.msra.mxu0 %v14086_v8  ;;  %v14215_v48 = vcombine.high %v9060_v21, %v9068_v29  ;;  %v14214_v15 = vcombine.low %v9060_v21, %v9068_v29  ;;  %v15871_v33 = vld [vmem:[#allocation19 + $0x814] ss:$8 sps:$4 sm:$0xff]   ;;  %v15869_v34 = vld [vmem:[#allocation19 + $0x810] ss:$8 sps:$4 sm:$0xff]   ;;  %v15872_v8 = vld [vmem:[#allocation19 + $0x820] ss:$8 sps:$4 sm:$0xff]  }
0x2330   : > { %10709 = vmatprep.subr.bf16.mxu0 %v14103_v43  ;;  %v15883_v14 = vld [vmem:[#allocation19 + $0x854] ss:$8 sps:$4 sm:$0xff]   ;;  %v15881_v2 = vld [vmem:[#allocation19 + $0x850] ss:$8 sps:$4 sm:$0xff]   ;;  %v15886_v43 = vld [vmem:[#allocation19 + $0x864] ss:$8 sps:$4 sm:$0xff]  }
0x2331   : > { %v15889_v23 = vld [vmem:[#allocation19 + $0x874] ss:$8 sps:$4 sm:$0xff]  }
0x2333   : > { %10710 = vmatpush1.bf16.msra.mxu0 %v14102_v28 }
0x2334   : > { %10711 = vmatprep.subr.bf16.mxu0 %v14119_v1 }
0x2337   : > { %10712 = vmatpush1.bf16.msra.mxu0 %v14118_v52 }
0x2338   : > { %10713 = vmatprep.subr.bf16.mxu0 %v14135_v57 }
0x233b   : > { %10714 = vmatpush1.bf16.msra.mxu0 %v14134_v19 }
0x233c   : > { %10715 = vmatprep.subr.bf16.mxu0 %v14151_v61 }
0x233f   : > { %10716 = vmatpush1.bf16.msra.mxu0 %v14150_v45 }
0x2340   : > { %10717 = vmatprep.subr.bf16.mxu0 %v14167_v7 }
0x2343   : > { %10718 = vmatpush1.bf16.msra.mxu0 %v14166_v13 }
0x2344   : > { %10719 = vmatprep.subr.bf16.mxu0 %v14183_v24 }
0x2347   : > { %10720 = vmatpush1.bf16.msra.mxu0 %v14182_v11 }
0x2348   : > { %10721 = vmatprep.subr.bf16.mxu0 %v14199_v12  ;;  %v15887_v12 = vld [vmem:[#allocation19 + $0x870] ss:$8 sps:$4 sm:$0xff]  }
0x234b   : > { %10722 = vmatpush1.bf16.msra.mxu0 %v14198_v20  ;;  %v15892_v20 = vld [vmem:[#allocation19 + $0x884] ss:$8 sps:$4 sm:$0xff]  }
0x234c   : > { %10723 = vmatprep.subr.bf16.mxu0 %v14215_v48 }
0x234f   : > { %10724 = vmatpush1.bf16.msra.mxu0 %v14214_v15 }
0x2350   : > { %12377 = vmatprep.subr.bf16.mxu0 %v15868_v60  ;;  %v15890_v60 = vld [vmem:[#allocation19 + $0x880] ss:$8 sps:$4 sm:$0xff]  }
0x2352   : > { %10726 = vmatmul.mubr.bf16.vlgmr.msra.gmra.mrb[84].mxu0 %v17872_v9  ;;  %v9086_v9 = vrot.slane %v17893_v46, %v17408_v22 }
0x2353   : > { %12378 = vmatpush1.bf16.msra.mxu0 %v15866_v32  ;;  %12409 = vmatprep.mubr.bf16.mxu0 %v10812_v35  ;;  %v15895_v32 = vld [vmem:[#allocation19 + $0x894] ss:$8 sps:$4 sm:$0xff]  }
0x2354   : > { %12379 = vmatprep.subr.bf16.mxu0 %v15871_v33  ;;  %v15893_v33 = vld [vmem:[#allocation19 + $0x890] ss:$8 sps:$4 sm:$0xff]  }
0x2357   : > { %12380 = vmatpush1.bf16.msra.mxu0 %v15869_v34  ;;  %v15898_v34 = vld [vmem:[#allocation19 + $0x8a4] ss:$8 sps:$4 sm:$0xff]  }
0x2358   : > { %12381 = vmatprep.subr.bf16.mxu0 %v15874_v30  ;;  %v15896_v30 = vld [vmem:[#allocation19 + $0x8a0] ss:$8 sps:$4 sm:$0xff]  }
0x235b   : > { %12382 = vmatpush1.bf16.msra.mxu0 %v15872_v8  ;;  %v15901_v8 = vld [vmem:[#allocation19 + $0x8b4] ss:$8 sps:$4 sm:$0xff]  }
0x235c   : > { %12383 = vmatprep.subr.bf16.mxu0 %v15877_v36  ;;  %v15899_v36 = vld [vmem:[#allocation19 + $0x8b0] ss:$8 sps:$4 sm:$0xff]  }
0x235f   : > { %12384 = vmatpush1.bf16.msra.mxu0 %v15875_v27  ;;  %v15904_v27 = vld [vmem:[#allocation19 + $0x8c4] ss:$8 sps:$4 sm:$0xff]  }
0x2360   : > { %12385 = vmatprep.subr.bf16.mxu0 %v15880_v39  ;;  %v15902_v39 = vld [vmem:[#allocation19 + $0x8c0] ss:$8 sps:$4 sm:$0xff]  }
0x2363   : > { %12386 = vmatpush1.bf16.msra.mxu0 %v15878_v3  ;;  %v15907_v3 = vld [vmem:[#allocation19 + $0x8d4] ss:$8 sps:$4 sm:$0xff]  }
0x2364   : > { %12387 = vmatprep.subr.bf16.mxu0 %v15883_v14  ;;  %v15905_v14 = vld [vmem:[#allocation19 + $0x8d0] ss:$8 sps:$4 sm:$0xff]  }
0x2365   : > { %v10512_v35 = vpop.f32.mrb[72].mxu0  ;;  %v10684_v47 = vpop.f32.mrb[72].mxu1 }
0x2366   : > { %v10513_v0 = vadd.f32 %v10512_v35, %v9086_v9  ;;  %v10685_v28 = vadd.f32 %v10684_v47, %v9118_v17  ;;  %v10514_v1 = vpop.f32.mrb[73].mxu0  ;;  %v10686_v41 = vpop.f32.mrb[73].mxu1  ;;  %v15919_v35 = vld [vmem:[#allocation19 + $0x914] ss:$8 sps:$4 sm:$0xff]   ;;  %v15917_v47 = vld [vmem:[#allocation19 + $0x910] ss:$8 sps:$4 sm:$0xff]  }
0x2367   : > { %v10515_v26 = vadd.f32 %v10514_v1, %v9090_v40  ;;  %v10687_v52 = vadd.f32 %v10686_v41, %v9122_v42  ;;  %v10516_v57 = vpop.f32.mrb[74].mxu0  ;;  %v10688_v22 = vpop.f32.mrb[74].mxu1  ;;  %12388 = vmatpush1.bf16.msra.mxu0 %v15881_v2  ;;  %v15916_v2 = vld [vmem:[#allocation19 + $0x904] ss:$8 sps:$4 sm:$0xff]   ;;  %v15925_v1 = vld [vmem:[#allocation19 + $0x934] ss:$8 sps:$4 sm:$0xff]  }
0x2368   : > { %v10517_v18 = vadd.f32 %v10516_v57, %v9086_v9  ;;  %v10689_v19 = vadd.f32 %v10688_v22, %v9118_v17  ;;  %v10518_v61 = vpop.f32.mrb[75].mxu0  ;;  %v10690_v55 = vpop.f32.mrb[75].mxu1  ;;  %12389 = vmatprep.subr.bf16.mxu0 %v15886_v43  ;;  %v10781_v7 = vmax.f32 %v10513_v0, 0.0  ;;  %v10789_v16 = vmax.f32 %v10685_v28, 0.0  ;;  %v15910_v9 = vld [vmem:[#allocation19 + $0x8e4] ss:$8 sps:$4 sm:$0xff]  }
0x2369   : > { %v10519_v63 = vadd.f32 %v10518_v61, %v9090_v40  ;;  %v10691_v45 = vadd.f32 %v10690_v55, %v9122_v42  ;;  %v10782_v24 = vmax.f32 %v10515_v26, 0.0  ;;  %v10790_v4 = vmax.f32 %v10687_v52, 0.0  ;;  %v15908_v17 = vld [vmem:[#allocation19 + $0x8e0] ss:$8 sps:$4 sm:$0xff]   ;;  %v15913_v40 = vld [vmem:[#allocation19 + $0x8f4] ss:$8 sps:$4 sm:$0xff]  }
0x236a   : > { %v10797_v50 = vmax.f32 %v10517_v18, 0.0  ;;  %v10805_v13 = vmax.f32 %v10689_v19, 0.0  ;;  %v15911_v42 = vld [vmem:[#allocation19 + $0x8f0] ss:$8 sps:$4 sm:$0xff]   ;;  %v15914_v43 = vld [vmem:[#allocation19 + $0x900] ss:$8 sps:$4 sm:$0xff]   ;;  %v9134_v22 = vrot.slane %v17910_v31, %v17612_v59  ;;  %v9138_v19 = vrot.slane %v17910_v31, %v17615_v54 }
0x236b   : > { %v10798_v10 = vmax.f32 %v10519_v63, 0.0  ;;  %v10806_v11 = vmax.f32 %v10691_v45, 0.0  ;;  %12390 = vmatpush1.bf16.msra.mxu0 %v15884_v58  ;;  %v15922_v0 = vld [vmem:[#allocation19 + $0x924] ss:$8 sps:$4 sm:$0xff]   ;;  %v15920_v28 = vld [vmem:[#allocation19 + $0x920] ss:$8 sps:$4 sm:$0xff]   ;;  %v9098_v58 = vrot.slane %v17893_v46, %v17427_v38 }
0x236c   : > { %v17920_v21 = vpack.c.bf16 %v10797_v50, %v10781_v7  ;;  %v17922_v29 = vpack.c.bf16 %v10805_v13, %v10789_v16  ;;  %12391 = vmatprep.subr.bf16.mxu0 %v15889_v23  ;;  %v15923_v41 = vld [vmem:[#allocation19 + $0x930] ss:$8 sps:$4 sm:$0xff]   ;;  %v15928_v26 = vld [vmem:[#allocation19 + $0x944] ss:$8 sps:$4 sm:$0xff]   ;;  %v15926_v52 = vld [vmem:[#allocation19 + $0x940] ss:$8 sps:$4 sm:$0xff]  }
0x236d   : > { %v10814_v48 = vpack.c.bf16 %v10798_v10, %v10782_v24  ;;  %v17924_v15 = vpack.c.bf16 %v10806_v11, %v10790_v4  ;;  %v15931_v57 = vld [vmem:[#allocation19 + $0x954] ss:$8 sps:$4 sm:$0xff]   ;;  %v15929_v18 = vld [vmem:[#allocation19 + $0x950] ss:$8 sps:$4 sm:$0xff]   ;;  %v15934_v61 = vld [vmem:[#allocation19 + $0x964] ss:$8 sps:$4 sm:$0xff]  }
0x236e   : > { %v15932_v24 = vld [vmem:[#allocation19 + $0x960] ss:$8 sps:$4 sm:$0xff]   ;;  %v15937_v11 = vld [vmem:[#allocation19 + $0x974] ss:$8 sps:$4 sm:$0xff]  }
0x236f   : > { %12392 = vmatpush1.bf16.msra.mxu0 %v15887_v12 }
0x2370   : > { %12393 = vmatprep.subr.bf16.mxu0 %v15892_v20 }
0x2373   : > { %12394 = vmatpush1.bf16.msra.mxu0 %v15890_v60 }
0x2374   : > { %12395 = vmatprep.subr.bf16.mxu0 %v15895_v32 }
0x2377   : > { %12396 = vmatpush1.bf16.msra.mxu0 %v15893_v33 }
0x2378   : > { %12397 = vmatprep.subr.bf16.mxu0 %v15898_v34 }
0x237b   : > { %12398 = vmatpush1.bf16.msra.mxu0 %v15896_v30 }
0x237c   : > { %12399 = vmatprep.subr.bf16.mxu0 %v15901_v8 }
0x237f   : > { %12400 = vmatpush1.bf16.msra.mxu0 %v15899_v36  ;;  %v15935_v36 = vld [vmem:[#allocation19 + $0x970] ss:$8 sps:$4 sm:$0xff]  }
0x2380   : > { %12401 = vmatprep.subr.bf16.mxu0 %v15904_v27 }
0x2383   : > { %12402 = vmatpush1.bf16.msra.mxu0 %v15902_v39 }
0x2384   : > { %12403 = vmatprep.subr.bf16.mxu0 %v15907_v3 }
0x2387   : > { %12404 = vmatpush1.bf16.msra.mxu0 %v15905_v14  ;;  %v15940_v14 = vld [vmem:[#allocation19 + $0x984] ss:$8 sps:$4 sm:$0xff]  }
0x2388   : > { %12405 = vmatprep.subr.bf16.mxu0 %v15910_v9 }
0x238b   : > { %12406 = vmatpush1.bf16.msra.mxu0 %v15908_v17 }
0x238c   : > { %12407 = vmatprep.subr.bf16.mxu0 %v15913_v40 }
0x238f   : > { %12408 = vmatpush1.bf16.msra.mxu0 %v15911_v42  ;;  %v15938_v42 = vld [vmem:[#allocation19 + $0x980] ss:$8 sps:$4 sm:$0xff]  }
0x2390   : > { %12420 = vmatprep.subr.bf16.mxu0 %v15916_v2  ;;  %v15943_v2 = vld [vmem:[#allocation19 + $0x994] ss:$8 sps:$4 sm:$0xff]  }
0x2392   : > { %12410 = vmatmul.mubr.bf16.vlgmr.msra.gmra.mrb[88].mxu0 %v17903_v56  ;;  %v9094_v56 = vrot.slane %v17893_v46, %v17424_v37 }
0x2393   : > { %12421 = vmatpush1.bf16.msra.mxu0 %v15914_v43  ;;  %12452 = vmatprep.mubr.bf16.mxu0 %v10814_v48  ;;  %v15941_v43 = vld [vmem:[#allocation19 + $0x990] ss:$8 sps:$4 sm:$0xff]  }
0x2394   : > { %12422 = vmatprep.subr.bf16.mxu0 %v15919_v35  ;;  %v15946_v35 = vld [vmem:[#allocation19 + $0x9a4] ss:$8 sps:$4 sm:$0xff]  }
0x2397   : > { %12423 = vmatpush1.bf16.msra.mxu0 %v15917_v47  ;;  %v15944_v47 = vld [vmem:[#allocation19 + $0x9a0] ss:$8 sps:$4 sm:$0xff]  }
0x2398   : > { %12424 = vmatprep.subr.bf16.mxu0 %v15922_v0  ;;  %v15949_v0 = vld [vmem:[#allocation19 + $0x9b4] ss:$8 sps:$4 sm:$0xff]  }
0x239b   : > { %12425 = vmatpush1.bf16.msra.mxu0 %v15920_v28  ;;  %v15947_v28 = vld [vmem:[#allocation19 + $0x9b0] ss:$8 sps:$4 sm:$0xff]  }
0x239c   : > { %12426 = vmatprep.subr.bf16.mxu0 %v15925_v1  ;;  %v15952_v1 = vld [vmem:[#allocation19 + $0x9c4] ss:$8 sps:$4 sm:$0xff]  }
0x239f   : > { %12427 = vmatpush1.bf16.msra.mxu0 %v15923_v41  ;;  %v15950_v41 = vld [vmem:[#allocation19 + $0x9c0] ss:$8 sps:$4 sm:$0xff]  }
0x23a0   : > { %12428 = vmatprep.subr.bf16.mxu0 %v15928_v26  ;;  %v15955_v26 = vld [vmem:[#allocation19 + $0x9d4] ss:$8 sps:$4 sm:$0xff]  }
0x23a3   : > { %12429 = vmatpush1.bf16.msra.mxu0 %v15926_v52  ;;  %v15953_v52 = vld [vmem:[#allocation19 + $0x9d0] ss:$8 sps:$4 sm:$0xff]  }
0x23a4   : > { %12430 = vmatprep.subr.bf16.mxu0 %v15931_v57  ;;  %v15958_v57 = vld [vmem:[#allocation19 + $0x9e4] ss:$8 sps:$4 sm:$0xff]  }
0x23a5   : > { %v10555_v55 = vpop.f32.mrb[76].mxu0 }
0x23a6   : > { %v10556_v23 = vadd.f32 %v10555_v55, %v9094_v56  ;;  %v10770_v63 = vpop.f32.mrb[76].mxu1  ;;  %v10557_v45 = vpop.f32.mrb[77].mxu0  ;;  %v15965_v55 = vld [vmem:[#allocation19 + $0xa10] ss:$8 sps:$4 sm:$0xff]  }
0x23a7   : > { %v10771_v7 = vadd.f32 %v10770_v63, %v9134_v22  ;;  %v10558_v16 = vadd.f32 %v10557_v45, %v9098_v58  ;;  %v10772_v50 = vpop.f32.mrb[77].mxu1  ;;  %v10559_v13 = vpop.f32.mrb[78].mxu0  ;;  %12431 = vmatpush1.bf16.msra.mxu0 %v15929_v18  ;;  %v15964_v18 = vld [vmem:[#allocation19 + $0xa04] ss:$8 sps:$4 sm:$0xff]   ;;  %v15968_v63 = vld [vmem:[#allocation19 + $0xa20] ss:$8 sps:$4 sm:$0xff]  }
0x23a8   : > { %v10773_v59 = vadd.f32 %v10772_v50, %v9138_v19  ;;  %v10560_v4 = vadd.f32 %v10559_v13, %v9094_v56  ;;  %v10774_v10 = vpop.f32.mrb[78].mxu1  ;;  %v10561_v46 = vpop.f32.mrb[79].mxu0  ;;  %12432 = vmatprep.subr.bf16.mxu0 %v15934_v61  ;;  %v10783_v48 = vmax.f32 %v10556_v23, 0.0  ;;  %v15956_v56 = vld [vmem:[#allocation19 + $0x9e0] ss:$8 sps:$4 sm:$0xff]  }
0x23a9   : > { %v10775_v12 = vadd.f32 %v10774_v10, %v9134_v22  ;;  %v10562_v54 = vadd.f32 %v10561_v46, %v9098_v58  ;;  %v10776_v20 = vpop.f32.mrb[79].mxu1  ;;  %v10793_v33 = vmax.f32 %v10771_v7, 0.0  ;;  %v10784_v34 = vmax.f32 %v10558_v16, 0.0  ;;  %v15961_v22 = vld [vmem:[#allocation19 + $0x9f4] ss:$8 sps:$4 sm:$0xff]  }
0x23aa   : > { %v10799_v60 = vmax.f32 %v10560_v4, 0.0  ;;  %v10777_v32 = vadd.f32 %v10776_v20, %v9138_v19  ;;  %v10794_v27 = vmax.f32 %v10773_v59, 0.0  ;;  %v15959_v58 = vld [vmem:[#allocation19 + $0x9f0] ss:$8 sps:$4 sm:$0xff]   ;;  %v15962_v19 = vld [vmem:[#allocation19 + $0xa00] ss:$8 sps:$4 sm:$0xff]  }
0x23ab   : > { %v10809_v30 = vmax.f32 %v10775_v12, 0.0  ;;  %v10800_v8 = vmax.f32 %v10562_v54, 0.0  ;;  %12433 = vmatpush1.bf16.msra.mxu0 %v15932_v24  ;;  %v15967_v61 = vld [vmem:[#allocation19 + $0xa14] ss:$8 sps:$4 sm:$0xff]   ;;  %v15970_v23 = vld [vmem:[#allocation19 + $0xa24] ss:$8 sps:$4 sm:$0xff]   ;;  %v9114_v24 = vrot.slane %v17910_v31, %v17369_v51 }
0x23ac   : > { %v17935_v39 = vpack.c.bf16 %v10799_v60, %v10783_v48  ;;  %v10810_v3 = vmax.f32 %v10777_v32, 0.0  ;;  %12434 = vmatprep.subr.bf16.mxu0 %v15937_v11  ;;  %v15973_v45 = vld [vmem:[#allocation19 + $0xa34] ss:$8 sps:$4 sm:$0xff]   ;;  %v15971_v7 = vld [vmem:[#allocation19 + $0xa30] ss:$8 sps:$4 sm:$0xff]  }
0x23ad   : > { %v17937_v9 = vpack.c.bf16 %v10809_v30, %v10793_v33  ;;  %v10816_v17 = vpack.c.bf16 %v10800_v8, %v10784_v34  ;;  %v15976_v16 = vld [vmem:[#allocation19 + $0xa44] ss:$8 sps:$4 sm:$0xff]   ;;  %v15974_v50 = vld [vmem:[#allocation19 + $0xa40] ss:$8 sps:$4 sm:$0xff]   ;;  %v15979_v13 = vld [vmem:[#allocation19 + $0xa54] ss:$8 sps:$4 sm:$0xff]  }
0x23ae   : > { %v17939_v40 = vpack.c.bf16 %v10810_v3, %v10794_v27  ;;  %v15977_v59 = vld [vmem:[#allocation19 + $0xa50] ss:$8 sps:$4 sm:$0xff]   ;;  %v15982_v4 = vld [vmem:[#allocation19 + $0xa64] ss:$8 sps:$4 sm:$0xff]   ;;  %v15980_v20 = vld [vmem:[#allocation19 + $0xa60] ss:$8 sps:$4 sm:$0xff]  }
0x23af   : > { %12435 = vmatpush1.bf16.msra.mxu0 %v15935_v36  ;;  %v15985_v32 = vld [vmem:[#allocation19 + $0xa74] ss:$8 sps:$4 sm:$0xff]   ;;  %v15983_v27 = vld [vmem:[#allocation19 + $0xa70] ss:$8 sps:$4 sm:$0xff]  }
0x23b0   : > { %12436 = vmatprep.subr.bf16.mxu0 %v15940_v14  ;;  %v15988_v14 = vld [vmem:[#allocation19 + $0xa84] ss:$8 sps:$4 sm:$0xff]  }
0x23b3   : > { %12437 = vmatpush1.bf16.msra.mxu0 %v15938_v42  ;;  %v15986_v42 = vld [vmem:[#allocation19 + $0xa80] ss:$8 sps:$4 sm:$0xff]  }
0x23b4   : > { %12438 = vmatprep.subr.bf16.mxu0 %v15943_v2  ;;  %v15991_v2 = vld [vmem:[#allocation19 + $0xa94] ss:$8 sps:$4 sm:$0xff]  }
0x23b7   : > { %12439 = vmatpush1.bf16.msra.mxu0 %v15941_v43  ;;  %v15989_v43 = vld [vmem:[#allocation19 + $0xa90] ss:$8 sps:$4 sm:$0xff]  }
0x23b8   : > { %12440 = vmatprep.subr.bf16.mxu0 %v15946_v35  ;;  %v15994_v35 = vld [vmem:[#allocation19 + $0xaa4] ss:$8 sps:$4 sm:$0xff]  }
0x23bb   : > { %12441 = vmatpush1.bf16.msra.mxu0 %v15944_v47  ;;  %v15992_v47 = vld [vmem:[#allocation19 + $0xaa0] ss:$8 sps:$4 sm:$0xff]  }
0x23bc   : > { %12442 = vmatprep.subr.bf16.mxu0 %v15949_v0  ;;  %v15997_v0 = vld [vmem:[#allocation19 + $0xab4] ss:$8 sps:$4 sm:$0xff]  }
0x23bf   : > { %12443 = vmatpush1.bf16.msra.mxu0 %v15947_v28  ;;  %v15995_v28 = vld [vmem:[#allocation19 + $0xab0] ss:$8 sps:$4 sm:$0xff]  }
0x23c0   : > { %12444 = vmatprep.subr.bf16.mxu0 %v15952_v1  ;;  %v16000_v1 = vld [vmem:[#allocation19 + $0xac4] ss:$8 sps:$4 sm:$0xff]  }
0x23c3   : > { %12445 = vmatpush1.bf16.msra.mxu0 %v15950_v41  ;;  %v15998_v41 = vld [vmem:[#allocation19 + $0xac0] ss:$8 sps:$4 sm:$0xff]  }
0x23c4   : > { %12446 = vmatprep.subr.bf16.mxu0 %v15955_v26  ;;  %v16003_v26 = vld [vmem:[#allocation19 + $0xad4] ss:$8 sps:$4 sm:$0xff]  }
0x23c7   : > { %12447 = vmatpush1.bf16.msra.mxu0 %v15953_v52  ;;  %v16001_v52 = vld [vmem:[#allocation19 + $0xad0] ss:$8 sps:$4 sm:$0xff]  }
0x23c8   : > { %12448 = vmatprep.subr.bf16.mxu0 %v15958_v57  ;;  %v16006_v57 = vld [vmem:[#allocation19 + $0xae4] ss:$8 sps:$4 sm:$0xff]  }
0x23cb   : > { %12449 = vmatpush1.bf16.msra.mxu0 %v15956_v56  ;;  %v16004_v56 = vld [vmem:[#allocation19 + $0xae0] ss:$8 sps:$4 sm:$0xff]  }
0x23cc   : > { %12450 = vmatprep.subr.bf16.mxu0 %v15961_v22  ;;  %v16009_v22 = vld [vmem:[#allocation19 + $0xaf4] ss:$8 sps:$4 sm:$0xff]  }
0x23cf   : > { %12451 = vmatpush1.bf16.msra.mxu0 %v15959_v58  ;;  %v16007_v58 = vld [vmem:[#allocation19 + $0xaf0] ss:$8 sps:$4 sm:$0xff]  }
0x23d0   : > { %12463 = vmatprep.subr.bf16.mxu0 %v15964_v18  ;;  %v16012_v18 = vld [vmem:[#allocation19 + $0xb04] ss:$8 sps:$4 sm:$0xff]  }
0x23d2   : > { %12453 = vmatmul.mubr.bf16.vlgmr.msra.gmra.mrb[88].mxu0 %v17920_v21  ;;  %v9110_v21 = vrot.slane %v17910_v31, %v17372_v53 }
0x23d3   : > { %12464 = vmatpush1.bf16.msra.mxu0 %v15962_v19  ;;  %12495 = vmatprep.mubr.bf16.mxu0 %v10816_v17  ;;  %v16010_v19 = vld [vmem:[#allocation19 + $0xb00] ss:$8 sps:$4 sm:$0xff]  }
0x23d4   : > { %12465 = vmatprep.subr.bf16.mxu0 %v15967_v61  ;;  %v16015_v61 = vld [vmem:[#allocation19 + $0xb14] ss:$8 sps:$4 sm:$0xff]  }
0x23d7   : > { %12466 = vmatpush1.bf16.msra.mxu0 %v15965_v55  ;;  %v16013_v55 = vld [vmem:[#allocation19 + $0xb10] ss:$8 sps:$4 sm:$0xff]  }
0x23d8   : > { %12467 = vmatprep.subr.bf16.mxu0 %v15970_v23  ;;  %v16018_v23 = vld [vmem:[#allocation19 + $0xb24] ss:$8 sps:$4 sm:$0xff]  }
0x23db   : > { %12468 = vmatpush1.bf16.msra.mxu0 %v15968_v63  ;;  %v16016_v63 = vld [vmem:[#allocation19 + $0xb20] ss:$8 sps:$4 sm:$0xff]  }
0x23dc   : > { %12469 = vmatprep.subr.bf16.mxu0 %v15973_v45  ;;  %v16021_v45 = vld [vmem:[#allocation19 + $0xb34] ss:$8 sps:$4 sm:$0xff]  }
0x23df   : > { %12470 = vmatpush1.bf16.msra.mxu0 %v15971_v7  ;;  %v16019_v7 = vld [vmem:[#allocation19 + $0xb30] ss:$8 sps:$4 sm:$0xff]  }
0x23e0   : > { %12471 = vmatprep.subr.bf16.mxu0 %v15976_v16  ;;  %v16024_v16 = vld [vmem:[#allocation19 + $0xb44] ss:$8 sps:$4 sm:$0xff]  }
0x23e3   : > { %12472 = vmatpush1.bf16.msra.mxu0 %v15974_v50  ;;  %v16022_v50 = vld [vmem:[#allocation19 + $0xb40] ss:$8 sps:$4 sm:$0xff]  }
0x23e4   : > { %12473 = vmatprep.subr.bf16.mxu0 %v15979_v13  ;;  %v16027_v13 = vld [vmem:[#allocation19 + $0xb54] ss:$8 sps:$4 sm:$0xff]  }
0x23e5   : > { %v10641_v10 = vpop.f32.mrb[80].mxu0 }
0x23e6   : > { %v10642_v46 = vadd.f32 %v10641_v10, %v9110_v21  ;;  %v10643_v11 = vpop.f32.mrb[81].mxu0 }
0x23e7   : > { %v10644_v12 = vadd.f32 %v10643_v11, %v9114_v24  ;;  %v10645_v54 = vpop.f32.mrb[82].mxu0  ;;  %12474 = vmatpush1.bf16.msra.mxu0 %v15977_v59 }
0x23e8   : > { %v10646_v48 = vadd.f32 %v10645_v54, %v9110_v21  ;;  %v10647_v60 = vpop.f32.mrb[83].mxu0  ;;  %12475 = vmatprep.subr.bf16.mxu0 %v15982_v4  ;;  %v10787_v34 = vmax.f32 %v10642_v46, 0.0  ;;  %v16025_v21 = vld [vmem:[#allocation19 + $0xb50] ss:$8 sps:$4 sm:$0xff]  }
0x23e9   : > { %v10648_v33 = vadd.f32 %v10647_v60, %v9114_v24  ;;  %v10788_v8 = vmax.f32 %v10644_v12, 0.0  ;;  %v16030_v24 = vld [vmem:[#allocation19 + $0xb64] ss:$8 sps:$4 sm:$0xff]   ;;  %v16028_v12 = vld [vmem:[#allocation19 + $0xb60] ss:$8 sps:$4 sm:$0xff]  }
0x23ea   : > { %v10803_v30 = vmax.f32 %v10646_v48, 0.0  ;;  %v16033_v48 = vld [vmem:[#allocation19 + $0xb74] ss:$8 sps:$4 sm:$0xff]  }
0x23eb   : > { %v10804_v36 = vmax.f32 %v10648_v33, 0.0  ;;  %12476 = vmatpush1.bf16.msra.mxu0 %v15980_v20 }
0x23ec   : > { %v17946_v3 = vpack.c.bf16 %v10803_v30, %v10787_v34  ;;  %12477 = vmatprep.subr.bf16.mxu0 %v15985_v32  ;;  %v16036_v30 = vld [vmem:[#allocation19 + $0xb84] ss:$8 sps:$4 sm:$0xff]  }
0x23ed   : > { %v17948_v17 = vpack.c.bf16 %v10804_v36, %v10788_v8  ;;  %v16034_v36 = vld [vmem:[#allocation19 + $0xb80] ss:$8 sps:$4 sm:$0xff]  }
0x23ef   : > { %12478 = vmatpush1.bf16.msra.mxu0 %v15983_v27  ;;  %v16039_v27 = vld [vmem:[#allocation19 + $0xb94] ss:$8 sps:$4 sm:$0xff]  }
0x23f0   : > { %12479 = vmatprep.subr.bf16.mxu0 %v15988_v14  ;;  %v16037_v14 = vld [vmem:[#allocation19 + $0xb90] ss:$8 sps:$4 sm:$0xff]  }
0x23f3   : > { %12480 = vmatpush1.bf16.msra.mxu0 %v15986_v42  ;;  %v16042_v42 = vld [vmem:[#allocation19 + $0xba4] ss:$8 sps:$4 sm:$0xff]  }
0x23f4   : > { %12481 = vmatprep.subr.bf16.mxu0 %v15991_v2  ;;  %v16040_v2 = vld [vmem:[#allocation19 + $0xba0] ss:$8 sps:$4 sm:$0xff]  }
0x23f7   : > { %12482 = vmatpush1.bf16.msra.mxu0 %v15989_v43  ;;  %v16045_v43 = vld [vmem:[#allocation19 + $0xbb4] ss:$8 sps:$4 sm:$0xff]  }
0x23f8   : > { %12483 = vmatprep.subr.bf16.mxu0 %v15994_v35  ;;  %v16043_v35 = vld [vmem:[#allocation19 + $0xbb0] ss:$8 sps:$4 sm:$0xff]  }
0x23fb   : > { %12484 = vmatpush1.bf16.msra.mxu0 %v15992_v47  ;;  %v16048_v47 = vld [vmem:[#allocation19 + $0xbc4] ss:$8 sps:$4 sm:$0xff]  }
0x23fc   : > { %12485 = vmatprep.subr.bf16.mxu0 %v15997_v0  ;;  %v16046_v0 = vld [vmem:[#allocation19 + $0xbc0] ss:$8 sps:$4 sm:$0xff]  }
0x23ff   : > { %12486 = vmatpush1.bf16.msra.mxu0 %v15995_v28  ;;  %v16051_v28 = vld [vmem:[#allocation19 + $0xbd4] ss:$8 sps:$4 sm:$0xff]  }
0x2400   : > { %12487 = vmatprep.subr.bf16.mxu0 %v16000_v1  ;;  %v16049_v1 = vld [vmem:[#allocation19 + $0xbd0] ss:$8 sps:$4 sm:$0xff]  }
0x2403   : > { %12488 = vmatpush1.bf16.msra.mxu0 %v15998_v41  ;;  %v16054_v41 = vld [vmem:[#allocation19 + $0xbe4] ss:$8 sps:$4 sm:$0xff]  }
0x2404   : > { %12489 = vmatprep.subr.bf16.mxu0 %v16003_v26  ;;  %v16052_v26 = vld [vmem:[#allocation19 + $0xbe0] ss:$8 sps:$4 sm:$0xff]  }
0x2407   : > { %12490 = vmatpush1.bf16.msra.mxu0 %v16001_v52  ;;  %v16057_v52 = vld [vmem:[#allocation19 + $0xbf4] ss:$8 sps:$4 sm:$0xff]  }
0x2408   : > { %12491 = vmatprep.subr.bf16.mxu0 %v16006_v57  ;;  %v16055_v57 = vld [vmem:[#allocation19 + $0xbf0] ss:$8 sps:$4 sm:$0xff]  }
0x240b   : > { %12492 = vmatpush1.bf16.msra.mxu0 %v16004_v56  ;;  %v16060_v56 = vld [vmem:[#allocation19 + $0xc04] ss:$8 sps:$4 sm:$0xff]  }
0x240c   : > { %12493 = vmatprep.subr.bf16.mxu0 %v16009_v22  ;;  %v16058_v22 = vld [vmem:[#allocation19 + $0xc00] ss:$8 sps:$4 sm:$0xff]  }
0x240f   : > { %12494 = vmatpush1.bf16.msra.mxu0 %v16007_v58  ;;  %v16063_v58 = vld [vmem:[#allocation19 + $0xc14] ss:$8 sps:$4 sm:$0xff]  }
0x2410   : > { %12506 = vmatprep.subr.bf16.mxu0 %v16012_v18  ;;  %v16061_v18 = vld [vmem:[#allocation19 + $0xc10] ss:$8 sps:$4 sm:$0xff]  }
0x2412   : > { %12496 = vmatmul.mubr.bf16.vlgmr.msra.gmra.mrb[88].mxu0 %v17935_v39  ;;  %v9126_v39 = vrot.slane %v17910_v31, %v17424_v37 }
0x2413   : > { %12507 = vmatpush1.bf16.msra.mxu0 %v16010_v19  ;;  %12538 = vmatprep.mubr.bf16.mxu0 %v17907_v5  ;;  %v9130_v5 = vrot.slane %v17910_v31, %v17427_v38  ;;  %v16031_v38 = vld [vmem:[#allocation19 + $0xb70] ss:$8 sps:$4 sm:$0xff]   ;;  %v16066_v19 = vld [vmem:[#allocation19 + $0xc24] ss:$8 sps:$4 sm:$0xff]  }
0x2414   : > { %12508 = vmatprep.subr.bf16.mxu0 %v16015_v61  ;;  %v16064_v61 = vld [vmem:[#allocation19 + $0xc20] ss:$8 sps:$4 sm:$0xff]  }
0x2417   : > { %12509 = vmatpush1.bf16.msra.mxu0 %v16013_v55  ;;  %v16069_v55 = vld [vmem:[#allocation19 + $0xc34] ss:$8 sps:$4 sm:$0xff]  }
0x2418   : > { %12510 = vmatprep.subr.bf16.mxu0 %v16018_v23  ;;  %v16067_v23 = vld [vmem:[#allocation19 + $0xc30] ss:$8 sps:$4 sm:$0xff]  }
0x241b   : > { %12511 = vmatpush1.bf16.msra.mxu0 %v16016_v63  ;;  %v16072_v63 = vld [vmem:[#allocation19 + $0xc44] ss:$8 sps:$4 sm:$0xff]  }
0x241c   : > { %12512 = vmatprep.subr.bf16.mxu0 %v16021_v45  ;;  %v16070_v45 = vld [vmem:[#allocation19 + $0xc40] ss:$8 sps:$4 sm:$0xff]  }
0x241f   : > { %12513 = vmatpush1.bf16.msra.mxu0 %v16019_v7  ;;  %v16075_v7 = vld [vmem:[#allocation19 + $0xc54] ss:$8 sps:$4 sm:$0xff]  }
0x2420   : > { %12514 = vmatprep.subr.bf16.mxu0 %v16024_v16  ;;  %v16078_v16 = vld [vmem:[#allocation19 + $0xc64] ss:$8 sps:$4 sm:$0xff]  }
0x2423   : > { %12515 = vmatpush1.bf16.msra.mxu0 %v16022_v50  ;;  %v16081_v50 = vld [vmem:[#allocation19 + $0xc74] ss:$8 sps:$4 sm:$0xff]  }
0x2424   : > { %12516 = vmatprep.subr.bf16.mxu0 %v16027_v13  ;;  %v16079_v13 = vld [vmem:[#allocation19 + $0xc70] ss:$8 sps:$4 sm:$0xff]  }
0x2425   : > { %v10727_v59 = vpop.f32.mrb[84].mxu0 }
0x2426   : > { %v10728_v4 = vadd.f32 %v10727_v59, %v9126_v39  ;;  %v10729_v10 = vpop.f32.mrb[85].mxu0  ;;  %v16090_v59 = vld [vmem:[#allocation19 + $0xca4] ss:$8 sps:$4 sm:$0xff]  }
0x2427   : > { %v10730_v46 = vadd.f32 %v10729_v10, %v9130_v5  ;;  %v10731_v11 = vpop.f32.mrb[86].mxu0  ;;  %12517 = vmatpush1.bf16.msra.mxu0 %v16025_v21  ;;  %v16087_v21 = vld [vmem:[#allocation19 + $0xc94] ss:$8 sps:$4 sm:$0xff]  }
0x2428   : > { %v10732_v54 = vadd.f32 %v10731_v11, %v9126_v39  ;;  %v10733_v20 = vpop.f32.mrb[87].mxu0  ;;  %12518 = vmatprep.subr.bf16.mxu0 %v16030_v24  ;;  %v10791_v37 = vmax.f32 %v10728_v4, 0.0  ;;  %v16084_v39 = vld [vmem:[#allocation19 + $0xc84] ss:$8 sps:$4 sm:$0xff]   ;;  %v16085_v24 = vld [vmem:[#allocation19 + $0xc90] ss:$8 sps:$4 sm:$0xff]  }
0x2429   : > { %v10734_v60 = vadd.f32 %v10733_v20, %v9130_v5  ;;  %v10792_v33 = vmax.f32 %v10730_v46, 0.0  ;;  %v16082_v5 = vld [vmem:[#allocation19 + $0xc80] ss:$8 sps:$4 sm:$0xff]   ;;  %v16093_v10 = vld [vmem:[#allocation19 + $0xcb4] ss:$8 sps:$4 sm:$0xff]  }
0x242a   : > { %v10807_v32 = vmax.f32 %v10732_v54, 0.0  ;;  %v16088_v4 = vld [vmem:[#allocation19 + $0xca0] ss:$8 sps:$4 sm:$0xff]   ;;  %v16091_v46 = vld [vmem:[#allocation19 + $0xcb0] ss:$8 sps:$4 sm:$0xff]  }
0x242b   : > { %v10808_v34 = vmax.f32 %v10734_v60, 0.0  ;;  %12519 = vmatpush1.bf16.msra.mxu0 %v16028_v12  ;;  %v16096_v11 = vld [vmem:[#allocation19 + $0xcc4] ss:$8 sps:$4 sm:$0xff]   ;;  %v16094_v12 = vld [vmem:[#allocation19 + $0xcc0] ss:$8 sps:$4 sm:$0xff]  }
0x242c   : > { %v17956_v31 = vpack.c.bf16 %v10807_v32, %v10791_v37  ;;  %12520 = vmatprep.subr.bf16.mxu0 %v16033_v48  ;;  %v16099_v54 = vld [vmem:[#allocation19 + $0xcd4] ss:$8 sps:$4 sm:$0xff]   ;;  %v16097_v20 = vld [vmem:[#allocation19 + $0xcd0] ss:$8 sps:$4 sm:$0xff]   ;;  %v16102_v48 = vld [vmem:[#allocation19 + $0xce4] ss:$8 sps:$4 sm:$0xff]  }
0x242d   : > { %v17958_v8 = vpack.c.bf16 %v10808_v34, %v10792_v33  ;;  %v16100_v60 = vld [vmem:[#allocation19 + $0xce0] ss:$8 sps:$4 sm:$0xff]   ;;  %v16105_v37 = vld [vmem:[#allocation19 + $0xcf4] ss:$8 sps:$4 sm:$0xff]   ;;  %v16103_v32 = vld [vmem:[#allocation19 + $0xcf0] ss:$8 sps:$4 sm:$0xff]  }
0x242e   : > { %v16108_v33 = vld [vmem:[#allocation19 + $0xd04] ss:$8 sps:$4 sm:$0xff]   ;;  %v16106_v34 = vld [vmem:[#allocation19 + $0xd00] ss:$8 sps:$4 sm:$0xff]  }
0x242f   : > { %12521 = vmatpush1.bf16.msra.mxu0 %v16031_v38  ;;  %v16111_v38 = vld [vmem:[#allocation19 + $0xd14] ss:$8 sps:$4 sm:$0xff]  }
0x2430   : > { %12522 = vmatprep.subr.bf16.mxu0 %v16036_v30  ;;  %v16109_v30 = vld [vmem:[#allocation19 + $0xd10] ss:$8 sps:$4 sm:$0xff]  }
0x2433   : > { %12523 = vmatpush1.bf16.msra.mxu0 %v16034_v36  ;;  %v16114_v36 = vld [vmem:[#allocation19 + $0xd24] ss:$8 sps:$4 sm:$0xff]  }
0x2434   : > { %12524 = vmatprep.subr.bf16.mxu0 %v16039_v27  ;;  %v16112_v27 = vld [vmem:[#allocation19 + $0xd20] ss:$8 sps:$4 sm:$0xff]  }
0x2437   : > { %12525 = vmatpush1.bf16.msra.mxu0 %v16037_v14  ;;  %v16117_v14 = vld [vmem:[#allocation19 + $0xd34] ss:$8 sps:$4 sm:$0xff]  }
0x2438   : > { %12526 = vmatprep.subr.bf16.mxu0 %v16042_v42  ;;  %v16115_v42 = vld [vmem:[#allocation19 + $0xd30] ss:$8 sps:$4 sm:$0xff]  }
0x243b   : > { %12527 = vmatpush1.bf16.msra.mxu0 %v16040_v2  ;;  %v16120_v2 = vld [vmem:[#allocation19 + $0xd44] ss:$8 sps:$4 sm:$0xff]  }
0x243c   : > { %12528 = vmatprep.subr.bf16.mxu0 %v16045_v43  ;;  %v16118_v43 = vld [vmem:[#allocation19 + $0xd40] ss:$8 sps:$4 sm:$0xff]  }
0x243f   : > { %12529 = vmatpush1.bf16.msra.mxu0 %v16043_v35  ;;  %v16123_v35 = vld [vmem:[#allocation19 + $0xd54] ss:$8 sps:$4 sm:$0xff]  }
0x2440   : > { %12530 = vmatprep.subr.bf16.mxu0 %v16048_v47  ;;  %v16126_v47 = vld [vmem:[#allocation19 + $0xd64] ss:$8 sps:$4 sm:$0xff]  }
0x2443   : > { %12531 = vmatpush1.bf16.msra.mxu0 %v16046_v0  ;;  %v16129_v0 = vld [vmem:[#allocation19 + $0xd74] ss:$8 sps:$4 sm:$0xff]  }
0x2444   : > { %12532 = vmatprep.subr.bf16.mxu0 %v16051_v28  ;;  %v16127_v28 = vld [vmem:[#allocation19 + $0xd70] ss:$8 sps:$4 sm:$0xff]  }
0x2447   : > { %12533 = vmatpush1.bf16.msra.mxu0 %v16049_v1  ;;  %v16132_v1 = vld [vmem:[#allocation19 + $0xd84] ss:$8 sps:$4 sm:$0xff]  }
0x2448   : > { %12534 = vmatprep.subr.bf16.mxu0 %v16054_v41  ;;  %v16130_v41 = vld [vmem:[#allocation19 + $0xd80] ss:$8 sps:$4 sm:$0xff]  }
0x244b   : > { %12535 = vmatpush1.bf16.msra.mxu0 %v16052_v26  ;;  %v16135_v26 = vld [vmem:[#allocation19 + $0xd94] ss:$8 sps:$4 sm:$0xff]  }
0x244c   : > { %12536 = vmatprep.subr.bf16.mxu0 %v16057_v52  ;;  %v16133_v52 = vld [vmem:[#allocation19 + $0xd90] ss:$8 sps:$4 sm:$0xff]  }
0x244f   : > { %12537 = vmatpush1.bf16.msra.mxu0 %v16055_v57  ;;  %v16138_v57 = vld [vmem:[#allocation19 + $0xda4] ss:$8 sps:$4 sm:$0xff]  }
0x2450   : > { %12549 = vmatprep.subr.bf16.mxu0 %v16060_v56  ;;  %v16136_v56 = vld [vmem:[#allocation19 + $0xda0] ss:$8 sps:$4 sm:$0xff]  }
0x2452   : > { %12539 = vmatmul.mubr.bf16.vlgmr.msra.gmra.mrb[88].mxu0 %v17905_v62  ;;  %v16073_v62 = vld [vmem:[#allocation19 + $0xc50] ss:$8 sps:$4 sm:$0xff]  }
0x2453   : > { %12550 = vmatpush1.bf16.msra.mxu0 %v16058_v22  ;;  %12581 = vmatprep.mubr.bf16.mxu0 %v17948_v17  ;;  %v16076_v17 = vld [vmem:[#allocation19 + $0xc60] ss:$8 sps:$4 sm:$0xff]   ;;  %v16141_v22 = vld [vmem:[#allocation19 + $0xdb4] ss:$8 sps:$4 sm:$0xff]  }
0x2454   : > { %12551 = vmatprep.subr.bf16.mxu0 %v16063_v58  ;;  %v16139_v58 = vld [vmem:[#allocation19 + $0xdb0] ss:$8 sps:$4 sm:$0xff]  }
0x2457   : > { %12552 = vmatpush1.bf16.msra.mxu0 %v16061_v18  ;;  %v16144_v18 = vld [vmem:[#allocation19 + $0xdc4] ss:$8 sps:$4 sm:$0xff]  }
0x2458   : > { %12553 = vmatprep.subr.bf16.mxu0 %v16066_v19  ;;  %v16142_v19 = vld [vmem:[#allocation19 + $0xdc0] ss:$8 sps:$4 sm:$0xff]  }
0x245b   : > { %12554 = vmatpush1.bf16.msra.mxu0 %v16064_v61  ;;  %v16147_v61 = vld [vmem:[#allocation19 + $0xdd4] ss:$8 sps:$4 sm:$0xff]  }
0x245c   : > { %12555 = vmatprep.subr.bf16.mxu0 %v16069_v55  ;;  %v16145_v55 = vld [vmem:[#allocation19 + $0xdd0] ss:$8 sps:$4 sm:$0xff]  }
0x245f   : > { %12556 = vmatpush1.bf16.msra.mxu0 %v16067_v23  ;;  %v16150_v23 = vld [vmem:[#allocation19 + $0xde4] ss:$8 sps:$4 sm:$0xff]  }
0x2460   : > { %12557 = vmatprep.subr.bf16.mxu0 %v16072_v63  ;;  %v16148_v63 = vld [vmem:[#allocation19 + $0xde0] ss:$8 sps:$4 sm:$0xff]  }
0x2463   : > { %12558 = vmatpush1.bf16.msra.mxu0 %v16070_v45  ;;  %v16153_v45 = vld [vmem:[#allocation19 + $0xdf4] ss:$8 sps:$4 sm:$0xff]  }
0x2464   : > { %12559 = vmatprep.subr.bf16.mxu0 %v16075_v7  ;;  %v16151_v7 = vld [vmem:[#allocation19 + $0xdf0] ss:$8 sps:$4 sm:$0xff]  }
0x2467   : > { %12560 = vmatpush1.bf16.msra.mxu0 %v16073_v62  ;;  %v16156_v62 = vld [vmem:[#allocation19 + $0xe04] ss:$8 sps:$4 sm:$0xff]  }
0x2468   : > { %12561 = vmatprep.subr.bf16.mxu0 %v16078_v16  ;;  %v16154_v16 = vld [vmem:[#allocation19 + $0xe00] ss:$8 sps:$4 sm:$0xff]  }
0x246b   : > { %12562 = vmatpush1.bf16.msra.mxu0 %v16076_v17  ;;  %v16159_v17 = vld [vmem:[#allocation19 + $0xe14] ss:$8 sps:$4 sm:$0xff]  }
0x246c   : > { %12563 = vmatprep.subr.bf16.mxu0 %v16081_v50  ;;  %v16157_v50 = vld [vmem:[#allocation19 + $0xe10] ss:$8 sps:$4 sm:$0xff]  }
0x246f   : > { %12564 = vmatpush1.bf16.msra.mxu0 %v16079_v13  ;;  %v16162_v13 = vld [vmem:[#allocation19 + $0xe24] ss:$8 sps:$4 sm:$0xff]  }
0x2470   : > { %12565 = vmatprep.subr.bf16.mxu0 %v16084_v39  ;;  %v16160_v39 = vld [vmem:[#allocation19 + $0xe20] ss:$8 sps:$4 sm:$0xff]  }
0x2473   : > { %12566 = vmatpush1.bf16.msra.mxu0 %v16082_v5  ;;  %v16165_v5 = vld [vmem:[#allocation19 + $0xe34] ss:$8 sps:$4 sm:$0xff]  }
0x2474   : > { %12567 = vmatprep.subr.bf16.mxu0 %v16087_v21  ;;  %v16163_v21 = vld [vmem:[#allocation19 + $0xe30] ss:$8 sps:$4 sm:$0xff]  }
0x2477   : > { %12568 = vmatpush1.bf16.msra.mxu0 %v16085_v24  ;;  %v16168_v24 = vld [vmem:[#allocation19 + $0xe44] ss:$8 sps:$4 sm:$0xff]  }
0x2478   : > { %12569 = vmatprep.subr.bf16.mxu0 %v16090_v59  ;;  %v16166_v59 = vld [vmem:[#allocation19 + $0xe40] ss:$8 sps:$4 sm:$0xff]  }
0x247b   : > { %12570 = vmatpush1.bf16.msra.mxu0 %v16088_v4  ;;  %v16171_v4 = vld [vmem:[#allocation19 + $0xe54] ss:$8 sps:$4 sm:$0xff]  }
0x247c   : > { %12571 = vmatprep.subr.bf16.mxu0 %v16093_v10  ;;  %v16174_v10 = vld [vmem:[#allocation19 + $0xe64] ss:$8 sps:$4 sm:$0xff]  }
0x247f   : > { %12572 = vmatpush1.bf16.msra.mxu0 %v16091_v46  ;;  %v16177_v46 = vld [vmem:[#allocation19 + $0xe74] ss:$8 sps:$4 sm:$0xff]  }
0x2480   : > { %12573 = vmatprep.subr.bf16.mxu0 %v16096_v11  ;;  %v16175_v11 = vld [vmem:[#allocation19 + $0xe70] ss:$8 sps:$4 sm:$0xff]  }
0x2483   : > { %12574 = vmatpush1.bf16.msra.mxu0 %v16094_v12  ;;  %v16180_v12 = vld [vmem:[#allocation19 + $0xe84] ss:$8 sps:$4 sm:$0xff]  }
0x2484   : > { %12575 = vmatprep.subr.bf16.mxu0 %v16099_v54  ;;  %v16178_v54 = vld [vmem:[#allocation19 + $0xe80] ss:$8 sps:$4 sm:$0xff]  }
0x2487   : > { %12576 = vmatpush1.bf16.msra.mxu0 %v16097_v20  ;;  %v16183_v20 = vld [vmem:[#allocation19 + $0xe94] ss:$8 sps:$4 sm:$0xff]  }
0x2488   : > { %12577 = vmatprep.subr.bf16.mxu0 %v16102_v48  ;;  %v16181_v48 = vld [vmem:[#allocation19 + $0xe90] ss:$8 sps:$4 sm:$0xff]  }
0x248b   : > { %12578 = vmatpush1.bf16.msra.mxu0 %v16100_v60  ;;  %v16186_v60 = vld [vmem:[#allocation19 + $0xea4] ss:$8 sps:$4 sm:$0xff]  }
0x248c   : > { %12579 = vmatprep.subr.bf16.mxu0 %v16105_v37  ;;  %v16184_v37 = vld [vmem:[#allocation19 + $0xea0] ss:$8 sps:$4 sm:$0xff]  }
0x248f   : > { %12580 = vmatpush1.bf16.msra.mxu0 %v16103_v32  ;;  %v16189_v32 = vld [vmem:[#allocation19 + $0xeb4] ss:$8 sps:$4 sm:$0xff]  }
0x2490   : > { %12592 = vmatprep.subr.bf16.mxu0 %v16108_v33  ;;  %v16187_v33 = vld [vmem:[#allocation19 + $0xeb0] ss:$8 sps:$4 sm:$0xff]  }
0x2492   : > { %12582 = vmatmul.mubr.bf16.vlgmr.msra.gmra.mrb[88].mxu0 %v17946_v3  ;;  %v16121_v3 = vld [vmem:[#allocation19 + $0xd50] ss:$8 sps:$4 sm:$0xff]  }
0x2493   : > { %12593 = vmatpush1.bf16.msra.mxu0 %v16106_v34  ;;  %12624 = vmatprep.mubr.bf16.mxu0 %v17924_v15  ;;  %v16124_v15 = vld [vmem:[#allocation19 + $0xd60] ss:$8 sps:$4 sm:$0xff]   ;;  %v16192_v34 = vld [vmem:[#allocation19 + $0xec4] ss:$8 sps:$4 sm:$0xff]  }
0x2494   : > { %12594 = vmatprep.subr.bf16.mxu0 %v16111_v38  ;;  %v16190_v38 = vld [vmem:[#allocation19 + $0xec0] ss:$8 sps:$4 sm:$0xff]  }
0x2497   : > { %12595 = vmatpush1.bf16.msra.mxu0 %v16109_v30  ;;  %v16195_v30 = vld [vmem:[#allocation19 + $0xed4] ss:$8 sps:$4 sm:$0xff]  }
0x2498   : > { %12596 = vmatprep.subr.bf16.mxu0 %v16114_v36  ;;  %v16193_v36 = vld [vmem:[#allocation19 + $0xed0] ss:$8 sps:$4 sm:$0xff]  }
0x249b   : > { %12597 = vmatpush1.bf16.msra.mxu0 %v16112_v27  ;;  %v16198_v27 = vld [vmem:[#allocation19 + $0xee4] ss:$8 sps:$4 sm:$0xff]  }
0x249c   : > { %12598 = vmatprep.subr.bf16.mxu0 %v16117_v14  ;;  %v16196_v14 = vld [vmem:[#allocation19 + $0xee0] ss:$8 sps:$4 sm:$0xff]  }
0x249f   : > { %12599 = vmatpush1.bf16.msra.mxu0 %v16115_v42  ;;  %v16201_v42 = vld [vmem:[#allocation19 + $0xef4] ss:$8 sps:$4 sm:$0xff]  }
0x24a0   : > { %12600 = vmatprep.subr.bf16.mxu0 %v16120_v2  ;;  %v16199_v2 = vld [vmem:[#allocation19 + $0xef0] ss:$8 sps:$4 sm:$0xff]  }
0x24a3   : > { %12601 = vmatpush1.bf16.msra.mxu0 %v16118_v43  ;;  %v16204_v43 = vld [vmem:[#allocation19 + $0xf04] ss:$8 sps:$4 sm:$0xff]  }
0x24a4   : > { %12602 = vmatprep.subr.bf16.mxu0 %v16123_v35  ;;  %v16202_v35 = vld [vmem:[#allocation19 + $0xf00] ss:$8 sps:$4 sm:$0xff]  }
0x24a7   : > { %12603 = vmatpush1.bf16.msra.mxu0 %v16121_v3  ;;  %v16207_v3 = vld [vmem:[#allocation19 + $0xf14] ss:$8 sps:$4 sm:$0xff]  }
0x24a8   : > { %12604 = vmatprep.subr.bf16.mxu0 %v16126_v47  ;;  %v16205_v47 = vld [vmem:[#allocation19 + $0xf10] ss:$8 sps:$4 sm:$0xff]  }
0x24ab   : > { %12605 = vmatpush1.bf16.msra.mxu0 %v16124_v15  ;;  %v16210_v15 = vld [vmem:[#allocation19 + $0xf24] ss:$8 sps:$4 sm:$0xff]  }
0x24ac   : > { %12606 = vmatprep.subr.bf16.mxu0 %v16129_v0  ;;  %v16208_v0 = vld [vmem:[#allocation19 + $0xf20] ss:$8 sps:$4 sm:$0xff]  }
0x24af   : > { %12607 = vmatpush1.bf16.msra.mxu0 %v16127_v28  ;;  %v16213_v28 = vld [vmem:[#allocation19 + $0xf34] ss:$8 sps:$4 sm:$0xff]  }
0x24b0   : > { %12608 = vmatprep.subr.bf16.mxu0 %v16132_v1  ;;  %v16211_v1 = vld [vmem:[#allocation19 + $0xf30] ss:$8 sps:$4 sm:$0xff]  }
0x24b3   : > { %12609 = vmatpush1.bf16.msra.mxu0 %v16130_v41  ;;  %v16216_v41 = vld [vmem:[#allocation19 + $0xf44] ss:$8 sps:$4 sm:$0xff]  }
0x24b4   : > { %12610 = vmatprep.subr.bf16.mxu0 %v16135_v26  ;;  %v16214_v26 = vld [vmem:[#allocation19 + $0xf40] ss:$8 sps:$4 sm:$0xff]  }
0x24b7   : > { %12611 = vmatpush1.bf16.msra.mxu0 %v16133_v52  ;;  %v16219_v52 = vld [vmem:[#allocation19 + $0xf54] ss:$8 sps:$4 sm:$0xff]  }
0x24b8   : > { %12612 = vmatprep.subr.bf16.mxu0 %v16138_v57  ;;  %v16222_v57 = vld [vmem:[#allocation19 + $0xf64] ss:$8 sps:$4 sm:$0xff]  }
0x24bb   : > { %12613 = vmatpush1.bf16.msra.mxu0 %v16136_v56  ;;  %v16225_v56 = vld [vmem:[#allocation19 + $0xf74] ss:$8 sps:$4 sm:$0xff]  }
0x24bc   : > { %12614 = vmatprep.subr.bf16.mxu0 %v16141_v22  ;;  %v16223_v22 = vld [vmem:[#allocation19 + $0xf70] ss:$8 sps:$4 sm:$0xff]  }
0x24bf   : > { %12615 = vmatpush1.bf16.msra.mxu0 %v16139_v58  ;;  %v16228_v58 = vld [vmem:[#allocation19 + $0xf84] ss:$8 sps:$4 sm:$0xff]  }
0x24c0   : > { %12616 = vmatprep.subr.bf16.mxu0 %v16144_v18  ;;  %v16226_v18 = vld [vmem:[#allocation19 + $0xf80] ss:$8 sps:$4 sm:$0xff]  }
0x24c3   : > { %12617 = vmatpush1.bf16.msra.mxu0 %v16142_v19  ;;  %v16231_v19 = vld [vmem:[#allocation19 + $0xf94] ss:$8 sps:$4 sm:$0xff]  }
0x24c4   : > { %12618 = vmatprep.subr.bf16.mxu0 %v16147_v61  ;;  %v16229_v61 = vld [vmem:[#allocation19 + $0xf90] ss:$8 sps:$4 sm:$0xff]  }
0x24c7   : > { %12619 = vmatpush1.bf16.msra.mxu0 %v16145_v55  ;;  %v16234_v55 = vld [vmem:[#allocation19 + $0xfa4] ss:$8 sps:$4 sm:$0xff]  }
0x24c8   : > { %12620 = vmatprep.subr.bf16.mxu0 %v16150_v23  ;;  %v16232_v23 = vld [vmem:[#allocation19 + $0xfa0] ss:$8 sps:$4 sm:$0xff]  }
0x24cb   : > { %12621 = vmatpush1.bf16.msra.mxu0 %v16148_v63  ;;  %v16237_v63 = vld [vmem:[#allocation19 + $0xfb4] ss:$8 sps:$4 sm:$0xff]  }
0x24cc   : > { %12622 = vmatprep.subr.bf16.mxu0 %v16153_v45  ;;  %v16235_v45 = vld [vmem:[#allocation19 + $0xfb0] ss:$8 sps:$4 sm:$0xff]  }
0x24cf   : > { %12623 = vmatpush1.bf16.msra.mxu0 %v16151_v7  ;;  %v16240_v7 = vld [vmem:[#allocation19 + $0xfc4] ss:$8 sps:$4 sm:$0xff]  }
0x24d0   : > { %12635 = vmatprep.subr.bf16.mxu0 %v16156_v62  ;;  %v16238_v62 = vld [vmem:[#allocation19 + $0xfc0] ss:$8 sps:$4 sm:$0xff]  }
0x24d2   : > { %12625 = vmatmul.mubr.bf16.vlgmr.msra.gmra.mrb[88].mxu0 %v17922_v29  ;;  %v16169_v29 = vld [vmem:[#allocation19 + $0xe50] ss:$8 sps:$4 sm:$0xff]  }
0x24d3   : > { %12636 = vmatpush1.bf16.msra.mxu0 %v16154_v16  ;;  %12667 = vmatprep.mubr.bf16.mxu0 %v17958_v8  ;;  %v16172_v8 = vld [vmem:[#allocation19 + $0xe60] ss:$8 sps:$4 sm:$0xff]   ;;  %v16243_v16 = vld [vmem:[#allocation19 + $0xfd4] ss:$8 sps:$4 sm:$0xff]  }
0x24d4   : > { %12637 = vmatprep.subr.bf16.mxu0 %v16159_v17  ;;  %v16241_v17 = vld [vmem:[#allocation19 + $0xfd0] ss:$8 sps:$4 sm:$0xff]  }
0x24d7   : > { %12638 = vmatpush1.bf16.msra.mxu0 %v16157_v50  ;;  %v16246_v50 = vld [vmem:[#allocation19 + $0xfe4] ss:$8 sps:$4 sm:$0xff]  }
0x24d8   : > { %12639 = vmatprep.subr.bf16.mxu0 %v16162_v13  ;;  %v16244_v13 = vld [vmem:[#allocation19 + $0xfe0] ss:$8 sps:$4 sm:$0xff]  }
0x24db   : > { %12640 = vmatpush1.bf16.msra.mxu0 %v16160_v39  ;;  %v16249_v39 = vld [vmem:[#allocation19 + $0xff4] ss:$8 sps:$4 sm:$0xff]  }
0x24dc   : > { %12641 = vmatprep.subr.bf16.mxu0 %v16165_v5  ;;  %v16247_v5 = vld [vmem:[#allocation19 + $0xff0] ss:$8 sps:$4 sm:$0xff]  }
0x24df   : > { %12642 = vmatpush1.bf16.msra.mxu0 %v16163_v21  ;;  %v11085_v21 = vld [vmem:[#allocation20 + $0x2] sm:$0x3] }
0x24e0   : > { %12643 = vmatprep.subr.bf16.mxu0 %v16168_v24  ;;  %v11090_v24 = vrot.slane %v11085_v21, %v17372_v53 }
0x24e3   : > { %12644 = vmatpush1.bf16.msra.mxu0 %v16166_v59  ;;  %v11094_v59 = vrot.slane %v11085_v21, %v17369_v51 }
0x24e4   : > { %12645 = vmatprep.subr.bf16.mxu0 %v16171_v4 }
0x24e7   : > { %12646 = vmatpush1.bf16.msra.mxu0 %v16169_v29 }
0x24e8   : > { %12647 = vmatprep.subr.bf16.mxu0 %v16174_v10 }
0x24eb   : > { %12648 = vmatpush1.bf16.msra.mxu0 %v16172_v8 }
0x24ec   : > { %12649 = vmatprep.subr.bf16.mxu0 %v16177_v46 }
0x24ef   : > { %12650 = vmatpush1.bf16.msra.mxu0 %v16175_v11 }
0x24f0   : > { %12651 = vmatprep.subr.bf16.mxu0 %v16180_v12 }
0x24f3   : > { %12652 = vmatpush1.bf16.msra.mxu0 %v16178_v54 }
0x24f4   : > { %12653 = vmatprep.subr.bf16.mxu0 %v16183_v20 }
0x24f7   : > { %12654 = vmatpush1.bf16.msra.mxu0 %v16181_v48 }
0x24f8   : > { %12655 = vmatprep.subr.bf16.mxu0 %v16186_v60 }
0x24fb   : > { %12656 = vmatpush1.bf16.msra.mxu0 %v16184_v37 }
0x24fc   : > { %12657 = vmatprep.subr.bf16.mxu0 %v16189_v32 }
0x24ff   : > { %12658 = vmatpush1.bf16.msra.mxu0 %v16187_v33 }
0x2500   : > { %12659 = vmatprep.subr.bf16.mxu0 %v16192_v34 }
0x2503   : > { %12660 = vmatpush1.bf16.msra.mxu0 %v16190_v38 }
0x2504   : > { %12661 = vmatprep.subr.bf16.mxu0 %v16195_v30 }
0x2507   : > { %12662 = vmatpush1.bf16.msra.mxu0 %v16193_v36 }
0x2508   : > { %12663 = vmatprep.subr.bf16.mxu0 %v16198_v27 }
0x250b   : > { %12664 = vmatpush1.bf16.msra.mxu0 %v16196_v14 }
0x250c   : > { %12665 = vmatprep.subr.bf16.mxu0 %v16201_v42 }
0x250f   : > { %12666 = vmatpush1.bf16.msra.mxu0 %v16199_v2 }
0x2510   : > { %12678 = vmatprep.subr.bf16.mxu0 %v16204_v43 }
0x2512   : > { %12668 = vmatmul.mubr.bf16.vlgmr.msra.gmra.mrb[88].mxu0 %v17956_v31  ;;  %v16217_v31 = vld [vmem:[#allocation19 + $0xf50] ss:$8 sps:$4 sm:$0xff]  }
0x2513   : > { %12679 = vmatpush1.bf16.msra.mxu0 %v16202_v35  ;;  %12710 = vmatprep.mubr.bf16.mxu0 %v17939_v40  ;;  %v16220_v40 = vld [vmem:[#allocation19 + $0xf60] ss:$8 sps:$4 sm:$0xff]  }
0x2514   : > { %12680 = vmatprep.subr.bf16.mxu0 %v16207_v3 }
0x2517   : > { %12681 = vmatpush1.bf16.msra.mxu0 %v16205_v47 }
0x2518   : > { %12682 = vmatprep.subr.bf16.mxu0 %v16210_v15 }
0x251b   : > { %12683 = vmatpush1.bf16.msra.mxu0 %v16208_v0 }
0x251c   : > { %12684 = vmatprep.subr.bf16.mxu0 %v16213_v28 }
0x251f   : > { %12685 = vmatpush1.bf16.msra.mxu0 %v16211_v1  ;;  %v12726_v1 = vld [vmem:[#allocation22 + $0x2] sm:$0x3] }
0x2520   : > { %12686 = vmatprep.subr.bf16.mxu0 %v16216_v41  ;;  %v12728_v41 = vld [vmem:[#allocation23 + $0x2] sm:$0x3] }
0x2523   : > { %12687 = vmatpush1.bf16.msra.mxu0 %v16214_v26  ;;  %v12765_v26 = vrot.slane %v12726_v1, %v17372_v53 }
0x2524   : > { %12688 = vmatprep.subr.bf16.mxu0 %v16219_v52  ;;  %v12769_v52 = vrot.slane %v12726_v1, %v17369_v51 }
0x2527   : > { %12689 = vmatpush1.bf16.msra.mxu0 %v16217_v31 }
0x2528   : > { %12690 = vmatprep.subr.bf16.mxu0 %v16222_v57  ;;  %v12780_v57 = vrot.slane %v12728_v41, %v17372_v53 }
0x252b   : > { %12691 = vmatpush1.bf16.msra.mxu0 %v16220_v40  ;;  %v12784_v40 = vrot.slane %v12728_v41, %v17369_v51 }
0x252c   : > { %12692 = vmatprep.subr.bf16.mxu0 %v16225_v56 }
0x252f   : > { %12693 = vmatpush1.bf16.msra.mxu0 %v16223_v22 }
0x2530   : > { %12694 = vmatprep.subr.bf16.mxu0 %v16228_v58 }
0x2533   : > { %12695 = vmatpush1.bf16.msra.mxu0 %v16226_v18 }
0x2534   : > { %12696 = vmatprep.subr.bf16.mxu0 %v16231_v19 }
0x2537   : > { %12697 = vmatpush1.bf16.msra.mxu0 %v16229_v61 }
0x2538   : > { %12698 = vmatprep.subr.bf16.mxu0 %v16234_v55 }
0x253b   : > { %12699 = vmatpush1.bf16.msra.mxu0 %v16232_v23 }
0x253c   : > { %12700 = vmatprep.subr.bf16.mxu0 %v16237_v63 }
0x253f   : > { %12701 = vmatpush1.bf16.msra.mxu0 %v16235_v45 }
0x2540   : > { %12702 = vmatprep.subr.bf16.mxu0 %v16240_v7 }
0x2543   : > { %12703 = vmatpush1.bf16.msra.mxu0 %v16238_v62 }
0x2544   : > { %12704 = vmatprep.subr.bf16.mxu0 %v16243_v16 }
0x2547   : > { %12705 = vmatpush1.bf16.msra.mxu0 %v16241_v17 }
0x2548   : > { %12706 = vmatprep.subr.bf16.mxu0 %v16246_v50 }
0x254b   : > { %12707 = vmatpush1.bf16.msra.mxu0 %v16244_v13 }
0x254c   : > { %12708 = vmatprep.subr.bf16.mxu0 %v16249_v39 }
0x254f   : > { %12709 = vmatpush1.bf16.msra.mxu0 %v16247_v5 }
0x2552   : > { %12711 = vmatmul.mubr.bf16.vlgmr.msra.gmra.mrb[88].mxu0 %v17937_v9 }
0x2625   : > { %v12712_v4 = vpop.f32.mrb[88].mxu0 }
0x2626   : > { %v14617_v29 = vadd.f32 %v12712_v4, %v11090_v24  ;;  %v12714_v10 = vpop.f32.mrb[89].mxu0 }
0x2627   : > { %v14618_v8 = vadd.f32 %v12714_v10, %v11094_v59  ;;  %v12716_v46 = vpop.f32.mrb[90].mxu0 }
0x2628   : > { %v12721_v11 = vadd.f32 %v14617_v29, %v17862_v49  ;;  %v14619_v12 = vadd.f32 %v12716_v46, %v11090_v24  ;;  %v12718_v54 = vpop.f32.mrb[91].mxu0 }
0x2629   : > { %v12722_v20 = vadd.f32 %v14618_v8, %v17864_v6  ;;  %v14620_v48 = vadd.f32 %v12718_v54, %v11094_v59 }
0x262a   : > { %v12723_v60 = vadd.f32 %v14619_v12, %v17866_v44 }
0x262b   : > { %v12724_v9 = vadd.f32 %v14620_v48, %v17868_v25  ;;  %v12729_v37 = vadd.f32 %v12722_v20, %v12721_v11 }
0x262d   : > { %12730 = vadd.xlane.f32.xlu0 %v12729_v37  ;;  %v12732_v32 = vadd.f32 %v12724_v9, %v12723_v60 }
0x262f   : > { %12733 = vadd.xlane.f32.xlu1 %v12732_v32 }
0x26ba   : > { %v12731_v33 = vpop.xlane.xlu0 %12730 }
0x26bb   : > { %v12735_v34 = vmul.f32 0.00390625, %v12731_v33 }
0x26bc   : > { %v12734_v38 = vpop.xlane.xlu1 %12733 }
0x26bd   : > { %v12737_v30 = vsub.f32 %v12721_v11, %v12735_v34  ;;  %v12738_v36 = vsub.f32 %v12722_v20, %v12735_v34  ;;  %v12736_v27 = vmul.f32 0.00390625, %v12734_v38 }
0x26bf   : > { %v12739_v49 = vsub.f32 %v12723_v60, %v12736_v27  ;;  %v12740_v14 = vsub.f32 %v12724_v9, %v12736_v27  ;;  %v12741_v42 = vmul.f32 %v12737_v30, %v12737_v30  ;;  %v12742_v6 = vmul.f32 %v12738_v36, %v12738_v36 }
0x26c1   : > { %v12745_v2 = vadd.f32 %v12742_v6, %v12741_v42  ;;  %v12743_v44 = vmul.f32 %v12739_v49, %v12739_v49  ;;  %v12744_v43 = vmul.f32 %v12740_v14, %v12740_v14 }
0x26c3   : > { %12746 = vadd.xlane.f32.xlu0 %v12745_v2  ;;  %v12748_v25 = vadd.f32 %v12744_v43, %v12743_v44 }
0x26c5   : > { %12749 = vadd.xlane.f32.xlu1 %v12748_v25 }
0x2750   : > { %v12747_v35 = vpop.xlane.xlu0 %12746 }
0x2751   : > { %v12751_v3 = vmul.f32 0.00390625, %v12747_v35 }
0x2752   : > { %v12750_v47 = vpop.xlane.xlu1 %12749 }
0x2753   : > { %v12753_v15 = vadd.f32 1e-05, %v12751_v3  ;;  %v12752_v0 = vmul.f32 0.00390625, %v12750_v47 }
0x2755   : > { %16326 = vrsqrt.f32 %v12753_v15  ;;  %v12754_v28 = vadd.f32 1e-05, %v12752_v0 }
0x2757   : > { %16328 = vrsqrt.f32 %v12754_v28 }
0x275f   : > { %v16327_v31 = vpop.eup %16326 }
0x2760   : > { %v12757_v56 = vmul.f32 %v16327_v31, %v12737_v30  ;;  %v12758_v22 = vmul.f32 %v16327_v31, %v12738_v36 }
0x2761   : > { %v16329_v58 = vpop.eup %16328 }
0x2762   : > { %v12772_v18 = vmul.f32 %v12765_v26, %v12757_v56  ;;  %v12773_v19 = vmul.f32 %v12769_v52, %v12758_v22  ;;  %v12759_v61 = vmul.f32 %v16329_v58, %v12739_v49  ;;  %v12760_v55 = vmul.f32 %v16329_v58, %v12740_v14 }
0x2764   : > { %v12787_v23 = vadd.f32 %v12780_v57, %v12772_v18  ;;  %v12788_v63 = vadd.f32 %v12784_v40, %v12773_v19  ;;  %v12774_v45 = vmul.f32 %v12765_v26, %v12759_v61  ;;  %v12775_v7 = vmul.f32 %v12769_v52, %v12760_v55 }
0x2766   : > { %12791 = vst [vmem:[%s689_s20] sm:$0xff] %v12787_v23  ;;  %12792 = vst [vmem:[%s689_s20 + $0x8] sm:$0xff] %v12788_v63  ;;  %v12789_v51 = vadd.f32 %v12780_v57, %v12774_v45  ;;  %v12790_v53 = vadd.f32 %v12784_v40, %v12775_v7 }
0x2768   : > { %12793 = vst [vmem:[%s689_s20 + $0x10] sm:$0xff] %v12789_v51  ;;  %12794 = vst [vmem:[%s689_s20 + $0x18] sm:$0xff] %v12790_v53 }
0x2769   : > { %16735 = shalt.err (!%p16732_p7)
}
0x276a   : > { %s16736_s30 = scalar_lea.hbm %s17986_s5, 512  ;;  %s16740_s18 = scalar_lea.hbm %s18125_s3, 1024 }
0x276b   : > { %p16737_p8 = scmp.ne.s32.totalorder %s17986_s5, %s16736_s30  ;;  %p16741_p0 = scmp.lt.u32.totalorder %s17986_s5, %s18125_s3 }
0x276c   : > { %p16742_p1 = scmp.lt.u32.totalorder %s16740_s18, %s16736_s30  ;;  %p16744_p5 = scmp.lt.u32.totalorder %s16736_s30, %s17986_s5 }
0x276d   : > { %p16738_p11 = pnand %p16737_p8, %p18126_p9 }
0x276e   : > { %p16743_p6 = por %p16742_p1, %p16741_p0 }
0x276f   : > { %p16739_p13 = pneg %p16738_p11 }
0x2770   : > { %p16745_p12 = por %p16744_p5, %p16743_p6 }
0x2772   : > { %p16746_p10 = pnand %p16745_p12, %p16739_p13 }
0x2774   : > { %16749 = shalt.err (!%p16746_p10)
}
0x2775   : > { %s16848_s27 = smov 256   ;;  %s16849_s19 = smov 16  }
0x2776   : > { %14745 = dma.vmem_to_hbm [thread:$0]  (%p18126_p9), %s17988_s2, 512, %s17986_s5, %s17992_s6, %s16848_s27, %s16848_s27, %s16849_s19  }
0x2777 PF: > { %s18127_s22 = sld [smem:[#allocation38_spill]]  ;;  %s18128_s17 = sld [smem:[#allocation35_spill]] }
0x2778   : > { %s18129_s24 = sld [smem:[#allocation43_spill]] }
0x277d   : > { %p14822_p2 = scmp.ge.s32.totalorder %s18127_s22, 2  ;;  %s12824_s20 = sand.u32 1, %s18128_s17  }
0x277e   : > { %p18130_p3 = scmp.ne.s32.totalorder %s18129_s24, 0  ;;  %s12825_s4 = scalar_lea.sflag [#allocation4], %s12824_s20 }
0x2780   : > { %p14791_p4 = pnand %p14822_p2, %p18130_p3 }
0x2782   : > { %16799 = dma.done.wait (!%p14791_p4), %s12825_s4, 512  }
0x2783   : > { %16801 = vsyncadd (!%p14791_p4), %s12825_s4, 4294966784  ;;  %s18131_s21 = sld [smem:[#allocation40_spill]]  ;;  %s18132_s18 = sld [smem:[#allocation36_spill]] }
0x2784   : > { %s18133_s19 = sld [smem:[#allocation37_spill]]  ;;  %s18134_s20 = sld [smem:[#allocation41_spill]] }
0x2789   : > { %p33_p7 = scmp.ge.s32.totalorder %s18131_s21, 4  }
0x278b   :  { %35 = sbr.rel (!%p33_p7) target bundleno = 20 (0x14), region = 184 }
0x2792   :  { %12830 = vsyncpa [#allocation3], 1 }
0x2793   :  { %12832 = vsyncpa [#allocation3 + $0x1], 1 }
0x2794   :  { %12833 = vsyncpa [#allocation6], 1 }
0x2795   :  { %12834 = vsyncpa [#allocation9], 1 }
0x2796   :  { %12835 = vsyncpa [#allocation12], 1 }
0x2797   :  { %12836 = vsyncpa [#allocation15], 1 }
0x2798   :  { %12837 = vsyncpa [#allocation18], 1 }
0x2799   :  { %12838 = vsyncpa [#allocation21], 1 }
0x279a   :  { %12839 = vsyncpa [#allocation24], 1 }
0x279b   :  { %12840 = vsyncpa [#allocation4], 1 }
0x279c   :  { %12842 = vsyncpa [#allocation4 + $0x1], 1 }

</bundles_post_ra>
